<compile_context>
chip_gen: v7x
topology: tpu7x:2x2x1
jax: 0.10.0
libtpu: 0.0.40
codegen_flags: <defaults>
</compile_context>

<pallas_src>
import functools

import numpy as np
import jax
import jax.numpy as jnp
from jax.experimental import pallas as pl
from jax.experimental.pallas import tpu as pltpu


def _round_up(x, m):
    return (x + m - 1) // m * m


# --------------------------------------------------------------------------
# The single fused Pallas kernel
# --------------------------------------------------------------------------
def _fused_kernel(p1_ref, xyz_ref,
                  w1_ref, b1_ref,
                  sel_ref, w2_ref, b2_ref,
                  w3_ref, b3_ref,
                  fw1_ref, fb1_ref,
                  fw2a_hbm_ref, fw2b_ref, fb2_ref,
                  wva_ref, bva_ref,
                  o_ref,
                  g2_ref, g3_ref, fw2a_vmem_ref, fw2a_sem):
    f32, bf16 = jnp.float32, jnp.bfloat16

    # Kick off the big fc2 weight DMA immediately; it overlaps with the whole
    # conv / fc1 chain below and is only waited on right before fc2's dot.
    fw2a_cp = pltpu.make_async_copy(fw2a_hbm_ref, fw2a_vmem_ref, fw2a_sem)
    fw2a_cp.start()

    c1 = w1_ref.shape[1]              # 32  conv1 out channels
    c2 = w2_ref.shape[1]              # 64  conv2 out channels
    taps2 = sel_ref.shape[0]          # 16  conv2 kernel taps
    m_pad = g3_ref.shape[0]           # padded batch (multiple of 8)
    taps3 = g3_ref.shape[1] // c2     # 9   conv3 kernel taps

    # conv1: one GEMM over the host-built im2col patch matrix.
    x1 = jnp.dot(p1_ref[...].astype(bf16), w1_ref[...],
                 preferred_element_type=f32)
    x1 = jnp.maximum(x1 + b1_ref[...], 0.0)                 # (rows1, 32) f32
    x1b = x1.astype(bf16)

    # conv2 im2col: 16 independent one-hot gather matmuls, each written to a
    # static column block of one scratch (no serial dot->add->dot chain), then
    # ONE wide K=512 GEMM against the vstacked tap weights.
    for k in range(taps2):
        g2_ref[:, k * c1:(k + 1) * c1] = jnp.dot(
            sel_ref[k], x1b, preferred_element_type=f32)
    x2 = jnp.dot(g2_ref[...].astype(bf16), w2_ref[...],
                 preferred_element_type=f32)
    x2 = jnp.maximum(x2 + b2_ref[...], 0.0)                 # (9*m_pad, 64)
    # row layout of x2 is spatial-major: row = s*m_pad + n  (s = conv2 pos).

    # conv3 im2col without any gather matmul: tap s of batch n is exactly row
    # s*m_pad + n of x2, so 9 aligned 8-sublane slice copies assemble the
    # (m_pad, 576) patch matrix, followed by ONE GEMM.
    for s in range(taps3):
        g3_ref[:, s * c2:(s + 1) * c2] = x2[s * m_pad:(s + 1) * m_pad, :]
    x3 = jnp.dot(g3_ref[...].astype(bf16), w3_ref[...],
                 preferred_element_type=f32)
    x3 = jnp.maximum(x3 + b3_ref[...], 0.0)                 # (m_pad, 64)

    # fc1
    f1 = jnp.dot(x3.astype(bf16), fw1_ref[...], preferred_element_type=f32)
    f1 = jnp.maximum(f1 + fb1_ref[...], 0.0)                # (m_pad, 1024)

    # fc2 on cat(flat1, xyz): wait for the overlapped weight copy only now;
    # the 2-column xyz contribution is a VPU broadcast-FMA in f32.
    fw2a_cp.wait()
    xyz = xyz_ref[...]                                      # (m_pad, 2) f32
    h = jnp.dot(f1.astype(bf16), fw2a_vmem_ref[...],
                preferred_element_type=f32)
    h = h + xyz[:, 0:1] * fw2b_ref[0:1, :] + xyz[:, 1:2] * fw2b_ref[1:2, :]
    h = jnp.maximum(h + fb2_ref[...], 0.0)                  # (m_pad, 512)

    # merged V/A head: one lane-dense (m_pad, 128) store; col 0 = V,
    # cols 1..n_actions = A, remaining cols zero-padded.  Wrapper slices.
    out = jnp.dot(h.astype(bf16), wva_ref[...], preferred_element_type=f32)
    o_ref[...] = (out + bva_ref[...]).astype(o_ref.dtype)


# --------------------------------------------------------------------------
# Host-side glue: im2col for conv1 only (ordering matches torch Conv2d)
# --------------------------------------------------------------------------
def im2col(x_nchw, kh_size, kw_size, stride):
    n, c, h, w = x_nchw.shape
    oh = (h - kh_size) // stride + 1
    ow = (w - kw_size) // stride + 1
    cols = []
    for kh in range(kh_size):
        for kw in range(kw_size):
            cols.append(x_nchw[:, :, kh:kh + stride * oh:stride,
                               kw:kw + stride * ow:stride])
    p = jnp.stack(cols, axis=0).reshape(kh_size, kw_size, n, c, oh, ow)
    p = p.transpose(2, 4, 5, 3, 0, 1)            # (N, OH, OW, C, KH, KW)
    return p.reshape(n * oh * ow, c * kh_size * kw_size), oh, ow


# --------------------------------------------------------------------------
# Parameter preparation: bf16 kernel-ready layouts + constant one-hot selectors
# --------------------------------------------------------------------------
def prepare_kernel_params(params, *, n_batch, image_hw, n_actions):
    h, w = image_hw
    oh1, ow1 = (h - 8) // 4 + 1, (w - 8) // 4 + 1
    oh2, ow2 = (oh1 - 4) // 2 + 1, (ow1 - 4) // 2 + 1
    oh3, ow3 = oh2 - 3 + 1, ow2 - 3 + 1
    # TODO(synk): the fused kernel assumes conv3 reduces to 1x1 spatial (true
    # for this 36x36 demo); other sizes also need the NCHW-flatten permutation
    # folded into fc1_w.
    assert oh3 == 1 and ow3 == 1, "fused kernel assumes 1x1 conv3 output"

    m_pad = _round_up(max(n_batch, 8), 8)
    rows1 = n_batch * oh1 * ow1
    sp2 = oh2 * ow2                      # conv2 output positions per image (9)
    rows2_pad = sp2 * m_pad              # conv2 output rows, spatial-major

    # One-hot selectors: conv2's im2col as gather matmuls (exact in bf16).
    # Output rows are spatial-major (row = s*m_pad + n) so that conv3's im2col
    # later degenerates into aligned slice copies inside the kernel.
    sel = np.zeros((16, rows2_pad, rows1), np.float32)
    for kh in range(4):
        for kw in range(4):
            k = kh * 4 + kw
            for oh in range(oh2):
                for ow in range(ow2):
                    s = oh * ow2 + ow
                    for n in range(n_batch):
                        src = (n * oh1 * ow1
                               + (2 * oh + kh) * ow1 + (2 * ow + kw))
                        sel[k, s * m_pad + n, src] = 1.0

    bf16 = jnp.bfloat16
    in_ch = params["conv1_w"].shape[1]
    fc1_out = params["fc1_w"].shape[1]
    n_act = params["A_w"].shape[1]

    w1 = params["conv1_w"].transpose(1, 2, 3, 0).reshape(in_ch * 64, 32)
    w2 = params["conv2_w"].transpose(2, 3, 1, 0).reshape(16 * 32, 64)
    w3 = params["conv3_w"].transpose(2, 3, 1, 0).reshape(9 * 64, 64)

    wva = jnp.concatenate([params["V_w"], params["A_w"]], axis=1)   # (512,1+A)
    bva = jnp.concatenate([params["V_b"], params["A_b"]], axis=0)   # (1+A,)
    out_cols = _round_up(1 + n_act, 128)
    pad_cols = out_cols - (1 + n_act)

    return {
        # bf16 MXU operands (f32 accumulation via preferred_element_type);
        # biases and the tiny xyz FMA weight stay f32 (VPU operands).
        "w1": w1.astype(bf16),
        "b1": params["conv1_b"].reshape(1, -1),
        "sel": jnp.asarray(sel).astype(bf16),
        "w2": w2.astype(bf16),
        "b2": params["conv2_b"].reshape(1, -1),
        "w3": w3.astype(bf16),
        "b3": params["conv3_b"].reshape(1, -1),
        "fw1": params["fc1_w"].astype(bf16),
        "fb1": params["fc1_b"].reshape(1, -1),
        "fw2a": params["fc2_w"][:fc1_out].astype(bf16),     # manual-DMA weight
        "fw2b": params["fc2_w"][fc1_out:],                  # (2, 512) f32 FMA
        "fb2": params["fc2_b"].reshape(1, -1),
        "wva": jnp.pad(wva, ((0, 0), (0, pad_cols))).astype(bf16),
        "bva": jnp.pad(bva, (0, pad_cols)).reshape(1, -1),
    }


# --------------------------------------------------------------------------
# Forward pass (mirrors DuelingDeepQNetwork.forward)
# --------------------------------------------------------------------------
def forward(kp, state, *, n_actions):
    n, _, h, w = state.shape
    oh1, ow1 = (h - 8) // 4 + 1, (w - 8) // 4 + 1
    oh2, ow2 = (oh1 - 4) // 2 + 1, (ow1 - 4) // 2 + 1
    m_pad = _round_up(max(n, 8), 8)

    taps2, rows2_pad, rows1 = kp["sel"].shape
    c1 = kp["w1"].shape[1]
    c2 = kp["w2"].shape[1]
    taps3 = kp["w3"].shape[0] // c2
    assert rows1 == n * oh1 * ow1 and rows2_pad == oh2 * ow2 * m_pad, \
        "kernel params were prepared for a different batch / input size"

    image_state = state[:, 0:-1, :, :]
    patches, _, _ = im2col(image_state, 8, 8, 4)           # (rows1, C*64) f32

    xyz = jnp.stack([state[:, -1, 0, 0], state[:, -1, 0, 1]],
                    axis=-1).astype(jnp.float32)           # (N, 2)
    xyz_pad = jnp.pad(xyz, ((0, m_pad - n), (0, 0)))

    out_cols = kp["wva"].shape[1]
    fc1_out = kp["fw1"].shape[1]
    fc2_out = kp["fw2a"].shape[1]

    flops = 2 * (rows1 * patches.shape[1] * c1
                 + taps2 * rows2_pad * rows1 * c1
                 + rows2_pad * taps2 * c1 * c2
                 + m_pad * taps3 * c2 * c2
                 + m_pad * c2 * fc1_out
                 + m_pad * fc1_out * fc2_out
                 + m_pad * fc2_out * out_cols)
    bytes_accessed = (sum(int(v.size) * v.dtype.itemsize for v in kp.values())
                      + patches.size * 4 + xyz_pad.size * 4
                      + m_pad * out_cols * 4)

    vmem = pl.BlockSpec(memory_space=pltpu.MemorySpace.VMEM)
    hbm = pl.BlockSpec(memory_space=pl.ANY)    # fw2a: manual, overlapped DMA

    out = pl.pallas_call(
        _fused_kernel,
        out_shape=jax.ShapeDtypeStruct((m_pad, out_cols), jnp.float32),
        in_specs=[vmem, vmem,                 # patches, xyz
                  vmem, vmem,                 # w1, b1
                  vmem, vmem, vmem,           # sel, w2, b2
                  vmem, vmem,                 # w3, b3
                  vmem, vmem,                 # fw1, fb1
                  hbm, vmem, vmem,            # fw2a (HBM), fw2b, fb2
                  vmem, vmem],                # wva, bva
        out_specs=vmem,
        scratch_shapes=[
            pltpu.VMEM((rows2_pad, taps2 * c1), jnp.float32),   # conv2 im2col
            pltpu.VMEM((m_pad, taps3 * c2), jnp.float32),       # conv3 im2col
            pltpu.VMEM(kp["fw2a"].shape, kp["fw2a"].dtype),     # fc2 weight
            pltpu.SemaphoreType.DMA,
        ],
        cost_estimate=pl.CostEstimate(flops=int(flops), transcendentals=0,
                                      bytes_accessed=int(bytes_accessed)),
    )(patches, xyz_pad,
      kp["w1"], kp["b1"],
      kp["sel"], kp["w2"], kp["b2"],
      kp["w3"], kp["b3"],
      kp["fw1"], kp["fb1"],
      kp["fw2a"], kp["fw2b"], kp["fb2"],
      kp["wva"], kp["bva"])

    V = out[:n, 0:1]
    A = out[:n, 1:1 + n_actions]
    return V, A


# --------------------------------------------------------------------------
# Deterministic init (same shapes / torch-style bounds as the nn.Module)
# --------------------------------------------------------------------------
def init_params(key, in_ch, n_actions, fc_input_dims,
                fc1_out=1024, fc2_out=512, num_rel_positions=2):
    ks = jax.random.split(key, 14)

    def u(k, shape, fan_in):
        bound = 1.0 / jnp.sqrt(jnp.float32(fan_in))
        return jax.random.uniform(k, shape, jnp.float32, -bound, bound)

    return {
        "conv1_w": u(ks[0], (32, in_ch, 8, 8), in_ch * 64),
        "conv1_b": u(ks[1], (32,), in_ch * 64),
        "conv2_w": u(ks[2], (64, 32, 4, 4), 32 * 16),
        "conv2_b": u(ks[3], (64,), 32 * 16),
        "conv3_w": u(ks[4], (64, 64, 3, 3), 64 * 9),
        "conv3_b": u(ks[5], (64,), 64 * 9),
        # Linear weights stored (in_features, out_features)
        "fc1_w": u(ks[6], (fc_input_dims, fc1_out), fc_input_dims),
        "fc1_b": u(ks[7], (fc1_out,), fc_input_dims),
        "fc2_w": u(ks[8], (fc1_out + num_rel_positions, fc2_out),
                   fc1_out + num_rel_positions),
        "fc2_b": u(ks[9], (fc2_out,), fc1_out + num_rel_positions),
        "V_w": u(ks[10], (fc2_out, 1), fc2_out),
        "V_b": u(ks[11], (1,), fc2_out),
        "A_w": u(ks[12], (fc2_out, n_actions), fc2_out),
        "A_b": u(ks[13], (n_actions,), fc2_out),
    }


# --------------------------------------------------------------------------
# Pure-JAX reference (for a sanity check of the fused kernel)
# --------------------------------------------------------------------------
def reference_forward(params, state):
    hi = jax.lax.Precision.HIGHEST
    x = state[:, 0:-1, :, :]

    def conv(x, w, b, s):
        y = jax.lax.conv_general_dilated(
            x, w, (s, s), "VALID",
            dimension_numbers=("NCHW", "OIHW", "NCHW"), precision=hi)
        return jax.nn.relu(y + b[None, :, None, None])

    x = conv(x, params["conv1_w"], params["conv1_b"], 4)
    x = conv(x, params["conv2_w"], params["conv2_b"], 2)
    x = conv(x, params["conv3_w"], params["conv3_b"], 1)
    flat = x.reshape(x.shape[0], -1)
    f1 = jax.nn.relu(jnp.dot(flat, params["fc1_w"], precision=hi)
                     + params["fc1_b"])
    xyz = jnp.stack([state[:, -1, 0, 0], state[:, -1, 0, 1]],
                    axis=-1).astype(jnp.float32)
    cat = jnp.concatenate([f1, xyz], axis=1)
    h = jax.nn.relu(jnp.dot(cat, params["fc2_w"], precision=hi)
                    + params["fc2_b"])
    V = jnp.dot(h, params["V_w"], precision=hi) + params["V_b"]
    A = jnp.dot(h, params["A_w"], precision=hi) + params["A_b"]
    return V, A


if __name__ == "__main__":
    key = jax.random.PRNGKey(0)
    k_in, k_p = jax.random.split(key)

    N, C, H, W = 2, 5, 36, 36        # 4 image channels + 1 position channel
    n_actions = 6
    state = jax.random.normal(k_in, (N, C, H, W), jnp.float32)

    # conv output dims (valid conv) -> 8 -> 3 -> 1 spatial, 64 channels
    oh1 = (H - 8) // 4 + 1
    oh2 = (oh1 - 4) // 2 + 1
    oh3 = oh2 - 3 + 1
    fc_input_dims = 64 * oh3 * oh3

    params = init_params(k_p, C - 1, n_actions, fc_input_dims)
    kp = prepare_kernel_params(params, n_batch=N, image_hw=(H, W),
                               n_actions=n_actions)

    fwd = jax.jit(functools.partial(forward, n_actions=n_actions))
    V, A = fwd(kp, state)
    jax.block_until_ready((V, A))

    assert V.shape == (N, 1) and A.shape == (N, n_actions)
    assert V.dtype == jnp.float32 and A.dtype == jnp.float32

    V_ref, A_ref = jax.jit(reference_forward)(params, state)
    np.testing.assert_allclose(np.asarray(V), np.asarray(V_ref),
                               rtol=2e-2, atol=2e-2)
    np.testing.assert_allclose(np.asarray(A), np.asarray(A_ref),
                               rtol=2e-2, atol=2e-2)

    print("KERNEL_OK")
</pallas_src>

<mosaic_0001>
module attributes {stable_mosaic.version = 11 : i64} {
  func.func @_fused_kernel(%arg0: memref<128x256xf32, #tpu.memory_space<vmem>>, %arg1: memref<8x2xf32, #tpu.memory_space<vmem>>, %arg2: memref<256x32xbf16, #tpu.memory_space<vmem>>, %arg3: memref<1x32xf32, #tpu.memory_space<vmem>>, %arg4: memref<16x72x128xbf16, #tpu.memory_space<vmem>>, %arg5: memref<512x64xbf16, #tpu.memory_space<vmem>>, %arg6: memref<1x64xf32, #tpu.memory_space<vmem>>, %arg7: memref<576x64xbf16, #tpu.memory_space<vmem>>, %arg8: memref<1x64xf32, #tpu.memory_space<vmem>>, %arg9: memref<64x1024xbf16, #tpu.memory_space<vmem>>, %arg10: memref<1x1024xf32, #tpu.memory_space<vmem>>, %arg11: memref<1024x512xbf16, #tpu.memory_space<any>>, %arg12: memref<2x512xf32, #tpu.memory_space<vmem>>, %arg13: memref<1x512xf32, #tpu.memory_space<vmem>>, %arg14: memref<512x128xbf16, #tpu.memory_space<vmem>>, %arg15: memref<1x128xf32, #tpu.memory_space<vmem>>, %arg16: memref<8x128xf32, #tpu.memory_space<vmem>>, %arg17: memref<72x512xf32, #tpu.memory_space<vmem>>, %arg18: memref<8x576xf32, #tpu.memory_space<vmem>>, %arg19: memref<1024x512xbf16, #tpu.memory_space<vmem>>, %arg20: memref<!tpu.dma_semaphore, #tpu.memory_space<semaphore_mem>>) attributes {dimension_semantics = [], scalar_prefetch = 0 : i64, scratch_operands = 4 : i64, tpu.core_type = #tpu.core_type<tc>} {
    tpu.enqueue_dma source(%arg11 : memref<1024x512xbf16, #tpu.memory_space<any>>) target(%arg19 : memref<1024x512xbf16, #tpu.memory_space<vmem>>) target_semaphore(%arg20 : memref<!tpu.dma_semaphore, #tpu.memory_space<semaphore_mem>>)
    %c0 = arith.constant 0 : index
    %c0_0 = arith.constant 0 : index
    %0 = vector.load %arg0[%c0, %c0_0] : memref<128x256xf32, #tpu.memory_space<vmem>>, vector<128x256xf32>
    %1 = arith.truncf %0 : vector<128x256xf32> to vector<128x256xbf16>
    %c0_1 = arith.constant 0 : index
    %c0_2 = arith.constant 0 : index
    %2 = vector.load %arg2[%c0_1, %c0_2] : memref<256x32xbf16, #tpu.memory_space<vmem>>, vector<256x32xbf16>
    %cst = arith.constant dense<0.000000e+00> : vector<128x32xf32>
    %3 = tpu.matmul %1, %2, %cst {dimension_numbers = #tpu.dot_dimension_numbers<[1], [0], [0], [1], [0, 0, 1, 1], [], []>} : vector<128x256xbf16>, vector<256x32xbf16>, vector<128x32xf32> -> vector<128x32xf32>
    %c0_3 = arith.constant 0 : index
    %c0_4 = arith.constant 0 : index
    %4 = vector.load %arg3[%c0_3, %c0_4] : memref<1x32xf32, #tpu.memory_space<vmem>>, vector<1x32xf32>
    %5 = vector.broadcast %4 : vector<1x32xf32> to vector<128x32xf32>
    %6 = arith.addf %3, %5 : vector<128x32xf32>
    %cst_5 = arith.constant 0.000000e+00 : f32
    %7 = vector.broadcast %cst_5 : f32 to vector<128x32xf32>
    %8 = arith.maximumf %6, %7 : vector<128x32xf32>
    %9 = arith.truncf %8 : vector<128x32xf32> to vector<128x32xbf16>
    %c0_6 = arith.constant 0 : index
    %c0_7 = arith.constant 0 : index
    %c0_8 = arith.constant 0 : index
    %10 = vector.load %arg4[%c0_6, %c0_7, %c0_8] : memref<16x72x128xbf16, #tpu.memory_space<vmem>>, vector<1x72x128xbf16>
    %11 = vector.shape_cast %10 : vector<1x72x128xbf16> to vector<72x128xbf16>
    %cst_9 = arith.constant dense<0.000000e+00> : vector<72x32xf32>
    %12 = tpu.matmul %11, %9, %cst_9 {dimension_numbers = #tpu.dot_dimension_numbers<[1], [0], [0], [1], [0, 0, 1, 1], [], []>} : vector<72x128xbf16>, vector<128x32xbf16>, vector<72x32xf32> -> vector<72x32xf32>
    %c0_10 = arith.constant 0 : index
    %c0_11 = arith.constant 0 : index
    %13 = vector.load %arg17[%c0_10, %c0_11] : memref<72x512xf32, #tpu.memory_space<vmem>>, vector<72x32xf32>
    tpu.vector_store %arg17[%c0_10, %c0_11], %12 {strides = array<i32>} : memref<72x512xf32, #tpu.memory_space<vmem>>, vector<72x32xf32>,
    %c1 = arith.constant 1 : index
    %c0_12 = arith.constant 0 : index
    %c0_13 = arith.constant 0 : index
    %14 = vector.load %arg4[%c1, %c0_12, %c0_13] : memref<16x72x128xbf16, #tpu.memory_space<vmem>>, vector<1x72x128xbf16>
    %15 = vector.shape_cast %14 : vector<1x72x128xbf16> to vector<72x128xbf16>
    %cst_14 = arith.constant dense<0.000000e+00> : vector<72x32xf32>
    %16 = tpu.matmul %15, %9, %cst_14 {dimension_numbers = #tpu.dot_dimension_numbers<[1], [0], [0], [1], [0, 0, 1, 1], [], []>} : vector<72x128xbf16>, vector<128x32xbf16>, vector<72x32xf32> -> vector<72x32xf32>
    %c0_15 = arith.constant 0 : index
    %c32 = arith.constant 32 : index
    %17 = vector.load %arg17[%c0_15, %c32] : memref<72x512xf32, #tpu.memory_space<vmem>>, vector<72x32xf32>
    tpu.vector_store %arg17[%c0_15, %c32], %16 {strides = array<i32>} : memref<72x512xf32, #tpu.memory_space<vmem>>, vector<72x32xf32>,
    %c2 = arith.constant 2 : index
    %c0_16 = arith.constant 0 : index
    %c0_17 = arith.constant 0 : index
    %18 = vector.load %arg4[%c2, %c0_16, %c0_17] : memref<16x72x128xbf16, #tpu.memory_space<vmem>>, vector<1x72x128xbf16>
    %19 = vector.shape_cast %18 : vector<1x72x128xbf16> to vector<72x128xbf16>
    %cst_18 = arith.constant dense<0.000000e+00> : vector<72x32xf32>
    %20 = tpu.matmul %19, %9, %cst_18 {dimension_numbers = #tpu.dot_dimension_numbers<[1], [0], [0], [1], [0, 0, 1, 1], [], []>} : vector<72x128xbf16>, vector<128x32xbf16>, vector<72x32xf32> -> vector<72x32xf32>
    %c0_19 = arith.constant 0 : index
    %c64 = arith.constant 64 : index
    %21 = vector.load %arg17[%c0_19, %c64] : memref<72x512xf32, #tpu.memory_space<vmem>>, vector<72x32xf32>
    tpu.vector_store %arg17[%c0_19, %c64], %20 {strides = array<i32>} : memref<72x512xf32, #tpu.memory_space<vmem>>, vector<72x32xf32>,
    %c3 = arith.constant 3 : index
    %c0_20 = arith.constant 0 : index
    %c0_21 = arith.constant 0 : index
    %22 = vector.load %arg4[%c3, %c0_20, %c0_21] : memref<16x72x128xbf16, #tpu.memory_space<vmem>>, vector<1x72x128xbf16>
    %23 = vector.shape_cast %22 : vector<1x72x128xbf16> to vector<72x128xbf16>
    %cst_22 = arith.constant dense<0.000000e+00> : vector<72x32xf32>
    %24 = tpu.matmul %23, %9, %cst_22 {dimension_numbers = #tpu.dot_dimension_numbers<[1], [0], [0], [1], [0, 0, 1, 1], [], []>} : vector<72x128xbf16>, vector<128x32xbf16>, vector<72x32xf32> -> vector<72x32xf32>
    %c0_23 = arith.constant 0 : index
    %c96 = arith.constant 96 : index
    %25 = vector.load %arg17[%c0_23, %c96] : memref<72x512xf32, #tpu.memory_space<vmem>>, vector<72x32xf32>
    tpu.vector_store %arg17[%c0_23, %c96], %24 {strides = array<i32>} : memref<72x512xf32, #tpu.memory_space<vmem>>, vector<72x32xf32>,
    %c4 = arith.constant 4 : index
    %c0_24 = arith.constant 0 : index
    %c0_25 = arith.constant 0 : index
    %26 = vector.load %arg4[%c4, %c0_24, %c0_25] : memref<16x72x128xbf16, #tpu.memory_space<vmem>>, vector<1x72x128xbf16>
    %27 = vector.shape_cast %26 : vector<1x72x128xbf16> to vector<72x128xbf16>
    %cst_26 = arith.constant dense<0.000000e+00> : vector<72x32xf32>
    %28 = tpu.matmul %27, %9, %cst_26 {dimension_numbers = #tpu.dot_dimension_numbers<[1], [0], [0], [1], [0, 0, 1, 1], [], []>} : vector<72x128xbf16>, vector<128x32xbf16>, vector<72x32xf32> -> vector<72x32xf32>
    %c0_27 = arith.constant 0 : index
    %c128 = arith.constant 128 : index
    %29 = vector.load %arg17[%c0_27, %c128] : memref<72x512xf32, #tpu.memory_space<vmem>>, vector<72x32xf32>
    tpu.vector_store %arg17[%c0_27, %c128], %28 {strides = array<i32>} : memref<72x512xf32, #tpu.memory_space<vmem>>, vector<72x32xf32>,
    %c5 = arith.constant 5 : index
    %c0_28 = arith.constant 0 : index
    %c0_29 = arith.constant 0 : index
    %30 = vector.load %arg4[%c5, %c0_28, %c0_29] : memref<16x72x128xbf16, #tpu.memory_space<vmem>>, vector<1x72x128xbf16>
    %31 = vector.shape_cast %30 : vector<1x72x128xbf16> to vector<72x128xbf16>
    %cst_30 = arith.constant dense<0.000000e+00> : vector<72x32xf32>
    %32 = tpu.matmul %31, %9, %cst_30 {dimension_numbers = #tpu.dot_dimension_numbers<[1], [0], [0], [1], [0, 0, 1, 1], [], []>} : vector<72x128xbf16>, vector<128x32xbf16>, vector<72x32xf32> -> vector<72x32xf32>
    %c0_31 = arith.constant 0 : index
    %c160 = arith.constant 160 : index
    %33 = vector.load %arg17[%c0_31, %c160] : memref<72x512xf32, #tpu.memory_space<vmem>>, vector<72x32xf32>
    tpu.vector_store %arg17[%c0_31, %c160], %32 {strides = array<i32>} : memref<72x512xf32, #tpu.memory_space<vmem>>, vector<72x32xf32>,
    %c6 = arith.constant 6 : index
    %c0_32 = arith.constant 0 : index
    %c0_33 = arith.constant 0 : index
    %34 = vector.load %arg4[%c6, %c0_32, %c0_33] : memref<16x72x128xbf16, #tpu.memory_space<vmem>>, vector<1x72x128xbf16>
    %35 = vector.shape_cast %34 : vector<1x72x128xbf16> to vector<72x128xbf16>
    %cst_34 = arith.constant dense<0.000000e+00> : vector<72x32xf32>
    %36 = tpu.matmul %35, %9, %cst_34 {dimension_numbers = #tpu.dot_dimension_numbers<[1], [0], [0], [1], [0, 0, 1, 1], [], []>} : vector<72x128xbf16>, vector<128x32xbf16>, vector<72x32xf32> -> vector<72x32xf32>
    %c0_35 = arith.constant 0 : index
    %c192 = arith.constant 192 : index
    %37 = vector.load %arg17[%c0_35, %c192] : memref<72x512xf32, #tpu.memory_space<vmem>>, vector<72x32xf32>
    tpu.vector_store %arg17[%c0_35, %c192], %36 {strides = array<i32>} : memref<72x512xf32, #tpu.memory_space<vmem>>, vector<72x32xf32>,
    %c7 = arith.constant 7 : index
    %c0_36 = arith.constant 0 : index
    %c0_37 = arith.constant 0 : index
    %38 = vector.load %arg4[%c7, %c0_36, %c0_37] : memref<16x72x128xbf16, #tpu.memory_space<vmem>>, vector<1x72x128xbf16>
    %39 = vector.shape_cast %38 : vector<1x72x128xbf16> to vector<72x128xbf16>
    %cst_38 = arith.constant dense<0.000000e+00> : vector<72x32xf32>
    %40 = tpu.matmul %39, %9, %cst_38 {dimension_numbers = #tpu.dot_dimension_numbers<[1], [0], [0], [1], [0, 0, 1, 1], [], []>} : vector<72x128xbf16>, vector<128x32xbf16>, vector<72x32xf32> -> vector<72x32xf32>
    %c0_39 = arith.constant 0 : index
    %c224 = arith.constant 224 : index
    %41 = vector.load %arg17[%c0_39, %c224] : memref<72x512xf32, #tpu.memory_space<vmem>>, vector<72x32xf32>
    tpu.vector_store %arg17[%c0_39, %c224], %40 {strides = array<i32>} : memref<72x512xf32, #tpu.memory_space<vmem>>, vector<72x32xf32>,
    %c8 = arith.constant 8 : index
    %c0_40 = arith.constant 0 : index
    %c0_41 = arith.constant 0 : index
    %42 = vector.load %arg4[%c8, %c0_40, %c0_41] : memref<16x72x128xbf16, #tpu.memory_space<vmem>>, vector<1x72x128xbf16>
    %43 = vector.shape_cast %42 : vector<1x72x128xbf16> to vector<72x128xbf16>
    %cst_42 = arith.constant dense<0.000000e+00> : vector<72x32xf32>
    %44 = tpu.matmul %43, %9, %cst_42 {dimension_numbers = #tpu.dot_dimension_numbers<[1], [0], [0], [1], [0, 0, 1, 1], [], []>} : vector<72x128xbf16>, vector<128x32xbf16>, vector<72x32xf32> -> vector<72x32xf32>
    %c0_43 = arith.constant 0 : index
    %c256 = arith.constant 256 : index
    %45 = vector.load %arg17[%c0_43, %c256] : memref<72x512xf32, #tpu.memory_space<vmem>>, vector<72x32xf32>
    tpu.vector_store %arg17[%c0_43, %c256], %44 {strides = array<i32>} : memref<72x512xf32, #tpu.memory_space<vmem>>, vector<72x32xf32>,
    %c9 = arith.constant 9 : index
    %c0_44 = arith.constant 0 : index
    %c0_45 = arith.constant 0 : index
    %46 = vector.load %arg4[%c9, %c0_44, %c0_45] : memref<16x72x128xbf16, #tpu.memory_space<vmem>>, vector<1x72x128xbf16>
    %47 = vector.shape_cast %46 : vector<1x72x128xbf16> to vector<72x128xbf16>
    %cst_46 = arith.constant dense<0.000000e+00> : vector<72x32xf32>
    %48 = tpu.matmul %47, %9, %cst_46 {dimension_numbers = #tpu.dot_dimension_numbers<[1], [0], [0], [1], [0, 0, 1, 1], [], []>} : vector<72x128xbf16>, vector<128x32xbf16>, vector<72x32xf32> -> vector<72x32xf32>
    %c0_47 = arith.constant 0 : index
    %c288 = arith.constant 288 : index
    %49 = vector.load %arg17[%c0_47, %c288] : memref<72x512xf32, #tpu.memory_space<vmem>>, vector<72x32xf32>
    tpu.vector_store %arg17[%c0_47, %c288], %48 {strides = array<i32>} : memref<72x512xf32, #tpu.memory_space<vmem>>, vector<72x32xf32>,
    %c10 = arith.constant 10 : index
    %c0_48 = arith.constant 0 : index
    %c0_49 = arith.constant 0 : index
    %50 = vector.load %arg4[%c10, %c0_48, %c0_49] : memref<16x72x128xbf16, #tpu.memory_space<vmem>>, vector<1x72x128xbf16>
    %51 = vector.shape_cast %50 : vector<1x72x128xbf16> to vector<72x128xbf16>
    %cst_50 = arith.constant dense<0.000000e+00> : vector<72x32xf32>
    %52 = tpu.matmul %51, %9, %cst_50 {dimension_numbers = #tpu.dot_dimension_numbers<[1], [0], [0], [1], [0, 0, 1, 1], [], []>} : vector<72x128xbf16>, vector<128x32xbf16>, vector<72x32xf32> -> vector<72x32xf32>
    %c0_51 = arith.constant 0 : index
    %c320 = arith.constant 320 : index
    %53 = vector.load %arg17[%c0_51, %c320] : memref<72x512xf32, #tpu.memory_space<vmem>>, vector<72x32xf32>
    tpu.vector_store %arg17[%c0_51, %c320], %52 {strides = array<i32>} : memref<72x512xf32, #tpu.memory_space<vmem>>, vector<72x32xf32>,
    %c11 = arith.constant 11 : index
    %c0_52 = arith.constant 0 : index
    %c0_53 = arith.constant 0 : index
    %54 = vector.load %arg4[%c11, %c0_52, %c0_53] : memref<16x72x128xbf16, #tpu.memory_space<vmem>>, vector<1x72x128xbf16>
    %55 = vector.shape_cast %54 : vector<1x72x128xbf16> to vector<72x128xbf16>
    %cst_54 = arith.constant dense<0.000000e+00> : vector<72x32xf32>
    %56 = tpu.matmul %55, %9, %cst_54 {dimension_numbers = #tpu.dot_dimension_numbers<[1], [0], [0], [1], [0, 0, 1, 1], [], []>} : vector<72x128xbf16>, vector<128x32xbf16>, vector<72x32xf32> -> vector<72x32xf32>
    %c0_55 = arith.constant 0 : index
    %c352 = arith.constant 352 : index
    %57 = vector.load %arg17[%c0_55, %c352] : memref<72x512xf32, #tpu.memory_space<vmem>>, vector<72x32xf32>
    tpu.vector_store %arg17[%c0_55, %c352], %56 {strides = array<i32>} : memref<72x512xf32, #tpu.memory_space<vmem>>, vector<72x32xf32>,
    %c12 = arith.constant 12 : index
    %c0_56 = arith.constant 0 : index
    %c0_57 = arith.constant 0 : index
    %58 = vector.load %arg4[%c12, %c0_56, %c0_57] : memref<16x72x128xbf16, #tpu.memory_space<vmem>>, vector<1x72x128xbf16>
    %59 = vector.shape_cast %58 : vector<1x72x128xbf16> to vector<72x128xbf16>
    %cst_58 = arith.constant dense<0.000000e+00> : vector<72x32xf32>
    %60 = tpu.matmul %59, %9, %cst_58 {dimension_numbers = #tpu.dot_dimension_numbers<[1], [0], [0], [1], [0, 0, 1, 1], [], []>} : vector<72x128xbf16>, vector<128x32xbf16>, vector<72x32xf32> -> vector<72x32xf32>
    %c0_59 = arith.constant 0 : index
    %c384 = arith.constant 384 : index
    %61 = vector.load %arg17[%c0_59, %c384] : memref<72x512xf32, #tpu.memory_space<vmem>>, vector<72x32xf32>
    tpu.vector_store %arg17[%c0_59, %c384], %60 {strides = array<i32>} : memref<72x512xf32, #tpu.memory_space<vmem>>, vector<72x32xf32>,
    %c13 = arith.constant 13 : index
    %c0_60 = arith.constant 0 : index
    %c0_61 = arith.constant 0 : index
    %62 = vector.load %arg4[%c13, %c0_60, %c0_61] : memref<16x72x128xbf16, #tpu.memory_space<vmem>>, vector<1x72x128xbf16>
    %63 = vector.shape_cast %62 : vector<1x72x128xbf16> to vector<72x128xbf16>
    %cst_62 = arith.constant dense<0.000000e+00> : vector<72x32xf32>
    %64 = tpu.matmul %63, %9, %cst_62 {dimension_numbers = #tpu.dot_dimension_numbers<[1], [0], [0], [1], [0, 0, 1, 1], [], []>} : vector<72x128xbf16>, vector<128x32xbf16>, vector<72x32xf32> -> vector<72x32xf32>
    %c0_63 = arith.constant 0 : index
    %c416 = arith.constant 416 : index
    %65 = vector.load %arg17[%c0_63, %c416] : memref<72x512xf32, #tpu.memory_space<vmem>>, vector<72x32xf32>
    tpu.vector_store %arg17[%c0_63, %c416], %64 {strides = array<i32>} : memref<72x512xf32, #tpu.memory_space<vmem>>, vector<72x32xf32>,
    %c14 = arith.constant 14 : index
    %c0_64 = arith.constant 0 : index
    %c0_65 = arith.constant 0 : index
    %66 = vector.load %arg4[%c14, %c0_64, %c0_65] : memref<16x72x128xbf16, #tpu.memory_space<vmem>>, vector<1x72x128xbf16>
    %67 = vector.shape_cast %66 : vector<1x72x128xbf16> to vector<72x128xbf16>
    %cst_66 = arith.constant dense<0.000000e+00> : vector<72x32xf32>
    %68 = tpu.matmul %67, %9, %cst_66 {dimension_numbers = #tpu.dot_dimension_numbers<[1], [0], [0], [1], [0, 0, 1, 1], [], []>} : vector<72x128xbf16>, vector<128x32xbf16>, vector<72x32xf32> -> vector<72x32xf32>
    %c0_67 = arith.constant 0 : index
    %c448 = arith.constant 448 : index
    %69 = vector.load %arg17[%c0_67, %c448] : memref<72x512xf32, #tpu.memory_space<vmem>>, vector<72x32xf32>
    tpu.vector_store %arg17[%c0_67, %c448], %68 {strides = array<i32>} : memref<72x512xf32, #tpu.memory_space<vmem>>, vector<72x32xf32>,
    %c15 = arith.constant 15 : index
    %c0_68 = arith.constant 0 : index
    %c0_69 = arith.constant 0 : index
    %70 = vector.load %arg4[%c15, %c0_68, %c0_69] : memref<16x72x128xbf16, #tpu.memory_space<vmem>>, vector<1x72x128xbf16>
    %71 = vector.shape_cast %70 : vector<1x72x128xbf16> to vector<72x128xbf16>
    %cst_70 = arith.constant dense<0.000000e+00> : vector<72x32xf32>
    %72 = tpu.matmul %71, %9, %cst_70 {dimension_numbers = #tpu.dot_dimension_numbers<[1], [0], [0], [1], [0, 0, 1, 1], [], []>} : vector<72x128xbf16>, vector<128x32xbf16>, vector<72x32xf32> -> vector<72x32xf32>
    %c0_71 = arith.constant 0 : index
    %c480 = arith.constant 480 : index
    %73 = vector.load %arg17[%c0_71, %c480] : memref<72x512xf32, #tpu.memory_space<vmem>>, vector<72x32xf32>
    tpu.vector_store %arg17[%c0_71, %c480], %72 {strides = array<i32>} : memref<72x512xf32, #tpu.memory_space<vmem>>, vector<72x32xf32>,
    %c0_72 = arith.constant 0 : index
    %c0_73 = arith.constant 0 : index
    %74 = vector.load %arg17[%c0_72, %c0_73] : memref<72x512xf32, #tpu.memory_space<vmem>>, vector<72x512xf32>
    %75 = arith.truncf %74 : vector<72x512xf32> to vector<72x512xbf16>
    %c0_74 = arith.constant 0 : index
    %c0_75 = arith.constant 0 : index
    %76 = vector.load %arg5[%c0_74, %c0_75] : memref<512x64xbf16, #tpu.memory_space<vmem>>, vector<512x64xbf16>
    %cst_76 = arith.constant dense<0.000000e+00> : vector<72x64xf32>
    %77 = tpu.matmul %75, %76, %cst_76 {dimension_numbers = #tpu.dot_dimension_numbers<[1], [0], [0], [1], [0, 0, 1, 1], [], []>} : vector<72x512xbf16>, vector<512x64xbf16>, vector<72x64xf32> -> vector<72x64xf32>
    %c0_77 = arith.constant 0 : index
    %c0_78 = arith.constant 0 : index
    %78 = vector.load %arg6[%c0_77, %c0_78] : memref<1x64xf32, #tpu.memory_space<vmem>>, vector<1x64xf32>
    %79 = vector.broadcast %78 : vector<1x64xf32> to vector<72x64xf32>
    %80 = arith.addf %77, %79 : vector<72x64xf32>
    %cst_79 = arith.constant 0.000000e+00 : f32
    %81 = vector.broadcast %cst_79 : f32 to vector<72x64xf32>
    %82 = arith.maximumf %80, %81 : vector<72x64xf32>
    %83 = vector.extract_strided_slice %82 {offsets = [0, 0], sizes = [8, 64], strides = [1, 1]} : vector<72x64xf32> to vector<8x64xf32>
    %c0_80 = arith.constant 0 : index
    %c0_81 = arith.constant 0 : index
    %84 = vector.load %arg18[%c0_80, %c0_81] : memref<8x576xf32, #tpu.memory_space<vmem>>, vector<8x64xf32>
    tpu.vector_store %arg18[%c0_80, %c0_81], %83 {strides = array<i32>} : memref<8x576xf32, #tpu.memory_space<vmem>>, vector<8x64xf32>,
    %85 = vector.extract_strided_slice %82 {offsets = [8, 0], sizes = [8, 64], strides = [1, 1]} : vector<72x64xf32> to vector<8x64xf32>
    %c0_82 = arith.constant 0 : index
    %c64_83 = arith.constant 64 : index
    %86 = vector.load %arg18[%c0_82, %c64_83] : memref<8x576xf32, #tpu.memory_space<vmem>>, vector<8x64xf32>
    tpu.vector_store %arg18[%c0_82, %c64_83], %85 {strides = array<i32>} : memref<8x576xf32, #tpu.memory_space<vmem>>, vector<8x64xf32>,
    %87 = vector.extract_strided_slice %82 {offsets = [16, 0], sizes = [8, 64], strides = [1, 1]} : vector<72x64xf32> to vector<8x64xf32>
    %c0_84 = arith.constant 0 : index
    %c128_85 = arith.constant 128 : index
    %88 = vector.load %arg18[%c0_84, %c128_85] : memref<8x576xf32, #tpu.memory_space<vmem>>, vector<8x64xf32>
    tpu.vector_store %arg18[%c0_84, %c128_85], %87 {strides = array<i32>} : memref<8x576xf32, #tpu.memory_space<vmem>>, vector<8x64xf32>,
    %89 = vector.extract_strided_slice %82 {offsets = [24, 0], sizes = [8, 64], strides = [1, 1]} : vector<72x64xf32> to vector<8x64xf32>
    %c0_86 = arith.constant 0 : index
    %c192_87 = arith.constant 192 : index
    %90 = vector.load %arg18[%c0_86, %c192_87] : memref<8x576xf32, #tpu.memory_space<vmem>>, vector<8x64xf32>
    tpu.vector_store %arg18[%c0_86, %c192_87], %89 {strides = array<i32>} : memref<8x576xf32, #tpu.memory_space<vmem>>, vector<8x64xf32>,
    %91 = vector.extract_strided_slice %82 {offsets = [32, 0], sizes = [8, 64], strides = [1, 1]} : vector<72x64xf32> to vector<8x64xf32>
    %c0_88 = arith.constant 0 : index
    %c256_89 = arith.constant 256 : index
    %92 = vector.load %arg18[%c0_88, %c256_89] : memref<8x576xf32, #tpu.memory_space<vmem>>, vector<8x64xf32>
    tpu.vector_store %arg18[%c0_88, %c256_89], %91 {strides = array<i32>} : memref<8x576xf32, #tpu.memory_space<vmem>>, vector<8x64xf32>,
    %93 = vector.extract_strided_slice %82 {offsets = [40, 0], sizes = [8, 64], strides = [1, 1]} : vector<72x64xf32> to vector<8x64xf32>
    %c0_90 = arith.constant 0 : index
    %c320_91 = arith.constant 320 : index
    %94 = vector.load %arg18[%c0_90, %c320_91] : memref<8x576xf32, #tpu.memory_space<vmem>>, vector<8x64xf32>
    tpu.vector_store %arg18[%c0_90, %c320_91], %93 {strides = array<i32>} : memref<8x576xf32, #tpu.memory_space<vmem>>, vector<8x64xf32>,
    %95 = vector.extract_strided_slice %82 {offsets = [48, 0], sizes = [8, 64], strides = [1, 1]} : vector<72x64xf32> to vector<8x64xf32>
    %c0_92 = arith.constant 0 : index
    %c384_93 = arith.constant 384 : index
    %96 = vector.load %arg18[%c0_92, %c384_93] : memref<8x576xf32, #tpu.memory_space<vmem>>, vector<8x64xf32>
    tpu.vector_store %arg18[%c0_92, %c384_93], %95 {strides = array<i32>} : memref<8x576xf32, #tpu.memory_space<vmem>>, vector<8x64xf32>,
    %97 = vector.extract_strided_slice %82 {offsets = [56, 0], sizes = [8, 64], strides = [1, 1]} : vector<72x64xf32> to vector<8x64xf32>
    %c0_94 = arith.constant 0 : index
    %c448_95 = arith.constant 448 : index
    %98 = vector.load %arg18[%c0_94, %c448_95] : memref<8x576xf32, #tpu.memory_space<vmem>>, vector<8x64xf32>
    tpu.vector_store %arg18[%c0_94, %c448_95], %97 {strides = array<i32>} : memref<8x576xf32, #tpu.memory_space<vmem>>, vector<8x64xf32>,
    %99 = vector.extract_strided_slice %82 {offsets = [64, 0], sizes = [8, 64], strides = [1, 1]} : vector<72x64xf32> to vector<8x64xf32>
    %c0_96 = arith.constant 0 : index
    %c512 = arith.constant 512 : index
    %100 = vector.load %arg18[%c0_96, %c512] : memref<8x576xf32, #tpu.memory_space<vmem>>, vector<8x64xf32>
    tpu.vector_store %arg18[%c0_96, %c512], %99 {strides = array<i32>} : memref<8x576xf32, #tpu.memory_space<vmem>>, vector<8x64xf32>,
    %c0_97 = arith.constant 0 : index
    %c0_98 = arith.constant 0 : index
    %101 = vector.load %arg18[%c0_97, %c0_98] : memref<8x576xf32, #tpu.memory_space<vmem>>, vector<8x576xf32>
    %102 = arith.truncf %101 : vector<8x576xf32> to vector<8x576xbf16>
    %c0_99 = arith.constant 0 : index
    %c0_100 = arith.constant 0 : index
    %103 = vector.load %arg7[%c0_99, %c0_100] : memref<576x64xbf16, #tpu.memory_space<vmem>>, vector<576x64xbf16>
    %cst_101 = arith.constant dense<0.000000e+00> : vector<8x64xf32>
    %104 = tpu.matmul %102, %103, %cst_101 {dimension_numbers = #tpu.dot_dimension_numbers<[1], [0], [0], [1], [0, 0, 1, 1], [], []>} : vector<8x576xbf16>, vector<576x64xbf16>, vector<8x64xf32> -> vector<8x64xf32>
    %c0_102 = arith.constant 0 : index
    %c0_103 = arith.constant 0 : index
    %105 = vector.load %arg8[%c0_102, %c0_103] : memref<1x64xf32, #tpu.memory_space<vmem>>, vector<1x64xf32>
    %106 = vector.broadcast %105 : vector<1x64xf32> to vector<8x64xf32>
    %107 = arith.addf %104, %106 : vector<8x64xf32>
    %cst_104 = arith.constant 0.000000e+00 : f32
    %108 = vector.broadcast %cst_104 : f32 to vector<8x64xf32>
    %109 = arith.maximumf %107, %108 : vector<8x64xf32>
    %110 = arith.truncf %109 : vector<8x64xf32> to vector<8x64xbf16>
    %c0_105 = arith.constant 0 : index
    %c0_106 = arith.constant 0 : index
    %111 = vector.load %arg9[%c0_105, %c0_106] : memref<64x1024xbf16, #tpu.memory_space<vmem>>, vector<64x1024xbf16>
    %cst_107 = arith.constant dense<0.000000e+00> : vector<8x1024xf32>
    %112 = tpu.matmul %110, %111, %cst_107 {dimension_numbers = #tpu.dot_dimension_numbers<[1], [0], [0], [1], [0, 0, 1, 1], [], []>} : vector<8x64xbf16>, vector<64x1024xbf16>, vector<8x1024xf32> -> vector<8x1024xf32>
    %c0_108 = arith.constant 0 : index
    %c0_109 = arith.constant 0 : index
    %113 = vector.load %arg10[%c0_108, %c0_109] : memref<1x1024xf32, #tpu.memory_space<vmem>>, vector<1x1024xf32>
    %114 = vector.broadcast %113 : vector<1x1024xf32> to vector<8x1024xf32>
    %115 = arith.addf %112, %114 : vector<8x1024xf32>
    %cst_110 = arith.constant 0.000000e+00 : f32
    %116 = vector.broadcast %cst_110 : f32 to vector<8x1024xf32>
    %117 = arith.maximumf %115, %116 : vector<8x1024xf32>
    tpu.wait_dma2 semaphore(%arg20 : memref<!tpu.dma_semaphore, #tpu.memory_space<semaphore_mem>>) src(%arg11 : memref<1024x512xbf16, #tpu.memory_space<any>>) dst(%arg19 : memref<1024x512xbf16, #tpu.memory_space<vmem>>)
    %c0_111 = arith.constant 0 : index
    %c0_112 = arith.constant 0 : index
    %118 = vector.load %arg1[%c0_111, %c0_112] : memref<8x2xf32, #tpu.memory_space<vmem>>, vector<8x2xf32>
    %119 = arith.truncf %117 : vector<8x1024xf32> to vector<8x1024xbf16>
    %c0_113 = arith.constant 0 : index
    %c0_114 = arith.constant 0 : index
    %120 = vector.load %arg19[%c0_113, %c0_114] : memref<1024x512xbf16, #tpu.memory_space<vmem>>, vector<1024x512xbf16>
    %cst_115 = arith.constant dense<0.000000e+00> : vector<8x512xf32>
    %121 = tpu.matmul %119, %120, %cst_115 {dimension_numbers = #tpu.dot_dimension_numbers<[1], [0], [0], [1], [0, 0, 1, 1], [], []>} : vector<8x1024xbf16>, vector<1024x512xbf16>, vector<8x512xf32> -> vector<8x512xf32>
    %122 = vector.extract_strided_slice %118 {offsets = [0, 0], sizes = [8, 1], strides = [1, 1]} : vector<8x2xf32> to vector<8x1xf32>
    %c0_116 = arith.constant 0 : index
    %c0_117 = arith.constant 0 : index
    %123 = vector.load %arg12[%c0_116, %c0_117] : memref<2x512xf32, #tpu.memory_space<vmem>>, vector<1x512xf32>
    %124 = vector.broadcast %122 : vector<8x1xf32> to vector<8x512xf32>
    %125 = vector.broadcast %123 : vector<1x512xf32> to vector<8x512xf32>
    %126 = arith.mulf %124, %125 : vector<8x512xf32>
    %127 = arith.addf %121, %126 : vector<8x512xf32>
    %128 = vector.extract_strided_slice %118 {offsets = [0, 1], sizes = [8, 1], strides = [1, 1]} : vector<8x2xf32> to vector<8x1xf32>
    %c1_118 = arith.constant 1 : index
    %c0_119 = arith.constant 0 : index
    %129 = vector.load %arg12[%c1_118, %c0_119] : memref<2x512xf32, #tpu.memory_space<vmem>>, vector<1x512xf32>
    %130 = vector.broadcast %128 : vector<8x1xf32> to vector<8x512xf32>
    %131 = vector.broadcast %129 : vector<1x512xf32> to vector<8x512xf32>
    %132 = arith.mulf %130, %131 : vector<8x512xf32>
    %133 = arith.addf %127, %132 : vector<8x512xf32>
    %c0_120 = arith.constant 0 : index
    %c0_121 = arith.constant 0 : index
    %134 = vector.load %arg13[%c0_120, %c0_121] : memref<1x512xf32, #tpu.memory_space<vmem>>, vector<1x512xf32>
    %135 = vector.broadcast %134 : vector<1x512xf32> to vector<8x512xf32>
    %136 = arith.addf %133, %135 : vector<8x512xf32>
    %cst_122 = arith.constant 0.000000e+00 : f32
    %137 = vector.broadcast %cst_122 : f32 to vector<8x512xf32>
    %138 = arith.maximumf %136, %137 : vector<8x512xf32>
    %139 = arith.truncf %138 : vector<8x512xf32> to vector<8x512xbf16>
    %c0_123 = arith.constant 0 : index
    %c0_124 = arith.constant 0 : index
    %140 = vector.load %arg14[%c0_123, %c0_124] : memref<512x128xbf16, #tpu.memory_space<vmem>>, vector<512x128xbf16>
    %cst_125 = arith.constant dense<0.000000e+00> : vector<8x128xf32>
    %141 = tpu.matmul %139, %140, %cst_125 {dimension_numbers = #tpu.dot_dimension_numbers<[1], [0], [0], [1], [0, 0, 1, 1], [], []>} : vector<8x512xbf16>, vector<512x128xbf16>, vector<8x128xf32> -> vector<8x128xf32>
    %c0_126 = arith.constant 0 : index
    %c0_127 = arith.constant 0 : index
    %142 = vector.load %arg15[%c0_126, %c0_127] : memref<1x128xf32, #tpu.memory_space<vmem>>, vector<1x128xf32>
    %143 = vector.broadcast %142 : vector<1x128xf32> to vector<8x128xf32>
    %144 = arith.addf %141, %143 : vector<8x128xf32>
    %c0_128 = arith.constant 0 : index
    %c0_129 = arith.constant 0 : index
    %145 = vector.load %arg16[%c0_128, %c0_129] : memref<8x128xf32, #tpu.memory_space<vmem>>, vector<8x128xf32>
    tpu.vector_store %arg16[%c0_128, %c0_129], %144 {strides = array<i32>} : memref<8x128xf32, #tpu.memory_space<vmem>>, vector<8x128xf32>,
    return
  }
}

</mosaic_0001>

<bundles_post_ra>
// kernel: forward.1
= control target key start
LH: loop header
LB: loop body
LE: loop exit
PB: predicated region body
PF: predicated region fallthrough
CT: control target
= control target key end

     0   :  { %s14195_s0 = inlined_call_operand.vmem [shape: f32[128,256], index: 0, kind: input, shape index: {}]   ;;  %s14196_s1 = inlined_call_operand.vmem [shape: f32[8,2], index: 1, kind: input, shape index: {}]   ;;  %s14197_s2 = inlined_call_operand.vmem [shape: bf16[256,32], index: 2, kind: input, shape index: {}]   ;;  %s14198_s3 = inlined_call_operand.vmem [shape: f32[1,32], index: 3, kind: input, shape index: {}]   ;;  %s14199_s4 = inlined_call_operand.vmem [shape: bf16[16,72,128], index: 4, kind: input, shape index: {}]   ;;  %s14200_s5 = inlined_call_operand.vmem [shape: bf16[512,64], index: 5, kind: input, shape index: {}]   ;;  %s14201_s6 = inlined_call_operand.vmem [shape: f32[1,64], index: 6, kind: input, shape index: {}]   ;;  %s14202_s7 = inlined_call_operand.vmem [shape: bf16[576,64], index: 7, kind: input, shape index: {}]   ;;  %s14203_s8 = inlined_call_operand.vmem [shape: f32[1,64], index: 8, kind: input, shape index: {}]   ;;  %s14204_s9 = inlined_call_operand.vmem [shape: bf16[64,1024], index: 9, kind: input, shape index: {}]   ;;  %s14205_s10 = inlined_call_operand.vmem [shape: f32[1,1024], index: 10, kind: input, shape index: {}]   ;;  %s14206_s11 = inlined_call_operand.vmem [shape: bf16[1024,512], index: 11, kind: input, shape index: {}]   ;;  %s14207_s12 = inlined_call_operand.vmem [shape: f32[2,512], index: 12, kind: input, shape index: {}]   ;;  %s14208_s13 = inlined_call_operand.vmem [shape: f32[1,512], index: 13, kind: input, shape index: {}]   ;;  %s14209_s14 = inlined_call_operand.vmem [shape: bf16[512,128], index: 14, kind: input, shape index: {}]   ;;  %s14210_s15 = inlined_call_operand.vmem [shape: f32[1,128], index: 15, kind: input, shape index: {}]   ;;  %s14211_s16 = inlined_call_operand.vmem [shape: f32[8,128], index: 16, kind: output, shape index: {}]  }
   0x1   :  { %14213 = sst [smem:[#allocation8_spill]] %s14195_s0  ;;  %v69_v0 = vld [vmem:[%s14206_s11] sm:$0xf]  ;;  %v71_v1 = vld [vmem:[%s14206_s11 + $0x10] sm:$0xf] }
   0x2   :  { %v73_v2 = vld [vmem:[%s14206_s11 + $0x4] sm:$0xf]  ;;  %70 = vst [vmem:[#allocation4] sm:$0xf] %v69_v0  ;;  %72 = vst [vmem:[#allocation4 + $0x4] sm:$0xf] %v71_v1 }
   0x3   :  { %74 = vst [vmem:[#allocation4 + $0x8] sm:$0xf] %v73_v2  ;;  %v75_v3 = vld [vmem:[%s14206_s11 + $0x14] sm:$0xf]  ;;  %v77_v4 = vld [vmem:[%s14206_s11 + $0x8] sm:$0xf] }
   0x4   :  { %v79_v5 = vld [vmem:[%s14206_s11 + $0x18] sm:$0xf]  ;;  %76 = vst [vmem:[#allocation4 + $0xc] sm:$0xf] %v75_v3  ;;  %78 = vst [vmem:[#allocation4 + $0x10] sm:$0xf] %v77_v4 }
   0x5   :  { %80 = vst [vmem:[#allocation4 + $0x14] sm:$0xf] %v79_v5  ;;  %v81_v6 = vld [vmem:[%s14206_s11 + $0xc] sm:$0xf]  ;;  %v83_v7 = vld [vmem:[%s14206_s11 + $0x1c] sm:$0xff]  }
   0x6   :  { %v87_v8 = vld [vmem:[%s14206_s11 + $0x30] sm:$0xf]  ;;  %82 = vst [vmem:[#allocation4 + $0x18] sm:$0xf] %v81_v6  ;;  %84 = vst [vmem:[#allocation4 + $0x1c] sm:$0xff] %v83_v7   ;;  %v99_v14 = vld [vmem:[%s14206_s11 + $0x3c] sm:$0xff]  }
   0x7   :  { %88 = vst [vmem:[#allocation4 + $0x24] sm:$0xf] %v87_v8  ;;  %v89_v9 = vld [vmem:[%s14206_s11 + $0x24] sm:$0xf]  ;;  %v91_v10 = vld [vmem:[%s14206_s11 + $0x34] sm:$0xf] }
   0x8   :  { %v93_v11 = vld [vmem:[%s14206_s11 + $0x28] sm:$0xf]  ;;  %90 = vst [vmem:[#allocation4 + $0x28] sm:$0xf] %v89_v9  ;;  %92 = vst [vmem:[#allocation4 + $0x2c] sm:$0xf] %v91_v10 }
   0x9   :  { %94 = vst [vmem:[#allocation4 + $0x30] sm:$0xf] %v93_v11  ;;  %v95_v12 = vld [vmem:[%s14206_s11 + $0x38] sm:$0xf]  ;;  %v97_v13 = vld [vmem:[%s14206_s11 + $0x2c] sm:$0xf] }
   0xa   :  { %96 = vst [vmem:[#allocation4 + $0x34] sm:$0xf] %v95_v12  ;;  %98 = vst [vmem:[#allocation4 + $0x38] sm:$0xf] %v97_v13  ;;  %v103_v15 = vld [vmem:[%s14206_s11 + $0x50] sm:$0xf] }
   0xb   :  { %100 = vst [vmem:[#allocation4 + $0x3c] sm:$0xff] %v99_v14   ;;  %v105_v16 = vld [vmem:[%s14206_s11 + $0x44] sm:$0xf]  ;;  %v107_v17 = vld [vmem:[%s14206_s11 + $0x54] sm:$0xf]  ;;  %v115_v21 = vld [vmem:[%s14206_s11 + $0x5c] sm:$0xff]  }
   0xc   :  { %104 = vst [vmem:[#allocation4 + $0x44] sm:$0xf] %v103_v15  ;;  %106 = vst [vmem:[#allocation4 + $0x48] sm:$0xf] %v105_v16  ;;  %v109_v18 = vld [vmem:[%s14206_s11 + $0x48] sm:$0xf] }
   0xd   :  { %108 = vst [vmem:[#allocation4 + $0x4c] sm:$0xf] %v107_v17  ;;  %v111_v19 = vld [vmem:[%s14206_s11 + $0x58] sm:$0xf]  ;;  %v113_v20 = vld [vmem:[%s14206_s11 + $0x4c] sm:$0xf] }
   0xe   :  { %110 = vst [vmem:[#allocation4 + $0x50] sm:$0xf] %v109_v18  ;;  %112 = vst [vmem:[#allocation4 + $0x54] sm:$0xf] %v111_v19  ;;  %v119_v22 = vld [vmem:[%s14206_s11 + $0x70] sm:$0xf] }
   0xf   :  { %114 = vst [vmem:[#allocation4 + $0x58] sm:$0xf] %v113_v20  ;;  %v121_v23 = vld [vmem:[%s14206_s11 + $0x64] sm:$0xf]  ;;  %116 = vst [vmem:[#allocation4 + $0x5c] sm:$0xff] %v115_v21   ;;  %v131_v28 = vld [vmem:[%s14206_s11 + $0x7c] sm:$0xff]  }
  0x10   :  { %120 = vst [vmem:[#allocation4 + $0x64] sm:$0xf] %v119_v22  ;;  %122 = vst [vmem:[#allocation4 + $0x68] sm:$0xf] %v121_v23  ;;  %v123_v24 = vld [vmem:[%s14206_s11 + $0x74] sm:$0xf] }
  0x11   :  { %v125_v25 = vld [vmem:[%s14206_s11 + $0x68] sm:$0xf]  ;;  %v127_v26 = vld [vmem:[%s14206_s11 + $0x78] sm:$0xf]  ;;  %124 = vst [vmem:[#allocation4 + $0x6c] sm:$0xf] %v123_v24 }
  0x12   :  { %126 = vst [vmem:[#allocation4 + $0x70] sm:$0xf] %v125_v25  ;;  %128 = vst [vmem:[#allocation4 + $0x74] sm:$0xf] %v127_v26  ;;  %v129_v27 = vld [vmem:[%s14206_s11 + $0x6c] sm:$0xf] }
  0x13   :  { %v135_v29 = vld [vmem:[%s14206_s11 + $0x90] sm:$0xf]  ;;  %130 = vst [vmem:[#allocation4 + $0x78] sm:$0xf] %v129_v27  ;;  %132 = vst [vmem:[#allocation4 + $0x7c] sm:$0xff] %v131_v28   ;;  %v147_v35 = vld [vmem:[%s14206_s11 + $0x9c] sm:$0xff]  }
  0x14   :  { %136 = vst [vmem:[#allocation4 + $0x84] sm:$0xf] %v135_v29  ;;  %v137_v30 = vld [vmem:[%s14206_s11 + $0x84] sm:$0xf]  ;;  %v139_v31 = vld [vmem:[%s14206_s11 + $0x94] sm:$0xf] }
  0x15   :  { %v141_v32 = vld [vmem:[%s14206_s11 + $0x88] sm:$0xf]  ;;  %138 = vst [vmem:[#allocation4 + $0x88] sm:$0xf] %v137_v30  ;;  %140 = vst [vmem:[#allocation4 + $0x8c] sm:$0xf] %v139_v31 }
  0x16   :  { %142 = vst [vmem:[#allocation4 + $0x90] sm:$0xf] %v141_v32  ;;  %v143_v33 = vld [vmem:[%s14206_s11 + $0x98] sm:$0xf]  ;;  %v145_v34 = vld [vmem:[%s14206_s11 + $0x8c] sm:$0xf] }
  0x17   :  { %144 = vst [vmem:[#allocation4 + $0x94] sm:$0xf] %v143_v33  ;;  %146 = vst [vmem:[#allocation4 + $0x98] sm:$0xf] %v145_v34  ;;  %v151_v36 = vld [vmem:[%s14206_s11 + $0xb0] sm:$0xf] }
  0x18   :  { %148 = vst [vmem:[#allocation4 + $0x9c] sm:$0xff] %v147_v35   ;;  %v153_v37 = vld [vmem:[%s14206_s11 + $0xa4] sm:$0xf]  ;;  %v155_v38 = vld [vmem:[%s14206_s11 + $0xb4] sm:$0xf]  ;;  %v163_v42 = vld [vmem:[%s14206_s11 + $0xbc] sm:$0xff]  }
  0x19   :  { %152 = vst [vmem:[#allocation4 + $0xa4] sm:$0xf] %v151_v36  ;;  %154 = vst [vmem:[#allocation4 + $0xa8] sm:$0xf] %v153_v37  ;;  %v157_v39 = vld [vmem:[%s14206_s11 + $0xa8] sm:$0xf] }
  0x1a   :  { %156 = vst [vmem:[#allocation4 + $0xac] sm:$0xf] %v155_v38  ;;  %v159_v40 = vld [vmem:[%s14206_s11 + $0xb8] sm:$0xf]  ;;  %v161_v41 = vld [vmem:[%s14206_s11 + $0xac] sm:$0xf] }
  0x1b   :  { %158 = vst [vmem:[#allocation4 + $0xb0] sm:$0xf] %v157_v39  ;;  %160 = vst [vmem:[#allocation4 + $0xb4] sm:$0xf] %v159_v40  ;;  %v167_v43 = vld [vmem:[%s14206_s11 + $0xd0] sm:$0xf] }
  0x1c   :  { %162 = vst [vmem:[#allocation4 + $0xb8] sm:$0xf] %v161_v41  ;;  %v169_v44 = vld [vmem:[%s14206_s11 + $0xc4] sm:$0xf]  ;;  %164 = vst [vmem:[#allocation4 + $0xbc] sm:$0xff] %v163_v42   ;;  %v179_v49 = vld [vmem:[%s14206_s11 + $0xdc] sm:$0xff]  }
  0x1d   :  { %168 = vst [vmem:[#allocation4 + $0xc4] sm:$0xf] %v167_v43  ;;  %170 = vst [vmem:[#allocation4 + $0xc8] sm:$0xf] %v169_v44  ;;  %v171_v45 = vld [vmem:[%s14206_s11 + $0xd4] sm:$0xf] }
  0x1e   :  { %v173_v46 = vld [vmem:[%s14206_s11 + $0xc8] sm:$0xf]  ;;  %v175_v47 = vld [vmem:[%s14206_s11 + $0xd8] sm:$0xf]  ;;  %172 = vst [vmem:[#allocation4 + $0xcc] sm:$0xf] %v171_v45 }
  0x1f   :  { %174 = vst [vmem:[#allocation4 + $0xd0] sm:$0xf] %v173_v46  ;;  %176 = vst [vmem:[#allocation4 + $0xd4] sm:$0xf] %v175_v47  ;;  %v177_v48 = vld [vmem:[%s14206_s11 + $0xcc] sm:$0xf] }
  0x20   :  { %v183_v50 = vld [vmem:[%s14206_s11 + $0xf0] sm:$0xf]  ;;  %178 = vst [vmem:[#allocation4 + $0xd8] sm:$0xf] %v177_v48  ;;  %180 = vst [vmem:[#allocation4 + $0xdc] sm:$0xff] %v179_v49   ;;  %v195_v56 = vld [vmem:[%s14206_s11 + $0xfc] sm:$0xff]  }
  0x21   :  { %184 = vst [vmem:[#allocation4 + $0xe4] sm:$0xf] %v183_v50  ;;  %v185_v51 = vld [vmem:[%s14206_s11 + $0xe4] sm:$0xf]  ;;  %v187_v52 = vld [vmem:[%s14206_s11 + $0xf4] sm:$0xf] }
  0x22   :  { %v189_v53 = vld [vmem:[%s14206_s11 + $0xe8] sm:$0xf]  ;;  %186 = vst [vmem:[#allocation4 + $0xe8] sm:$0xf] %v185_v51  ;;  %188 = vst [vmem:[#allocation4 + $0xec] sm:$0xf] %v187_v52 }
  0x23   :  { %190 = vst [vmem:[#allocation4 + $0xf0] sm:$0xf] %v189_v53  ;;  %v191_v54 = vld [vmem:[%s14206_s11 + $0xf8] sm:$0xf]  ;;  %v193_v55 = vld [vmem:[%s14206_s11 + $0xec] sm:$0xf] }
  0x24   :  { %192 = vst [vmem:[#allocation4 + $0xf4] sm:$0xf] %v191_v54  ;;  %194 = vst [vmem:[#allocation4 + $0xf8] sm:$0xf] %v193_v55  ;;  %v199_v57 = vld [vmem:[%s14206_s11 + $0x110] sm:$0xf] }
  0x25   :  { %196 = vst [vmem:[#allocation4 + $0xfc] sm:$0xff] %v195_v56   ;;  %v201_v58 = vld [vmem:[%s14206_s11 + $0x104] sm:$0xf]  ;;  %v203_v59 = vld [vmem:[%s14206_s11 + $0x114] sm:$0xf]  ;;  %v211_v63 = vld [vmem:[%s14206_s11 + $0x11c] sm:$0xff]  }
  0x26   :  { %200 = vst [vmem:[#allocation4 + $0x104] sm:$0xf] %v199_v57  ;;  %202 = vst [vmem:[#allocation4 + $0x108] sm:$0xf] %v201_v58  ;;  %v205_v60 = vld [vmem:[%s14206_s11 + $0x108] sm:$0xf] }
  0x27   :  { %204 = vst [vmem:[#allocation4 + $0x10c] sm:$0xf] %v203_v59  ;;  %v207_v61 = vld [vmem:[%s14206_s11 + $0x118] sm:$0xf]  ;;  %v209_v62 = vld [vmem:[%s14206_s11 + $0x10c] sm:$0xf] }
  0x28   :  { %206 = vst [vmem:[#allocation4 + $0x110] sm:$0xf] %v205_v60  ;;  %208 = vst [vmem:[#allocation4 + $0x114] sm:$0xf] %v207_v61  ;;  %v215_v0 = vld [vmem:[%s14206_s11 + $0x130] sm:$0xf] }
  0x29   :  { %210 = vst [vmem:[#allocation4 + $0x118] sm:$0xf] %v209_v62  ;;  %v217_v1 = vld [vmem:[%s14206_s11 + $0x124] sm:$0xf]  ;;  %212 = vst [vmem:[#allocation4 + $0x11c] sm:$0xff] %v211_v63   ;;  %v227_v6 = vld [vmem:[%s14206_s11 + $0x13c] sm:$0xff]  }
  0x2a   :  { %216 = vst [vmem:[#allocation4 + $0x124] sm:$0xf] %v215_v0  ;;  %218 = vst [vmem:[#allocation4 + $0x128] sm:$0xf] %v217_v1  ;;  %v219_v2 = vld [vmem:[%s14206_s11 + $0x134] sm:$0xf] }
  0x2b   :  { %v221_v3 = vld [vmem:[%s14206_s11 + $0x128] sm:$0xf]  ;;  %v223_v4 = vld [vmem:[%s14206_s11 + $0x138] sm:$0xf]  ;;  %220 = vst [vmem:[#allocation4 + $0x12c] sm:$0xf] %v219_v2 }
  0x2c   :  { %222 = vst [vmem:[#allocation4 + $0x130] sm:$0xf] %v221_v3  ;;  %224 = vst [vmem:[#allocation4 + $0x134] sm:$0xf] %v223_v4  ;;  %v225_v5 = vld [vmem:[%s14206_s11 + $0x12c] sm:$0xf] }
  0x2d   :  { %v231_v7 = vld [vmem:[%s14206_s11 + $0x150] sm:$0xf]  ;;  %226 = vst [vmem:[#allocation4 + $0x138] sm:$0xf] %v225_v5  ;;  %228 = vst [vmem:[#allocation4 + $0x13c] sm:$0xff] %v227_v6   ;;  %v243_v13 = vld [vmem:[%s14206_s11 + $0x15c] sm:$0xff]  }
  0x2e   :  { %232 = vst [vmem:[#allocation4 + $0x144] sm:$0xf] %v231_v7  ;;  %v233_v8 = vld [vmem:[%s14206_s11 + $0x144] sm:$0xf]  ;;  %v235_v9 = vld [vmem:[%s14206_s11 + $0x154] sm:$0xf] }
  0x2f   :  { %v237_v10 = vld [vmem:[%s14206_s11 + $0x148] sm:$0xf]  ;;  %234 = vst [vmem:[#allocation4 + $0x148] sm:$0xf] %v233_v8  ;;  %236 = vst [vmem:[#allocation4 + $0x14c] sm:$0xf] %v235_v9 }
  0x30   :  { %238 = vst [vmem:[#allocation4 + $0x150] sm:$0xf] %v237_v10  ;;  %v239_v11 = vld [vmem:[%s14206_s11 + $0x158] sm:$0xf]  ;;  %v241_v12 = vld [vmem:[%s14206_s11 + $0x14c] sm:$0xf] }
  0x31   :  { %240 = vst [vmem:[#allocation4 + $0x154] sm:$0xf] %v239_v11  ;;  %242 = vst [vmem:[#allocation4 + $0x158] sm:$0xf] %v241_v12  ;;  %v247_v14 = vld [vmem:[%s14206_s11 + $0x170] sm:$0xf] }
  0x32   :  { %244 = vst [vmem:[#allocation4 + $0x15c] sm:$0xff] %v243_v13   ;;  %v249_v15 = vld [vmem:[%s14206_s11 + $0x164] sm:$0xf]  ;;  %v251_v16 = vld [vmem:[%s14206_s11 + $0x174] sm:$0xf]  ;;  %v259_v20 = vld [vmem:[%s14206_s11 + $0x17c] sm:$0xff]  }
  0x33   :  { %248 = vst [vmem:[#allocation4 + $0x164] sm:$0xf] %v247_v14  ;;  %250 = vst [vmem:[#allocation4 + $0x168] sm:$0xf] %v249_v15  ;;  %v253_v17 = vld [vmem:[%s14206_s11 + $0x168] sm:$0xf] }
  0x34   :  { %252 = vst [vmem:[#allocation4 + $0x16c] sm:$0xf] %v251_v16  ;;  %v255_v18 = vld [vmem:[%s14206_s11 + $0x178] sm:$0xf]  ;;  %v257_v19 = vld [vmem:[%s14206_s11 + $0x16c] sm:$0xf] }
  0x35   :  { %254 = vst [vmem:[#allocation4 + $0x170] sm:$0xf] %v253_v17  ;;  %256 = vst [vmem:[#allocation4 + $0x174] sm:$0xf] %v255_v18  ;;  %v263_v21 = vld [vmem:[%s14206_s11 + $0x190] sm:$0xf] }
  0x36   :  { %258 = vst [vmem:[#allocation4 + $0x178] sm:$0xf] %v257_v19  ;;  %v265_v22 = vld [vmem:[%s14206_s11 + $0x184] sm:$0xf]  ;;  %260 = vst [vmem:[#allocation4 + $0x17c] sm:$0xff] %v259_v20   ;;  %v275_v27 = vld [vmem:[%s14206_s11 + $0x19c] sm:$0xff]  }
  0x37   :  { %264 = vst [vmem:[#allocation4 + $0x184] sm:$0xf] %v263_v21  ;;  %266 = vst [vmem:[#allocation4 + $0x188] sm:$0xf] %v265_v22  ;;  %v267_v23 = vld [vmem:[%s14206_s11 + $0x194] sm:$0xf] }
  0x38   :  { %v269_v24 = vld [vmem:[%s14206_s11 + $0x188] sm:$0xf]  ;;  %v271_v25 = vld [vmem:[%s14206_s11 + $0x198] sm:$0xf]  ;;  %268 = vst [vmem:[#allocation4 + $0x18c] sm:$0xf] %v267_v23 }
  0x39   :  { %270 = vst [vmem:[#allocation4 + $0x190] sm:$0xf] %v269_v24  ;;  %272 = vst [vmem:[#allocation4 + $0x194] sm:$0xf] %v271_v25  ;;  %v273_v26 = vld [vmem:[%s14206_s11 + $0x18c] sm:$0xf] }
  0x3a   :  { %v279_v28 = vld [vmem:[%s14206_s11 + $0x1b0] sm:$0xf]  ;;  %274 = vst [vmem:[#allocation4 + $0x198] sm:$0xf] %v273_v26  ;;  %276 = vst [vmem:[#allocation4 + $0x19c] sm:$0xff] %v275_v27   ;;  %v291_v34 = vld [vmem:[%s14206_s11 + $0x1bc] sm:$0xff]  }
  0x3b   :  { %280 = vst [vmem:[#allocation4 + $0x1a4] sm:$0xf] %v279_v28  ;;  %v281_v29 = vld [vmem:[%s14206_s11 + $0x1a4] sm:$0xf]  ;;  %v283_v30 = vld [vmem:[%s14206_s11 + $0x1b4] sm:$0xf] }
  0x3c   :  { %v285_v31 = vld [vmem:[%s14206_s11 + $0x1a8] sm:$0xf]  ;;  %282 = vst [vmem:[#allocation4 + $0x1a8] sm:$0xf] %v281_v29  ;;  %284 = vst [vmem:[#allocation4 + $0x1ac] sm:$0xf] %v283_v30 }
  0x3d   :  { %286 = vst [vmem:[#allocation4 + $0x1b0] sm:$0xf] %v285_v31  ;;  %v287_v32 = vld [vmem:[%s14206_s11 + $0x1b8] sm:$0xf]  ;;  %v289_v33 = vld [vmem:[%s14206_s11 + $0x1ac] sm:$0xf] }
  0x3e   :  { %288 = vst [vmem:[#allocation4 + $0x1b4] sm:$0xf] %v287_v32  ;;  %290 = vst [vmem:[#allocation4 + $0x1b8] sm:$0xf] %v289_v33  ;;  %v295_v35 = vld [vmem:[%s14206_s11 + $0x1d0] sm:$0xf] }
  0x3f   :  { %292 = vst [vmem:[#allocation4 + $0x1bc] sm:$0xff] %v291_v34   ;;  %v297_v36 = vld [vmem:[%s14206_s11 + $0x1c4] sm:$0xf]  ;;  %v299_v37 = vld [vmem:[%s14206_s11 + $0x1d4] sm:$0xf]  ;;  %v307_v41 = vld [vmem:[%s14206_s11 + $0x1dc] sm:$0xff]  }
  0x40   :  { %296 = vst [vmem:[#allocation4 + $0x1c4] sm:$0xf] %v295_v35  ;;  %298 = vst [vmem:[#allocation4 + $0x1c8] sm:$0xf] %v297_v36  ;;  %v301_v38 = vld [vmem:[%s14206_s11 + $0x1c8] sm:$0xf] }
  0x41   :  { %300 = vst [vmem:[#allocation4 + $0x1cc] sm:$0xf] %v299_v37  ;;  %v303_v39 = vld [vmem:[%s14206_s11 + $0x1d8] sm:$0xf]  ;;  %v305_v40 = vld [vmem:[%s14206_s11 + $0x1cc] sm:$0xf] }
  0x42   :  { %302 = vst [vmem:[#allocation4 + $0x1d0] sm:$0xf] %v301_v38  ;;  %304 = vst [vmem:[#allocation4 + $0x1d4] sm:$0xf] %v303_v39  ;;  %v311_v42 = vld [vmem:[%s14206_s11 + $0x1f0] sm:$0xf] }
  0x43   :  { %306 = vst [vmem:[#allocation4 + $0x1d8] sm:$0xf] %v305_v40  ;;  %v313_v43 = vld [vmem:[%s14206_s11 + $0x1e4] sm:$0xf]  ;;  %308 = vst [vmem:[#allocation4 + $0x1dc] sm:$0xff] %v307_v41   ;;  %v323_v48 = vld [vmem:[%s14206_s11 + $0x1fc] sm:$0xff]  }
  0x44   :  { %312 = vst [vmem:[#allocation4 + $0x1e4] sm:$0xf] %v311_v42  ;;  %314 = vst [vmem:[#allocation4 + $0x1e8] sm:$0xf] %v313_v43  ;;  %v315_v44 = vld [vmem:[%s14206_s11 + $0x1f4] sm:$0xf] }
  0x45   :  { %v317_v45 = vld [vmem:[%s14206_s11 + $0x1e8] sm:$0xf]  ;;  %v319_v46 = vld [vmem:[%s14206_s11 + $0x1f8] sm:$0xf]  ;;  %316 = vst [vmem:[#allocation4 + $0x1ec] sm:$0xf] %v315_v44 }
  0x46   :  { %318 = vst [vmem:[#allocation4 + $0x1f0] sm:$0xf] %v317_v45  ;;  %320 = vst [vmem:[#allocation4 + $0x1f4] sm:$0xf] %v319_v46  ;;  %v321_v47 = vld [vmem:[%s14206_s11 + $0x1ec] sm:$0xf] }
  0x47   :  { %v327_v49 = vld [vmem:[%s14206_s11 + $0x210] sm:$0xf]  ;;  %322 = vst [vmem:[#allocation4 + $0x1f8] sm:$0xf] %v321_v47  ;;  %324 = vst [vmem:[#allocation4 + $0x1fc] sm:$0xff] %v323_v48   ;;  %v339_v55 = vld [vmem:[%s14206_s11 + $0x21c] sm:$0xff]  }
  0x48   :  { %328 = vst [vmem:[#allocation4 + $0x204] sm:$0xf] %v327_v49  ;;  %v329_v50 = vld [vmem:[%s14206_s11 + $0x204] sm:$0xf]  ;;  %v331_v51 = vld [vmem:[%s14206_s11 + $0x214] sm:$0xf] }
  0x49   :  { %v333_v52 = vld [vmem:[%s14206_s11 + $0x208] sm:$0xf]  ;;  %330 = vst [vmem:[#allocation4 + $0x208] sm:$0xf] %v329_v50  ;;  %332 = vst [vmem:[#allocation4 + $0x20c] sm:$0xf] %v331_v51 }
  0x4a   :  { %334 = vst [vmem:[#allocation4 + $0x210] sm:$0xf] %v333_v52  ;;  %v335_v53 = vld [vmem:[%s14206_s11 + $0x218] sm:$0xf]  ;;  %v337_v54 = vld [vmem:[%s14206_s11 + $0x20c] sm:$0xf] }
  0x4b   :  { %336 = vst [vmem:[#allocation4 + $0x214] sm:$0xf] %v335_v53  ;;  %338 = vst [vmem:[#allocation4 + $0x218] sm:$0xf] %v337_v54  ;;  %v343_v56 = vld [vmem:[%s14206_s11 + $0x230] sm:$0xf] }
  0x4c   :  { %340 = vst [vmem:[#allocation4 + $0x21c] sm:$0xff] %v339_v55   ;;  %v345_v57 = vld [vmem:[%s14206_s11 + $0x224] sm:$0xf]  ;;  %v347_v58 = vld [vmem:[%s14206_s11 + $0x234] sm:$0xf]  ;;  %v355_v62 = vld [vmem:[%s14206_s11 + $0x23c] sm:$0xff]  }
  0x4d   :  { %344 = vst [vmem:[#allocation4 + $0x224] sm:$0xf] %v343_v56  ;;  %346 = vst [vmem:[#allocation4 + $0x228] sm:$0xf] %v345_v57  ;;  %v349_v59 = vld [vmem:[%s14206_s11 + $0x228] sm:$0xf] }
  0x4e   :  { %348 = vst [vmem:[#allocation4 + $0x22c] sm:$0xf] %v347_v58  ;;  %v351_v60 = vld [vmem:[%s14206_s11 + $0x238] sm:$0xf]  ;;  %v353_v61 = vld [vmem:[%s14206_s11 + $0x22c] sm:$0xf] }
  0x4f   :  { %350 = vst [vmem:[#allocation4 + $0x230] sm:$0xf] %v349_v59  ;;  %352 = vst [vmem:[#allocation4 + $0x234] sm:$0xf] %v351_v60  ;;  %v359_v63 = vld [vmem:[%s14206_s11 + $0x250] sm:$0xf] }
  0x50   :  { %354 = vst [vmem:[#allocation4 + $0x238] sm:$0xf] %v353_v61  ;;  %v361_v0 = vld [vmem:[%s14206_s11 + $0x244] sm:$0xf]  ;;  %356 = vst [vmem:[#allocation4 + $0x23c] sm:$0xff] %v355_v62   ;;  %v371_v5 = vld [vmem:[%s14206_s11 + $0x25c] sm:$0xff]  }
  0x51   :  { %360 = vst [vmem:[#allocation4 + $0x244] sm:$0xf] %v359_v63  ;;  %362 = vst [vmem:[#allocation4 + $0x248] sm:$0xf] %v361_v0  ;;  %v363_v1 = vld [vmem:[%s14206_s11 + $0x254] sm:$0xf] }
  0x52   :  { %v365_v2 = vld [vmem:[%s14206_s11 + $0x248] sm:$0xf]  ;;  %v367_v3 = vld [vmem:[%s14206_s11 + $0x258] sm:$0xf]  ;;  %364 = vst [vmem:[#allocation4 + $0x24c] sm:$0xf] %v363_v1 }
  0x53   :  { %366 = vst [vmem:[#allocation4 + $0x250] sm:$0xf] %v365_v2  ;;  %368 = vst [vmem:[#allocation4 + $0x254] sm:$0xf] %v367_v3  ;;  %v369_v4 = vld [vmem:[%s14206_s11 + $0x24c] sm:$0xf] }
  0x54   :  { %v375_v6 = vld [vmem:[%s14206_s11 + $0x270] sm:$0xf]  ;;  %370 = vst [vmem:[#allocation4 + $0x258] sm:$0xf] %v369_v4  ;;  %372 = vst [vmem:[#allocation4 + $0x25c] sm:$0xff] %v371_v5   ;;  %v387_v12 = vld [vmem:[%s14206_s11 + $0x27c] sm:$0xff]  }
  0x55   :  { %376 = vst [vmem:[#allocation4 + $0x264] sm:$0xf] %v375_v6  ;;  %v377_v7 = vld [vmem:[%s14206_s11 + $0x264] sm:$0xf]  ;;  %v379_v8 = vld [vmem:[%s14206_s11 + $0x274] sm:$0xf] }
  0x56   :  { %v381_v9 = vld [vmem:[%s14206_s11 + $0x268] sm:$0xf]  ;;  %378 = vst [vmem:[#allocation4 + $0x268] sm:$0xf] %v377_v7  ;;  %380 = vst [vmem:[#allocation4 + $0x26c] sm:$0xf] %v379_v8 }
  0x57   :  { %382 = vst [vmem:[#allocation4 + $0x270] sm:$0xf] %v381_v9  ;;  %v383_v10 = vld [vmem:[%s14206_s11 + $0x278] sm:$0xf]  ;;  %v385_v11 = vld [vmem:[%s14206_s11 + $0x26c] sm:$0xf] }
  0x58   :  { %384 = vst [vmem:[#allocation4 + $0x274] sm:$0xf] %v383_v10  ;;  %386 = vst [vmem:[#allocation4 + $0x278] sm:$0xf] %v385_v11  ;;  %v391_v13 = vld [vmem:[%s14206_s11 + $0x290] sm:$0xf] }
  0x59   :  { %388 = vst [vmem:[#allocation4 + $0x27c] sm:$0xff] %v387_v12   ;;  %v393_v14 = vld [vmem:[%s14206_s11 + $0x284] sm:$0xf]  ;;  %v395_v15 = vld [vmem:[%s14206_s11 + $0x294] sm:$0xf]  ;;  %v403_v19 = vld [vmem:[%s14206_s11 + $0x29c] sm:$0xff]  }
  0x5a   :  { %392 = vst [vmem:[#allocation4 + $0x284] sm:$0xf] %v391_v13  ;;  %394 = vst [vmem:[#allocation4 + $0x288] sm:$0xf] %v393_v14  ;;  %v397_v16 = vld [vmem:[%s14206_s11 + $0x288] sm:$0xf] }
  0x5b   :  { %396 = vst [vmem:[#allocation4 + $0x28c] sm:$0xf] %v395_v15  ;;  %v399_v17 = vld [vmem:[%s14206_s11 + $0x298] sm:$0xf]  ;;  %v401_v18 = vld [vmem:[%s14206_s11 + $0x28c] sm:$0xf] }
  0x5c   :  { %398 = vst [vmem:[#allocation4 + $0x290] sm:$0xf] %v397_v16  ;;  %400 = vst [vmem:[#allocation4 + $0x294] sm:$0xf] %v399_v17  ;;  %v407_v20 = vld [vmem:[%s14206_s11 + $0x2b0] sm:$0xf] }
  0x5d   :  { %402 = vst [vmem:[#allocation4 + $0x298] sm:$0xf] %v401_v18  ;;  %v409_v21 = vld [vmem:[%s14206_s11 + $0x2a4] sm:$0xf]  ;;  %404 = vst [vmem:[#allocation4 + $0x29c] sm:$0xff] %v403_v19   ;;  %v419_v26 = vld [vmem:[%s14206_s11 + $0x2bc] sm:$0xff]  }
  0x5e   :  { %408 = vst [vmem:[#allocation4 + $0x2a4] sm:$0xf] %v407_v20  ;;  %410 = vst [vmem:[#allocation4 + $0x2a8] sm:$0xf] %v409_v21  ;;  %v411_v22 = vld [vmem:[%s14206_s11 + $0x2b4] sm:$0xf] }
  0x5f   :  { %v413_v23 = vld [vmem:[%s14206_s11 + $0x2a8] sm:$0xf]  ;;  %v415_v24 = vld [vmem:[%s14206_s11 + $0x2b8] sm:$0xf]  ;;  %412 = vst [vmem:[#allocation4 + $0x2ac] sm:$0xf] %v411_v22 }
  0x60   :  { %414 = vst [vmem:[#allocation4 + $0x2b0] sm:$0xf] %v413_v23  ;;  %416 = vst [vmem:[#allocation4 + $0x2b4] sm:$0xf] %v415_v24  ;;  %v417_v25 = vld [vmem:[%s14206_s11 + $0x2ac] sm:$0xf] }
  0x61   :  { %v423_v27 = vld [vmem:[%s14206_s11 + $0x2d0] sm:$0xf]  ;;  %418 = vst [vmem:[#allocation4 + $0x2b8] sm:$0xf] %v417_v25  ;;  %420 = vst [vmem:[#allocation4 + $0x2bc] sm:$0xff] %v419_v26   ;;  %v435_v33 = vld [vmem:[%s14206_s11 + $0x2dc] sm:$0xff]  }
  0x62   :  { %424 = vst [vmem:[#allocation4 + $0x2c4] sm:$0xf] %v423_v27  ;;  %v425_v28 = vld [vmem:[%s14206_s11 + $0x2c4] sm:$0xf]  ;;  %v427_v29 = vld [vmem:[%s14206_s11 + $0x2d4] sm:$0xf] }
  0x63   :  { %v429_v30 = vld [vmem:[%s14206_s11 + $0x2c8] sm:$0xf]  ;;  %426 = vst [vmem:[#allocation4 + $0x2c8] sm:$0xf] %v425_v28  ;;  %428 = vst [vmem:[#allocation4 + $0x2cc] sm:$0xf] %v427_v29 }
  0x64   :  { %430 = vst [vmem:[#allocation4 + $0x2d0] sm:$0xf] %v429_v30  ;;  %v431_v31 = vld [vmem:[%s14206_s11 + $0x2d8] sm:$0xf]  ;;  %v433_v32 = vld [vmem:[%s14206_s11 + $0x2cc] sm:$0xf] }
  0x65   :  { %432 = vst [vmem:[#allocation4 + $0x2d4] sm:$0xf] %v431_v31  ;;  %434 = vst [vmem:[#allocation4 + $0x2d8] sm:$0xf] %v433_v32  ;;  %v439_v34 = vld [vmem:[%s14206_s11 + $0x2f0] sm:$0xf] }
  0x66   :  { %436 = vst [vmem:[#allocation4 + $0x2dc] sm:$0xff] %v435_v33   ;;  %v441_v35 = vld [vmem:[%s14206_s11 + $0x2e4] sm:$0xf]  ;;  %v443_v36 = vld [vmem:[%s14206_s11 + $0x2f4] sm:$0xf]  ;;  %v451_v40 = vld [vmem:[%s14206_s11 + $0x2fc] sm:$0xff]  }
  0x67   :  { %440 = vst [vmem:[#allocation4 + $0x2e4] sm:$0xf] %v439_v34  ;;  %442 = vst [vmem:[#allocation4 + $0x2e8] sm:$0xf] %v441_v35  ;;  %v445_v37 = vld [vmem:[%s14206_s11 + $0x2e8] sm:$0xf] }
  0x68   :  { %444 = vst [vmem:[#allocation4 + $0x2ec] sm:$0xf] %v443_v36  ;;  %v447_v38 = vld [vmem:[%s14206_s11 + $0x2f8] sm:$0xf]  ;;  %v449_v39 = vld [vmem:[%s14206_s11 + $0x2ec] sm:$0xf] }
  0x69   :  { %446 = vst [vmem:[#allocation4 + $0x2f0] sm:$0xf] %v445_v37  ;;  %448 = vst [vmem:[#allocation4 + $0x2f4] sm:$0xf] %v447_v38  ;;  %v455_v41 = vld [vmem:[%s14206_s11 + $0x310] sm:$0xf] }
  0x6a   :  { %450 = vst [vmem:[#allocation4 + $0x2f8] sm:$0xf] %v449_v39  ;;  %v457_v42 = vld [vmem:[%s14206_s11 + $0x304] sm:$0xf]  ;;  %452 = vst [vmem:[#allocation4 + $0x2fc] sm:$0xff] %v451_v40   ;;  %v467_v47 = vld [vmem:[%s14206_s11 + $0x31c] sm:$0xff]  }
  0x6b   :  { %456 = vst [vmem:[#allocation4 + $0x304] sm:$0xf] %v455_v41  ;;  %458 = vst [vmem:[#allocation4 + $0x308] sm:$0xf] %v457_v42  ;;  %v459_v43 = vld [vmem:[%s14206_s11 + $0x314] sm:$0xf] }
  0x6c   :  { %v461_v44 = vld [vmem:[%s14206_s11 + $0x308] sm:$0xf]  ;;  %v463_v45 = vld [vmem:[%s14206_s11 + $0x318] sm:$0xf]  ;;  %460 = vst [vmem:[#allocation4 + $0x30c] sm:$0xf] %v459_v43 }
  0x6d   :  { %462 = vst [vmem:[#allocation4 + $0x310] sm:$0xf] %v461_v44  ;;  %464 = vst [vmem:[#allocation4 + $0x314] sm:$0xf] %v463_v45  ;;  %v465_v46 = vld [vmem:[%s14206_s11 + $0x30c] sm:$0xf] }
  0x6e   :  { %v471_v48 = vld [vmem:[%s14206_s11 + $0x330] sm:$0xf]  ;;  %466 = vst [vmem:[#allocation4 + $0x318] sm:$0xf] %v465_v46  ;;  %468 = vst [vmem:[#allocation4 + $0x31c] sm:$0xff] %v467_v47   ;;  %v483_v54 = vld [vmem:[%s14206_s11 + $0x33c] sm:$0xff]  }
  0x6f   :  { %472 = vst [vmem:[#allocation4 + $0x324] sm:$0xf] %v471_v48  ;;  %v473_v49 = vld [vmem:[%s14206_s11 + $0x324] sm:$0xf]  ;;  %v475_v50 = vld [vmem:[%s14206_s11 + $0x334] sm:$0xf] }
  0x70   :  { %v477_v51 = vld [vmem:[%s14206_s11 + $0x328] sm:$0xf]  ;;  %474 = vst [vmem:[#allocation4 + $0x328] sm:$0xf] %v473_v49  ;;  %476 = vst [vmem:[#allocation4 + $0x32c] sm:$0xf] %v475_v50 }
  0x71   :  { %478 = vst [vmem:[#allocation4 + $0x330] sm:$0xf] %v477_v51  ;;  %v479_v52 = vld [vmem:[%s14206_s11 + $0x338] sm:$0xf]  ;;  %v481_v53 = vld [vmem:[%s14206_s11 + $0x32c] sm:$0xf] }
  0x72   :  { %480 = vst [vmem:[#allocation4 + $0x334] sm:$0xf] %v479_v52  ;;  %482 = vst [vmem:[#allocation4 + $0x338] sm:$0xf] %v481_v53  ;;  %v487_v55 = vld [vmem:[%s14206_s11 + $0x350] sm:$0xf] }
  0x73   :  { %484 = vst [vmem:[#allocation4 + $0x33c] sm:$0xff] %v483_v54   ;;  %v489_v56 = vld [vmem:[%s14206_s11 + $0x344] sm:$0xf]  ;;  %v491_v57 = vld [vmem:[%s14206_s11 + $0x354] sm:$0xf]  ;;  %v499_v61 = vld [vmem:[%s14206_s11 + $0x35c] sm:$0xff]  }
  0x74   :  { %488 = vst [vmem:[#allocation4 + $0x344] sm:$0xf] %v487_v55  ;;  %490 = vst [vmem:[#allocation4 + $0x348] sm:$0xf] %v489_v56  ;;  %v493_v58 = vld [vmem:[%s14206_s11 + $0x348] sm:$0xf] }
  0x75   :  { %492 = vst [vmem:[#allocation4 + $0x34c] sm:$0xf] %v491_v57  ;;  %v495_v59 = vld [vmem:[%s14206_s11 + $0x358] sm:$0xf]  ;;  %v497_v60 = vld [vmem:[%s14206_s11 + $0x34c] sm:$0xf] }
  0x76   :  { %494 = vst [vmem:[#allocation4 + $0x350] sm:$0xf] %v493_v58  ;;  %496 = vst [vmem:[#allocation4 + $0x354] sm:$0xf] %v495_v59  ;;  %v503_v62 = vld [vmem:[%s14206_s11 + $0x370] sm:$0xf] }
  0x77   :  { %498 = vst [vmem:[#allocation4 + $0x358] sm:$0xf] %v497_v60  ;;  %v505_v63 = vld [vmem:[%s14206_s11 + $0x364] sm:$0xf]  ;;  %500 = vst [vmem:[#allocation4 + $0x35c] sm:$0xff] %v499_v61   ;;  %v515_v4 = vld [vmem:[%s14206_s11 + $0x37c] sm:$0xff]  }
  0x78   :  { %504 = vst [vmem:[#allocation4 + $0x364] sm:$0xf] %v503_v62  ;;  %506 = vst [vmem:[#allocation4 + $0x368] sm:$0xf] %v505_v63  ;;  %v507_v0 = vld [vmem:[%s14206_s11 + $0x374] sm:$0xf] }
  0x79   :  { %v509_v1 = vld [vmem:[%s14206_s11 + $0x368] sm:$0xf]  ;;  %v511_v2 = vld [vmem:[%s14206_s11 + $0x378] sm:$0xf]  ;;  %508 = vst [vmem:[#allocation4 + $0x36c] sm:$0xf] %v507_v0 }
  0x7a   :  { %510 = vst [vmem:[#allocation4 + $0x370] sm:$0xf] %v509_v1  ;;  %512 = vst [vmem:[#allocation4 + $0x374] sm:$0xf] %v511_v2  ;;  %v513_v3 = vld [vmem:[%s14206_s11 + $0x36c] sm:$0xf] }
  0x7b   :  { %v519_v5 = vld [vmem:[%s14206_s11 + $0x390] sm:$0xf]  ;;  %514 = vst [vmem:[#allocation4 + $0x378] sm:$0xf] %v513_v3  ;;  %516 = vst [vmem:[#allocation4 + $0x37c] sm:$0xff] %v515_v4   ;;  %v531_v11 = vld [vmem:[%s14206_s11 + $0x39c] sm:$0xff]  }
  0x7c   :  { %520 = vst [vmem:[#allocation4 + $0x384] sm:$0xf] %v519_v5  ;;  %v521_v6 = vld [vmem:[%s14206_s11 + $0x384] sm:$0xf]  ;;  %v523_v7 = vld [vmem:[%s14206_s11 + $0x394] sm:$0xf] }
  0x7d   :  { %v525_v8 = vld [vmem:[%s14206_s11 + $0x388] sm:$0xf]  ;;  %522 = vst [vmem:[#allocation4 + $0x388] sm:$0xf] %v521_v6  ;;  %524 = vst [vmem:[#allocation4 + $0x38c] sm:$0xf] %v523_v7 }
  0x7e   :  { %526 = vst [vmem:[#allocation4 + $0x390] sm:$0xf] %v525_v8  ;;  %v527_v9 = vld [vmem:[%s14206_s11 + $0x398] sm:$0xf]  ;;  %v529_v10 = vld [vmem:[%s14206_s11 + $0x38c] sm:$0xf] }
  0x7f   :  { %528 = vst [vmem:[#allocation4 + $0x394] sm:$0xf] %v527_v9  ;;  %530 = vst [vmem:[#allocation4 + $0x398] sm:$0xf] %v529_v10  ;;  %v535_v12 = vld [vmem:[%s14206_s11 + $0x3b0] sm:$0xf] }
  0x80   :  { %532 = vst [vmem:[#allocation4 + $0x39c] sm:$0xff] %v531_v11   ;;  %v537_v13 = vld [vmem:[%s14206_s11 + $0x3a4] sm:$0xf]  ;;  %v539_v14 = vld [vmem:[%s14206_s11 + $0x3b4] sm:$0xf]  ;;  %v547_v18 = vld [vmem:[%s14206_s11 + $0x3bc] sm:$0xff]  }
  0x81   :  { %536 = vst [vmem:[#allocation4 + $0x3a4] sm:$0xf] %v535_v12  ;;  %538 = vst [vmem:[#allocation4 + $0x3a8] sm:$0xf] %v537_v13  ;;  %v541_v15 = vld [vmem:[%s14206_s11 + $0x3a8] sm:$0xf] }
  0x82   :  { %540 = vst [vmem:[#allocation4 + $0x3ac] sm:$0xf] %v539_v14  ;;  %v543_v16 = vld [vmem:[%s14206_s11 + $0x3b8] sm:$0xf]  ;;  %v545_v17 = vld [vmem:[%s14206_s11 + $0x3ac] sm:$0xf] }
  0x83   :  { %542 = vst [vmem:[#allocation4 + $0x3b0] sm:$0xf] %v541_v15  ;;  %544 = vst [vmem:[#allocation4 + $0x3b4] sm:$0xf] %v543_v16  ;;  %v551_v19 = vld [vmem:[%s14206_s11 + $0x3d0] sm:$0xf] }
  0x84   :  { %546 = vst [vmem:[#allocation4 + $0x3b8] sm:$0xf] %v545_v17  ;;  %v553_v20 = vld [vmem:[%s14206_s11 + $0x3c4] sm:$0xf]  ;;  %548 = vst [vmem:[#allocation4 + $0x3bc] sm:$0xff] %v547_v18   ;;  %v563_v25 = vld [vmem:[%s14206_s11 + $0x3dc] sm:$0xff]  }
  0x85   :  { %552 = vst [vmem:[#allocation4 + $0x3c4] sm:$0xf] %v551_v19  ;;  %554 = vst [vmem:[#allocation4 + $0x3c8] sm:$0xf] %v553_v20  ;;  %v555_v21 = vld [vmem:[%s14206_s11 + $0x3d4] sm:$0xf] }
  0x86   :  { %v557_v22 = vld [vmem:[%s14206_s11 + $0x3c8] sm:$0xf]  ;;  %v559_v23 = vld [vmem:[%s14206_s11 + $0x3d8] sm:$0xf]  ;;  %556 = vst [vmem:[#allocation4 + $0x3cc] sm:$0xf] %v555_v21 }
  0x87   :  { %558 = vst [vmem:[#allocation4 + $0x3d0] sm:$0xf] %v557_v22  ;;  %560 = vst [vmem:[#allocation4 + $0x3d4] sm:$0xf] %v559_v23  ;;  %v561_v24 = vld [vmem:[%s14206_s11 + $0x3cc] sm:$0xf] }
  0x88   :  { %v567_v26 = vld [vmem:[%s14206_s11 + $0x3f0] sm:$0xf]  ;;  %562 = vst [vmem:[#allocation4 + $0x3d8] sm:$0xf] %v561_v24  ;;  %564 = vst [vmem:[#allocation4 + $0x3dc] sm:$0xff] %v563_v25   ;;  %v579_v32 = vld [vmem:[%s14206_s11 + $0x3fc] sm:$0xff]  }
  0x89   :  { %568 = vst [vmem:[#allocation4 + $0x3e4] sm:$0xf] %v567_v26  ;;  %v569_v27 = vld [vmem:[%s14206_s11 + $0x3e4] sm:$0xf]  ;;  %v571_v28 = vld [vmem:[%s14206_s11 + $0x3f4] sm:$0xf] }
  0x8a   :  { %v573_v29 = vld [vmem:[%s14206_s11 + $0x3e8] sm:$0xf]  ;;  %570 = vst [vmem:[#allocation4 + $0x3e8] sm:$0xf] %v569_v27  ;;  %572 = vst [vmem:[#allocation4 + $0x3ec] sm:$0xf] %v571_v28 }
  0x8b   :  { %574 = vst [vmem:[#allocation4 + $0x3f0] sm:$0xf] %v573_v29  ;;  %v575_v30 = vld [vmem:[%s14206_s11 + $0x3f8] sm:$0xf]  ;;  %v577_v31 = vld [vmem:[%s14206_s11 + $0x3ec] sm:$0xf] }
  0x8c   :  { %576 = vst [vmem:[#allocation4 + $0x3f4] sm:$0xf] %v575_v30  ;;  %578 = vst [vmem:[#allocation4 + $0x3f8] sm:$0xf] %v577_v31  ;;  %v583_v33 = vld [vmem:[%s14206_s11 + $0x410] sm:$0xf] }
  0x8d   :  { %580 = vst [vmem:[#allocation4 + $0x3fc] sm:$0xff] %v579_v32   ;;  %v585_v34 = vld [vmem:[%s14206_s11 + $0x404] sm:$0xf]  ;;  %v587_v35 = vld [vmem:[%s14206_s11 + $0x414] sm:$0xf]  ;;  %v595_v39 = vld [vmem:[%s14206_s11 + $0x41c] sm:$0xff]  }
  0x8e   :  { %584 = vst [vmem:[#allocation4 + $0x404] sm:$0xf] %v583_v33  ;;  %586 = vst [vmem:[#allocation4 + $0x408] sm:$0xf] %v585_v34  ;;  %v589_v36 = vld [vmem:[%s14206_s11 + $0x408] sm:$0xf] }
  0x8f   :  { %588 = vst [vmem:[#allocation4 + $0x40c] sm:$0xf] %v587_v35  ;;  %v591_v37 = vld [vmem:[%s14206_s11 + $0x418] sm:$0xf]  ;;  %v593_v38 = vld [vmem:[%s14206_s11 + $0x40c] sm:$0xf] }
  0x90   :  { %590 = vst [vmem:[#allocation4 + $0x410] sm:$0xf] %v589_v36  ;;  %592 = vst [vmem:[#allocation4 + $0x414] sm:$0xf] %v591_v37  ;;  %v599_v40 = vld [vmem:[%s14206_s11 + $0x430] sm:$0xf] }
  0x91   :  { %594 = vst [vmem:[#allocation4 + $0x418] sm:$0xf] %v593_v38  ;;  %v601_v41 = vld [vmem:[%s14206_s11 + $0x424] sm:$0xf]  ;;  %596 = vst [vmem:[#allocation4 + $0x41c] sm:$0xff] %v595_v39   ;;  %v611_v46 = vld [vmem:[%s14206_s11 + $0x43c] sm:$0xff]  }
  0x92   :  { %600 = vst [vmem:[#allocation4 + $0x424] sm:$0xf] %v599_v40  ;;  %602 = vst [vmem:[#allocation4 + $0x428] sm:$0xf] %v601_v41  ;;  %v603_v42 = vld [vmem:[%s14206_s11 + $0x434] sm:$0xf] }
  0x93   :  { %v605_v43 = vld [vmem:[%s14206_s11 + $0x428] sm:$0xf]  ;;  %v607_v44 = vld [vmem:[%s14206_s11 + $0x438] sm:$0xf]  ;;  %604 = vst [vmem:[#allocation4 + $0x42c] sm:$0xf] %v603_v42 }
  0x94   :  { %606 = vst [vmem:[#allocation4 + $0x430] sm:$0xf] %v605_v43  ;;  %608 = vst [vmem:[#allocation4 + $0x434] sm:$0xf] %v607_v44  ;;  %v609_v45 = vld [vmem:[%s14206_s11 + $0x42c] sm:$0xf] }
  0x95   :  { %v615_v47 = vld [vmem:[%s14206_s11 + $0x450] sm:$0xf]  ;;  %610 = vst [vmem:[#allocation4 + $0x438] sm:$0xf] %v609_v45  ;;  %612 = vst [vmem:[#allocation4 + $0x43c] sm:$0xff] %v611_v46   ;;  %v627_v53 = vld [vmem:[%s14206_s11 + $0x45c] sm:$0xff]  }
  0x96   :  { %616 = vst [vmem:[#allocation4 + $0x444] sm:$0xf] %v615_v47  ;;  %v617_v48 = vld [vmem:[%s14206_s11 + $0x444] sm:$0xf]  ;;  %v619_v49 = vld [vmem:[%s14206_s11 + $0x454] sm:$0xf] }
  0x97   :  { %v621_v50 = vld [vmem:[%s14206_s11 + $0x448] sm:$0xf]  ;;  %618 = vst [vmem:[#allocation4 + $0x448] sm:$0xf] %v617_v48  ;;  %620 = vst [vmem:[#allocation4 + $0x44c] sm:$0xf] %v619_v49 }
  0x98   :  { %622 = vst [vmem:[#allocation4 + $0x450] sm:$0xf] %v621_v50  ;;  %v623_v51 = vld [vmem:[%s14206_s11 + $0x458] sm:$0xf]  ;;  %v625_v52 = vld [vmem:[%s14206_s11 + $0x44c] sm:$0xf] }
  0x99   :  { %624 = vst [vmem:[#allocation4 + $0x454] sm:$0xf] %v623_v51  ;;  %626 = vst [vmem:[#allocation4 + $0x458] sm:$0xf] %v625_v52  ;;  %v631_v54 = vld [vmem:[%s14206_s11 + $0x470] sm:$0xf] }
  0x9a   :  { %628 = vst [vmem:[#allocation4 + $0x45c] sm:$0xff] %v627_v53   ;;  %v633_v55 = vld [vmem:[%s14206_s11 + $0x464] sm:$0xf]  ;;  %v635_v56 = vld [vmem:[%s14206_s11 + $0x474] sm:$0xf]  ;;  %v643_v60 = vld [vmem:[%s14206_s11 + $0x47c] sm:$0xff]  }
  0x9b   :  { %632 = vst [vmem:[#allocation4 + $0x464] sm:$0xf] %v631_v54  ;;  %634 = vst [vmem:[#allocation4 + $0x468] sm:$0xf] %v633_v55  ;;  %v637_v57 = vld [vmem:[%s14206_s11 + $0x468] sm:$0xf] }
  0x9c   :  { %636 = vst [vmem:[#allocation4 + $0x46c] sm:$0xf] %v635_v56  ;;  %v639_v58 = vld [vmem:[%s14206_s11 + $0x478] sm:$0xf]  ;;  %v641_v59 = vld [vmem:[%s14206_s11 + $0x46c] sm:$0xf] }
  0x9d   :  { %638 = vst [vmem:[#allocation4 + $0x470] sm:$0xf] %v637_v57  ;;  %640 = vst [vmem:[#allocation4 + $0x474] sm:$0xf] %v639_v58  ;;  %v647_v61 = vld [vmem:[%s14206_s11 + $0x490] sm:$0xf] }
  0x9e   :  { %642 = vst [vmem:[#allocation4 + $0x478] sm:$0xf] %v641_v59  ;;  %v649_v62 = vld [vmem:[%s14206_s11 + $0x484] sm:$0xf]  ;;  %644 = vst [vmem:[#allocation4 + $0x47c] sm:$0xff] %v643_v60   ;;  %v659_v3 = vld [vmem:[%s14206_s11 + $0x49c] sm:$0xff]  }
  0x9f   :  { %648 = vst [vmem:[#allocation4 + $0x484] sm:$0xf] %v647_v61  ;;  %650 = vst [vmem:[#allocation4 + $0x488] sm:$0xf] %v649_v62  ;;  %v651_v63 = vld [vmem:[%s14206_s11 + $0x494] sm:$0xf] }
  0xa0   :  { %v653_v0 = vld [vmem:[%s14206_s11 + $0x488] sm:$0xf]  ;;  %v655_v1 = vld [vmem:[%s14206_s11 + $0x498] sm:$0xf]  ;;  %652 = vst [vmem:[#allocation4 + $0x48c] sm:$0xf] %v651_v63 }
  0xa1   :  { %654 = vst [vmem:[#allocation4 + $0x490] sm:$0xf] %v653_v0  ;;  %656 = vst [vmem:[#allocation4 + $0x494] sm:$0xf] %v655_v1  ;;  %v657_v2 = vld [vmem:[%s14206_s11 + $0x48c] sm:$0xf] }
  0xa2   :  { %v663_v4 = vld [vmem:[%s14206_s11 + $0x4b0] sm:$0xf]  ;;  %658 = vst [vmem:[#allocation4 + $0x498] sm:$0xf] %v657_v2  ;;  %660 = vst [vmem:[#allocation4 + $0x49c] sm:$0xff] %v659_v3   ;;  %v675_v10 = vld [vmem:[%s14206_s11 + $0x4bc] sm:$0xff]  }
  0xa3   :  { %664 = vst [vmem:[#allocation4 + $0x4a4] sm:$0xf] %v663_v4  ;;  %v665_v5 = vld [vmem:[%s14206_s11 + $0x4a4] sm:$0xf]  ;;  %v667_v6 = vld [vmem:[%s14206_s11 + $0x4b4] sm:$0xf] }
  0xa4   :  { %v669_v7 = vld [vmem:[%s14206_s11 + $0x4a8] sm:$0xf]  ;;  %666 = vst [vmem:[#allocation4 + $0x4a8] sm:$0xf] %v665_v5  ;;  %668 = vst [vmem:[#allocation4 + $0x4ac] sm:$0xf] %v667_v6 }
  0xa5   :  { %670 = vst [vmem:[#allocation4 + $0x4b0] sm:$0xf] %v669_v7  ;;  %v671_v8 = vld [vmem:[%s14206_s11 + $0x4b8] sm:$0xf]  ;;  %v673_v9 = vld [vmem:[%s14206_s11 + $0x4ac] sm:$0xf] }
  0xa6   :  { %672 = vst [vmem:[#allocation4 + $0x4b4] sm:$0xf] %v671_v8  ;;  %674 = vst [vmem:[#allocation4 + $0x4b8] sm:$0xf] %v673_v9  ;;  %v679_v11 = vld [vmem:[%s14206_s11 + $0x4d0] sm:$0xf] }
  0xa7   :  { %676 = vst [vmem:[#allocation4 + $0x4bc] sm:$0xff] %v675_v10   ;;  %v681_v12 = vld [vmem:[%s14206_s11 + $0x4c4] sm:$0xf]  ;;  %v683_v13 = vld [vmem:[%s14206_s11 + $0x4d4] sm:$0xf]  ;;  %v691_v17 = vld [vmem:[%s14206_s11 + $0x4dc] sm:$0xff]  }
  0xa8   :  { %680 = vst [vmem:[#allocation4 + $0x4c4] sm:$0xf] %v679_v11  ;;  %682 = vst [vmem:[#allocation4 + $0x4c8] sm:$0xf] %v681_v12  ;;  %v685_v14 = vld [vmem:[%s14206_s11 + $0x4c8] sm:$0xf] }
  0xa9   :  { %684 = vst [vmem:[#allocation4 + $0x4cc] sm:$0xf] %v683_v13  ;;  %v687_v15 = vld [vmem:[%s14206_s11 + $0x4d8] sm:$0xf]  ;;  %v689_v16 = vld [vmem:[%s14206_s11 + $0x4cc] sm:$0xf] }
  0xaa   :  { %686 = vst [vmem:[#allocation4 + $0x4d0] sm:$0xf] %v685_v14  ;;  %688 = vst [vmem:[#allocation4 + $0x4d4] sm:$0xf] %v687_v15  ;;  %v695_v18 = vld [vmem:[%s14206_s11 + $0x4f0] sm:$0xf] }
  0xab   :  { %690 = vst [vmem:[#allocation4 + $0x4d8] sm:$0xf] %v689_v16  ;;  %v697_v19 = vld [vmem:[%s14206_s11 + $0x4e4] sm:$0xf]  ;;  %692 = vst [vmem:[#allocation4 + $0x4dc] sm:$0xff] %v691_v17   ;;  %v707_v24 = vld [vmem:[%s14206_s11 + $0x4fc] sm:$0xff]  }
  0xac   :  { %696 = vst [vmem:[#allocation4 + $0x4e4] sm:$0xf] %v695_v18  ;;  %698 = vst [vmem:[#allocation4 + $0x4e8] sm:$0xf] %v697_v19  ;;  %v699_v20 = vld [vmem:[%s14206_s11 + $0x4f4] sm:$0xf] }
  0xad   :  { %v701_v21 = vld [vmem:[%s14206_s11 + $0x4e8] sm:$0xf]  ;;  %v703_v22 = vld [vmem:[%s14206_s11 + $0x4f8] sm:$0xf]  ;;  %700 = vst [vmem:[#allocation4 + $0x4ec] sm:$0xf] %v699_v20 }
  0xae   :  { %702 = vst [vmem:[#allocation4 + $0x4f0] sm:$0xf] %v701_v21  ;;  %704 = vst [vmem:[#allocation4 + $0x4f4] sm:$0xf] %v703_v22  ;;  %v705_v23 = vld [vmem:[%s14206_s11 + $0x4ec] sm:$0xf] }
  0xaf   :  { %v711_v25 = vld [vmem:[%s14206_s11 + $0x510] sm:$0xf]  ;;  %706 = vst [vmem:[#allocation4 + $0x4f8] sm:$0xf] %v705_v23  ;;  %708 = vst [vmem:[#allocation4 + $0x4fc] sm:$0xff] %v707_v24   ;;  %v723_v31 = vld [vmem:[%s14206_s11 + $0x51c] sm:$0xff]  }
  0xb0   :  { %712 = vst [vmem:[#allocation4 + $0x504] sm:$0xf] %v711_v25  ;;  %v713_v26 = vld [vmem:[%s14206_s11 + $0x504] sm:$0xf]  ;;  %v715_v27 = vld [vmem:[%s14206_s11 + $0x514] sm:$0xf] }
  0xb1   :  { %v717_v28 = vld [vmem:[%s14206_s11 + $0x508] sm:$0xf]  ;;  %714 = vst [vmem:[#allocation4 + $0x508] sm:$0xf] %v713_v26  ;;  %716 = vst [vmem:[#allocation4 + $0x50c] sm:$0xf] %v715_v27 }
  0xb2   :  { %718 = vst [vmem:[#allocation4 + $0x510] sm:$0xf] %v717_v28  ;;  %v719_v29 = vld [vmem:[%s14206_s11 + $0x518] sm:$0xf]  ;;  %v721_v30 = vld [vmem:[%s14206_s11 + $0x50c] sm:$0xf] }
  0xb3   :  { %720 = vst [vmem:[#allocation4 + $0x514] sm:$0xf] %v719_v29  ;;  %722 = vst [vmem:[#allocation4 + $0x518] sm:$0xf] %v721_v30  ;;  %v727_v32 = vld [vmem:[%s14206_s11 + $0x530] sm:$0xf] }
  0xb4   :  { %724 = vst [vmem:[#allocation4 + $0x51c] sm:$0xff] %v723_v31   ;;  %v729_v33 = vld [vmem:[%s14206_s11 + $0x524] sm:$0xf]  ;;  %v731_v34 = vld [vmem:[%s14206_s11 + $0x534] sm:$0xf]  ;;  %v739_v38 = vld [vmem:[%s14206_s11 + $0x53c] sm:$0xff]  }
  0xb5   :  { %728 = vst [vmem:[#allocation4 + $0x524] sm:$0xf] %v727_v32  ;;  %730 = vst [vmem:[#allocation4 + $0x528] sm:$0xf] %v729_v33  ;;  %v733_v35 = vld [vmem:[%s14206_s11 + $0x528] sm:$0xf] }
  0xb6   :  { %732 = vst [vmem:[#allocation4 + $0x52c] sm:$0xf] %v731_v34  ;;  %v735_v36 = vld [vmem:[%s14206_s11 + $0x538] sm:$0xf]  ;;  %v737_v37 = vld [vmem:[%s14206_s11 + $0x52c] sm:$0xf] }
  0xb7   :  { %734 = vst [vmem:[#allocation4 + $0x530] sm:$0xf] %v733_v35  ;;  %736 = vst [vmem:[#allocation4 + $0x534] sm:$0xf] %v735_v36  ;;  %v743_v39 = vld [vmem:[%s14206_s11 + $0x550] sm:$0xf] }
  0xb8   :  { %738 = vst [vmem:[#allocation4 + $0x538] sm:$0xf] %v737_v37  ;;  %v745_v40 = vld [vmem:[%s14206_s11 + $0x544] sm:$0xf]  ;;  %740 = vst [vmem:[#allocation4 + $0x53c] sm:$0xff] %v739_v38   ;;  %v755_v45 = vld [vmem:[%s14206_s11 + $0x55c] sm:$0xff]  }
  0xb9   :  { %744 = vst [vmem:[#allocation4 + $0x544] sm:$0xf] %v743_v39  ;;  %746 = vst [vmem:[#allocation4 + $0x548] sm:$0xf] %v745_v40  ;;  %v747_v41 = vld [vmem:[%s14206_s11 + $0x554] sm:$0xf] }
  0xba   :  { %v749_v42 = vld [vmem:[%s14206_s11 + $0x548] sm:$0xf]  ;;  %v751_v43 = vld [vmem:[%s14206_s11 + $0x558] sm:$0xf]  ;;  %748 = vst [vmem:[#allocation4 + $0x54c] sm:$0xf] %v747_v41 }
  0xbb   :  { %750 = vst [vmem:[#allocation4 + $0x550] sm:$0xf] %v749_v42  ;;  %752 = vst [vmem:[#allocation4 + $0x554] sm:$0xf] %v751_v43  ;;  %v753_v44 = vld [vmem:[%s14206_s11 + $0x54c] sm:$0xf] }
  0xbc   :  { %v759_v46 = vld [vmem:[%s14206_s11 + $0x570] sm:$0xf]  ;;  %754 = vst [vmem:[#allocation4 + $0x558] sm:$0xf] %v753_v44  ;;  %756 = vst [vmem:[#allocation4 + $0x55c] sm:$0xff] %v755_v45   ;;  %v771_v52 = vld [vmem:[%s14206_s11 + $0x57c] sm:$0xff]  }
  0xbd   :  { %760 = vst [vmem:[#allocation4 + $0x564] sm:$0xf] %v759_v46  ;;  %v761_v47 = vld [vmem:[%s14206_s11 + $0x564] sm:$0xf]  ;;  %v763_v48 = vld [vmem:[%s14206_s11 + $0x574] sm:$0xf] }
  0xbe   :  { %v765_v49 = vld [vmem:[%s14206_s11 + $0x568] sm:$0xf]  ;;  %762 = vst [vmem:[#allocation4 + $0x568] sm:$0xf] %v761_v47  ;;  %764 = vst [vmem:[#allocation4 + $0x56c] sm:$0xf] %v763_v48 }
  0xbf   :  { %766 = vst [vmem:[#allocation4 + $0x570] sm:$0xf] %v765_v49  ;;  %v767_v50 = vld [vmem:[%s14206_s11 + $0x578] sm:$0xf]  ;;  %v769_v51 = vld [vmem:[%s14206_s11 + $0x56c] sm:$0xf] }
  0xc0   :  { %768 = vst [vmem:[#allocation4 + $0x574] sm:$0xf] %v767_v50  ;;  %770 = vst [vmem:[#allocation4 + $0x578] sm:$0xf] %v769_v51  ;;  %v775_v53 = vld [vmem:[%s14206_s11 + $0x590] sm:$0xf] }
  0xc1   :  { %772 = vst [vmem:[#allocation4 + $0x57c] sm:$0xff] %v771_v52   ;;  %v777_v54 = vld [vmem:[%s14206_s11 + $0x584] sm:$0xf]  ;;  %v779_v55 = vld [vmem:[%s14206_s11 + $0x594] sm:$0xf]  ;;  %v787_v59 = vld [vmem:[%s14206_s11 + $0x59c] sm:$0xff]  }
  0xc2   :  { %776 = vst [vmem:[#allocation4 + $0x584] sm:$0xf] %v775_v53  ;;  %778 = vst [vmem:[#allocation4 + $0x588] sm:$0xf] %v777_v54  ;;  %v781_v56 = vld [vmem:[%s14206_s11 + $0x588] sm:$0xf] }
  0xc3   :  { %780 = vst [vmem:[#allocation4 + $0x58c] sm:$0xf] %v779_v55  ;;  %v783_v57 = vld [vmem:[%s14206_s11 + $0x598] sm:$0xf]  ;;  %v785_v58 = vld [vmem:[%s14206_s11 + $0x58c] sm:$0xf] }
  0xc4   :  { %782 = vst [vmem:[#allocation4 + $0x590] sm:$0xf] %v781_v56  ;;  %784 = vst [vmem:[#allocation4 + $0x594] sm:$0xf] %v783_v57  ;;  %v791_v60 = vld [vmem:[%s14206_s11 + $0x5b0] sm:$0xf] }
  0xc5   :  { %786 = vst [vmem:[#allocation4 + $0x598] sm:$0xf] %v785_v58  ;;  %v793_v61 = vld [vmem:[%s14206_s11 + $0x5a4] sm:$0xf]  ;;  %788 = vst [vmem:[#allocation4 + $0x59c] sm:$0xff] %v787_v59   ;;  %v803_v2 = vld [vmem:[%s14206_s11 + $0x5bc] sm:$0xff]  }
  0xc6   :  { %792 = vst [vmem:[#allocation4 + $0x5a4] sm:$0xf] %v791_v60  ;;  %794 = vst [vmem:[#allocation4 + $0x5a8] sm:$0xf] %v793_v61  ;;  %v795_v62 = vld [vmem:[%s14206_s11 + $0x5b4] sm:$0xf] }
  0xc7   :  { %v797_v63 = vld [vmem:[%s14206_s11 + $0x5a8] sm:$0xf]  ;;  %v799_v0 = vld [vmem:[%s14206_s11 + $0x5b8] sm:$0xf]  ;;  %796 = vst [vmem:[#allocation4 + $0x5ac] sm:$0xf] %v795_v62 }
  0xc8   :  { %798 = vst [vmem:[#allocation4 + $0x5b0] sm:$0xf] %v797_v63  ;;  %800 = vst [vmem:[#allocation4 + $0x5b4] sm:$0xf] %v799_v0  ;;  %v801_v1 = vld [vmem:[%s14206_s11 + $0x5ac] sm:$0xf] }
  0xc9   :  { %v807_v3 = vld [vmem:[%s14206_s11 + $0x5d0] sm:$0xf]  ;;  %802 = vst [vmem:[#allocation4 + $0x5b8] sm:$0xf] %v801_v1  ;;  %804 = vst [vmem:[#allocation4 + $0x5bc] sm:$0xff] %v803_v2   ;;  %v819_v9 = vld [vmem:[%s14206_s11 + $0x5dc] sm:$0xff]  }
  0xca   :  { %808 = vst [vmem:[#allocation4 + $0x5c4] sm:$0xf] %v807_v3  ;;  %v809_v4 = vld [vmem:[%s14206_s11 + $0x5c4] sm:$0xf]  ;;  %v811_v5 = vld [vmem:[%s14206_s11 + $0x5d4] sm:$0xf] }
  0xcb   :  { %v813_v6 = vld [vmem:[%s14206_s11 + $0x5c8] sm:$0xf]  ;;  %810 = vst [vmem:[#allocation4 + $0x5c8] sm:$0xf] %v809_v4  ;;  %812 = vst [vmem:[#allocation4 + $0x5cc] sm:$0xf] %v811_v5 }
  0xcc   :  { %814 = vst [vmem:[#allocation4 + $0x5d0] sm:$0xf] %v813_v6  ;;  %v815_v7 = vld [vmem:[%s14206_s11 + $0x5d8] sm:$0xf]  ;;  %v817_v8 = vld [vmem:[%s14206_s11 + $0x5cc] sm:$0xf] }
  0xcd   :  { %816 = vst [vmem:[#allocation4 + $0x5d4] sm:$0xf] %v815_v7  ;;  %818 = vst [vmem:[#allocation4 + $0x5d8] sm:$0xf] %v817_v8  ;;  %v823_v10 = vld [vmem:[%s14206_s11 + $0x5f0] sm:$0xf] }
  0xce   :  { %820 = vst [vmem:[#allocation4 + $0x5dc] sm:$0xff] %v819_v9   ;;  %v825_v11 = vld [vmem:[%s14206_s11 + $0x5e4] sm:$0xf]  ;;  %v827_v12 = vld [vmem:[%s14206_s11 + $0x5f4] sm:$0xf]  ;;  %v835_v16 = vld [vmem:[%s14206_s11 + $0x5fc] sm:$0xff]  }
  0xcf   :  { %824 = vst [vmem:[#allocation4 + $0x5e4] sm:$0xf] %v823_v10  ;;  %826 = vst [vmem:[#allocation4 + $0x5e8] sm:$0xf] %v825_v11  ;;  %v829_v13 = vld [vmem:[%s14206_s11 + $0x5e8] sm:$0xf] }
  0xd0   :  { %828 = vst [vmem:[#allocation4 + $0x5ec] sm:$0xf] %v827_v12  ;;  %v831_v14 = vld [vmem:[%s14206_s11 + $0x5f8] sm:$0xf]  ;;  %v833_v15 = vld [vmem:[%s14206_s11 + $0x5ec] sm:$0xf] }
  0xd1   :  { %830 = vst [vmem:[#allocation4 + $0x5f0] sm:$0xf] %v829_v13  ;;  %832 = vst [vmem:[#allocation4 + $0x5f4] sm:$0xf] %v831_v14  ;;  %v839_v17 = vld [vmem:[%s14206_s11 + $0x610] sm:$0xf] }
  0xd2   :  { %834 = vst [vmem:[#allocation4 + $0x5f8] sm:$0xf] %v833_v15  ;;  %v841_v18 = vld [vmem:[%s14206_s11 + $0x604] sm:$0xf]  ;;  %836 = vst [vmem:[#allocation4 + $0x5fc] sm:$0xff] %v835_v16   ;;  %v851_v23 = vld [vmem:[%s14206_s11 + $0x61c] sm:$0xff]  }
  0xd3   :  { %840 = vst [vmem:[#allocation4 + $0x604] sm:$0xf] %v839_v17  ;;  %842 = vst [vmem:[#allocation4 + $0x608] sm:$0xf] %v841_v18  ;;  %v843_v19 = vld [vmem:[%s14206_s11 + $0x614] sm:$0xf] }
  0xd4   :  { %v845_v20 = vld [vmem:[%s14206_s11 + $0x608] sm:$0xf]  ;;  %v847_v21 = vld [vmem:[%s14206_s11 + $0x618] sm:$0xf]  ;;  %844 = vst [vmem:[#allocation4 + $0x60c] sm:$0xf] %v843_v19 }
  0xd5   :  { %846 = vst [vmem:[#allocation4 + $0x610] sm:$0xf] %v845_v20  ;;  %848 = vst [vmem:[#allocation4 + $0x614] sm:$0xf] %v847_v21  ;;  %v849_v22 = vld [vmem:[%s14206_s11 + $0x60c] sm:$0xf] }
  0xd6   :  { %v855_v24 = vld [vmem:[%s14206_s11 + $0x630] sm:$0xf]  ;;  %850 = vst [vmem:[#allocation4 + $0x618] sm:$0xf] %v849_v22  ;;  %852 = vst [vmem:[#allocation4 + $0x61c] sm:$0xff] %v851_v23   ;;  %v867_v30 = vld [vmem:[%s14206_s11 + $0x63c] sm:$0xff]  }
  0xd7   :  { %856 = vst [vmem:[#allocation4 + $0x624] sm:$0xf] %v855_v24  ;;  %v857_v25 = vld [vmem:[%s14206_s11 + $0x624] sm:$0xf]  ;;  %v859_v26 = vld [vmem:[%s14206_s11 + $0x634] sm:$0xf] }
  0xd8   :  { %v861_v27 = vld [vmem:[%s14206_s11 + $0x628] sm:$0xf]  ;;  %858 = vst [vmem:[#allocation4 + $0x628] sm:$0xf] %v857_v25  ;;  %860 = vst [vmem:[#allocation4 + $0x62c] sm:$0xf] %v859_v26 }
  0xd9   :  { %862 = vst [vmem:[#allocation4 + $0x630] sm:$0xf] %v861_v27  ;;  %v863_v28 = vld [vmem:[%s14206_s11 + $0x638] sm:$0xf]  ;;  %v865_v29 = vld [vmem:[%s14206_s11 + $0x62c] sm:$0xf] }
  0xda   :  { %864 = vst [vmem:[#allocation4 + $0x634] sm:$0xf] %v863_v28  ;;  %866 = vst [vmem:[#allocation4 + $0x638] sm:$0xf] %v865_v29  ;;  %v871_v31 = vld [vmem:[%s14206_s11 + $0x650] sm:$0xf] }
  0xdb   :  { %868 = vst [vmem:[#allocation4 + $0x63c] sm:$0xff] %v867_v30   ;;  %v873_v32 = vld [vmem:[%s14206_s11 + $0x644] sm:$0xf]  ;;  %v875_v33 = vld [vmem:[%s14206_s11 + $0x654] sm:$0xf]  ;;  %v883_v37 = vld [vmem:[%s14206_s11 + $0x65c] sm:$0xff]  }
  0xdc   :  { %872 = vst [vmem:[#allocation4 + $0x644] sm:$0xf] %v871_v31  ;;  %874 = vst [vmem:[#allocation4 + $0x648] sm:$0xf] %v873_v32  ;;  %v877_v34 = vld [vmem:[%s14206_s11 + $0x648] sm:$0xf] }
  0xdd   :  { %876 = vst [vmem:[#allocation4 + $0x64c] sm:$0xf] %v875_v33  ;;  %v879_v35 = vld [vmem:[%s14206_s11 + $0x658] sm:$0xf]  ;;  %v881_v36 = vld [vmem:[%s14206_s11 + $0x64c] sm:$0xf] }
  0xde   :  { %878 = vst [vmem:[#allocation4 + $0x650] sm:$0xf] %v877_v34  ;;  %880 = vst [vmem:[#allocation4 + $0x654] sm:$0xf] %v879_v35  ;;  %v887_v38 = vld [vmem:[%s14206_s11 + $0x670] sm:$0xf] }
  0xdf   :  { %882 = vst [vmem:[#allocation4 + $0x658] sm:$0xf] %v881_v36  ;;  %v889_v39 = vld [vmem:[%s14206_s11 + $0x664] sm:$0xf]  ;;  %884 = vst [vmem:[#allocation4 + $0x65c] sm:$0xff] %v883_v37   ;;  %v899_v44 = vld [vmem:[%s14206_s11 + $0x67c] sm:$0xff]  }
  0xe0   :  { %888 = vst [vmem:[#allocation4 + $0x664] sm:$0xf] %v887_v38  ;;  %890 = vst [vmem:[#allocation4 + $0x668] sm:$0xf] %v889_v39  ;;  %v891_v40 = vld [vmem:[%s14206_s11 + $0x674] sm:$0xf] }
  0xe1   :  { %v893_v41 = vld [vmem:[%s14206_s11 + $0x668] sm:$0xf]  ;;  %v895_v42 = vld [vmem:[%s14206_s11 + $0x678] sm:$0xf]  ;;  %892 = vst [vmem:[#allocation4 + $0x66c] sm:$0xf] %v891_v40 }
  0xe2   :  { %894 = vst [vmem:[#allocation4 + $0x670] sm:$0xf] %v893_v41  ;;  %896 = vst [vmem:[#allocation4 + $0x674] sm:$0xf] %v895_v42  ;;  %v897_v43 = vld [vmem:[%s14206_s11 + $0x66c] sm:$0xf] }
  0xe3   :  { %v903_v45 = vld [vmem:[%s14206_s11 + $0x690] sm:$0xf]  ;;  %898 = vst [vmem:[#allocation4 + $0x678] sm:$0xf] %v897_v43  ;;  %900 = vst [vmem:[#allocation4 + $0x67c] sm:$0xff] %v899_v44   ;;  %v915_v51 = vld [vmem:[%s14206_s11 + $0x69c] sm:$0xff]  }
  0xe4   :  { %904 = vst [vmem:[#allocation4 + $0x684] sm:$0xf] %v903_v45  ;;  %v905_v46 = vld [vmem:[%s14206_s11 + $0x684] sm:$0xf]  ;;  %v907_v47 = vld [vmem:[%s14206_s11 + $0x694] sm:$0xf] }
  0xe5   :  { %v909_v48 = vld [vmem:[%s14206_s11 + $0x688] sm:$0xf]  ;;  %906 = vst [vmem:[#allocation4 + $0x688] sm:$0xf] %v905_v46  ;;  %908 = vst [vmem:[#allocation4 + $0x68c] sm:$0xf] %v907_v47 }
  0xe6   :  { %910 = vst [vmem:[#allocation4 + $0x690] sm:$0xf] %v909_v48  ;;  %v911_v49 = vld [vmem:[%s14206_s11 + $0x698] sm:$0xf]  ;;  %v913_v50 = vld [vmem:[%s14206_s11 + $0x68c] sm:$0xf] }
  0xe7   :  { %912 = vst [vmem:[#allocation4 + $0x694] sm:$0xf] %v911_v49  ;;  %914 = vst [vmem:[#allocation4 + $0x698] sm:$0xf] %v913_v50  ;;  %v919_v52 = vld [vmem:[%s14206_s11 + $0x6b0] sm:$0xf] }
  0xe8   :  { %916 = vst [vmem:[#allocation4 + $0x69c] sm:$0xff] %v915_v51   ;;  %v921_v53 = vld [vmem:[%s14206_s11 + $0x6a4] sm:$0xf]  ;;  %v923_v54 = vld [vmem:[%s14206_s11 + $0x6b4] sm:$0xf]  ;;  %v931_v58 = vld [vmem:[%s14206_s11 + $0x6bc] sm:$0xff]  }
  0xe9   :  { %920 = vst [vmem:[#allocation4 + $0x6a4] sm:$0xf] %v919_v52  ;;  %922 = vst [vmem:[#allocation4 + $0x6a8] sm:$0xf] %v921_v53  ;;  %v925_v55 = vld [vmem:[%s14206_s11 + $0x6a8] sm:$0xf] }
  0xea   :  { %924 = vst [vmem:[#allocation4 + $0x6ac] sm:$0xf] %v923_v54  ;;  %v927_v56 = vld [vmem:[%s14206_s11 + $0x6b8] sm:$0xf]  ;;  %v929_v57 = vld [vmem:[%s14206_s11 + $0x6ac] sm:$0xf] }
  0xeb   :  { %926 = vst [vmem:[#allocation4 + $0x6b0] sm:$0xf] %v925_v55  ;;  %928 = vst [vmem:[#allocation4 + $0x6b4] sm:$0xf] %v927_v56  ;;  %v935_v59 = vld [vmem:[%s14206_s11 + $0x6d0] sm:$0xf] }
  0xec   :  { %930 = vst [vmem:[#allocation4 + $0x6b8] sm:$0xf] %v929_v57  ;;  %v937_v60 = vld [vmem:[%s14206_s11 + $0x6c4] sm:$0xf]  ;;  %932 = vst [vmem:[#allocation4 + $0x6bc] sm:$0xff] %v931_v58   ;;  %v947_v1 = vld [vmem:[%s14206_s11 + $0x6dc] sm:$0xff]  }
  0xed   :  { %936 = vst [vmem:[#allocation4 + $0x6c4] sm:$0xf] %v935_v59  ;;  %938 = vst [vmem:[#allocation4 + $0x6c8] sm:$0xf] %v937_v60  ;;  %v939_v61 = vld [vmem:[%s14206_s11 + $0x6d4] sm:$0xf] }
  0xee   :  { %v941_v62 = vld [vmem:[%s14206_s11 + $0x6c8] sm:$0xf]  ;;  %v943_v63 = vld [vmem:[%s14206_s11 + $0x6d8] sm:$0xf]  ;;  %940 = vst [vmem:[#allocation4 + $0x6cc] sm:$0xf] %v939_v61 }
  0xef   :  { %942 = vst [vmem:[#allocation4 + $0x6d0] sm:$0xf] %v941_v62  ;;  %944 = vst [vmem:[#allocation4 + $0x6d4] sm:$0xf] %v943_v63  ;;  %v945_v0 = vld [vmem:[%s14206_s11 + $0x6cc] sm:$0xf] }
  0xf0   :  { %v951_v2 = vld [vmem:[%s14206_s11 + $0x6f0] sm:$0xf]  ;;  %946 = vst [vmem:[#allocation4 + $0x6d8] sm:$0xf] %v945_v0  ;;  %948 = vst [vmem:[#allocation4 + $0x6dc] sm:$0xff] %v947_v1   ;;  %v963_v8 = vld [vmem:[%s14206_s11 + $0x6fc] sm:$0xff]  }
  0xf1   :  { %952 = vst [vmem:[#allocation4 + $0x6e4] sm:$0xf] %v951_v2  ;;  %v953_v3 = vld [vmem:[%s14206_s11 + $0x6e4] sm:$0xf]  ;;  %v955_v4 = vld [vmem:[%s14206_s11 + $0x6f4] sm:$0xf] }
  0xf2   :  { %v957_v5 = vld [vmem:[%s14206_s11 + $0x6e8] sm:$0xf]  ;;  %954 = vst [vmem:[#allocation4 + $0x6e8] sm:$0xf] %v953_v3  ;;  %956 = vst [vmem:[#allocation4 + $0x6ec] sm:$0xf] %v955_v4 }
  0xf3   :  { %958 = vst [vmem:[#allocation4 + $0x6f0] sm:$0xf] %v957_v5  ;;  %v959_v6 = vld [vmem:[%s14206_s11 + $0x6f8] sm:$0xf]  ;;  %v961_v7 = vld [vmem:[%s14206_s11 + $0x6ec] sm:$0xf] }
  0xf4   :  { %960 = vst [vmem:[#allocation4 + $0x6f4] sm:$0xf] %v959_v6  ;;  %962 = vst [vmem:[#allocation4 + $0x6f8] sm:$0xf] %v961_v7  ;;  %v967_v9 = vld [vmem:[%s14206_s11 + $0x710] sm:$0xf] }
  0xf5   :  { %964 = vst [vmem:[#allocation4 + $0x6fc] sm:$0xff] %v963_v8   ;;  %v969_v10 = vld [vmem:[%s14206_s11 + $0x704] sm:$0xf]  ;;  %v971_v11 = vld [vmem:[%s14206_s11 + $0x714] sm:$0xf]  ;;  %v979_v15 = vld [vmem:[%s14206_s11 + $0x71c] sm:$0xff]  }
  0xf6   :  { %968 = vst [vmem:[#allocation4 + $0x704] sm:$0xf] %v967_v9  ;;  %970 = vst [vmem:[#allocation4 + $0x708] sm:$0xf] %v969_v10  ;;  %v973_v12 = vld [vmem:[%s14206_s11 + $0x708] sm:$0xf] }
  0xf7   :  { %972 = vst [vmem:[#allocation4 + $0x70c] sm:$0xf] %v971_v11  ;;  %v975_v13 = vld [vmem:[%s14206_s11 + $0x718] sm:$0xf]  ;;  %v977_v14 = vld [vmem:[%s14206_s11 + $0x70c] sm:$0xf] }
  0xf8   :  { %974 = vst [vmem:[#allocation4 + $0x710] sm:$0xf] %v973_v12  ;;  %976 = vst [vmem:[#allocation4 + $0x714] sm:$0xf] %v975_v13  ;;  %v983_v16 = vld [vmem:[%s14206_s11 + $0x730] sm:$0xf] }
  0xf9   :  { %978 = vst [vmem:[#allocation4 + $0x718] sm:$0xf] %v977_v14  ;;  %v985_v17 = vld [vmem:[%s14206_s11 + $0x724] sm:$0xf]  ;;  %980 = vst [vmem:[#allocation4 + $0x71c] sm:$0xff] %v979_v15   ;;  %v995_v22 = vld [vmem:[%s14206_s11 + $0x73c] sm:$0xff]  }
  0xfa   :  { %984 = vst [vmem:[#allocation4 + $0x724] sm:$0xf] %v983_v16  ;;  %986 = vst [vmem:[#allocation4 + $0x728] sm:$0xf] %v985_v17  ;;  %v987_v18 = vld [vmem:[%s14206_s11 + $0x734] sm:$0xf] }
  0xfb   :  { %v989_v19 = vld [vmem:[%s14206_s11 + $0x728] sm:$0xf]  ;;  %v991_v20 = vld [vmem:[%s14206_s11 + $0x738] sm:$0xf]  ;;  %988 = vst [vmem:[#allocation4 + $0x72c] sm:$0xf] %v987_v18 }
  0xfc   :  { %990 = vst [vmem:[#allocation4 + $0x730] sm:$0xf] %v989_v19  ;;  %992 = vst [vmem:[#allocation4 + $0x734] sm:$0xf] %v991_v20  ;;  %v993_v21 = vld [vmem:[%s14206_s11 + $0x72c] sm:$0xf] }
  0xfd   :  { %v999_v23 = vld [vmem:[%s14206_s11 + $0x750] sm:$0xf]  ;;  %994 = vst [vmem:[#allocation4 + $0x738] sm:$0xf] %v993_v21  ;;  %996 = vst [vmem:[#allocation4 + $0x73c] sm:$0xff] %v995_v22   ;;  %v1011_v29 = vld [vmem:[%s14206_s11 + $0x75c] sm:$0xff]  }
  0xfe   :  { %1000 = vst [vmem:[#allocation4 + $0x744] sm:$0xf] %v999_v23  ;;  %v1001_v24 = vld [vmem:[%s14206_s11 + $0x744] sm:$0xf]  ;;  %v1003_v25 = vld [vmem:[%s14206_s11 + $0x754] sm:$0xf] }
  0xff   :  { %v1005_v26 = vld [vmem:[%s14206_s11 + $0x748] sm:$0xf]  ;;  %1002 = vst [vmem:[#allocation4 + $0x748] sm:$0xf] %v1001_v24  ;;  %1004 = vst [vmem:[#allocation4 + $0x74c] sm:$0xf] %v1003_v25 }
 0x100   :  { %1006 = vst [vmem:[#allocation4 + $0x750] sm:$0xf] %v1005_v26  ;;  %v1007_v27 = vld [vmem:[%s14206_s11 + $0x758] sm:$0xf]  ;;  %v1009_v28 = vld [vmem:[%s14206_s11 + $0x74c] sm:$0xf] }
 0x101   :  { %1008 = vst [vmem:[#allocation4 + $0x754] sm:$0xf] %v1007_v27  ;;  %1010 = vst [vmem:[#allocation4 + $0x758] sm:$0xf] %v1009_v28  ;;  %v1015_v30 = vld [vmem:[%s14206_s11 + $0x770] sm:$0xf] }
 0x102   :  { %1012 = vst [vmem:[#allocation4 + $0x75c] sm:$0xff] %v1011_v29   ;;  %v1017_v31 = vld [vmem:[%s14206_s11 + $0x764] sm:$0xf]  ;;  %v1019_v32 = vld [vmem:[%s14206_s11 + $0x774] sm:$0xf]  ;;  %v1027_v36 = vld [vmem:[%s14206_s11 + $0x77c] sm:$0xff]  }
 0x103   :  { %1016 = vst [vmem:[#allocation4 + $0x764] sm:$0xf] %v1015_v30  ;;  %1018 = vst [vmem:[#allocation4 + $0x768] sm:$0xf] %v1017_v31  ;;  %v1021_v33 = vld [vmem:[%s14206_s11 + $0x768] sm:$0xf] }
 0x104   :  { %1020 = vst [vmem:[#allocation4 + $0x76c] sm:$0xf] %v1019_v32  ;;  %v1023_v34 = vld [vmem:[%s14206_s11 + $0x778] sm:$0xf]  ;;  %v1025_v35 = vld [vmem:[%s14206_s11 + $0x76c] sm:$0xf] }
 0x105   :  { %1022 = vst [vmem:[#allocation4 + $0x770] sm:$0xf] %v1021_v33  ;;  %1024 = vst [vmem:[#allocation4 + $0x774] sm:$0xf] %v1023_v34  ;;  %v1031_v37 = vld [vmem:[%s14206_s11 + $0x790] sm:$0xf] }
 0x106   :  { %1026 = vst [vmem:[#allocation4 + $0x778] sm:$0xf] %v1025_v35  ;;  %v1033_v38 = vld [vmem:[%s14206_s11 + $0x784] sm:$0xf]  ;;  %1028 = vst [vmem:[#allocation4 + $0x77c] sm:$0xff] %v1027_v36   ;;  %v1043_v43 = vld [vmem:[%s14206_s11 + $0x79c] sm:$0xff]  }
 0x107   :  { %1032 = vst [vmem:[#allocation4 + $0x784] sm:$0xf] %v1031_v37  ;;  %1034 = vst [vmem:[#allocation4 + $0x788] sm:$0xf] %v1033_v38  ;;  %v1035_v39 = vld [vmem:[%s14206_s11 + $0x794] sm:$0xf] }
 0x108   :  { %v1037_v40 = vld [vmem:[%s14206_s11 + $0x788] sm:$0xf]  ;;  %v1039_v41 = vld [vmem:[%s14206_s11 + $0x798] sm:$0xf]  ;;  %1036 = vst [vmem:[#allocation4 + $0x78c] sm:$0xf] %v1035_v39 }
 0x109   :  { %1038 = vst [vmem:[#allocation4 + $0x790] sm:$0xf] %v1037_v40  ;;  %1040 = vst [vmem:[#allocation4 + $0x794] sm:$0xf] %v1039_v41  ;;  %v1041_v42 = vld [vmem:[%s14206_s11 + $0x78c] sm:$0xf] }
 0x10a   :  { %v1047_v44 = vld [vmem:[%s14206_s11 + $0x7b0] sm:$0xf]  ;;  %1042 = vst [vmem:[#allocation4 + $0x798] sm:$0xf] %v1041_v42  ;;  %1044 = vst [vmem:[#allocation4 + $0x79c] sm:$0xff] %v1043_v43   ;;  %v1059_v50 = vld [vmem:[%s14206_s11 + $0x7bc] sm:$0xff]  }
 0x10b   :  { %1048 = vst [vmem:[#allocation4 + $0x7a4] sm:$0xf] %v1047_v44  ;;  %v1049_v45 = vld [vmem:[%s14206_s11 + $0x7a4] sm:$0xf]  ;;  %v1051_v46 = vld [vmem:[%s14206_s11 + $0x7b4] sm:$0xf] }
 0x10c   :  { %v1053_v47 = vld [vmem:[%s14206_s11 + $0x7a8] sm:$0xf]  ;;  %1050 = vst [vmem:[#allocation4 + $0x7a8] sm:$0xf] %v1049_v45  ;;  %1052 = vst [vmem:[#allocation4 + $0x7ac] sm:$0xf] %v1051_v46 }
 0x10d   :  { %1054 = vst [vmem:[#allocation4 + $0x7b0] sm:$0xf] %v1053_v47  ;;  %v1055_v48 = vld [vmem:[%s14206_s11 + $0x7b8] sm:$0xf]  ;;  %v1057_v49 = vld [vmem:[%s14206_s11 + $0x7ac] sm:$0xf] }
 0x10e   :  { %1056 = vst [vmem:[#allocation4 + $0x7b4] sm:$0xf] %v1055_v48  ;;  %1058 = vst [vmem:[#allocation4 + $0x7b8] sm:$0xf] %v1057_v49  ;;  %v1063_v51 = vld [vmem:[%s14206_s11 + $0x7d0] sm:$0xf] }
 0x10f   :  { %1060 = vst [vmem:[#allocation4 + $0x7bc] sm:$0xff] %v1059_v50   ;;  %v1065_v52 = vld [vmem:[%s14206_s11 + $0x7c4] sm:$0xf]  ;;  %v1067_v53 = vld [vmem:[%s14206_s11 + $0x7d4] sm:$0xf]  ;;  %v1075_v57 = vld [vmem:[%s14206_s11 + $0x7dc] sm:$0xff]  }
 0x110   :  { %1064 = vst [vmem:[#allocation4 + $0x7c4] sm:$0xf] %v1063_v51  ;;  %1066 = vst [vmem:[#allocation4 + $0x7c8] sm:$0xf] %v1065_v52  ;;  %v1069_v54 = vld [vmem:[%s14206_s11 + $0x7c8] sm:$0xf] }
 0x111   :  { %1068 = vst [vmem:[#allocation4 + $0x7cc] sm:$0xf] %v1067_v53  ;;  %v1071_v55 = vld [vmem:[%s14206_s11 + $0x7d8] sm:$0xf]  ;;  %v1073_v56 = vld [vmem:[%s14206_s11 + $0x7cc] sm:$0xf] }
 0x112   :  { %1070 = vst [vmem:[#allocation4 + $0x7d0] sm:$0xf] %v1069_v54  ;;  %1072 = vst [vmem:[#allocation4 + $0x7d4] sm:$0xf] %v1071_v55  ;;  %v1079_v58 = vld [vmem:[%s14206_s11 + $0x7f0] sm:$0xf] }
 0x113   :  { %1074 = vst [vmem:[#allocation4 + $0x7d8] sm:$0xf] %v1073_v56  ;;  %v1081_v59 = vld [vmem:[%s14206_s11 + $0x7e4] sm:$0xf]  ;;  %1076 = vst [vmem:[#allocation4 + $0x7dc] sm:$0xff] %v1075_v57  }
 0x114   :  { %1080 = vst [vmem:[#allocation4 + $0x7e4] sm:$0xf] %v1079_v58  ;;  %1082 = vst [vmem:[#allocation4 + $0x7e8] sm:$0xf] %v1081_v59  ;;  %v1083_v60 = vld [vmem:[%s14206_s11 + $0x7f4] sm:$0xf] }
 0x115   :  { %v1085_v61 = vld [vmem:[%s14206_s11 + $0x7e8] sm:$0xf]  ;;  %v1087_v62 = vld [vmem:[%s14206_s11 + $0x7f8] sm:$0xf]  ;;  %1084 = vst [vmem:[#allocation4 + $0x7ec] sm:$0xf] %v1083_v60 }
 0x116   :  { %1086 = vst [vmem:[#allocation4 + $0x7f0] sm:$0xf] %v1085_v61  ;;  %1088 = vst [vmem:[#allocation4 + $0x7f4] sm:$0xf] %v1087_v62  ;;  %v1089_v63 = vld [vmem:[%s14206_s11 + $0x7ec] sm:$0xf] }
 0x117   :  { %v1091_v0 = vld [vmem:[%s14206_s11 + $0x7fc] sm:$0xf]  ;;  %1090 = vst [vmem:[#allocation4 + $0x7f8] sm:$0xf] %v1089_v63 }
 0x118   :  { %1092 = vst [vmem:[#allocation4 + $0x7fc] sm:$0xf] %v1091_v0 }
 0x119   :  { %4228 = vsyncadd [#allocation5], 32768  ;;  %v10737_v1 = vld [vmem:[%s14197_s2 + $0x40] sm:$0xff]   ;;  %v10739_v3 = vld [vmem:[%s14197_s2 + $0x48] sm:$0xff]   ;;  %s14214_s25 = sld [smem:[#allocation8_spill]]  ;;  %vm10938_vm0 = vmmov 0  }
 0x11a   :  { %v10738_v2 = vld [vmem:[%s14197_s2] sm:$0xff]   ;;  %9685 = vmatprep.subr.bf16.mxu0 %v10737_v1  ;;  %v10740_v4 = vld [vmem:[%s14197_s2 + $0x8] sm:$0xff]   ;;  %v10741_v5 = vld [vmem:[%s14197_s2 + $0x50] sm:$0xff]   ;;  %v10937_v1 = vmov 0.0   ;;  %vm4642_vm1 = vcmask 261120   ;;  %s10939_s24 = smov 64  }
 0x11b   :  { %9686 = vmatpush3.bf16.msra.mxu0 %v10738_v2  ;;  %v10742_v6 = vld [vmem:[%s14197_s2 + $0x10] sm:$0xff]   ;;  %v10743_v7 = vld [vmem:[%s14197_s2 + $0x58] sm:$0xff]   ;;  %v10745_v9 = vld [vmem:[%s14197_s2 + $0x60] sm:$0xff]   ;;  %10142 = vmatprep.subr.bf16.mxu1 %v10937_v1  ;;  %s10940_s23 = smov 32   ;;  %s10941_s27 = smov 96   ;;  %vm4798_vm2 = vcmask 523520  }
 0x11c   :  { %9687 = vmatprep.subr.bf16.mxu0 %v10739_v3  ;;  %v10744_v8 = vld [vmem:[%s14197_s2 + $0x18] sm:$0xff]   ;;  %v10746_v10 = vld [vmem:[%s14197_s2 + $0x20] sm:$0xff]   ;;  %v10747_v13 = vld [vmem:[%s14197_s2 + $0x68] sm:$0xff]   ;;  %10158 = vmatprep.mubr.msk.bf16.mxu1 %vm10938_vm0, %v10937_v1  ;;  %vm4954_vm3 = vcmask 785920   ;;  %vm5110_vm4 = vcmask 1048320   ;;  %vm7344_vm5 = vcmask 523264  }
 0x11d   :  { %v10748_v15 = vld [vmem:[%s14197_s2 + $0x28] sm:$0xff]   ;;  %v10749_v16 = vld [vmem:[%s14197_s2 + $0x70] sm:$0xff]   ;;  %v10751_v18 = vld [vmem:[%s14197_s2 + $0x78] sm:$0xff]   ;;  %vm7350_vm6 = vcmask 1048064  }
 0x11e   :  { %v10750_v17 = vld [vmem:[%s14197_s2 + $0x30] sm:$0xff]   ;;  %v10752_v19 = vld [vmem:[%s14197_s2 + $0x38] sm:$0xff]   ;;  %v12529_v3 = vld [vmem:[%s14198_s3] ss:$0 sm:$0xff] }
 0x11f   :  { %9688 = vmatpush3.bf16.msra.mxu0 %v10740_v4  ;;  %v4230_v11 = vld [vmem:[%s14214_s25 + $0x8] sm:$0xff]  ;;  %v4232_v12 = vld [vmem:[%s14214_s25 + $0x18] sm:$0xff]  ;;  %v4229_v20 = vld [vmem:[%s14214_s25] sm:$0xff] }
 0x120   :  { %9689 = vmatprep.subr.bf16.mxu0 %v10741_v5  ;;  %v4262_v14 = vpack.c.bf16 %v4232_v12, %v4230_v11  ;;  %v4231_v21 = vld [vmem:[%s14214_s25 + $0x10] sm:$0xff]  ;;  %v4234_v22 = vld [vmem:[%s14214_s25 + $0x28] sm:$0xff]  ;;  %v4236_v23 = vld [vmem:[%s14214_s25 + $0x38] sm:$0xff] }
 0x121   :  { %v4261_v24 = vpack.c.bf16 %v4231_v21, %v4229_v20  ;;  %v4264_v25 = vpack.c.bf16 %v4236_v23, %v4234_v22  ;;  %v4233_v26 = vld [vmem:[%s14214_s25 + $0x20] sm:$0xff]  ;;  %v4235_v27 = vld [vmem:[%s14214_s25 + $0x30] sm:$0xff]  ;;  %v4238_v28 = vld [vmem:[%s14214_s25 + $0x48] sm:$0xff] }
 0x122   :  { %4444 = vmatprep.mubr.bf16.mxu0 %v4262_v14  ;;  %v4240_v29 = vld [vmem:[%s14214_s25 + $0x58] sm:$0xff]  ;;  %v4263_v30 = vpack.c.bf16 %v4235_v27, %v4233_v26  ;;  %v4237_v32 = vld [vmem:[%s14214_s25 + $0x40] sm:$0xff]  ;;  %v4239_v33 = vld [vmem:[%s14214_s25 + $0x50] sm:$0xff] }
 0x123   :  { %9690 = vmatpush3.bf16.msra.mxu0 %v10742_v6  ;;  %v4266_v31 = vpack.c.bf16 %v4240_v29, %v4238_v28  ;;  %v4242_v34 = vld [vmem:[%s14214_s25 + $0x68] sm:$0xff]  ;;  %v4244_v35 = vld [vmem:[%s14214_s25 + $0x78] sm:$0xff]  ;;  %v4265_v36 = vpack.c.bf16 %v4239_v33, %v4237_v32  ;;  %v4241_v38 = vld [vmem:[%s14214_s25 + $0x60] sm:$0xff] }
 0x124   :  { %9691 = vmatprep.subr.bf16.mxu0 %v10743_v7  ;;  %v4268_v37 = vpack.c.bf16 %v4244_v35, %v4242_v34  ;;  %v4243_v39 = vld [vmem:[%s14214_s25 + $0x70] sm:$0xff]  ;;  %v4246_v40 = vld [vmem:[%s14214_s25 + $0x88] sm:$0xff]  ;;  %v4248_v41 = vld [vmem:[%s14214_s25 + $0x98] sm:$0xff] }
 0x125   :  { %v4267_v42 = vpack.c.bf16 %v4243_v39, %v4241_v38  ;;  %v4270_v43 = vpack.c.bf16 %v4248_v41, %v4246_v40  ;;  %v4245_v44 = vld [vmem:[%s14214_s25 + $0x80] sm:$0xff]  ;;  %v4247_v45 = vld [vmem:[%s14214_s25 + $0x90] sm:$0xff]  ;;  %v4250_v46 = vld [vmem:[%s14214_s25 + $0xa8] sm:$0xff] }
 0x126   :  { %v4252_v47 = vld [vmem:[%s14214_s25 + $0xb8] sm:$0xff]  ;;  %v4269_v48 = vpack.c.bf16 %v4247_v45, %v4245_v44  ;;  %v4249_v50 = vld [vmem:[%s14214_s25 + $0xa0] sm:$0xff]  ;;  %v4251_v51 = vld [vmem:[%s14214_s25 + $0xb0] sm:$0xff] }
 0x127   :  { %9692 = vmatpush3.bf16.msra.mxu0 %v10744_v8  ;;  %v4272_v49 = vpack.c.bf16 %v4252_v47, %v4250_v46  ;;  %v4254_v52 = vld [vmem:[%s14214_s25 + $0xc8] sm:$0xff]  ;;  %v4256_v53 = vld [vmem:[%s14214_s25 + $0xd8] sm:$0xff]  ;;  %v4271_v54 = vpack.c.bf16 %v4251_v51, %v4249_v50  ;;  %v4253_v56 = vld [vmem:[%s14214_s25 + $0xc0] sm:$0xff] }
 0x128   :  { %9693 = vmatprep.subr.bf16.mxu0 %v10745_v9  ;;  %v4274_v55 = vpack.c.bf16 %v4256_v53, %v4254_v52  ;;  %v4255_v57 = vld [vmem:[%s14214_s25 + $0xd0] sm:$0xff]  ;;  %v4258_v58 = vld [vmem:[%s14214_s25 + $0xe8] sm:$0xff]  ;;  %v4260_v59 = vld [vmem:[%s14214_s25 + $0xf8] sm:$0xff] }
 0x129   :  { %v4273_v60 = vpack.c.bf16 %v4255_v57, %v4253_v56  ;;  %v4276_v61 = vpack.c.bf16 %v4260_v59, %v4258_v58  ;;  %v4257_v62 = vld [vmem:[%s14214_s25 + $0xe0] sm:$0xff]  ;;  %v4259_v63 = vld [vmem:[%s14214_s25 + $0xf0] sm:$0xff] }
 0x12a   :  { %v4275_v0 = vpack.c.bf16 %v4259_v63, %v4257_v62 }
 0x12b   :  { %9694 = vmatpush3.bf16.msra.mxu0 %v10746_v10 }
 0x12c   :  { %9695 = vmatprep.subr.bf16.mxu0 %v10747_v13 }
 0x12f   :  { %9696 = vmatpush3.bf16.msra.mxu0 %v10748_v15 }
 0x130   :  { %9697 = vmatprep.subr.bf16.mxu0 %v10749_v16 }
 0x133   :  { %9698 = vmatpush3.bf16.msra.mxu0 %v10750_v17 }
 0x134   :  { %9699 = vmatprep.subr.bf16.mxu0 %v10751_v18 }
 0x137   :  { %9700 = vmatpush3.bf16.msra.mxu0 %v10752_v19 }
 0x138   :  { %10214 = vmatprep.subr.bf16.mxu0 %v10937_v1 }
 0x13a   :  { %4445 = vmatmul.mubr.bf16.vlgmr.msra.gmra.mrb[0].mxu0 %v4261_v24 }
 0x13b   :  { %4452 = vmatprep.mubr.bf16.mxu0 %v4264_v25 }
 0x142   :  { %4453 = vmatmul.mubr.bf16.gmra.mrb[4].mxu0 %v4263_v30 }
 0x143   :  { %4460 = vmatprep.mubr.bf16.mxu0 %v4266_v31 }
 0x14a   :  { %4461 = vmatmul.mubr.bf16.gmra.mrb[8].mxu0 %v4265_v36 }
 0x14b   :  { %4468 = vmatprep.mubr.bf16.mxu0 %v4268_v37 }
 0x152   :  { %4469 = vmatmul.mubr.bf16.gmra.mrb[12].mxu0 %v4267_v42 }
 0x153   :  { %4476 = vmatprep.mubr.bf16.mxu0 %v4270_v43 }
 0x15a   :  { %4477 = vmatmul.mubr.bf16.gmra.mrb[16].mxu0 %v4269_v48 }
 0x15b   :  { %4484 = vmatprep.mubr.bf16.mxu0 %v4272_v49 }
 0x162   :  { %4485 = vmatmul.mubr.bf16.gmra.mrb[20].mxu0 %v4271_v54 }
 0x163   :  { %4492 = vmatprep.mubr.bf16.mxu0 %v4274_v55 }
 0x16a   :  { %4493 = vmatmul.mubr.bf16.gmra.mrb[24].mxu0 %v4273_v60 }
 0x16b   :  { %4500 = vmatprep.mubr.bf16.mxu0 %v4276_v61 }
 0x172   :  { %4501 = vmatmul.mubr.bf16.gmra.mrb[28].mxu0 %v4275_v0 }
 0x173   :  { %10230 = vmatprep.mubr.msk.bf16.mxu0 %vm10938_vm0, %v10937_v1 }
 0x20d   :  { %v9701_v2 = vpop.f32.mrb[0].mxu0 }
 0x20e   :  { %v9702_v4 = vpop.f32.mrb[1].mxu0 }
 0x20f   :  { %v9703_v5 = vadd.f32 %v9702_v4, %v9701_v2  ;;  %v9704_v6 = vpop.f32.mrb[2].mxu0 }
 0x210   :  { %v9705_v7 = vpop.f32.mrb[3].mxu0 }
 0x211   :  { %v4447_v8 = vadd.f32 %v9703_v5, %v12529_v3  ;;  %v9706_v9 = vadd.f32 %v9705_v7, %v9704_v6 }
 0x213   :  { %v4450_v10 = vadd.f32 %v9706_v9, %v12529_v3  ;;  %v4509_v11 = vmax.f32 %v4447_v8, 0.0 }
 0x215   :  { %v4510_v12 = vmax.f32 %v4450_v10, 0.0  ;;  %v9707_v13 = vpop.f32.mrb[4].mxu0 }
 0x216   :  { %v9708_v14 = vpop.f32.mrb[5].mxu0 }
 0x217   :  { %v12533_v15 = vpack.c.bf16 %v4510_v12, %v4509_v11  ;;  %v9709_v16 = vadd.f32 %v9708_v14, %v9707_v13  ;;  %v9710_v17 = vpop.f32.mrb[6].mxu0 }
 0x218   :  { %v9711_v18 = vpop.f32.mrb[7].mxu0 }
 0x219   :  { %v4455_v19 = vadd.f32 %v9709_v16, %v12529_v3  ;;  %v9712_v20 = vadd.f32 %v9711_v18, %v9710_v17  ;;  %10143 = vmatpush3.bf16.msra.mxu1 %v12533_v15  ;;  %10215 = vmatpush3.bf16.msra.mxu0 %v12533_v15 }
 0x21a   :  { %10144 = vmatprep.subr.bf16.mxu1 %v10937_v1  ;;  %10216 = vmatprep.subr.bf16.mxu0 %v10937_v1 }
 0x21b   :  { %v4458_v21 = vadd.f32 %v9712_v20, %v12529_v3  ;;  %v4511_v22 = vmax.f32 %v4455_v19, 0.0 }
 0x21d   :  { %v4512_v23 = vmax.f32 %v4458_v21, 0.0  ;;  %v9713_v24 = vpop.f32.mrb[8].mxu0 }
 0x21e   :  { %v9714_v25 = vpop.f32.mrb[9].mxu0 }
 0x21f   :  { %v12541_v26 = vpack.c.bf16 %v4512_v23, %v4511_v22  ;;  %v9715_v27 = vadd.f32 %v9714_v25, %v9713_v24  ;;  %v9716_v28 = vpop.f32.mrb[10].mxu0 }
 0x220   :  { %v9717_v29 = vpop.f32.mrb[11].mxu0 }
 0x221   :  { %v4463_v30 = vadd.f32 %v9715_v27, %v12529_v3  ;;  %v9718_v31 = vadd.f32 %v9717_v29, %v9716_v28  ;;  %10145 = vmatpush3.bf16.msra.mxu1 %v12541_v26  ;;  %10217 = vmatpush3.bf16.msra.mxu0 %v12541_v26 }
 0x222   :  { %10146 = vmatprep.subr.bf16.mxu1 %v10937_v1  ;;  %10218 = vmatprep.subr.bf16.mxu0 %v10937_v1 }
 0x223   :  { %v4466_v32 = vadd.f32 %v9718_v31, %v12529_v3  ;;  %v4513_v33 = vmax.f32 %v4463_v30, 0.0  ;;  %v10753_v31 = vld [vmem:[%s14199_s4] sm:$0xff]  }
 0x225   :  { %v4514_v34 = vmax.f32 %v4466_v32, 0.0  ;;  %v9719_v35 = vpop.f32.mrb[12].mxu0  ;;  %v10754_v32 = vld [vmem:[%s14199_s4 + $0x48] sm:$0xff]  }
 0x226   :  { %v9720_v36 = vpop.f32.mrb[13].mxu0 }
 0x227   :  { %v12549_v37 = vpack.c.bf16 %v4514_v34, %v4513_v33  ;;  %v9721_v38 = vadd.f32 %v9720_v36, %v9719_v35  ;;  %v9722_v39 = vpop.f32.mrb[14].mxu0  ;;  %v10756_v33 = vld [vmem:[%s14199_s4 + $0x50] sm:$0xff]   ;;  %v10758_v35 = vld [vmem:[%s14199_s4 + $0x58] sm:$0xff]  }
 0x228   :  { %v9723_v40 = vpop.f32.mrb[15].mxu0  ;;  %v10757_v34 = vld [vmem:[%s14199_s4 + $0x10] sm:$0xff]   ;;  %v10759_v36 = vld [vmem:[%s14199_s4 + $0x18] sm:$0xff]  }
 0x229   :  { %v4471_v41 = vadd.f32 %v9721_v38, %v12529_v3  ;;  %v9724_v42 = vadd.f32 %v9723_v40, %v9722_v39  ;;  %10147 = vmatpush3.bf16.msra.mxu1 %v12549_v37  ;;  %10219 = vmatpush3.bf16.msra.mxu0 %v12549_v37  ;;  %v10760_v38 = vld [vmem:[%s14199_s4 + $0x60] sm:$0xff]   ;;  %v10762_v40 = vld [vmem:[%s14199_s4 + $0x68] ss:$0 sps:$4 sm:$0xff]  }
 0x22a   :  { %10148 = vmatprep.subr.bf16.mxu1 %v10937_v1  ;;  %10220 = vmatprep.subr.bf16.mxu0 %v10937_v1  ;;  %v10761_v39 = vld [vmem:[%s14199_s4 + $0x20] ss:$0 sps:$4 sm:$0xff]  }
 0x22b   :  { %v4474_v43 = vadd.f32 %v9724_v42, %v12529_v3  ;;  %v4515_v44 = vmax.f32 %v4471_v41, 0.0  ;;  %v10763_v41 = vld [vmem:[%s14199_s4 + $0x24] sm:$0xff]   ;;  %v10764_v42 = vld [vmem:[%s14199_s4 + $0x90] sm:$0xff]  }
 0x22d   :  { %v4516_v45 = vmax.f32 %v4474_v43, 0.0  ;;  %v9725_v46 = vpop.f32.mrb[16].mxu0  ;;  %v10765_v43 = vld [vmem:[%s14199_s4 + $0x2c] sm:$0xff]  }
 0x22e   :  { %v9726_v47 = vpop.f32.mrb[17].mxu0 }
 0x22f   :  { %v12557_v48 = vpack.c.bf16 %v4516_v45, %v4515_v44  ;;  %v9727_v49 = vadd.f32 %v9726_v47, %v9725_v46  ;;  %v9728_v50 = vpop.f32.mrb[18].mxu0  ;;  %v10766_v44 = vld [vmem:[%s14199_s4 + $0x98] sm:$0xff]   ;;  %v10768_v46 = vld [vmem:[%s14199_s4 + $0xa0] sm:$0xff]  }
 0x230   :  { %v9729_v51 = vpop.f32.mrb[19].mxu0  ;;  %v10767_v45 = vld [vmem:[%s14199_s4 + $0x34] sm:$0xff]   ;;  %v10769_v47 = vld [vmem:[%s14199_s4 + $0x3c] sm:$0xff]  }
 0x231   :  { %v4479_v52 = vadd.f32 %v9727_v49, %v12529_v3  ;;  %v9730_v53 = vadd.f32 %v9729_v51, %v9728_v50  ;;  %10149 = vmatpush3.bf16.msra.mxu1 %v12557_v48  ;;  %10221 = vmatpush3.bf16.msra.mxu0 %v12557_v48  ;;  %v10770_v49 = vld [vmem:[%s14199_s4 + $0xa8] sm:$0xff]   ;;  %v10771_v50 = vld [vmem:[%s14199_s4 + $0x44] ss:$0 sps:$4 sm:$0xff]   ;;  %v10772_v51 = vld [vmem:[%s14199_s4 + $0xb0] ss:$0 sps:$4 sm:$0xff]  }
 0x232   :  { %10150 = vmatprep.subr.bf16.mxu1 %v10937_v1  ;;  %10222 = vmatprep.subr.bf16.mxu0 %v10937_v1 }
 0x233   :  { %v4482_v54 = vadd.f32 %v9730_v53, %v12529_v3  ;;  %v4517_v55 = vmax.f32 %v4479_v52, 0.0  ;;  %v10773_v52 = vld [vmem:[%s14199_s4 + $0x6c] sm:$0xff]   ;;  %v10774_v53 = vld [vmem:[%s14199_s4 + $0xd8] sm:$0xff]  }
 0x235   :  { %v4518_v56 = vmax.f32 %v4482_v54, 0.0  ;;  %v9731_v57 = vpop.f32.mrb[20].mxu0  ;;  %v10775_v54 = vld [vmem:[%s14199_s4 + $0x74] sm:$0xff]  }
 0x236   :  { %v9732_v58 = vpop.f32.mrb[21].mxu0 }
 0x237   :  { %v12565_v59 = vpack.c.bf16 %v4518_v56, %v4517_v55  ;;  %v9733_v60 = vadd.f32 %v9732_v58, %v9731_v57  ;;  %v9734_v61 = vpop.f32.mrb[22].mxu0  ;;  %v10776_v55 = vld [vmem:[%s14199_s4 + $0xe0] sm:$0xff]   ;;  %v10778_v57 = vld [vmem:[%s14199_s4 + $0xe8] sm:$0xff]  }
 0x238   :  { %v9735_v62 = vpop.f32.mrb[23].mxu0  ;;  %v10777_v56 = vld [vmem:[%s14199_s4 + $0x7c] sm:$0xff]   ;;  %v10779_v58 = vld [vmem:[%s14199_s4 + $0x84] sm:$0xff]  }
 0x239   :  { %v4487_v63 = vadd.f32 %v9733_v60, %v12529_v3  ;;  %v9736_v0 = vadd.f32 %v9735_v62, %v9734_v61  ;;  %10151 = vmatpush3.bf16.msra.mxu1 %v12565_v59  ;;  %10223 = vmatpush3.bf16.msra.mxu0 %v12565_v59  ;;  %v10780_v60 = vld [vmem:[%s14199_s4 + $0xf0] sm:$0xff]   ;;  %v10781_v61 = vld [vmem:[%s14199_s4 + $0x8c] ss:$0 sps:$4 sm:$0xff]   ;;  %v10782_v62 = vld [vmem:[%s14199_s4 + $0xf8] ss:$0 sps:$4 sm:$0xff]  }
 0x23a   :  { %10152 = vmatprep.subr.bf16.mxu1 %v10937_v1  ;;  %10224 = vmatprep.subr.bf16.mxu0 %v10937_v1 }
 0x23b   :  { %v4490_v2 = vadd.f32 %v9736_v0, %v12529_v3  ;;  %v4519_v4 = vmax.f32 %v4487_v63, 0.0  ;;  %v10783_v63 = vld [vmem:[%s14199_s4 + $0xb4] sm:$0xff]   ;;  %v10784_v0 = vld [vmem:[%s14199_s4 + $0x120] sm:$0xff]  }
 0x23d   :  { %v4520_v5 = vmax.f32 %v4490_v2, 0.0  ;;  %v9737_v6 = vpop.f32.mrb[24].mxu0  ;;  %v10785_v2 = vld [vmem:[%s14199_s4 + $0xbc] sm:$0xff]  }
 0x23e   :  { %v9738_v7 = vpop.f32.mrb[25].mxu0 }
 0x23f   :  { %v12573_v8 = vpack.c.bf16 %v4520_v5, %v4519_v4  ;;  %v9739_v9 = vadd.f32 %v9738_v7, %v9737_v6  ;;  %v9740_v10 = vpop.f32.mrb[26].mxu0  ;;  %v10786_v4 = vld [vmem:[%s14199_s4 + $0x128] sm:$0xff]   ;;  %v10788_v6 = vld [vmem:[%s14199_s4 + $0x130] sm:$0xff]  }
 0x240   :  { %v9741_v11 = vpop.f32.mrb[27].mxu0  ;;  %v10787_v5 = vld [vmem:[%s14199_s4 + $0xc4] sm:$0xff]   ;;  %v10789_v7 = vld [vmem:[%s14199_s4 + $0xcc] sm:$0xff]  }
 0x241   :  { %v4495_v12 = vadd.f32 %v9739_v9, %v12529_v3  ;;  %v9742_v13 = vadd.f32 %v9741_v11, %v9740_v10  ;;  %10153 = vmatpush3.bf16.msra.mxu1 %v12573_v8  ;;  %10225 = vmatpush3.bf16.msra.mxu0 %v12573_v8  ;;  %v10790_v9 = vld [vmem:[%s14199_s4 + $0x138] sm:$0xff]   ;;  %v10791_v10 = vld [vmem:[%s14199_s4 + $0xd4] ss:$0 sps:$4 sm:$0xff]   ;;  %v10792_v11 = vld [vmem:[%s14199_s4 + $0x140] ss:$0 sps:$4 sm:$0xff]  }
 0x242   :  { %10154 = vmatprep.subr.bf16.mxu1 %v10937_v1  ;;  %10226 = vmatprep.subr.bf16.mxu0 %v10937_v1 }
 0x243   :  { %v4498_v14 = vadd.f32 %v9742_v13, %v12529_v3  ;;  %v4521_v16 = vmax.f32 %v4495_v12, 0.0  ;;  %v10793_v12 = vld [vmem:[%s14199_s4 + $0xfc] sm:$0xff]   ;;  %v10794_v13 = vld [vmem:[%s14199_s4 + $0x168] sm:$0xff]  }
 0x245   :  { %v4522_v17 = vmax.f32 %v4498_v14, 0.0  ;;  %v9743_v18 = vpop.f32.mrb[28].mxu0  ;;  %v10795_v14 = vld [vmem:[%s14199_s4 + $0x104] sm:$0xff]  }
 0x246   :  { %v9744_v19 = vpop.f32.mrb[29].mxu0 }
 0x247   :  { %v12581_v20 = vpack.c.bf16 %v4522_v17, %v4521_v16  ;;  %v9745_v21 = vadd.f32 %v9744_v19, %v9743_v18  ;;  %v9746_v22 = vpop.f32.mrb[30].mxu0  ;;  %v10796_v16 = vld [vmem:[%s14199_s4 + $0x170] sm:$0xff]   ;;  %v10798_v18 = vld [vmem:[%s14199_s4 + $0x178] sm:$0xff]  }
 0x248   :  { %v9747_v23 = vpop.f32.mrb[31].mxu0  ;;  %v10797_v17 = vld [vmem:[%s14199_s4 + $0x10c] sm:$0xff]   ;;  %v10799_v19 = vld [vmem:[%s14199_s4 + $0x114] sm:$0xff]  }
 0x249   :  { %v4503_v24 = vadd.f32 %v9745_v21, %v12529_v3  ;;  %v9748_v25 = vadd.f32 %v9747_v23, %v9746_v22  ;;  %10155 = vmatpush3.bf16.msra.mxu1 %v12581_v20  ;;  %10227 = vmatpush3.bf16.msra.mxu0 %v12581_v20  ;;  %v10800_v21 = vld [vmem:[%s14199_s4 + $0x180] sm:$0xff]   ;;  %v10801_v22 = vld [vmem:[%s14199_s4 + $0x11c] ss:$0 sps:$4 sm:$0xff]   ;;  %v10802_v23 = vld [vmem:[%s14199_s4 + $0x188] ss:$0 sps:$4 sm:$0xff]  }
 0x24a   :  { %10156 = vmatprep.subr.bf16.mxu1 %v10937_v1  ;;  %10228 = vmatprep.subr.bf16.mxu0 %v10937_v1 }
 0x24b   :  { %v4506_v27 = vadd.f32 %v9748_v25, %v12529_v3  ;;  %v4523_v28 = vmax.f32 %v4503_v24, 0.0  ;;  %v10755_v3 = vld [vmem:[%s14199_s4 + $0x8] sm:$0xff]   ;;  %v10804_v25 = vld [vmem:[%s14199_s4 + $0x1b0] sm:$0xff]  }
 0x24c   :  { %v10803_v24 = vld [vmem:[%s14199_s4 + $0x144] sm:$0xff]  }
 0x24d   :  { %v4524_v29 = vmax.f32 %v4506_v27, 0.0  ;;  %v10805_v27 = vld [vmem:[%s14199_s4 + $0x14c] sm:$0xff]  }
 0x24f   :  { %v12589_v30 = vpack.c.bf16 %v4524_v29, %v4523_v28  ;;  %v10806_v28 = vld [vmem:[%s14199_s4 + $0x1b8] sm:$0xff]  }
 0x251   :  { %10157 = vmatpush3.bf16.msra.mxu1 %v12589_v30  ;;  %10229 = vmatpush3.bf16.msra.mxu0 %v12589_v30 }
 0x252   :  { %10178 = vmatprep.subr.bf16.mxu1 %v10937_v1  ;;  %10286 = vmatprep.subr.bf16.mxu0 %v10937_v1 }
 0x254   :  { %10159 = vmatmul.mubr.bf16.vlgmr.msra.gmra.mrb[0].mxu1 %v10753_v31  ;;  %10231 = vmatmul.mubr.bf16.vlgmr.msra.gmra.mrb[32].mxu0 %v10754_v32 }
 0x255   :  { %10179 = vmatpush3.bf16.msra.mxu1 %v12533_v15  ;;  %10287 = vmatpush3.bf16.msra.mxu0 %v12533_v15 }
 0x256   :  { %10180 = vmatprep.subr.bf16.mxu1 %v10937_v1  ;;  %10288 = vmatprep.subr.bf16.mxu0 %v10937_v1 }
 0x257   :  { %10162 = vmatprep.mubr.msk.bf16.mxu1 %vm10938_vm0, %v10937_v1  ;;  %10234 = vmatprep.mubr.msk.bf16.mxu0 %vm10938_vm0, %v10937_v1 }
 0x259   :  { %10181 = vmatpush3.bf16.msra.mxu1 %v12541_v26  ;;  %10289 = vmatpush3.bf16.msra.mxu0 %v12541_v26 }
 0x25a   :  { %10182 = vmatprep.subr.bf16.mxu1 %v10937_v1  ;;  %10290 = vmatprep.subr.bf16.mxu0 %v10937_v1 }
 0x25c   :  { %10163 = vmatmul.mubr.bf16.gmra.mrb[4].mxu1 %v10755_v3  ;;  %10235 = vmatmul.mubr.bf16.gmra.mrb[36].mxu0 %v10756_v33  ;;  %v10807_v3 = vld [vmem:[%s14199_s4 + $0x154] sm:$0xff]   ;;  %v10808_v33 = vld [vmem:[%s14199_s4 + $0x1c0] sm:$0xff]  }
 0x25d   :  { %10183 = vmatpush3.bf16.msra.mxu1 %v12549_v37  ;;  %10291 = vmatpush3.bf16.msra.mxu0 %v12549_v37 }
 0x25e   :  { %10184 = vmatprep.subr.bf16.mxu1 %v10937_v1  ;;  %10292 = vmatprep.subr.bf16.mxu0 %v10937_v1 }
 0x25f   :  { %10166 = vmatprep.mubr.msk.bf16.mxu1 %vm10938_vm0, %v10937_v1  ;;  %10238 = vmatprep.mubr.msk.bf16.mxu0 %vm10938_vm0, %v10937_v1 }
 0x261   :  { %10185 = vmatpush3.bf16.msra.mxu1 %v12557_v48  ;;  %10293 = vmatpush3.bf16.msra.mxu0 %v12557_v48 }
 0x262   :  { %10186 = vmatprep.subr.bf16.mxu1 %v10937_v1  ;;  %10294 = vmatprep.subr.bf16.mxu0 %v10937_v1 }
 0x264   :  { %10167 = vmatmul.mubr.bf16.gmra.mrb[8].mxu1 %v10757_v34  ;;  %10239 = vmatmul.mubr.bf16.gmra.mrb[40].mxu0 %v10758_v35 }
 0x265   :  { %10187 = vmatpush3.bf16.msra.mxu1 %v12565_v59  ;;  %10295 = vmatpush3.bf16.msra.mxu0 %v12565_v59 }
 0x266   :  { %10188 = vmatprep.subr.bf16.mxu1 %v10937_v1  ;;  %10296 = vmatprep.subr.bf16.mxu0 %v10937_v1 }
 0x267   :  { %10170 = vmatprep.mubr.msk.bf16.mxu1 %vm10938_vm0, %v10937_v1  ;;  %10242 = vmatprep.mubr.msk.bf16.mxu0 %vm10938_vm0, %v10937_v1 }
 0x269   :  { %10189 = vmatpush3.bf16.msra.mxu1 %v12573_v8  ;;  %10297 = vmatpush3.bf16.msra.mxu0 %v12573_v8 }
 0x26a   :  { %10190 = vmatprep.subr.bf16.mxu1 %v10937_v1  ;;  %10298 = vmatprep.subr.bf16.mxu0 %v10937_v1 }
 0x26c   :  { %10171 = vmatmul.mubr.bf16.gmra.mrb[12].mxu1 %v10759_v36  ;;  %10243 = vmatmul.mubr.bf16.gmra.mrb[44].mxu0 %v10760_v38 }
 0x26d   :  { %10191 = vmatpush3.bf16.msra.mxu1 %v12581_v20  ;;  %10299 = vmatpush3.bf16.msra.mxu0 %v12581_v20 }
 0x26e   :  { %10192 = vmatprep.subr.bf16.mxu1 %v10937_v1  ;;  %10300 = vmatprep.subr.bf16.mxu0 %v10937_v1 }
 0x26f   :  { %10174 = vmatprep.mubr.msk.bf16.mxu1 %vm10938_vm0, %v10937_v1  ;;  %10246 = vmatprep.mubr.msk.bf16.mxu0 %vm10938_vm0, %v10937_v1 }
 0x271   :  { %10193 = vmatpush3.bf16.msra.mxu1 %v12589_v30  ;;  %10301 = vmatpush3.bf16.msra.mxu0 %v12589_v30 }
 0x272   :  { %10250 = vmatprep.subr.bf16.mxu1 %v10937_v1  ;;  %10358 = vmatprep.subr.bf16.mxu0 %v10937_v1 }
 0x274   :  { %10175 = vmatmul.mubr.bf16.gmra.mrb[16].mxu1 %v10761_v39  ;;  %10247 = vmatmul.mubr.bf16.gmra.mrb[48].mxu0 %v10762_v40 }
 0x275   :  { %10194 = vmatprep.mubr.msk.bf16.mxu1 %vm10938_vm0, %v10937_v1  ;;  %10302 = vmatprep.mubr.msk.bf16.mxu0 %vm10938_vm0, %v10937_v1 }
 0x27c   :  { %10195 = vmatmul.mubr.bf16.vlgmr.msra.gmra.mrb[20].mxu1 %v10763_v41  ;;  %10303 = vmatmul.mubr.bf16.vlgmr.msra.gmra.mrb[52].mxu0 %v10764_v42 }
 0x27d   :  { %10251 = vmatpush3.bf16.msra.mxu1 %v12533_v15  ;;  %10359 = vmatpush3.bf16.msra.mxu0 %v12533_v15 }
 0x27e   :  { %10252 = vmatprep.subr.bf16.mxu1 %v10937_v1  ;;  %10360 = vmatprep.subr.bf16.mxu0 %v10937_v1 }
 0x27f   :  { %10198 = vmatprep.mubr.msk.bf16.mxu1 %vm10938_vm0, %v10937_v1  ;;  %10306 = vmatprep.mubr.msk.bf16.mxu0 %vm10938_vm0, %v10937_v1 }
 0x281   :  { %10253 = vmatpush3.bf16.msra.mxu1 %v12541_v26  ;;  %10361 = vmatpush3.bf16.msra.mxu0 %v12541_v26 }
 0x282   :  { %10254 = vmatprep.subr.bf16.mxu1 %v10937_v1  ;;  %10362 = vmatprep.subr.bf16.mxu0 %v10937_v1 }
 0x284   :  { %10199 = vmatmul.mubr.bf16.gmra.mrb[24].mxu1 %v10765_v43  ;;  %10307 = vmatmul.mubr.bf16.gmra.mrb[56].mxu0 %v10766_v44  ;;  %v10809_v43 = vld [vmem:[%s14199_s4 + $0x15c] sm:$0xff]   ;;  %v10810_v44 = vld [vmem:[%s14199_s4 + $0x1c8] sm:$0xff]  }
 0x285   :  { %10255 = vmatpush3.bf16.msra.mxu1 %v12549_v37  ;;  %10363 = vmatpush3.bf16.msra.mxu0 %v12549_v37 }
 0x286   :  { %10256 = vmatprep.subr.bf16.mxu1 %v10937_v1  ;;  %10364 = vmatprep.subr.bf16.mxu0 %v10937_v1 }
 0x287   :  { %10202 = vmatprep.mubr.msk.bf16.mxu1 %vm10938_vm0, %v10937_v1  ;;  %10310 = vmatprep.mubr.msk.bf16.mxu0 %vm10938_vm0, %v10937_v1 }
 0x289   :  { %10257 = vmatpush3.bf16.msra.mxu1 %v12557_v48  ;;  %10365 = vmatpush3.bf16.msra.mxu0 %v12557_v48 }
 0x28a   :  { %10258 = vmatprep.subr.bf16.mxu1 %v10937_v1  ;;  %10366 = vmatprep.subr.bf16.mxu0 %v10937_v1 }
 0x28c   :  { %10203 = vmatmul.mubr.bf16.gmra.mrb[28].mxu1 %v10767_v45  ;;  %10311 = vmatmul.mubr.bf16.gmra.mrb[60].mxu0 %v10768_v46 }
 0x28d   :  { %10259 = vmatpush3.bf16.msra.mxu1 %v12565_v59  ;;  %10367 = vmatpush3.bf16.msra.mxu0 %v12565_v59 }
 0x28e   :  { %10260 = vmatprep.subr.bf16.mxu1 %v10937_v1  ;;  %10368 = vmatprep.subr.bf16.mxu0 %v10937_v1 }
 0x28f   :  { %10206 = vmatprep.mubr.msk.bf16.mxu1 %vm10938_vm0, %v10937_v1  ;;  %10314 = vmatprep.mubr.msk.bf16.mxu0 %vm10938_vm0, %v10937_v1 }
 0x291   :  { %10261 = vmatpush3.bf16.msra.mxu1 %v12573_v8  ;;  %10369 = vmatpush3.bf16.msra.mxu0 %v12573_v8 }
 0x292   :  { %10262 = vmatprep.subr.bf16.mxu1 %v10937_v1  ;;  %10370 = vmatprep.subr.bf16.mxu0 %v10937_v1 }
 0x294   :  { %10207 = vmatmul.mubr.bf16.gmra.mrb[32].mxu1 %v10769_v47  ;;  %10315 = vmatmul.mubr.bf16.gmra.mrb[64].mxu0 %v10770_v49 }
 0x295   :  { %10263 = vmatpush3.bf16.msra.mxu1 %v12581_v20  ;;  %10371 = vmatpush3.bf16.msra.mxu0 %v12581_v20 }
 0x296   :  { %10264 = vmatprep.subr.bf16.mxu1 %v10937_v1  ;;  %10372 = vmatprep.subr.bf16.mxu0 %v10937_v1 }
 0x297   :  { %10210 = vmatprep.mubr.msk.bf16.mxu1 %vm10938_vm0, %v10937_v1  ;;  %10318 = vmatprep.mubr.msk.bf16.mxu0 %vm10938_vm0, %v10937_v1 }
 0x299   :  { %10265 = vmatpush3.bf16.msra.mxu1 %v12589_v30  ;;  %10373 = vmatpush3.bf16.msra.mxu0 %v12589_v30 }
 0x29a   :  { %10322 = vmatprep.subr.bf16.mxu1 %v10937_v1  ;;  %10430 = vmatprep.subr.bf16.mxu0 %v10937_v1 }
 0x29c   :  { %10211 = vmatmul.mubr.bf16.gmra.mrb[36].mxu1 %v10771_v50  ;;  %10319 = vmatmul.mubr.bf16.gmra.mrb[68].mxu0 %v10772_v51 }
 0x29d   :  { %10266 = vmatprep.mubr.msk.bf16.mxu1 %vm10938_vm0, %v10937_v1  ;;  %10374 = vmatprep.mubr.msk.bf16.mxu0 %vm10938_vm0, %v10937_v1 }
 0x2a4   :  { %10267 = vmatmul.mubr.bf16.vlgmr.msra.gmra.mrb[40].mxu1 %v10773_v52  ;;  %10375 = vmatmul.mubr.bf16.vlgmr.msra.gmra.mrb[72].mxu0 %v10774_v53 }
 0x2a5   :  { %10323 = vmatpush3.bf16.msra.mxu1 %v12533_v15  ;;  %10431 = vmatpush3.bf16.msra.mxu0 %v12533_v15 }
 0x2a6   :  { %10324 = vmatprep.subr.bf16.mxu1 %v10937_v1  ;;  %10432 = vmatprep.subr.bf16.mxu0 %v10937_v1 }
 0x2a7   :  { %10270 = vmatprep.mubr.msk.bf16.mxu1 %vm10938_vm0, %v10937_v1  ;;  %10378 = vmatprep.mubr.msk.bf16.mxu0 %vm10938_vm0, %v10937_v1 }
 0x2a9   :  { %10325 = vmatpush3.bf16.msra.mxu1 %v12541_v26  ;;  %10433 = vmatpush3.bf16.msra.mxu0 %v12541_v26 }
 0x2aa   :  { %10326 = vmatprep.subr.bf16.mxu1 %v10937_v1  ;;  %10434 = vmatprep.subr.bf16.mxu0 %v10937_v1 }
 0x2ac   :  { %10271 = vmatmul.mubr.bf16.gmra.mrb[44].mxu1 %v10775_v54  ;;  %10379 = vmatmul.mubr.bf16.gmra.mrb[76].mxu0 %v10776_v55  ;;  %v10811_v54 = vld [vmem:[%s14199_s4 + $0x164] ss:$0 sps:$4 sm:$0xff]   ;;  %v10812_v55 = vld [vmem:[%s14199_s4 + $0x1d0] ss:$0 sps:$4 sm:$0xff]  }
 0x2ad   :  { %10327 = vmatpush3.bf16.msra.mxu1 %v12549_v37  ;;  %10435 = vmatpush3.bf16.msra.mxu0 %v12549_v37 }
 0x2ae   :  { %10328 = vmatprep.subr.bf16.mxu1 %v10937_v1  ;;  %10436 = vmatprep.subr.bf16.mxu0 %v10937_v1 }
 0x2af   :  { %10274 = vmatprep.mubr.msk.bf16.mxu1 %vm10938_vm0, %v10937_v1  ;;  %10382 = vmatprep.mubr.msk.bf16.mxu0 %vm10938_vm0, %v10937_v1 }
 0x2b1   :  { %10329 = vmatpush3.bf16.msra.mxu1 %v12557_v48  ;;  %10437 = vmatpush3.bf16.msra.mxu0 %v12557_v48 }
 0x2b2   :  { %10330 = vmatprep.subr.bf16.mxu1 %v10937_v1  ;;  %10438 = vmatprep.subr.bf16.mxu0 %v10937_v1 }
 0x2b4   :  { %10275 = vmatmul.mubr.bf16.gmra.mrb[48].mxu1 %v10777_v56  ;;  %10383 = vmatmul.mubr.bf16.gmra.mrb[80].mxu0 %v10778_v57 }
 0x2b5   :  { %10331 = vmatpush3.bf16.msra.mxu1 %v12565_v59  ;;  %10439 = vmatpush3.bf16.msra.mxu0 %v12565_v59 }
 0x2b6   :  { %10332 = vmatprep.subr.bf16.mxu1 %v10937_v1  ;;  %10440 = vmatprep.subr.bf16.mxu0 %v10937_v1 }
 0x2b7   :  { %10278 = vmatprep.mubr.msk.bf16.mxu1 %vm10938_vm0, %v10937_v1  ;;  %10386 = vmatprep.mubr.msk.bf16.mxu0 %vm10938_vm0, %v10937_v1 }
 0x2b9   :  { %10333 = vmatpush3.bf16.msra.mxu1 %v12573_v8  ;;  %10441 = vmatpush3.bf16.msra.mxu0 %v12573_v8 }
 0x2ba   :  { %10334 = vmatprep.subr.bf16.mxu1 %v10937_v1  ;;  %10442 = vmatprep.subr.bf16.mxu0 %v10937_v1 }
 0x2bc   :  { %10279 = vmatmul.mubr.bf16.gmra.mrb[52].mxu1 %v10779_v58  ;;  %10387 = vmatmul.mubr.bf16.gmra.mrb[84].mxu0 %v10780_v60 }
 0x2bd   :  { %10335 = vmatpush3.bf16.msra.mxu1 %v12581_v20  ;;  %10443 = vmatpush3.bf16.msra.mxu0 %v12581_v20 }
 0x2be   :  { %10336 = vmatprep.subr.bf16.mxu1 %v10937_v1  ;;  %10444 = vmatprep.subr.bf16.mxu0 %v10937_v1 }
 0x2bf   :  { %10282 = vmatprep.mubr.msk.bf16.mxu1 %vm10938_vm0, %v10937_v1  ;;  %10390 = vmatprep.mubr.msk.bf16.mxu0 %vm10938_vm0, %v10937_v1 }
 0x2c1   :  { %10337 = vmatpush3.bf16.msra.mxu1 %v12589_v30  ;;  %10445 = vmatpush3.bf16.msra.mxu0 %v12589_v30 }
 0x2c2   :  { %10394 = vmatprep.subr.bf16.mxu1 %v10937_v1  ;;  %10502 = vmatprep.subr.bf16.mxu0 %v10937_v1 }
 0x2c4   :  { %10283 = vmatmul.mubr.bf16.gmra.mrb[56].mxu1 %v10781_v61  ;;  %10391 = vmatmul.mubr.bf16.gmra.mrb[88].mxu0 %v10782_v62 }
 0x2c5   :  { %10338 = vmatprep.mubr.msk.bf16.mxu1 %vm10938_vm0, %v10937_v1  ;;  %10446 = vmatprep.mubr.msk.bf16.mxu0 %vm10938_vm0, %v10937_v1 }
 0x2cc   :  { %10339 = vmatmul.mubr.bf16.vlgmr.msra.gmra.mrb[60].mxu1 %v10783_v63  ;;  %10447 = vmatmul.mubr.bf16.vlgmr.msra.gmra.mrb[92].mxu0 %v10784_v0 }
 0x2cd   :  { %10395 = vmatpush3.bf16.msra.mxu1 %v12533_v15  ;;  %10503 = vmatpush3.bf16.msra.mxu0 %v12533_v15 }
 0x2ce   :  { %10396 = vmatprep.subr.bf16.mxu1 %v10937_v1  ;;  %10504 = vmatprep.subr.bf16.mxu0 %v10937_v1 }
 0x2cf   :  { %10342 = vmatprep.mubr.msk.bf16.mxu1 %vm10938_vm0, %v10937_v1  ;;  %10450 = vmatprep.mubr.msk.bf16.mxu0 %vm10938_vm0, %v10937_v1 }
 0x2d1   :  { %10397 = vmatpush3.bf16.msra.mxu1 %v12541_v26  ;;  %10505 = vmatpush3.bf16.msra.mxu0 %v12541_v26 }
 0x2d2   :  { %10398 = vmatprep.subr.bf16.mxu1 %v10937_v1  ;;  %10506 = vmatprep.subr.bf16.mxu0 %v10937_v1 }
 0x2d4   :  { %10343 = vmatmul.mubr.bf16.gmra.mrb[64].mxu1 %v10785_v2  ;;  %10451 = vmatmul.mubr.bf16.gmra.mrb[96].mxu0 %v10786_v4  ;;  %v10813_v2 = vld [vmem:[%s14199_s4 + $0x1f8] sm:$0xff]   ;;  %v10814_v4 = vld [vmem:[%s14199_s4 + $0x18c] sm:$0xff]  }
 0x2d5   :  { %10399 = vmatpush3.bf16.msra.mxu1 %v12549_v37  ;;  %10507 = vmatpush3.bf16.msra.mxu0 %v12549_v37 }
 0x2d6   :  { %10400 = vmatprep.subr.bf16.mxu1 %v10937_v1  ;;  %10508 = vmatprep.subr.bf16.mxu0 %v10937_v1 }
 0x2d7   :  { %10346 = vmatprep.mubr.msk.bf16.mxu1 %vm10938_vm0, %v10937_v1  ;;  %10454 = vmatprep.mubr.msk.bf16.mxu0 %vm10938_vm0, %v10937_v1 }
 0x2d9   :  { %10401 = vmatpush3.bf16.msra.mxu1 %v12557_v48  ;;  %10509 = vmatpush3.bf16.msra.mxu0 %v12557_v48 }
 0x2da   :  { %10402 = vmatprep.subr.bf16.mxu1 %v10937_v1  ;;  %10510 = vmatprep.subr.bf16.mxu0 %v10937_v1 }
 0x2dc   :  { %10347 = vmatmul.mubr.bf16.gmra.mrb[68].mxu1 %v10787_v5  ;;  %10455 = vmatmul.mubr.bf16.gmra.mrb[100].mxu0 %v10788_v6 }
 0x2dd   :  { %10403 = vmatpush3.bf16.msra.mxu1 %v12565_v59  ;;  %10511 = vmatpush3.bf16.msra.mxu0 %v12565_v59 }
 0x2de   :  { %10404 = vmatprep.subr.bf16.mxu1 %v10937_v1  ;;  %10512 = vmatprep.subr.bf16.mxu0 %v10937_v1 }
 0x2df   :  { %10350 = vmatprep.mubr.msk.bf16.mxu1 %vm10938_vm0, %v10937_v1  ;;  %10458 = vmatprep.mubr.msk.bf16.mxu0 %vm10938_vm0, %v10937_v1 }
 0x2e1   :  { %10405 = vmatpush3.bf16.msra.mxu1 %v12573_v8  ;;  %10513 = vmatpush3.bf16.msra.mxu0 %v12573_v8 }
 0x2e2   :  { %10406 = vmatprep.subr.bf16.mxu1 %v10937_v1  ;;  %10514 = vmatprep.subr.bf16.mxu0 %v10937_v1 }
 0x2e4   :  { %10351 = vmatmul.mubr.bf16.gmra.mrb[72].mxu1 %v10789_v7  ;;  %10459 = vmatmul.mubr.bf16.gmra.mrb[104].mxu0 %v10790_v9 }
 0x2e5   :  { %10407 = vmatpush3.bf16.msra.mxu1 %v12581_v20  ;;  %10515 = vmatpush3.bf16.msra.mxu0 %v12581_v20 }
 0x2e6   :  { %10408 = vmatprep.subr.bf16.mxu1 %v10937_v1  ;;  %10516 = vmatprep.subr.bf16.mxu0 %v10937_v1 }
 0x2e7   :  { %10354 = vmatprep.mubr.msk.bf16.mxu1 %vm10938_vm0, %v10937_v1  ;;  %10462 = vmatprep.mubr.msk.bf16.mxu0 %vm10938_vm0, %v10937_v1 }
 0x2e9   :  { %10409 = vmatpush3.bf16.msra.mxu1 %v12589_v30  ;;  %10517 = vmatpush3.bf16.msra.mxu0 %v12589_v30 }
 0x2ea   :  { %10466 = vmatprep.subr.bf16.mxu1 %v10937_v1  ;;  %10574 = vmatprep.subr.bf16.mxu0 %v10937_v1 }
 0x2ec   :  { %10355 = vmatmul.mubr.bf16.gmra.mrb[76].mxu1 %v10791_v10  ;;  %10463 = vmatmul.mubr.bf16.gmra.mrb[108].mxu0 %v10792_v11 }
 0x2ed   :  { %10410 = vmatprep.mubr.msk.bf16.mxu1 %vm10938_vm0, %v10937_v1  ;;  %10518 = vmatprep.mubr.msk.bf16.mxu0 %vm10938_vm0, %v10937_v1 }
 0x2f4   :  { %10411 = vmatmul.mubr.bf16.vlgmr.msra.gmra.mrb[80].mxu1 %v10793_v12  ;;  %10519 = vmatmul.mubr.bf16.vlgmr.msra.gmra.mrb[112].mxu0 %v10794_v13 }
 0x2f5   :  { %10467 = vmatpush3.bf16.msra.mxu1 %v12533_v15  ;;  %10575 = vmatpush3.bf16.msra.mxu0 %v12533_v15 }
 0x2f6   :  { %10468 = vmatprep.subr.bf16.mxu1 %v10937_v1  ;;  %10576 = vmatprep.subr.bf16.mxu0 %v10937_v1 }
 0x2f7   :  { %10414 = vmatprep.mubr.msk.bf16.mxu1 %vm10938_vm0, %v10937_v1  ;;  %10522 = vmatprep.mubr.msk.bf16.mxu0 %vm10938_vm0, %v10937_v1 }
 0x2f9   :  { %10469 = vmatpush3.bf16.msra.mxu1 %v12541_v26  ;;  %10577 = vmatpush3.bf16.msra.mxu0 %v12541_v26 }
 0x2fa   :  { %10470 = vmatprep.subr.bf16.mxu1 %v10937_v1  ;;  %10578 = vmatprep.subr.bf16.mxu0 %v10937_v1 }
 0x2fc   :  { %10415 = vmatmul.mubr.bf16.gmra.mrb[84].mxu1 %v10795_v14  ;;  %10523 = vmatmul.mubr.bf16.gmra.mrb[116].mxu0 %v10796_v16  ;;  %v10815_v14 = vld [vmem:[%s14199_s4 + $0x200] sm:$0xff]   ;;  %v10816_v16 = vld [vmem:[%s14199_s4 + $0x194] sm:$0xff]  }
 0x2fd   :  { %10471 = vmatpush3.bf16.msra.mxu1 %v12549_v37  ;;  %10579 = vmatpush3.bf16.msra.mxu0 %v12549_v37 }
 0x2fe   :  { %10472 = vmatprep.subr.bf16.mxu1 %v10937_v1  ;;  %10580 = vmatprep.subr.bf16.mxu0 %v10937_v1 }
 0x2ff   :  { %10418 = vmatprep.mubr.msk.bf16.mxu1 %vm10938_vm0, %v10937_v1  ;;  %10526 = vmatprep.mubr.msk.bf16.mxu0 %vm10938_vm0, %v10937_v1 }
 0x301   :  { %10473 = vmatpush3.bf16.msra.mxu1 %v12557_v48  ;;  %10581 = vmatpush3.bf16.msra.mxu0 %v12557_v48 }
 0x302   :  { %10474 = vmatprep.subr.bf16.mxu1 %v10937_v1  ;;  %10582 = vmatprep.subr.bf16.mxu0 %v10937_v1 }
 0x304   :  { %10419 = vmatmul.mubr.bf16.gmra.mrb[88].mxu1 %v10797_v17  ;;  %10527 = vmatmul.mubr.bf16.gmra.mrb[120].mxu0 %v10798_v18 }
 0x305   :  { %10475 = vmatpush3.bf16.msra.mxu1 %v12565_v59  ;;  %10583 = vmatpush3.bf16.msra.mxu0 %v12565_v59 }
 0x306   :  { %10476 = vmatprep.subr.bf16.mxu1 %v10937_v1  ;;  %10584 = vmatprep.subr.bf16.mxu0 %v10937_v1 }
 0x307   :  { %10422 = vmatprep.mubr.msk.bf16.mxu1 %vm10938_vm0, %v10937_v1  ;;  %10530 = vmatprep.mubr.msk.bf16.mxu0 %vm10938_vm0, %v10937_v1 }
 0x309   :  { %10477 = vmatpush3.bf16.msra.mxu1 %v12573_v8  ;;  %10585 = vmatpush3.bf16.msra.mxu0 %v12573_v8 }
 0x30a   :  { %10478 = vmatprep.subr.bf16.mxu1 %v10937_v1  ;;  %10586 = vmatprep.subr.bf16.mxu0 %v10937_v1 }
 0x30c   :  { %10423 = vmatmul.mubr.bf16.gmra.mrb[92].mxu1 %v10799_v19  ;;  %10531 = vmatmul.mubr.bf16.gmra.mrb[124].mxu0 %v10800_v21 }
 0x30d   :  { %10479 = vmatpush3.bf16.msra.mxu1 %v12581_v20  ;;  %10587 = vmatpush3.bf16.msra.mxu0 %v12581_v20 }
 0x30e   :  { %10480 = vmatprep.subr.bf16.mxu1 %v10937_v1  ;;  %10588 = vmatprep.subr.bf16.mxu0 %v10937_v1 }
 0x30f   :  { %10426 = vmatprep.mubr.msk.bf16.mxu1 %vm10938_vm0, %v10937_v1  ;;  %10534 = vmatprep.mubr.msk.bf16.mxu0 %vm10938_vm0, %v10937_v1 }
 0x311   :  { %10481 = vmatpush3.bf16.msra.mxu1 %v12589_v30  ;;  %10589 = vmatpush3.bf16.msra.mxu0 %v12589_v30 }
 0x312   :  { %10538 = vmatprep.subr.bf16.mxu1 %v10937_v1  ;;  %10646 = vmatprep.subr.bf16.mxu0 %v10937_v1 }
 0x314   :  { %10427 = vmatmul.mubr.bf16.gmra.mrb[96].mxu1 %v10801_v22  ;;  %10535 = vmatmul.mubr.bf16.gmra.mrb[128].mxu0 %v10802_v23 }
 0x315   :  { %10482 = vmatprep.mubr.msk.bf16.mxu1 %vm10938_vm0, %v10937_v1  ;;  %10590 = vmatprep.mubr.msk.bf16.mxu0 %vm10938_vm0, %v10937_v1 }
 0x31c   :  { %10483 = vmatmul.mubr.bf16.vlgmr.msra.gmra.mrb[100].mxu1 %v10803_v24  ;;  %10591 = vmatmul.mubr.bf16.vlgmr.msra.gmra.mrb[132].mxu0 %v10804_v25 }
 0x31d   :  { %10539 = vmatpush3.bf16.msra.mxu1 %v12533_v15  ;;  %10647 = vmatpush3.bf16.msra.mxu0 %v12533_v15 }
 0x31e   :  { %10540 = vmatprep.subr.bf16.mxu1 %v10937_v1  ;;  %10648 = vmatprep.subr.bf16.mxu0 %v10937_v1 }
 0x31f   :  { %10486 = vmatprep.mubr.msk.bf16.mxu1 %vm10938_vm0, %v10937_v1  ;;  %10594 = vmatprep.mubr.msk.bf16.mxu0 %vm10938_vm0, %v10937_v1 }
 0x321   :  { %10541 = vmatpush3.bf16.msra.mxu1 %v12541_v26  ;;  %10649 = vmatpush3.bf16.msra.mxu0 %v12541_v26 }
 0x322   :  { %10542 = vmatprep.subr.bf16.mxu1 %v10937_v1  ;;  %10650 = vmatprep.subr.bf16.mxu0 %v10937_v1 }
 0x324   :  { %10487 = vmatmul.mubr.bf16.gmra.mrb[104].mxu1 %v10805_v27  ;;  %10595 = vmatmul.mubr.bf16.gmra.mrb[136].mxu0 %v10806_v28  ;;  %v10817_v27 = vld [vmem:[%s14199_s4 + $0x208] sm:$0xff]   ;;  %v10818_v28 = vld [vmem:[%s14199_s4 + $0x19c] sm:$0xff]  }
 0x325   :  { %10543 = vmatpush3.bf16.msra.mxu1 %v12549_v37  ;;  %10651 = vmatpush3.bf16.msra.mxu0 %v12549_v37 }
 0x326   :  { %10544 = vmatprep.subr.bf16.mxu1 %v10937_v1  ;;  %10652 = vmatprep.subr.bf16.mxu0 %v10937_v1 }
 0x327   :  { %v4604_v29 = vpop.f32.mrb[0].mxu1  ;;  %10490 = vmatprep.mubr.msk.bf16.mxu1 %vm10938_vm0, %v10937_v1  ;;  %10598 = vmatprep.mubr.msk.bf16.mxu0 %vm10938_vm0, %v10937_v1  ;;  %v4880_v31 = vpop.f32.mrb[32].mxu0 }
 0x328   :  { %4643 = vst.msk [vmem:[#allocation2] sm:$0xff] %vm4642_vm1, %v4604_v29  ;;  %v10160_v32 = vpop.f32.mrb[1].mxu1  ;;  %v10232_v34 = vpop.f32.mrb[33].mxu0  ;;  %4927 = vrot.lane.b32.xlu0 %v4880_v31, %s10939_s24 }
 0x329   :  { %10545 = vmatpush3.bf16.msra.mxu1 %v12557_v48  ;;  %10653 = vmatpush3.bf16.msra.mxu0 %v12557_v48  ;;  %v4607_v35 = vpop.f32.mrb[2].mxu1  ;;  %v4883_v36 = vpop.f32.mrb[34].mxu0 }
 0x32a   :  { %4644 = vst.msk [vmem:[#allocation2 + $0x20] sm:$0xff] %vm4642_vm1, %v4607_v35  ;;  %v10161_v38 = vpop.f32.mrb[3].mxu1  ;;  %10546 = vmatprep.subr.bf16.mxu1 %v10937_v1  ;;  %10654 = vmatprep.subr.bf16.mxu0 %v10937_v1  ;;  %v10233_v39 = vpop.f32.mrb[35].mxu0 }
 0x32b   :  { %4929 = vrot.lane.b32.xlu1 %v4883_v36, %s10939_s24  ;;  %v10819_v38 = vld [vmem:[%s14199_s4 + $0x1a4] sm:$0xff]  }
 0x32c   :  { %10491 = vmatmul.mubr.bf16.gmra.mrb[108].mxu1 %v10807_v3  ;;  %10599 = vmatmul.mubr.bf16.gmra.mrb[140].mxu0 %v10808_v33 }
 0x32d   :  { %10547 = vmatpush3.bf16.msra.mxu1 %v12565_v59  ;;  %10655 = vmatpush3.bf16.msra.mxu0 %v12565_v59 }
 0x32e   :  { %10548 = vmatprep.subr.bf16.mxu1 %v10937_v1  ;;  %10656 = vmatprep.subr.bf16.mxu0 %v10937_v1 }
 0x32f   :  { %v4612_v40 = vpop.f32.mrb[4].mxu1  ;;  %10494 = vmatprep.mubr.msk.bf16.mxu1 %vm10938_vm0, %v10937_v1  ;;  %10602 = vmatprep.mubr.msk.bf16.mxu0 %vm10938_vm0, %v10937_v1  ;;  %v4888_v41 = vpop.f32.mrb[36].mxu0 }
 0x330   :  { %4645 = vst.msk [vmem:[#allocation2 + $0x40] sm:$0xff] %vm4642_vm1, %v4612_v40  ;;  %v10164_v42 = vpop.f32.mrb[5].mxu1  ;;  %v10236_v45 = vpop.f32.mrb[37].mxu0  ;;  %4931 = vrot.lane.b32.xlu0 %v4888_v41, %s10939_s24  ;;  %v10828_v40 = vld [vmem:[%s14199_s4 + $0x210] sm:$0xff]  }
 0x331   :  { %10549 = vmatpush3.bf16.msra.mxu1 %v12573_v8  ;;  %10657 = vmatpush3.bf16.msra.mxu0 %v12573_v8  ;;  %v4615_v46 = vpop.f32.mrb[6].mxu1  ;;  %v4891_v47 = vpop.f32.mrb[38].mxu0 }
 0x332   :  { %4646 = vst.msk [vmem:[#allocation2 + $0x60] sm:$0xff] %vm4642_vm1, %v4615_v46  ;;  %v10165_v49 = vpop.f32.mrb[7].mxu1  ;;  %10550 = vmatprep.subr.bf16.mxu1 %v10937_v1  ;;  %10658 = vmatprep.subr.bf16.mxu0 %v10937_v1  ;;  %v10237_v50 = vpop.f32.mrb[39].mxu0 }
 0x333   :  { %4933 = vrot.lane.b32.xlu1 %v4891_v47, %s10939_s24  ;;  %v10820_v49 = vld [vmem:[%s14199_s4 + $0x1ac] ss:$0 sps:$4 sm:$0xff]  }
 0x334   :  { %10495 = vmatmul.mubr.bf16.gmra.mrb[112].mxu1 %v10809_v43  ;;  %10603 = vmatmul.mubr.bf16.gmra.mrb[144].mxu0 %v10810_v44 }
 0x335   :  { %10551 = vmatpush3.bf16.msra.mxu1 %v12581_v20  ;;  %10659 = vmatpush3.bf16.msra.mxu0 %v12581_v20 }
 0x336   :  { %10552 = vmatprep.subr.bf16.mxu1 %v10937_v1  ;;  %10660 = vmatprep.subr.bf16.mxu0 %v10937_v1 }
 0x337   :  { %v4620_v51 = vpop.f32.mrb[8].mxu1  ;;  %10498 = vmatprep.mubr.msk.bf16.mxu1 %vm10938_vm0, %v10937_v1  ;;  %10606 = vmatprep.mubr.msk.bf16.mxu0 %vm10938_vm0, %v10937_v1  ;;  %v4896_v52 = vpop.f32.mrb[40].mxu0 }
 0x338   :  { %4647 = vst.msk [vmem:[#allocation2 + $0x80] sm:$0xff] %vm4642_vm1, %v4620_v51  ;;  %v10168_v53 = vpop.f32.mrb[9].mxu1  ;;  %v10240_v56 = vpop.f32.mrb[41].mxu0  ;;  %4935 = vrot.lane.b32.xlu0 %v4896_v52, %s10939_s24  ;;  %v10831_v51 = vld [vmem:[%s14199_s4 + $0x218] ss:$0 sps:$4 sm:$0xff]  }
 0x339   :  { %10553 = vmatpush3.bf16.msra.mxu1 %v12589_v30  ;;  %10661 = vmatpush3.bf16.msra.mxu0 %v12589_v30  ;;  %v4623_v57 = vpop.f32.mrb[10].mxu1  ;;  %v4899_v58 = vpop.f32.mrb[42].mxu0 }
 0x33a   :  { %4648 = vst.msk [vmem:[#allocation2 + $0xa0] sm:$0xff] %vm4642_vm1, %v4623_v57  ;;  %v10169_v60 = vpop.f32.mrb[11].mxu1  ;;  %10610 = vmatprep.subr.bf16.mxu1 %v10937_v1  ;;  %4937 = vrot.lane.b32.xlu1 %v4899_v58, %s10939_s24  ;;  %v10241_v61 = vpop.f32.mrb[43].mxu0 }
 0x33b   :  { %v10821_v60 = vld [vmem:[%s14199_s4 + $0x1d4] sm:$0xff]  }
 0x33c   :  { %10499 = vmatmul.mubr.bf16.gmra.mrb[116].mxu1 %v10811_v54  ;;  %10607 = vmatmul.mubr.bf16.gmra.mrb[148].mxu0 %v10812_v55 }
 0x33d   :  { %10554 = vmatprep.mubr.msk.bf16.mxu1 %vm10938_vm0, %v10937_v1  ;;  %10662 = vmatprep.mubr.msk.bf16.mxu0 %vm10938_vm0, %v10937_v1 }
 0x33f   :  { %v4628_v62 = vpop.f32.mrb[12].mxu1  ;;  %v4904_v63 = vpop.f32.mrb[44].mxu0 }
 0x340   :  { %4649 = vst.msk [vmem:[#allocation2 + $0xc0] sm:$0xff] %vm4642_vm1, %v4628_v62  ;;  %v10172_v0 = vpop.f32.mrb[13].mxu1  ;;  %v10244_v5 = vpop.f32.mrb[45].mxu0  ;;  %4939 = vrot.lane.b32.xlu0 %v4904_v63, %s10939_s24 }
 0x341   :  { %v4631_v6 = vpop.f32.mrb[14].mxu1  ;;  %v4907_v7 = vpop.f32.mrb[46].mxu0 }
 0x342   :  { %4650 = vst.msk [vmem:[#allocation2 + $0xe0] sm:$0xff] %vm4642_vm1, %v4631_v6  ;;  %v10173_v9 = vpop.f32.mrb[15].mxu1  ;;  %4941 = vrot.lane.b32.xlu1 %v4907_v7, %s10939_s24  ;;  %v10245_v10 = vpop.f32.mrb[47].mxu0 }
 0x343   :  { %v10822_v9 = vld [vmem:[%s14199_s4 + $0x1dc] sm:$0xff]  }
 0x344   :  { %10663 = vmatmul.mubr.bf16.vlgmr.msra.gmra.mrb[152].mxu0 %v10813_v2  ;;  %10555 = vmatmul.mubr.bf16.vlgmr.msra.gmra.mrb[120].mxu1 %v10814_v4 }
 0x345   :  { %10611 = vmatpush3.bf16.msra.mxu1 %v12533_v15  ;;  %10558 = vmatprep.mubr.msk.bf16.mxu1 %vm10938_vm0, %v10937_v1 }
 0x346   :  { %10612 = vmatprep.subr.bf16.mxu1 %v10937_v1  ;;  %10666 = vmatprep.mubr.msk.bf16.mxu0 %vm10938_vm0, %v10937_v1 }
 0x347   :  { %v4636_v11 = vpop.f32.mrb[16].mxu1  ;;  %v13114_v12 = vpop.f32.mrb[48].mxu0 }
 0x348   :  { %4651 = vst.msk [vmem:[#allocation2 + $0x100] sm:$0xff] %vm4642_vm1, %v4636_v11  ;;  %v10176_v13 = vpop.f32.mrb[17].mxu1  ;;  %v10248_v17 = vpop.f32.mrb[49].mxu0 }
 0x349   :  { %10613 = vmatpush3.bf16.msra.mxu1 %v12541_v26  ;;  %v4639_v18 = vpop.f32.mrb[18].mxu1  ;;  %v4915_v19 = vpop.f32.mrb[50].mxu0 }
 0x34a   :  { %v10177_v21 = vpop.f32.mrb[19].mxu1  ;;  %10614 = vmatprep.subr.bf16.mxu1 %v10937_v1  ;;  %v10249_v22 = vpop.f32.mrb[51].mxu0  ;;  %v10823_v18 = vld [vmem:[%s14199_s4 + $0x1e4] sm:$0xff]  }
 0x34c   :  { %10667 = vmatmul.mubr.bf16.gmra.mrb[156].mxu0 %v10815_v14  ;;  %10559 = vmatmul.mubr.bf16.gmra.mrb[124].mxu1 %v10816_v16 }
 0x34d   :  { %10615 = vmatpush3.bf16.msra.mxu1 %v12549_v37  ;;  %10562 = vmatprep.mubr.msk.bf16.mxu1 %vm10938_vm0, %v10937_v1 }
 0x34e   :  { %10616 = vmatprep.subr.bf16.mxu1 %v10937_v1  ;;  %10670 = vmatprep.mubr.msk.bf16.mxu0 %vm10938_vm0, %v10937_v1 }
 0x34f   :  { %v4724_v23 = vpop.f32.mrb[20].mxu1  ;;  %v5192_v24 = vpop.f32.mrb[52].mxu0 }
 0x350   :  { %4771 = vrot.lane.b32.xlu1 %v4724_v23, %s10940_s23  ;;  %v10196_v25 = vpop.f32.mrb[21].mxu1  ;;  %5230 = vst.msk [vmem:[#allocation2 + $0x8] sm:$0xff] %vm4642_vm1, %v5192_v24  ;;  %v10304_v29 = vpop.f32.mrb[53].mxu0 }
 0x351   :  { %10617 = vmatpush3.bf16.msra.mxu1 %v12557_v48  ;;  %v4727_v31 = vpop.f32.mrb[22].mxu1  ;;  %v5195_v32 = vpop.f32.mrb[54].mxu0 }
 0x352   :  { %v10197_v3 = vpop.f32.mrb[23].mxu1  ;;  %10618 = vmatprep.subr.bf16.mxu1 %v10937_v1  ;;  %5231 = vst.msk [vmem:[#allocation2 + $0x28] sm:$0xff] %vm4642_vm1, %v5195_v32  ;;  %v10305_v33 = vpop.f32.mrb[55].mxu0 }
 0x354   :  { %10671 = vmatmul.mubr.bf16.gmra.mrb[160].mxu0 %v10817_v27  ;;  %10563 = vmatmul.mubr.bf16.gmra.mrb[128].mxu1 %v10818_v28  ;;  %v10824_v27 = vld [vmem:[%s14199_s4 + $0x1ec] sm:$0xff]  }
 0x355   :  { %10619 = vmatpush3.bf16.msra.mxu1 %v12565_v59  ;;  %4773 = vrot.lane.b32.xlu1 %v4727_v31, %s10940_s23 }
 0x356   :  { %10620 = vmatprep.subr.bf16.mxu1 %v10937_v1  ;;  %10566 = vmatprep.mubr.msk.bf16.mxu1 %vm10938_vm0, %v10937_v1 }
 0x357   :  { %v4732_v34 = vpop.f32.mrb[24].mxu1  ;;  %v5200_v35 = vpop.f32.mrb[56].mxu0  ;;  %10674 = vmatprep.mubr.msk.bf16.mxu0 %vm10938_vm0, %v10937_v1 }
 0x358   :  { %4775 = vrot.lane.b32.xlu0 %v4732_v34, %s10940_s23  ;;  %v10200_v36 = vpop.f32.mrb[25].mxu1  ;;  %5232 = vst.msk [vmem:[#allocation2 + $0x48] sm:$0xff] %vm4642_vm1, %v5200_v35  ;;  %v10308_v39 = vpop.f32.mrb[57].mxu0  ;;  %v10825_v34 = vld [vmem:[%s14199_s4 + $0x1f4] ss:$0 sps:$4 sm:$0xff]  }
 0x359   :  { %10621 = vmatpush3.bf16.msra.mxu1 %v12573_v8  ;;  %v4735_v41 = vpop.f32.mrb[26].mxu1  ;;  %v5203_v42 = vpop.f32.mrb[58].mxu0 }
 0x35a   :  { %4777 = vrot.lane.b32.xlu1 %v4735_v41, %s10940_s23  ;;  %v10201_v43 = vpop.f32.mrb[27].mxu1  ;;  %10622 = vmatprep.subr.bf16.mxu1 %v10937_v1  ;;  %5233 = vst.msk [vmem:[#allocation2 + $0x68] sm:$0xff] %vm4642_vm1, %v5203_v42  ;;  %v10309_v44 = vpop.f32.mrb[59].mxu0  ;;  %v10826_v42 = vld [vmem:[%s14199_s4 + $0x21c] sm:$0xff]  }
 0x35c   :  { %10567 = vmatmul.mubr.bf16.gmra.mrb[132].mxu1 %v10819_v38  ;;  %10675 = vmatmul.mubr.bf16.gmra.mrb[164].mxu0 %v10828_v40 }
 0x35d   :  { %10623 = vmatpush3.bf16.msra.mxu1 %v12581_v20  ;;  %10570 = vmatprep.mubr.msk.bf16.mxu1 %vm10938_vm0, %v10937_v1 }
 0x35e   :  { %10624 = vmatprep.subr.bf16.mxu1 %v10937_v1  ;;  %10678 = vmatprep.mubr.msk.bf16.mxu0 %vm10938_vm0, %v10937_v1 }
 0x35f   :  { %v4740_v45 = vpop.f32.mrb[28].mxu1  ;;  %v5208_v46 = vpop.f32.mrb[60].mxu0 }
 0x360   :  { %4779 = vrot.lane.b32.xlu0 %v4740_v45, %s10940_s23  ;;  %v10204_v47 = vpop.f32.mrb[29].mxu1  ;;  %5234 = vst.msk [vmem:[#allocation2 + $0x88] sm:$0xff] %vm4642_vm1, %v5208_v46  ;;  %v10312_v50 = vpop.f32.mrb[61].mxu0 }
 0x361   :  { %10625 = vmatpush3.bf16.msra.mxu1 %v12589_v30  ;;  %v4743_v52 = vpop.f32.mrb[30].mxu1  ;;  %v5211_v53 = vpop.f32.mrb[62].mxu0 }
 0x362   :  { %4781 = vrot.lane.b32.xlu1 %v4743_v52, %s10940_s23  ;;  %v10205_v54 = vpop.f32.mrb[31].mxu1  ;;  %10682 = vmatprep.subr.bf16.mxu1 %v10937_v1  ;;  %5235 = vst.msk [vmem:[#allocation2 + $0xa8] sm:$0xff] %vm4642_vm1, %v5211_v53  ;;  %v10313_v55 = vpop.f32.mrb[63].mxu0 }
 0x364   :  { %10571 = vmatmul.mubr.bf16.gmra.mrb[136].mxu1 %v10820_v49  ;;  %10679 = vmatmul.mubr.bf16.gmra.mrb[168].mxu0 %v10831_v51  ;;  %v10827_v51 = vld [vmem:[%s14199_s4 + $0x224] sm:$0xff]  }
 0x365   :  { %10626 = vmatprep.mubr.msk.bf16.mxu1 %vm10938_vm0, %v10937_v1 }
 0x367   :  { %v4748_v56 = vpop.f32.mrb[32].mxu1  ;;  %v5216_v57 = vpop.f32.mrb[64].mxu0 }
 0x368   :  { %4783 = vrot.lane.b32.xlu0 %v4748_v56, %s10940_s23  ;;  %v10208_v58 = vpop.f32.mrb[33].mxu1  ;;  %5236 = vst.msk [vmem:[#allocation2 + $0xc8] sm:$0xff] %vm4642_vm1, %v5216_v57  ;;  %v10316_v61 = vpop.f32.mrb[65].mxu0 }
 0x369   :  { %v4751_v62 = vpop.f32.mrb[34].mxu1  ;;  %v5219_v63 = vpop.f32.mrb[66].mxu0  ;;  %v10829_v61 = vld [vmem:[%s14199_s4 + $0x22c] sm:$0xff]  }
 0x36a   :  { %4785 = vrot.lane.b32.xlu1 %v4751_v62, %s10940_s23  ;;  %v10209_v0 = vpop.f32.mrb[35].mxu1  ;;  %5237 = vst.msk [vmem:[#allocation2 + $0xe8] sm:$0xff] %vm4642_vm1, %v5219_v63  ;;  %v10317_v2 = vpop.f32.mrb[67].mxu0 }
 0x36c   :  { %10627 = vmatmul.mubr.bf16.vlgmr.msra.gmra.mrb[140].mxu1 %v10821_v60 }
 0x36d   :  { %10683 = vmatpush3.bf16.msra.mxu1 %v12533_v15  ;;  %10630 = vmatprep.mubr.msk.bf16.mxu1 %vm10938_vm0, %v10937_v1 }
 0x36e   :  { %10684 = vmatprep.subr.bf16.mxu1 %v10937_v1 }
 0x36f   :  { %v13192_v4 = vpop.f32.mrb[36].mxu1  ;;  %v5224_v5 = vpop.f32.mrb[68].mxu0 }
 0x370   :  { %v10212_v6 = vpop.f32.mrb[37].mxu1  ;;  %5238 = vst.msk [vmem:[#allocation2 + $0x108] sm:$0xff] %vm4642_vm1, %v5224_v5  ;;  %v10320_v7 = vpop.f32.mrb[69].mxu0 }
 0x371   :  { %10685 = vmatpush3.bf16.msra.mxu1 %v12541_v26  ;;  %v4759_v10 = vpop.f32.mrb[38].mxu1  ;;  %v5227_v15 = vpop.f32.mrb[70].mxu0 }
 0x372   :  { %v10213_v11 = vpop.f32.mrb[39].mxu1  ;;  %10686 = vmatprep.subr.bf16.mxu1 %v10937_v1  ;;  %v10321_v13 = vpop.f32.mrb[71].mxu0  ;;  %v10833_v10 = vld [vmem:[%s14200_s5 + $0x40] sm:$0xff]  }
 0x373   :  { %v10830_v11 = vld [vmem:[%s14199_s4 + $0x234] sm:$0xff]   ;;  %9957 = vmatprep.subr.bf16.mxu0 %v10833_v10 }
 0x374   :  { %10631 = vmatmul.mubr.bf16.gmra.mrb[144].mxu1 %v10822_v9 }
 0x375   :  { %10687 = vmatpush3.bf16.msra.mxu1 %v12549_v37  ;;  %10634 = vmatprep.mubr.msk.bf16.mxu1 %vm10938_vm0, %v10937_v1 }
 0x376   :  { %10688 = vmatprep.subr.bf16.mxu1 %v10937_v1 }
 0x377   :  { %v5036_v14 = vpop.f32.mrb[40].mxu1  ;;  %v5466_v16 = vpop.f32.mrb[72].mxu0 }
 0x378   :  { %v10376_v17 = vpop.f32.mrb[73].mxu0  ;;  %5513 = vrot.lane.b32.xlu0 %v5466_v16, %s10939_s24  ;;  %v10268_v26 = vpop.f32.mrb[41].mxu1 }
 0x379   :  { %10689 = vmatpush3.bf16.msra.mxu1 %v12557_v48  ;;  %v5039_v19 = vpop.f32.mrb[42].mxu1  ;;  %v5469_v21 = vpop.f32.mrb[74].mxu0 }
 0x37a   :  { %5515 = vrot.lane.b32.xlu1 %v5469_v21, %s10939_s24  ;;  %v10269_v37 = vpop.f32.mrb[43].mxu1  ;;  %10690 = vmatprep.subr.bf16.mxu1 %v10937_v1  ;;  %v10377_v22 = vpop.f32.mrb[75].mxu0  ;;  %v10836_v21 = vld [vmem:[%s14200_s5 + $0x8] sm:$0xff]  }
 0x37c   :  { %10635 = vmatmul.mubr.bf16.gmra.mrb[148].mxu1 %v10823_v18  ;;  %5083 = vrot.lane.b32.xlu0 %v5036_v14, %s10941_s27  ;;  %v10834_v14 = vld [vmem:[%s14200_s5] sm:$0xff]  }
 0x37d   :  { %10691 = vmatpush3.bf16.msra.mxu1 %v12565_v59  ;;  %10638 = vmatprep.mubr.msk.bf16.mxu1 %vm10938_vm0, %v10937_v1 }
 0x37e   :  { %5085 = vrot.lane.b32.xlu1 %v5039_v19, %s10941_s27  ;;  %10692 = vmatprep.subr.bf16.mxu1 %v10937_v1  ;;  %v10835_v19 = vld [vmem:[%s14200_s5 + $0x48] sm:$0xff]  }
 0x37f   :  { %v5044_v48 = vpop.f32.mrb[44].mxu1  ;;  %v5474_v23 = vpop.f32.mrb[76].mxu0  ;;  %9958 = vmatpush3.bf16.msra.mxu0 %v10834_v14 }
 0x380   :  { %v10380_v24 = vpop.f32.mrb[77].mxu0  ;;  %5517 = vrot.lane.b32.xlu0 %v5474_v23, %s10939_s24  ;;  %v10272_v25 = vpop.f32.mrb[45].mxu1  ;;  %9959 = vmatprep.subr.bf16.mxu0 %v10835_v19 }
 0x381   :  { %10693 = vmatpush3.bf16.msra.mxu1 %v12573_v8  ;;  %v5047_v59 = vpop.f32.mrb[46].mxu1  ;;  %v5477_v28 = vpop.f32.mrb[78].mxu0  ;;  %v10837_v24 = vld [vmem:[%s14200_s5 + $0x50] sm:$0xff]  }
 0x382   :  { %5519 = vrot.lane.b32.xlu1 %v5477_v28, %s10939_s24  ;;  %v10273_v29 = vpop.f32.mrb[47].mxu1  ;;  %10694 = vmatprep.subr.bf16.mxu1 %v10937_v1  ;;  %v10381_v31 = vpop.f32.mrb[79].mxu0  ;;  %v10838_v28 = vld [vmem:[%s14200_s5 + $0x10] sm:$0xff]  }
 0x383   :  { %9960 = vmatpush3.bf16.msra.mxu0 %v10836_v21 }
 0x384   :  { %10639 = vmatmul.mubr.bf16.gmra.mrb[152].mxu1 %v10824_v27  ;;  %5087 = vrot.lane.b32.xlu0 %v5044_v48, %s10941_s27 }
 0x385   :  { %10695 = vmatpush3.bf16.msra.mxu1 %v12581_v20  ;;  %10642 = vmatprep.mubr.msk.bf16.mxu1 %vm10938_vm0, %v10937_v1 }
 0x386   :  { %5089 = vrot.lane.b32.xlu1 %v5047_v59, %s10941_s27  ;;  %10696 = vmatprep.subr.bf16.mxu1 %v10937_v1  ;;  %v10832_v59 = vld [vmem:[%s14199_s4 + $0x23c] ss:$0 sps:$4 sm:$0xff]  }
 0x387   :  { %v5052_v8 = vpop.f32.mrb[48].mxu1  ;;  %v5482_v32 = vpop.f32.mrb[80].mxu0  ;;  %9961 = vmatprep.subr.bf16.mxu0 %v10837_v24 }
 0x388   :  { %v10384_v3 = vpop.f32.mrb[81].mxu0  ;;  %5521 = vrot.lane.b32.xlu0 %v5482_v32, %s10939_s24  ;;  %v10276_v33 = vpop.f32.mrb[49].mxu1  ;;  %9962 = vmatpush3.bf16.msra.mxu0 %v10838_v28 }
 0x389   :  { %10697 = vmatpush3.bf16.msra.mxu1 %v12589_v30  ;;  %v5055_v20 = vpop.f32.mrb[50].mxu1  ;;  %v5485_v35 = vpop.f32.mrb[82].mxu0  ;;  %v10839_v3 = vld [vmem:[%s14200_s5 + $0x58] sm:$0xff]  }
 0x38a   :  { %5523 = vrot.lane.b32.xlu1 %v5485_v35, %s10939_s24  ;;  %v10277_v36 = vpop.f32.mrb[51].mxu1  ;;  %v10385_v38 = vpop.f32.mrb[83].mxu0  ;;  %v10840_v33 = vld [vmem:[%s14200_s5 + $0x18] sm:$0xff]   ;;  %9963 = vmatprep.subr.bf16.mxu0 %v10839_v3 }
 0x38b   :  { %v10841_v38 = vld [vmem:[%s14200_s5 + $0x60] sm:$0xff]  }
 0x38c   :  { %10643 = vmatmul.mubr.bf16.gmra.mrb[156].mxu1 %v10825_v34  ;;  %5091 = vrot.lane.b32.xlu0 %v5052_v8, %s10941_s27 }
 0x38d   :  { %10698 = vmatprep.mubr.msk.bf16.mxu1 %vm10938_vm0, %v10937_v1  ;;  %9964 = vmatpush3.bf16.msra.mxu0 %v10840_v33 }
 0x38e   :  { %5093 = vrot.lane.b32.xlu1 %v5055_v20, %s10941_s27  ;;  %9965 = vmatprep.subr.bf16.mxu0 %v10841_v38 }
 0x38f   :  { %v5060_v39 = vpop.f32.mrb[52].mxu1  ;;  %v5490_v40 = vpop.f32.mrb[84].mxu0 }
 0x390   :  { %v10388_v41 = vpop.f32.mrb[85].mxu0  ;;  %5525 = vrot.lane.b32.xlu0 %v5490_v40, %s10939_s24  ;;  %v10280_v30 = vpop.f32.mrb[53].mxu1 }
 0x391   :  { %v5063_v43 = vpop.f32.mrb[54].mxu1  ;;  %v5493_v44 = vpop.f32.mrb[86].mxu0  ;;  %v10842_v41 = vld [vmem:[%s14200_s5 + $0x20] sm:$0xff]  }
 0x392   :  { %5527 = vrot.lane.b32.xlu1 %v5493_v44, %s10939_s24  ;;  %v10281_v45 = vpop.f32.mrb[55].mxu1  ;;  %v10389_v46 = vpop.f32.mrb[87].mxu0  ;;  %9966 = vmatpush3.bf16.msra.mxu0 %v10842_v41 }
 0x393   :  { %v10843_v45 = vld [vmem:[%s14200_s5 + $0x68] sm:$0xff]  }
 0x394   :  { %10699 = vmatmul.mubr.bf16.vlgmr.msra.gmra.mrb[160].mxu1 %v10826_v42  ;;  %5095 = vrot.lane.b32.xlu0 %v5060_v39, %s10941_s27 }
 0x395   :  { %10702 = vmatprep.mubr.msk.bf16.mxu1 %vm10938_vm0, %v10937_v1  ;;  %9967 = vmatprep.subr.bf16.mxu0 %v10843_v45 }
 0x396   :  { %5097 = vrot.lane.b32.xlu1 %v5063_v43, %s10941_s27 }
 0x397   :  { %v13249_v47 = vpop.f32.mrb[56].mxu1  ;;  %v13251_v49 = vpop.f32.mrb[88].mxu0 }
 0x398   :  { %v10284_v50 = vpop.f32.mrb[57].mxu1  ;;  %v10392_v52 = vpop.f32.mrb[89].mxu0 }
 0x399   :  { %v5071_v53 = vpop.f32.mrb[58].mxu1  ;;  %v5501_v54 = vpop.f32.mrb[90].mxu0  ;;  %v10844_v50 = vld [vmem:[%s14200_s5 + $0x28] sm:$0xff]  }
 0x39a   :  { %v10285_v55 = vpop.f32.mrb[59].mxu1  ;;  %v10393_v56 = vpop.f32.mrb[91].mxu0  ;;  %9968 = vmatpush3.bf16.msra.mxu0 %v10844_v50  ;;  %v10845_v54 = vld [vmem:[%s14200_s5 + $0x70] sm:$0xff]  }
 0x39b   :  { %v13292_v22 = vpop.permute.xlu0 %4927  ;;  %9969 = vmatprep.subr.bf16.mxu0 %v10845_v54 }
 0x39c   :  { %10703 = vmatmul.mubr.bf16.gmra.mrb[164].mxu1 %v10827_v51 }
 0x39d   :  { %10706 = vmatprep.mubr.msk.bf16.mxu1 %vm10938_vm0, %v10937_v1  ;;  %v13267_v6 = vpop.permute.xlu1 %4929 }
 0x39f   :  { %v5311_v57 = vpop.f32.mrb[60].mxu1  ;;  %v5776_v58 = vpop.f32.mrb[92].mxu0 }
 0x3a0   :  { %5358 = vrot.lane.b32.xlu0 %v5311_v57, %s10940_s23  ;;  %v10340_v60 = vpop.f32.mrb[61].mxu1  ;;  %5814 = vst.msk [vmem:[#allocation2 + $0x10] sm:$0xff] %vm4642_vm1, %v5776_v58  ;;  %v10448_v62 = vpop.f32.mrb[93].mxu0  ;;  %v10846_v57 = vld [vmem:[%s14200_s5 + $0x30] sm:$0xff]  }
 0x3a1   :  { %v5314_v63 = vpop.f32.mrb[62].mxu1  ;;  %v5779_v0 = vpop.f32.mrb[94].mxu0  ;;  %9970 = vmatpush3.bf16.msra.mxu0 %v10846_v57 }
 0x3a2   :  { %v10341_v2 = vpop.f32.mrb[63].mxu1  ;;  %5815 = vst.msk [vmem:[#allocation2 + $0x30] sm:$0xff] %vm4642_vm1, %v5779_v0  ;;  %v10449_v5 = vpop.f32.mrb[95].mxu0  ;;  %v10847_v0 = vld [vmem:[%s14200_s5 + $0x78] sm:$0xff]  }
 0x3a3   :  { %v13315_v20 = vpop.permute.xlu0 %4931  ;;  %v10848_v5 = vld [vmem:[%s14200_s5 + $0x38] sm:$0xff]   ;;  %9971 = vmatprep.subr.bf16.mxu0 %v10847_v0 }
 0x3a4   :  { %10707 = vmatmul.mubr.bf16.gmra.mrb[168].mxu1 %v10829_v61  ;;  %5360 = vrot.lane.b32.xlu0 %v5314_v63, %s10940_s23 }
 0x3a5   :  { %10710 = vmatprep.mubr.msk.bf16.mxu1 %vm10938_vm0, %v10937_v1  ;;  %v13290_v37 = vpop.permute.xlu1 %4933  ;;  %9972 = vmatpush3.bf16.msra.mxu0 %v10848_v5 }
 0x3a7   :  { %v5319_v7 = vpop.f32.mrb[64].mxu1  ;;  %v5784_v9 = vpop.f32.mrb[96].mxu0 }
 0x3a8   :  { %5362 = vrot.lane.b32.xlu0 %v5319_v7, %s10940_s23  ;;  %v10344_v15 = vpop.f32.mrb[65].mxu1  ;;  %5816 = vst.msk [vmem:[#allocation2 + $0x50] sm:$0xff] %vm4642_vm1, %v5784_v9  ;;  %v10452_v13 = vpop.f32.mrb[97].mxu0 }
 0x3a9   :  { %v5322_v16 = vpop.f32.mrb[66].mxu1  ;;  %v5787_v17 = vpop.f32.mrb[98].mxu0 }
 0x3aa   :  { %5364 = vrot.lane.b32.xlu1 %v5322_v16, %s10940_s23  ;;  %v10345_v26 = vpop.f32.mrb[67].mxu1  ;;  %5817 = vst.msk [vmem:[#allocation2 + $0x70] sm:$0xff] %vm4642_vm1, %v5787_v17  ;;  %v10453_v18 = vpop.f32.mrb[99].mxu0 }
 0x3ab   :  { %v4936_v51 = vpop.permute.xlu0 %4935 }
 0x3ac   :  { %10711 = vmatmul.mubr.bf16.gmra.mrb[172].mxu1 %v10830_v11  ;;  %v13313_v34 = vpop.permute.xlu1 %4937 }
 0x3ad   :  { %10714 = vmatprep.mubr.msk.bf16.mxu1 %vm10938_vm0, %v10937_v1 }
 0x3af   :  { %v5327_v48 = vpop.f32.mrb[68].mxu1  ;;  %v5792_v23 = vpop.f32.mrb[100].mxu0 }
 0x3b0   :  { %5366 = vrot.lane.b32.xlu0 %v5327_v48, %s10940_s23  ;;  %v10348_v25 = vpop.f32.mrb[69].mxu1  ;;  %5818 = vst.msk [vmem:[#allocation2 + $0x90] sm:$0xff] %vm4642_vm1, %v5792_v23  ;;  %v10456_v27 = vpop.f32.mrb[101].mxu0 }
 0x3b1   :  { %v5330_v29 = vpop.f32.mrb[70].mxu1  ;;  %v5795_v31 = vpop.f32.mrb[102].mxu0 }
 0x3b2   :  { %5368 = vrot.lane.b32.xlu1 %v5330_v29, %s10940_s23  ;;  %v10349_v8 = vpop.f32.mrb[71].mxu1  ;;  %5819 = vst.msk [vmem:[#allocation2 + $0xb0] sm:$0xff] %vm4642_vm1, %v5795_v31  ;;  %v10457_v32 = vpop.f32.mrb[103].mxu0 }
 0x3b3   :  { %v4940_v2 = vpop.permute.xlu0 %4939 }
 0x3b4   :  { %10715 = vmatmul.mubr.bf16.gmra.mrb[176].mxu1 %v10832_v59  ;;  %v13330_v46 = vpop.permute.xlu1 %4941 }
 0x3b7   :  { %v5335_v35 = vpop.f32.mrb[72].mxu1  ;;  %v5800_v36 = vpop.f32.mrb[104].mxu0 }
 0x3b8   :  { %5370 = vrot.lane.b32.xlu0 %v5335_v35, %s10940_s23  ;;  %v10352_v39 = vpop.f32.mrb[73].mxu1  ;;  %5820 = vst.msk [vmem:[#allocation2 + $0xd0] sm:$0xff] %vm4642_vm1, %v5800_v36  ;;  %v10460_v40 = vpop.f32.mrb[105].mxu0 }
 0x3b9   :  { %v5338_v30 = vpop.f32.mrb[74].mxu1  ;;  %v5803_v42 = vpop.f32.mrb[106].mxu0 }
 0x3ba   :  { %5372 = vrot.lane.b32.xlu1 %v5338_v30, %s10940_s23  ;;  %v10353_v43 = vpop.f32.mrb[75].mxu1  ;;  %5821 = vst.msk [vmem:[#allocation2 + $0xf0] sm:$0xff] %vm4642_vm1, %v5803_v42  ;;  %v10461_v44 = vpop.f32.mrb[107].mxu0 }
 0x3bf   :  { %v13335_v52 = vpop.f32.mrb[76].mxu1  ;;  %v5808_v53 = vpop.f32.mrb[108].mxu0 }
 0x3c0   :  { %v10356_v55 = vpop.f32.mrb[77].mxu1  ;;  %5822 = vst.msk [vmem:[#allocation2 + $0x110] sm:$0xff] %vm4642_vm1, %v5808_v53  ;;  %v10464_v56 = vpop.f32.mrb[109].mxu0 }
 0x3c1   :  { %v5346_v58 = vpop.f32.mrb[78].mxu1  ;;  %v5811_v60 = vpop.f32.mrb[110].mxu0 }
 0x3c2   :  { %v4772_v61 = vpop.permute.xlu1 %4771  ;;  %v10357_v62 = vpop.f32.mrb[79].mxu1 }
 0x3c3   :  { %4799 = vst.msk [vmem:[#allocation2] sm:$0xff] %vm4798_vm2, %v4772_v61  ;;  %v10465_v63 = vpop.f32.mrb[111].mxu0 }
 0x3c4   :  { %4955 = vst.msk [vmem:[#allocation2] sm:$0xff] %vm4954_vm3, %v13292_v22 }
 0x3c7   :  { %v4774_v7 = vpop.permute.xlu1 %4773  ;;  %v5621_v9 = vpop.f32.mrb[80].mxu1 }
 0x3c8   :  { %4800 = vst.msk [vmem:[#allocation2 + $0x20] sm:$0xff] %vm4798_vm2, %v4774_v7  ;;  %v10412_v10 = vpop.f32.mrb[81].mxu1  ;;  %5668 = vrot.lane.b32.xlu0 %v5621_v9, %s10941_s27  ;;  %v6050_v15 = vpop.f32.mrb[112].mxu0 }
 0x3c9   :  { %v5624_v11 = vpop.f32.mrb[82].mxu1  ;;  %v10520_v13 = vpop.f32.mrb[113].mxu0  ;;  %4956 = vst.msk [vmem:[#allocation2 + $0x20] sm:$0xff] %vm4954_vm3, %v13267_v6 }
 0x3ca   :  { %v4776_v14 = vpop.permute.xlu0 %4775  ;;  %5670 = vrot.lane.b32.xlu1 %v5624_v11, %s10941_s27  ;;  %v10413_v16 = vpop.f32.mrb[83].mxu1 }
 0x3cb   :  { %4801 = vst.msk [vmem:[#allocation2 + $0x40] sm:$0xff] %vm4798_vm2, %v4776_v14  ;;  %v6053_v17 = vpop.f32.mrb[114].mxu0 }
 0x3cc   :  { %v4778_v26 = vpop.permute.xlu1 %4777  ;;  %6097 = vrot.lane.b32.xlu0 %v6050_v15, %s10939_s24  ;;  %v10521_v18 = vpop.f32.mrb[115].mxu0  ;;  %4957 = vst.msk [vmem:[#allocation2 + $0x40] sm:$0xff] %vm4954_vm3, %v13315_v20 }
 0x3cd   :  { %4802 = vst.msk [vmem:[#allocation2 + $0x60] sm:$0xff] %vm4798_vm2, %v4778_v26 }
 0x3ce   :  { %6099 = vrot.lane.b32.xlu1 %v6053_v17, %s10939_s24  ;;  %4958 = vst.msk [vmem:[#allocation2 + $0x60] sm:$0xff] %vm4954_vm3, %v13290_v37 }
 0x3cf   :  { %v5629_v6 = vpop.f32.mrb[84].mxu1  ;;  %v6058_v19 = vpop.f32.mrb[116].mxu0 }
 0x3d0   :  { %v10416_v21 = vpop.f32.mrb[85].mxu1  ;;  %5672 = vrot.lane.b32.xlu0 %v5629_v6, %s10941_s27  ;;  %v10524_v22 = vpop.f32.mrb[117].mxu0 }
 0x3d1   :  { %v5632_v48 = vpop.f32.mrb[86].mxu1  ;;  %v6061_v23 = vpop.f32.mrb[118].mxu0 }
 0x3d2   :  { %v4780_v24 = vpop.permute.xlu0 %4779  ;;  %5674 = vrot.lane.b32.xlu1 %v5632_v48, %s10941_s27  ;;  %v10417_v25 = vpop.f32.mrb[87].mxu1 }
 0x3d3   :  { %4803 = vst.msk [vmem:[#allocation2 + $0x80] sm:$0xff] %vm4798_vm2, %v4780_v24  ;;  %v10525_v27 = vpop.f32.mrb[119].mxu0 }
 0x3d4   :  { %v4782_v59 = vpop.permute.xlu1 %4781  ;;  %6101 = vrot.lane.b32.xlu0 %v6058_v19, %s10939_s24  ;;  %4959 = vst.msk [vmem:[#allocation2 + $0x80] sm:$0xff] %vm4954_vm3, %v4936_v51 }
 0x3d5   :  { %4804 = vst.msk [vmem:[#allocation2 + $0xa0] sm:$0xff] %vm4798_vm2, %v4782_v59 }
 0x3d6   :  { %6103 = vrot.lane.b32.xlu1 %v6061_v23, %s10939_s24  ;;  %4960 = vst.msk [vmem:[#allocation2 + $0xa0] sm:$0xff] %vm4954_vm3, %v13313_v34 }
 0x3d7   :  { %v5637_v37 = vpop.f32.mrb[88].mxu1  ;;  %v6066_v28 = vpop.f32.mrb[120].mxu0 }
 0x3d8   :  { %v10420_v29 = vpop.f32.mrb[89].mxu1  ;;  %5676 = vrot.lane.b32.xlu0 %v5637_v37, %s10941_s27  ;;  %v10528_v31 = vpop.f32.mrb[121].mxu0 }
 0x3d9   :  { %v5640_v8 = vpop.f32.mrb[90].mxu1  ;;  %v6069_v32 = vpop.f32.mrb[122].mxu0 }
 0x3da   :  { %v4784_v3 = vpop.permute.xlu0 %4783  ;;  %5678 = vrot.lane.b32.xlu1 %v5640_v8, %s10941_s27  ;;  %v10421_v33 = vpop.f32.mrb[91].mxu1 }
 0x3db   :  { %4805 = vst.msk [vmem:[#allocation2 + $0xc0] sm:$0xff] %vm4798_vm2, %v4784_v3  ;;  %v10529_v20 = vpop.f32.mrb[123].mxu0 }
 0x3dc   :  { %v4786_v35 = vpop.permute.xlu1 %4785  ;;  %6105 = vrot.lane.b32.xlu0 %v6066_v28, %s10939_s24  ;;  %4961 = vst.msk [vmem:[#allocation2 + $0xc0] sm:$0xff] %vm4954_vm3, %v4940_v2 }
 0x3dd   :  { %4806 = vst.msk [vmem:[#allocation2 + $0xe0] sm:$0xff] %vm4798_vm2, %v4786_v35 }
 0x3de   :  { %6107 = vrot.lane.b32.xlu1 %v6069_v32, %s10939_s24  ;;  %4962 = vst.msk [vmem:[#allocation2 + $0xe0] sm:$0xff] %vm4954_vm3, %v13330_v46 }
 0x3df   :  { %v5645_v34 = vpop.f32.mrb[92].mxu1  ;;  %v13384_v36 = vpop.f32.mrb[124].mxu0 }
 0x3e0   :  { %v10424_v38 = vpop.f32.mrb[93].mxu1  ;;  %5680 = vrot.lane.b32.xlu0 %v5645_v34, %s10941_s27  ;;  %v10532_v39 = vpop.f32.mrb[125].mxu0 }
 0x3e1   :  { %v5648_v40 = vpop.f32.mrb[94].mxu1  ;;  %v13387_v41 = vpop.f32.mrb[126].mxu0 }
 0x3e2   :  { %5682 = vrot.lane.b32.xlu1 %v5648_v40, %s10941_s27  ;;  %v10425_v30 = vpop.f32.mrb[95].mxu1  ;;  %v10533_v42 = vpop.f32.mrb[127].mxu0 }
 0x3e7   :  { %v13390_v43 = vpop.f32.mrb[96].mxu1  ;;  %v13392_v44 = vpop.f32.mrb[128].mxu0 }
 0x3e8   :  { %v10428_v45 = vpop.f32.mrb[97].mxu1  ;;  %v10536_v46 = vpop.f32.mrb[129].mxu0 }
 0x3e9   :  { %v5656_v50 = vpop.f32.mrb[98].mxu1  ;;  %v6085_v51 = vpop.f32.mrb[130].mxu0 }
 0x3ea   :  { %v13394_v53 = vpop.permute.xlu0 %5513  ;;  %v10429_v54 = vpop.f32.mrb[99].mxu1 }
 0x3eb   :  { %v10537_v55 = vpop.f32.mrb[131].mxu0 }
 0x3ec   :  { %v13396_v56 = vpop.permute.xlu1 %5515 }
 0x3ee   :  { %v5084_v57 = vpop.permute.xlu0 %5083 }
 0x3ef   :  { %5111 = vst.msk [vmem:[#allocation2] sm:$0xff] %vm5110_vm4, %v5084_v57  ;;  %v5895_v58 = vpop.f32.mrb[100].mxu1  ;;  %v6360_v60 = vpop.f32.mrb[132].mxu0 }
 0x3f0   :  { %v5086_v61 = vpop.permute.xlu1 %5085  ;;  %5942 = vrot.lane.b32.xlu0 %v5895_v58, %s10940_s23  ;;  %v10484_v62 = vpop.f32.mrb[101].mxu1  ;;  %6398 = vst.msk [vmem:[#allocation2 + $0x18] sm:$0xff] %vm4642_vm1, %v6360_v60 }
 0x3f1   :  { %5112 = vst.msk [vmem:[#allocation2 + $0x20] sm:$0xff] %vm5110_vm4, %v5086_v61  ;;  %v5898_v63 = vpop.f32.mrb[102].mxu1  ;;  %v10592_v0 = vpop.f32.mrb[133].mxu0 }
 0x3f2   :  { %v13402_v2 = vpop.permute.xlu0 %5517  ;;  %5944 = vrot.lane.b32.xlu1 %v5898_v63, %s10940_s23  ;;  %v10485_v5 = vpop.f32.mrb[103].mxu1 }
 0x3f3   :  { %v6363_v7 = vpop.f32.mrb[134].mxu0 }
 0x3f4   :  { %v13405_v9 = vpop.permute.xlu1 %5519  ;;  %6399 = vst.msk [vmem:[#allocation2 + $0x38] sm:$0xff] %vm4642_vm1, %v6363_v7  ;;  %v10593_v10 = vpop.f32.mrb[135].mxu0 }
 0x3f6   :  { %v5088_v15 = vpop.permute.xlu0 %5087 }
 0x3f7   :  { %5113 = vst.msk [vmem:[#allocation2 + $0x40] sm:$0xff] %vm5110_vm4, %v5088_v15  ;;  %v5903_v11 = vpop.f32.mrb[104].mxu1  ;;  %v6368_v13 = vpop.f32.mrb[136].mxu0 }
 0x3f8   :  { %v5090_v14 = vpop.permute.xlu1 %5089  ;;  %5946 = vrot.lane.b32.xlu0 %v5903_v11, %s10940_s23  ;;  %v10488_v16 = vpop.f32.mrb[105].mxu1  ;;  %6400 = vst.msk [vmem:[#allocation2 + $0x58] sm:$0xff] %vm4642_vm1, %v6368_v13 }
 0x3f9   :  { %5114 = vst.msk [vmem:[#allocation2 + $0x60] sm:$0xff] %vm5110_vm4, %v5090_v14  ;;  %v5906_v17 = vpop.f32.mrb[106].mxu1  ;;  %v10596_v26 = vpop.f32.mrb[137].mxu0 }
 0x3fa   :  { %v13412_v18 = vpop.permute.xlu0 %5521  ;;  %5948 = vrot.lane.b32.xlu1 %v5906_v17, %s10940_s23  ;;  %v10489_v6 = vpop.f32.mrb[107].mxu1 }
 0x3fb   :  { %v6371_v19 = vpop.f32.mrb[138].mxu0 }
 0x3fc   :  { %v13415_v21 = vpop.permute.xlu1 %5523  ;;  %6401 = vst.msk [vmem:[#allocation2 + $0x78] sm:$0xff] %vm4642_vm1, %v6371_v19  ;;  %v10597_v22 = vpop.f32.mrb[139].mxu0 }
 0x3fe   :  { %v5092_v48 = vpop.permute.xlu0 %5091 }
 0x3ff   :  { %5115 = vst.msk [vmem:[#allocation2 + $0x80] sm:$0xff] %vm5110_vm4, %v5092_v48  ;;  %v5911_v23 = vpop.f32.mrb[108].mxu1  ;;  %v6376_v24 = vpop.f32.mrb[140].mxu0 }
 0x400   :  { %v5094_v25 = vpop.permute.xlu1 %5093  ;;  %5950 = vrot.lane.b32.xlu0 %v5911_v23, %s10940_s23  ;;  %v10492_v27 = vpop.f32.mrb[109].mxu1  ;;  %6402 = vst.msk [vmem:[#allocation2 + $0x98] sm:$0xff] %vm4642_vm1, %v6376_v24 }
 0x401   :  { %5116 = vst.msk [vmem:[#allocation2 + $0xa0] sm:$0xff] %vm5110_vm4, %v5094_v25  ;;  %v5914_v59 = vpop.f32.mrb[110].mxu1  ;;  %v10600_v37 = vpop.f32.mrb[141].mxu0 }
 0x402   :  { %v13422_v28 = vpop.permute.xlu0 %5525  ;;  %5952 = vrot.lane.b32.xlu1 %v5914_v59, %s10940_s23  ;;  %v10493_v29 = vpop.f32.mrb[111].mxu1 }
 0x403   :  { %v6379_v31 = vpop.f32.mrb[142].mxu0 }
 0x404   :  { %v13425_v8 = vpop.permute.xlu1 %5527  ;;  %6403 = vst.msk [vmem:[#allocation2 + $0xb8] sm:$0xff] %vm4642_vm1, %v6379_v31  ;;  %v10601_v32 = vpop.f32.mrb[143].mxu0 }
 0x406   :  { %v5096_v3 = vpop.permute.xlu0 %5095 }
 0x407   :  { %5117 = vst.msk [vmem:[#allocation2 + $0xc0] sm:$0xff] %vm5110_vm4, %v5096_v3  ;;  %v13429_v33 = vpop.f32.mrb[112].mxu1  ;;  %v6384_v20 = vpop.f32.mrb[144].mxu0 }
 0x408   :  { %v5098_v35 = vpop.permute.xlu1 %5097  ;;  %v10496_v34 = vpop.f32.mrb[113].mxu1  ;;  %6404 = vst.msk [vmem:[#allocation2 + $0xd8] sm:$0xff] %vm4642_vm1, %v6384_v20 }
 0x409   :  { %5118 = vst.msk [vmem:[#allocation2 + $0xe0] sm:$0xff] %vm5110_vm4, %v5098_v35  ;;  %v13433_v38 = vpop.f32.mrb[114].mxu1  ;;  %v10604_v39 = vpop.f32.mrb[145].mxu0 }
 0x40a   :  { %v10497_v40 = vpop.f32.mrb[115].mxu1  ;;  %v6387_v30 = vpop.f32.mrb[146].mxu0 }
 0x40b   :  { %6405 = vst.msk [vmem:[#allocation2 + $0xf8] sm:$0xff] %vm4642_vm1, %v6387_v30  ;;  %v10605_v42 = vpop.f32.mrb[147].mxu0 }
 0x40f   :  { %v13436_v45 = vpop.f32.mrb[116].mxu1  ;;  %v6392_v46 = vpop.f32.mrb[148].mxu0 }
 0x410   :  { %v10500_v50 = vpop.f32.mrb[117].mxu1  ;;  %6406 = vst.msk [vmem:[#allocation2 + $0x118] sm:$0xff] %vm4642_vm1, %v6392_v46  ;;  %v10608_v51 = vpop.f32.mrb[149].mxu0 }
 0x411   :  { %v5930_v54 = vpop.f32.mrb[118].mxu1  ;;  %v6395_v55 = vpop.f32.mrb[150].mxu0 }
 0x412   :  { %v5359_v57 = vpop.permute.xlu0 %5358  ;;  %v10501_v58 = vpop.f32.mrb[119].mxu1 }
 0x413   :  { %5385 = vst.msk [vmem:[#allocation2 + $0x8] sm:$0xff] %vm4798_vm2, %v5359_v57  ;;  %v10609_v60 = vpop.f32.mrb[151].mxu0 }
 0x414   :  { %5540 = vst.msk [vmem:[#allocation2 + $0x8] sm:$0xff] %vm4954_vm3, %v13394_v53 }
 0x416   :  { %v5361_v61 = vpop.permute.xlu0 %5360 }
 0x417   :  { %5386 = vst.msk [vmem:[#allocation2 + $0x28] sm:$0xff] %vm4798_vm2, %v5361_v61  ;;  %v6205_v62 = vpop.f32.mrb[120].mxu1  ;;  %v6634_v63 = vpop.f32.mrb[152].mxu0 }
 0x418   :  { %5541 = vst.msk [vmem:[#allocation2 + $0x28] sm:$0xff] %vm4954_vm3, %v13396_v56  ;;  %v10664_v0 = vpop.f32.mrb[153].mxu0  ;;  %6681 = vrot.lane.b32.xlu0 %v6634_v63, %s10939_s24  ;;  %v10556_v5 = vpop.f32.mrb[121].mxu1 }
 0x419   :  { %v6208_v7 = vpop.f32.mrb[122].mxu1  ;;  %v6637_v10 = vpop.f32.mrb[154].mxu0 }
 0x41a   :  { %v5363_v15 = vpop.permute.xlu0 %5362  ;;  %6683 = vrot.lane.b32.xlu1 %v6637_v10, %s10939_s24  ;;  %v10557_v11 = vpop.f32.mrb[123].mxu1  ;;  %v6876_v10 = vld [vmem:[#allocation2 + $0x20] sm:$0xff] }
 0x41b   :  { %5387 = vst.msk [vmem:[#allocation2 + $0x48] sm:$0xff] %vm4798_vm2, %v5363_v15  ;;  %v10665_v53 = vpop.f32.mrb[155].mxu0 }
 0x41c   :  { %5542 = vst.msk [vmem:[#allocation2 + $0x48] sm:$0xff] %vm4954_vm3, %v13402_v2  ;;  %v5365_v13 = vpop.permute.xlu1 %5364  ;;  %6252 = vrot.lane.b32.xlu0 %v6205_v62, %s10941_s27  ;;  %v10849_v53 = vld [vmem:[%s14200_s5 + $0xc0] sm:$0xff]  }
 0x41d   :  { %5388 = vst.msk [vmem:[#allocation2 + $0x68] sm:$0xff] %vm4798_vm2, %v5365_v13  ;;  %v10850_v13 = vld [vmem:[%s14200_s5 + $0x80] sm:$0xff]   ;;  %10003 = vmatprep.subr.bf16.mxu1 %v10849_v53 }
 0x41e   :  { %5543 = vst.msk [vmem:[#allocation2 + $0x68] sm:$0xff] %vm4954_vm3, %v13405_v9  ;;  %6254 = vrot.lane.b32.xlu1 %v6208_v7, %s10941_s27  ;;  %10004 = vmatpush3.bf16.msra.mxu1 %v10850_v13 }
 0x41f   :  { %v6213_v56 = vpop.f32.mrb[124].mxu1  ;;  %v6642_v14 = vpop.f32.mrb[156].mxu0 }
 0x420   :  { %v10668_v16 = vpop.f32.mrb[157].mxu0  ;;  %6685 = vrot.lane.b32.xlu0 %v6642_v14, %s10939_s24  ;;  %v10560_v17 = vpop.f32.mrb[125].mxu1  ;;  %v6872_v14 = vld [vmem:[#allocation2] sm:$0xff] }
 0x421   :  { %v6216_v26 = vpop.f32.mrb[126].mxu1  ;;  %v6645_v6 = vpop.f32.mrb[158].mxu0  ;;  %v6908_v17 = vpack.c.bf16 %v6876_v10, %v6872_v14  ;;  %v10859_v14 = vld [vmem:[%s14200_s5 + $0xe8] sm:$0xff]  }
 0x422   :  { %v5367_v19 = vpop.permute.xlu0 %5366  ;;  %6687 = vrot.lane.b32.xlu1 %v6645_v6, %s10939_s24  ;;  %v10561_v2 = vpop.f32.mrb[127].mxu1 }
 0x423   :  { %5389 = vst.msk [vmem:[#allocation2 + $0x88] sm:$0xff] %vm4798_vm2, %v5367_v19  ;;  %v10669_v22 = vpop.f32.mrb[159].mxu0  ;;  %v10852_v19 = vld [vmem:[%s14200_s5 + $0x88] sm:$0xff]  }
 0x424   :  { %5544 = vst.msk [vmem:[#allocation2 + $0x88] sm:$0xff] %vm4954_vm3, %v13412_v18  ;;  %v5369_v9 = vpop.permute.xlu1 %5368  ;;  %6256 = vrot.lane.b32.xlu0 %v6213_v56, %s10941_s27 }
 0x425   :  { %5390 = vst.msk [vmem:[#allocation2 + $0xa8] sm:$0xff] %vm4798_vm2, %v5369_v9 }
 0x426   :  { %5545 = vst.msk [vmem:[#allocation2 + $0xa8] sm:$0xff] %vm4954_vm3, %v13415_v21  ;;  %6258 = vrot.lane.b32.xlu1 %v6216_v26, %s10941_s27  ;;  %v10851_v26 = vld [vmem:[%s14200_s5 + $0xc8] sm:$0xff]  }
 0x427   :  { %v6221_v48 = vpop.f32.mrb[128].mxu1  ;;  %v6650_v23 = vpop.f32.mrb[160].mxu0  ;;  %10005 = vmatprep.subr.bf16.mxu1 %v10851_v26 }
 0x428   :  { %v10672_v24 = vpop.f32.mrb[161].mxu0  ;;  %6689 = vrot.lane.b32.xlu0 %v6650_v23, %s10939_s24  ;;  %v10564_v25 = vpop.f32.mrb[129].mxu1  ;;  %10006 = vmatpush3.bf16.msra.mxu1 %v10852_v19 }
 0x429   :  { %v6224_v27 = vpop.f32.mrb[130].mxu1  ;;  %v6653_v59 = vpop.f32.mrb[162].mxu0  ;;  %v6884_v24 = vld [vmem:[#allocation2 + $0x60] sm:$0xff] }
 0x42a   :  { %v5371_v37 = vpop.permute.xlu0 %5370  ;;  %6691 = vrot.lane.b32.xlu1 %v6653_v59, %s10939_s24  ;;  %v10565_v18 = vpop.f32.mrb[131].mxu1 }
 0x42b   :  { %5391 = vst.msk [vmem:[#allocation2 + $0xc8] sm:$0xff] %vm4798_vm2, %v5371_v37  ;;  %v10673_v29 = vpop.f32.mrb[163].mxu0  ;;  %v6880_v18 = vld [vmem:[#allocation2 + $0x40] sm:$0xff] }
 0x42c   :  { %5546 = vst.msk [vmem:[#allocation2 + $0xc8] sm:$0xff] %vm4954_vm3, %v13422_v28  ;;  %v5373_v21 = vpop.permute.xlu1 %5372  ;;  %6260 = vrot.lane.b32.xlu0 %v6221_v48, %s10941_s27  ;;  %v10853_v29 = vld [vmem:[%s14200_s5 + $0xd0] sm:$0xff]  }
 0x42d   :  { %5392 = vst.msk [vmem:[#allocation2 + $0xe8] sm:$0xff] %vm4798_vm2, %v5373_v21  ;;  %v10854_v21 = vld [vmem:[%s14200_s5 + $0x90] sm:$0xff]   ;;  %10007 = vmatprep.subr.bf16.mxu1 %v10853_v29 }
 0x42e   :  { %5547 = vst.msk [vmem:[#allocation2 + $0xe8] sm:$0xff] %vm4954_vm3, %v13425_v8  ;;  %6262 = vrot.lane.b32.xlu1 %v6224_v27, %s10941_s27  ;;  %10008 = vmatpush3.bf16.msra.mxu1 %v10854_v21  ;;  %v10864_v21 = vld [vmem:[%s14200_s5 + $0xb8] sm:$0xff]  }
 0x42f   :  { %v13475_v31 = vpop.f32.mrb[132].mxu1  ;;  %v13477_v32 = vpop.f32.mrb[164].mxu0 }
 0x430   :  { %v10568_v3 = vpop.f32.mrb[133].mxu1  ;;  %v10676_v20 = vpop.f32.mrb[165].mxu0 }
 0x431   :  { %v13479_v35 = vpop.f32.mrb[134].mxu1  ;;  %v13481_v34 = vpop.f32.mrb[166].mxu0  ;;  %v6912_v20 = vpack.c.bf16 %v6884_v24, %v6880_v18  ;;  %v10863_v18 = vld [vmem:[%s14200_s5 + $0xf8] sm:$0xff]  }
 0x432   :  { %v10569_v28 = vpop.f32.mrb[135].mxu1  ;;  %v10677_v39 = vpop.f32.mrb[167].mxu0 }
 0x433   :  { %v10855_v28 = vld [vmem:[%s14200_s5 + $0xd8] sm:$0xff]  }
 0x434   :  { %10009 = vmatprep.subr.bf16.mxu1 %v10855_v28 }
 0x437   :  { %v13483_v40 = vpop.f32.mrb[136].mxu1  ;;  %v13485_v30 = vpop.f32.mrb[168].mxu0 }
 0x438   :  { %v10572_v42 = vpop.f32.mrb[137].mxu1  ;;  %v10680_v8 = vpop.f32.mrb[169].mxu0 }
 0x439   :  { %v6240_v46 = vpop.f32.mrb[138].mxu1  ;;  %v6669_v50 = vpop.f32.mrb[170].mxu0 }
 0x43a   :  { %v10573_v51 = vpop.f32.mrb[139].mxu1  ;;  %v5669_v54 = vpop.permute.xlu0 %5668  ;;  %v10856_v50 = vld [vmem:[%s14200_s5 + $0x98] sm:$0xff]  }
 0x43b   :  { %5695 = vst.msk [vmem:[#allocation2 + $0x8] sm:$0xff] %vm5110_vm4, %v5669_v54  ;;  %v10681_v55 = vpop.f32.mrb[171].mxu0  ;;  %10010 = vmatpush3.bf16.msra.mxu1 %v10856_v50 }
 0x43c   :  { %v5671_v57 = vpop.permute.xlu1 %5670  ;;  %v10857_v55 = vld [vmem:[%s14200_s5 + $0xe0] sm:$0xff]  }
 0x43d   :  { %5696 = vst.msk [vmem:[#allocation2 + $0x28] sm:$0xff] %vm5110_vm4, %v5671_v57  ;;  %v6892_v57 = vld [vmem:[#allocation2 + $0xa0] sm:$0xff]  ;;  %10011 = vmatprep.subr.bf16.mxu1 %v10857_v55 }
 0x43e   :  { %v13489_v58 = vpop.permute.xlu0 %6097 }
 0x43f   :  { %v6479_v60 = vpop.f32.mrb[140].mxu1 }
 0x440   :  { %v13491_v61 = vpop.permute.xlu1 %6099  ;;  %6526 = vrot.lane.b32.xlu0 %v6479_v60, %s10940_s23  ;;  %v10628_v62 = vpop.f32.mrb[141].mxu1 }
 0x441   :  { %v6482_v63 = vpop.f32.mrb[142].mxu1 }
 0x442   :  { %6528 = vrot.lane.b32.xlu1 %v6482_v63, %s10940_s23  ;;  %v10629_v0 = vpop.f32.mrb[143].mxu1  ;;  %v5673_v5 = vpop.permute.xlu0 %5672  ;;  %v6873_v7 = vld [vmem:[#allocation2 + $0x8] sm:$0xff] }
 0x443   :  { %5697 = vst.msk [vmem:[#allocation2 + $0x48] sm:$0xff] %vm5110_vm4, %v5673_v5  ;;  %v6888_v5 = vld [vmem:[#allocation2 + $0x80] sm:$0xff] }
 0x444   :  { %v5675_v15 = vpop.permute.xlu1 %5674  ;;  %v6877_v11 = vld [vmem:[#allocation2 + $0x28] sm:$0xff]  ;;  %v6916_v10 = vpack.c.bf16 %v6892_v57, %v6888_v5 }
 0x445   :  { %5698 = vst.msk [vmem:[#allocation2 + $0x68] sm:$0xff] %vm5110_vm4, %v5675_v15  ;;  %v6909_v56 = vpack.c.bf16 %v6877_v11, %v6873_v7  ;;  %v10858_v7 = vld [vmem:[%s14200_s5 + $0xa0] sm:$0xff]  }
 0x446   :  { %v13503_v16 = vpop.permute.xlu0 %6101  ;;  %10012 = vmatpush3.bf16.msra.mxu1 %v10858_v7 }
 0x447   :  { %7223 = vmatprep.mubr.bf16.mxu0 %v6909_v56  ;;  %v6487_v6 = vpop.f32.mrb[144].mxu1  ;;  %v6900_v56 = vld [vmem:[#allocation2 + $0xe0] sm:$0xff]  ;;  %10013 = vmatprep.subr.bf16.mxu1 %v10859_v14 }
 0x448   :  { %7224 = vmatmul.mubr.bf16.vlgmr.msra.gmra.mrb[172].mxu0 %v6908_v17  ;;  %v13511_v2 = vpop.permute.xlu1 %6103  ;;  %6530 = vrot.lane.b32.xlu0 %v6487_v6, %s10940_s23  ;;  %v10632_v22 = vpop.f32.mrb[145].mxu1  ;;  %v10860_v6 = vld [vmem:[%s14200_s5 + $0xa8] sm:$0xff]  }
 0x449   :  { %v6490_v9 = vpop.f32.mrb[146].mxu1  ;;  %v6896_v22 = vld [vmem:[#allocation2 + $0xc0] sm:$0xff] }
 0x44a   :  { %6532 = vrot.lane.b32.xlu1 %v6490_v9, %s10940_s23  ;;  %v10633_v48 = vpop.f32.mrb[147].mxu1  ;;  %v5677_v23 = vpop.permute.xlu0 %5676  ;;  %v6881_v27 = vld [vmem:[#allocation2 + $0x48] sm:$0xff]  ;;  %v6920_v9 = vpack.c.bf16 %v6900_v56, %v6896_v22  ;;  %10014 = vmatpush3.bf16.msra.mxu1 %v10860_v6 }
 0x44b   :  { %5699 = vst.msk [vmem:[#allocation2 + $0x88] sm:$0xff] %vm5110_vm4, %v5677_v23  ;;  %v10861_v23 = vld [vmem:[%s14200_s5 + $0xf0] sm:$0xff]  }
 0x44c   :  { %v5679_v25 = vpop.permute.xlu1 %5678  ;;  %v6885_v59 = vld [vmem:[#allocation2 + $0x68] sm:$0xff]  ;;  %10015 = vmatprep.subr.bf16.mxu1 %v10861_v23 }
 0x44d   :  { %5700 = vst.msk [vmem:[#allocation2 + $0xa8] sm:$0xff] %vm5110_vm4, %v5679_v25  ;;  %v6913_v37 = vpack.c.bf16 %v6885_v59, %v6881_v27  ;;  %v10862_v25 = vld [vmem:[%s14200_s5 + $0xb0] sm:$0xff]  }
 0x44e   :  { %v13523_v3 = vpop.permute.xlu0 %6105  ;;  %10016 = vmatpush3.bf16.msra.mxu1 %v10862_v25 }
 0x44f   :  { %7231 = vmatprep.mubr.bf16.mxu0 %v6913_v37  ;;  %v6495_v39 = vpop.f32.mrb[148].mxu1  ;;  %10017 = vmatprep.subr.bf16.mxu1 %v10863_v18 }
 0x450   :  { %7232 = vmatmul.mubr.bf16.gmra.mrb[176].mxu0 %v6912_v20  ;;  %v13528_v42 = vpop.permute.xlu1 %6107  ;;  %6534 = vrot.lane.b32.xlu0 %v6495_v39, %s10940_s23  ;;  %v10636_v8 = vpop.f32.mrb[149].mxu1 }
 0x451   :  { %v6498_v46 = vpop.f32.mrb[150].mxu1 }
 0x452   :  { %6536 = vrot.lane.b32.xlu1 %v6498_v46, %s10940_s23  ;;  %v10637_v51 = vpop.f32.mrb[151].mxu1  ;;  %v5681_v54 = vpop.permute.xlu0 %5680  ;;  %v6889_v62 = vld [vmem:[#allocation2 + $0x88] sm:$0xff]  ;;  %10018 = vmatpush3.bf16.msra.mxu1 %v10864_v21 }
 0x453   :  { %5701 = vst.msk [vmem:[#allocation2 + $0xc8] sm:$0xff] %vm5110_vm4, %v5681_v54 }
 0x454   :  { %v5683_v60 = vpop.permute.xlu1 %5682  ;;  %v6893_v63 = vld [vmem:[#allocation2 + $0xa8] sm:$0xff] }
 0x455   :  { %5702 = vst.msk [vmem:[#allocation2 + $0xe8] sm:$0xff] %vm5110_vm4, %v5683_v60  ;;  %v6917_v0 = vpack.c.bf16 %v6893_v63, %v6889_v62 }
 0x457   :  { %v6503_v15 = vpop.f32.mrb[152].mxu1  ;;  %7239 = vmatprep.mubr.bf16.mxu0 %v6917_v0 }
 0x458   :  { %v10640_v11 = vpop.f32.mrb[153].mxu1  ;;  %7240 = vmatmul.mubr.bf16.gmra.mrb[180].mxu0 %v6916_v10  ;;  %6538 = vrot.lane.b32.xlu0 %v6503_v15, %s10940_s23 }
 0x459   :  { %v6506_v53 = vpop.f32.mrb[154].mxu1 }
 0x45a   :  { %6540 = vrot.lane.b32.xlu1 %v6506_v53, %s10940_s23  ;;  %v10641_v13 = vpop.f32.mrb[155].mxu1  ;;  %v6897_v17 = vld [vmem:[#allocation2 + $0xc8] sm:$0xff] }
 0x45c   :  { %v6901_v26 = vld [vmem:[#allocation2 + $0xe8] sm:$0xff] }
 0x45d   :  { %v6921_v19 = vpack.c.bf16 %v6901_v26, %v6897_v17 }
 0x45f   :  { %v13551_v48 = vpop.f32.mrb[156].mxu1  ;;  %7247 = vmatprep.mubr.bf16.mxu0 %v6921_v19 }
 0x460   :  { %v10644_v24 = vpop.f32.mrb[157].mxu1  ;;  %7248 = vmatmul.mubr.bf16.gmra.mrb[184].mxu0 %v6920_v9 }
 0x461   :  { %v6514_v27 = vpop.f32.mrb[158].mxu1 }
 0x462   :  { %v5943_v59 = vpop.permute.xlu0 %5942  ;;  %v10645_v37 = vpop.f32.mrb[159].mxu1 }
 0x463   :  { %5969 = vst.msk [vmem:[#allocation2 + $0x10] sm:$0xff] %vm4798_vm2, %v5943_v59 }
 0x464   :  { %6124 = vst.msk [vmem:[#allocation2 + $0x10] sm:$0xff] %vm4954_vm3, %v13489_v58  ;;  %v5945_v29 = vpop.permute.xlu1 %5944 }
 0x465   :  { %5970 = vst.msk [vmem:[#allocation2 + $0x30] sm:$0xff] %vm4798_vm2, %v5945_v29 }
 0x466   :  { %6125 = vst.msk [vmem:[#allocation2 + $0x30] sm:$0xff] %vm4954_vm3, %v13491_v61 }
 0x467   :  { %v6789_v20 = vpop.f32.mrb[160].mxu1 }
 0x468   :  { %6836 = vrot.lane.b32.xlu0 %v6789_v20, %s10941_s27  ;;  %v10700_v28 = vpop.f32.mrb[161].mxu1 }
 0x469   :  { %v6792_v39 = vpop.f32.mrb[162].mxu1 }
 0x46a   :  { %v5947_v8 = vpop.permute.xlu0 %5946  ;;  %6838 = vrot.lane.b32.xlu1 %v6792_v39, %s10941_s27  ;;  %v10701_v58 = vpop.f32.mrb[163].mxu1 }
 0x46b   :  { %5971 = vst.msk [vmem:[#allocation2 + $0x50] sm:$0xff] %vm4798_vm2, %v5947_v8 }
 0x46c   :  { %6126 = vst.msk [vmem:[#allocation2 + $0x50] sm:$0xff] %vm4954_vm3, %v13503_v16  ;;  %v5949_v46 = vpop.permute.xlu1 %5948  ;;  %5954 = vrot.lane.b32.xlu0 %v13429_v33, %s10940_s23 }
 0x46d   :  { %5972 = vst.msk [vmem:[#allocation2 + $0x70] sm:$0xff] %vm4798_vm2, %v5949_v46 }
 0x46e   :  { %6127 = vst.msk [vmem:[#allocation2 + $0x70] sm:$0xff] %vm4954_vm3, %v13511_v2  ;;  %5956 = vrot.lane.b32.xlu1 %v13433_v38, %s10940_s23 }
 0x46f   :  { %v6797_v61 = vpop.f32.mrb[164].mxu1 }
 0x470   :  { %6840 = vrot.lane.b32.xlu0 %v6797_v61, %s10941_s27  ;;  %v10704_v50 = vpop.f32.mrb[165].mxu1 }
 0x471   :  { %v6800_v51 = vpop.f32.mrb[166].mxu1 }
 0x472   :  { %v5951_v54 = vpop.permute.xlu0 %5950  ;;  %6842 = vrot.lane.b32.xlu1 %v6800_v51, %s10941_s27  ;;  %v10705_v16 = vpop.f32.mrb[167].mxu1 }
 0x473   :  { %5973 = vst.msk [vmem:[#allocation2 + $0x90] sm:$0xff] %vm4798_vm2, %v5951_v54 }
 0x474   :  { %6128 = vst.msk [vmem:[#allocation2 + $0x90] sm:$0xff] %vm4954_vm3, %v13523_v3  ;;  %v5953_v33 = vpop.permute.xlu1 %5952  ;;  %6693 = vrot.lane.b32.xlu0 %v13477_v32, %s10939_s24 }
 0x475   :  { %5974 = vst.msk [vmem:[#allocation2 + $0xb0] sm:$0xff] %vm4798_vm2, %v5953_v33 }
 0x476   :  { %6129 = vst.msk [vmem:[#allocation2 + $0xb0] sm:$0xff] %vm4954_vm3, %v13528_v42  ;;  %6695 = vrot.lane.b32.xlu1 %v13481_v34, %s10939_s24 }
 0x477   :  { %v6805_v38 = vpop.f32.mrb[168].mxu1 }
 0x478   :  { %6844 = vrot.lane.b32.xlu0 %v6805_v38, %s10941_s27  ;;  %v10708_v2 = vpop.f32.mrb[169].mxu1 }
 0x479   :  { %v6808_v55 = vpop.f32.mrb[170].mxu1 }
 0x47a   :  { %6846 = vrot.lane.b32.xlu1 %v6808_v55, %s10941_s27  ;;  %v10709_v3 = vpop.f32.mrb[171].mxu1 }
 0x47c   :  { %6109 = vrot.lane.b32.xlu0 %v13384_v36, %s10939_s24 }
 0x47e   :  { %6111 = vrot.lane.b32.xlu1 %v13387_v41, %s10939_s24 }
 0x47f   :  { %v6813_v32 = vpop.f32.mrb[172].mxu1 }
 0x480   :  { %6848 = vrot.lane.b32.xlu0 %v6813_v32, %s10941_s27  ;;  %v10712_v42 = vpop.f32.mrb[173].mxu1 }
 0x481   :  { %v6816_v57 = vpop.f32.mrb[174].mxu1 }
 0x482   :  { %6850 = vrot.lane.b32.xlu1 %v6816_v57, %s10941_s27  ;;  %v10713_v34 = vpop.f32.mrb[175].mxu1 }
 0x484   :  { %6264 = vrot.lane.b32.xlu0 %v13475_v31, %s10941_s27 }
 0x486   :  { %6266 = vrot.lane.b32.xlu1 %v13479_v35, %s10941_s27 }
 0x487   :  { %v6821_v60 = vpop.f32.mrb[176].mxu1 }
 0x488   :  { %5374 = vrot.lane.b32.xlu0 %v13335_v52, %s10940_s23  ;;  %v10716_v36 = vpop.f32.mrb[177].mxu1 }
 0x489   :  { %v6824_v41 = vpop.f32.mrb[178].mxu1 }
 0x48a   :  { %v6682_v62 = vpop.permute.xlu0 %6681  ;;  %4787 = vrot.lane.b32.xlu1 %v13192_v4, %s10940_s23  ;;  %v10717_v63 = vpop.f32.mrb[179].mxu1 }
 0x48c   :  { %v6684_v0 = vpop.permute.xlu1 %6683  ;;  %5529 = vrot.lane.b32.xlu0 %v13251_v49, %s10939_s24 }
 0x48e   :  { %v6253_v5 = vpop.permute.xlu0 %6252  ;;  %4943 = vrot.lane.b32.xlu1 %v13114_v12, %s10939_s24 }
 0x48f   :  { %6279 = vst.msk [vmem:[#allocation2 + $0x10] sm:$0xff] %vm5110_vm4, %v6253_v5 }
 0x490   :  { %v6255_v31 = vpop.permute.xlu1 %6254  ;;  %5684 = vrot.lane.b32.xlu0 %v13390_v43, %s10941_s27 }
 0x491   :  { %6280 = vst.msk [vmem:[#allocation2 + $0x30] sm:$0xff] %vm5110_vm4, %v6255_v31 }
 0x492   :  { %v6686_v52 = vpop.permute.xlu0 %6685  ;;  %6542 = vrot.lane.b32.xlu1 %v13551_v48, %s10940_s23 }
 0x494   :  { %v6688_v4 = vpop.permute.xlu1 %6687  ;;  %5099 = vrot.lane.b32.xlu0 %v13249_v47, %s10941_s27 }
 0x496   :  { %v6257_v49 = vpop.permute.xlu0 %6256  ;;  %5958 = vrot.lane.b32.xlu1 %v13436_v45, %s10940_s23  ;;  %v6874_v23 = vld [vmem:[#allocation2 + $0x10] sm:$0xff] }
 0x497   :  { %6281 = vst.msk [vmem:[#allocation2 + $0x50] sm:$0xff] %vm5110_vm4, %v6257_v49 }
 0x498   :  { %v6259_v12 = vpop.permute.xlu1 %6258  ;;  %6697 = vrot.lane.b32.xlu0 %v13485_v30, %s10939_s24  ;;  %v6878_v6 = vld [vmem:[#allocation2 + $0x30] sm:$0xff] }
 0x499   :  { %6282 = vst.msk [vmem:[#allocation2 + $0x70] sm:$0xff] %vm5110_vm4, %v6259_v12  ;;  %v6910_v25 = vpack.c.bf16 %v6878_v6, %v6874_v23 }
 0x49a   :  { %v6690_v43 = vpop.permute.xlu0 %6689  ;;  %6113 = vrot.lane.b32.xlu1 %v13392_v44, %s10939_s24 }
 0x49c   :  { %v6692_v35 = vpop.permute.xlu1 %6691  ;;  %6852 = vrot.lane.b32.xlu0 %v6821_v60, %s10941_s27 }
 0x49e   :  { %v6261_v47 = vpop.permute.xlu0 %6260  ;;  %6268 = vrot.lane.b32.xlu1 %v13483_v40, %s10941_s27  ;;  %v6882_v28 = vld [vmem:[#allocation2 + $0x50] sm:$0xff] }
 0x49f   :  { %6283 = vst.msk [vmem:[#allocation2 + $0x90] sm:$0xff] %vm5110_vm4, %v6261_v47 }
 0x4a0   :  { %v6263_v45 = vpop.permute.xlu1 %6262  ;;  %v6886_v37 = vld [vmem:[#allocation2 + $0x70] sm:$0xff] }
 0x4a1   :  { %6284 = vst.msk [vmem:[#allocation2 + $0xb0] sm:$0xff] %vm5110_vm4, %v6263_v45  ;;  %v6914_v8 = vpack.c.bf16 %v6886_v37, %v6882_v28 }
 0x4a6   :  { %v6890_v33 = vld [vmem:[#allocation2 + $0x90] sm:$0xff] }
 0x4a8   :  { %v6894_v61 = vld [vmem:[#allocation2 + $0xb0] sm:$0xff] }
 0x4a9   :  { %v6918_v2 = vpack.c.bf16 %v6894_v61, %v6890_v33  ;;  %v10868_v61 = vld [vmem:[%s14202_s7 + $0x8] sm:$0xff]   ;;  %v10873_v33 = vld [vmem:[%s14202_s7 + $0x18] sm:$0xff]  }
 0x4b2   :  { %v6527_v7 = vpop.permute.xlu0 %6526 }
 0x4b3   :  { %6553 = vst.msk [vmem:[#allocation2 + $0x18] sm:$0xff] %vm4798_vm2, %v6527_v7 }
 0x4b4   :  { %6708 = vst.msk [vmem:[#allocation2 + $0x18] sm:$0xff] %vm4954_vm3, %v6682_v62  ;;  %v6529_v30 = vpop.permute.xlu1 %6528 }
 0x4b5   :  { %6554 = vst.msk [vmem:[#allocation2 + $0x38] sm:$0xff] %vm4798_vm2, %v6529_v30 }
 0x4b6   :  { %6709 = vst.msk [vmem:[#allocation2 + $0x38] sm:$0xff] %vm4954_vm3, %v6684_v0 }
 0x4ba   :  { %v6531_v44 = vpop.permute.xlu0 %6530 }
 0x4bb   :  { %6555 = vst.msk [vmem:[#allocation2 + $0x58] sm:$0xff] %vm4798_vm2, %v6531_v44 }
 0x4bc   :  { %6710 = vst.msk [vmem:[#allocation2 + $0x58] sm:$0xff] %vm4954_vm3, %v6686_v52  ;;  %v6533_v40 = vpop.permute.xlu1 %6532 }
 0x4bd   :  { %6556 = vst.msk [vmem:[#allocation2 + $0x78] sm:$0xff] %vm4798_vm2, %v6533_v40 }
 0x4be   :  { %6711 = vst.msk [vmem:[#allocation2 + $0x78] sm:$0xff] %vm4954_vm3, %v6688_v4 }
 0x4c2   :  { %v6535_v10 = vpop.permute.xlu0 %6534 }
 0x4c3   :  { %6557 = vst.msk [vmem:[#allocation2 + $0x98] sm:$0xff] %vm4798_vm2, %v6535_v10 }
 0x4c4   :  { %6712 = vst.msk [vmem:[#allocation2 + $0x98] sm:$0xff] %vm4954_vm3, %v6690_v43  ;;  %v6537_v15 = vpop.permute.xlu1 %6536 }
 0x4c5   :  { %6558 = vst.msk [vmem:[#allocation2 + $0xb8] sm:$0xff] %vm4798_vm2, %v6537_v15 }
 0x4c6   :  { %6713 = vst.msk [vmem:[#allocation2 + $0xb8] sm:$0xff] %vm4954_vm3, %v6692_v35 }
 0x4ca   :  { %v6539_v11 = vpop.permute.xlu0 %6538 }
 0x4cb   :  { %6559 = vst.msk [vmem:[#allocation2 + $0xd8] sm:$0xff] %vm4798_vm2, %v6539_v11 }
 0x4cc   :  { %v6541_v53 = vpop.permute.xlu1 %6540 }
 0x4cd   :  { %6560 = vst.msk [vmem:[#allocation2 + $0xf8] sm:$0xff] %vm4798_vm2, %v6541_v53 }
 0x4da   :  { %v6837_v13 = vpop.permute.xlu0 %6836 }
 0x4db   :  { %6863 = vst.msk [vmem:[#allocation2 + $0x18] sm:$0xff] %vm5110_vm4, %v6837_v13 }
 0x4dc   :  { %v6839_v56 = vpop.permute.xlu1 %6838 }
 0x4dd   :  { %6864 = vst.msk [vmem:[#allocation2 + $0x38] sm:$0xff] %vm5110_vm4, %v6839_v56 }
 0x4de   :  { %v5955_v14 = vpop.permute.xlu0 %5954 }
 0x4df   :  { %5975 = vst.msk [vmem:[#allocation2 + $0xd0] sm:$0xff] %vm4798_vm2, %v5955_v14 }
 0x4e0   :  { %v5957_v17 = vpop.permute.xlu1 %5956 }
 0x4e1   :  { %5976 = vst.msk [vmem:[#allocation2 + $0xf0] sm:$0xff] %vm4798_vm2, %v5957_v17 }
 0x4e2   :  { %v6841_v26 = vpop.permute.xlu0 %6840  ;;  %v6875_v22 = vld [vmem:[#allocation2 + $0x18] sm:$0xff] }
 0x4e3   :  { %6865 = vst.msk [vmem:[#allocation2 + $0x58] sm:$0xff] %vm5110_vm4, %v6841_v26 }
 0x4e4   :  { %v6843_v19 = vpop.permute.xlu1 %6842  ;;  %v6879_v9 = vld [vmem:[#allocation2 + $0x38] sm:$0xff] }
 0x4e5   :  { %6866 = vst.msk [vmem:[#allocation2 + $0x78] sm:$0xff] %vm5110_vm4, %v6843_v19  ;;  %v6911_v48 = vpack.c.bf16 %v6879_v9, %v6875_v22 }
 0x4e6   :  { %v6694_v24 = vpop.permute.xlu0 %6693 }
 0x4e7   :  { %6714 = vst.msk [vmem:[#allocation2 + $0xd8] sm:$0xff] %vm4954_vm3, %v6694_v24  ;;  %7295 = vmatprep.mubr.bf16.mxu1 %v6911_v48 }
 0x4e8   :  { %7296 = vmatmul.mubr.bf16.vlgmr.msra.gmra.mrb[180].mxu1 %v6910_v25  ;;  %v6696_v27 = vpop.permute.xlu1 %6695 }
 0x4e9   :  { %6715 = vst.msk [vmem:[#allocation2 + $0xf8] sm:$0xff] %vm4954_vm3, %v6696_v27 }
 0x4ea   :  { %v6845_v59 = vpop.permute.xlu0 %6844  ;;  %v6883_v29 = vld [vmem:[#allocation2 + $0x58] sm:$0xff] }
 0x4eb   :  { %6867 = vst.msk [vmem:[#allocation2 + $0x98] sm:$0xff] %vm5110_vm4, %v6845_v59 }
 0x4ec   :  { %v6847_v18 = vpop.permute.xlu1 %6846  ;;  %v6887_v21 = vld [vmem:[#allocation2 + $0x78] sm:$0xff] }
 0x4ed   :  { %6868 = vst.msk [vmem:[#allocation2 + $0xb8] sm:$0xff] %vm5110_vm4, %v6847_v18  ;;  %v6915_v20 = vpack.c.bf16 %v6887_v21, %v6883_v29 }
 0x4ee   :  { %v6110_v39 = vpop.permute.xlu0 %6109 }
 0x4ef   :  { %6130 = vst.msk [vmem:[#allocation2 + $0xd0] sm:$0xff] %vm4954_vm3, %v6110_v39  ;;  %7303 = vmatprep.mubr.bf16.mxu1 %v6915_v20  ;;  %v10865_v39 = vld [vmem:[%s14202_s7 + $0x40] sm:$0xff]  }
 0x4f0   :  { %7304 = vmatmul.mubr.bf16.gmra.mrb[184].mxu1 %v6914_v8  ;;  %v6112_v58 = vpop.permute.xlu1 %6111  ;;  %v10866_v8 = vld [vmem:[%s14202_s7] sm:$0xff]   ;;  %10049 = vmatprep.subr.bf16.mxu0 %v10865_v39 }
 0x4f1   :  { %6131 = vst.msk [vmem:[#allocation2 + $0xf0] sm:$0xff] %vm4954_vm3, %v6112_v58  ;;  %v10867_v58 = vld [vmem:[%s14202_s7 + $0x48] sm:$0xff]   ;;  %10050 = vmatpush3.bf16.msra.mxu0 %v10866_v8 }
 0x4f2   :  { %v6849_v46 = vpop.permute.xlu0 %6848  ;;  %v6891_v51 = vld [vmem:[#allocation2 + $0x98] sm:$0xff]  ;;  %10051 = vmatprep.subr.bf16.mxu0 %v10867_v58 }
 0x4f3   :  { %6869 = vst.msk [vmem:[#allocation2 + $0xd8] sm:$0xff] %vm5110_vm4, %v6849_v46  ;;  %v10872_v46 = vld [vmem:[%s14202_s7 + $0xc0] sm:$0xff]  }
 0x4f4   :  { %v6851_v50 = vpop.permute.xlu1 %6850  ;;  %v6895_v54 = vld [vmem:[#allocation2 + $0xb8] sm:$0xff]  ;;  %10071 = vmatprep.subr.bf16.mxu1 %v10872_v46 }
 0x4f5   :  { %6870 = vst.msk [vmem:[#allocation2 + $0xf8] sm:$0xff] %vm5110_vm4, %v6851_v50  ;;  %v6919_v16 = vpack.c.bf16 %v6895_v54, %v6891_v51  ;;  %v10874_v50 = vld [vmem:[%s14202_s7 + $0x80] sm:$0xff]   ;;  %v10869_v51 = vld [vmem:[%s14202_s7 + $0x50] sm:$0xff]   ;;  %10052 = vmatpush3.bf16.msra.mxu0 %v10868_v61 }
 0x4f6   :  { %v6265_v38 = vpop.permute.xlu0 %6264  ;;  %10072 = vmatpush3.bf16.msra.mxu1 %v10874_v50  ;;  %v10870_v54 = vld [vmem:[%s14202_s7 + $0x10] sm:$0xff]   ;;  %10053 = vmatprep.subr.bf16.mxu0 %v10869_v51 }
 0x4f7   :  { %6285 = vst.msk [vmem:[#allocation2 + $0xd0] sm:$0xff] %vm5110_vm4, %v6265_v38  ;;  %7311 = vmatprep.mubr.bf16.mxu1 %v6919_v16  ;;  %v10871_v16 = vld [vmem:[%s14202_s7 + $0x58] sm:$0xff]   ;;  %v10875_v38 = vld [vmem:[%s14202_s7 + $0x60] sm:$0xff]   ;;  %v10896_v50 = vld [vmem:[%s14202_s7 + $0xf0] sm:$0xff]  }
 0x4f8   :  { %7312 = vmatmul.mubr.bf16.gmra.mrb[188].mxu1 %v6918_v2  ;;  %v6267_v55 = vpop.permute.xlu1 %6266  ;;  %v10876_v2 = vld [vmem:[%s14202_s7 + $0x20] sm:$0xff]  }
 0x4f9   :  { %6286 = vst.msk [vmem:[#allocation2 + $0xf0] sm:$0xff] %vm5110_vm4, %v6267_v55  ;;  %10054 = vmatpush3.bf16.msra.mxu0 %v10870_v54  ;;  %v10877_v55 = vld [vmem:[%s14202_s7 + $0xc8] sm:$0xff]  }
 0x4fa   :  { %v5375_v3 = vpop.permute.xlu0 %5374  ;;  %v6899_v42 = vld [vmem:[#allocation2 + $0xd8] sm:$0xff]  ;;  %10055 = vmatprep.subr.bf16.mxu0 %v10871_v16  ;;  %10073 = vmatprep.subr.bf16.mxu1 %v10877_v55 }
 0x4fb   :  { %5393 = vst.msk [vmem:[#allocation2 + $0x108] sm:$0xff] %vm4798_vm2, %v5375_v3  ;;  %v10878_v3 = vld [vmem:[%s14202_s7 + $0x88] sm:$0xff]   ;;  %v10900_v55 = vld [vmem:[%s14202_s7 + $0xb8] sm:$0xff]  }
 0x4fc   :  { %v4788_v32 = vpop.permute.xlu1 %4787  ;;  %v6903_v57 = vld [vmem:[#allocation2 + $0xf8] sm:$0xff]  ;;  %10074 = vmatpush3.bf16.msra.mxu1 %v10878_v3 }
 0x4fd   :  { %4807 = vst.msk [vmem:[#allocation2 + $0x100] sm:$0xff] %vm4798_vm2, %v4788_v32  ;;  %v6923_v34 = vpack.c.bf16 %v6903_v57, %v6899_v42  ;;  %10056 = vmatpush3.bf16.msra.mxu0 %v10873_v33  ;;  %v10879_v32 = vld [vmem:[%s14202_s7 + $0x68] sm:$0xff]   ;;  %v13738_v42 = vld [vmem:[%s14201_s6] ss:$0 sm:$0xff] }
 0x4fe   :  { %v5530_v60 = vpop.permute.xlu0 %5529  ;;  %v6898_v41 = vld [vmem:[#allocation2 + $0xd0] sm:$0xff]  ;;  %10057 = vmatprep.subr.bf16.mxu0 %v10875_v38 }
 0x4ff   :  { %5548 = vst.msk [vmem:[#allocation2 + $0x108] sm:$0xff] %vm4954_vm3, %v5530_v60  ;;  %7319 = vmatprep.mubr.bf16.mxu1 %v6923_v34  ;;  %v10880_v34 = vld [vmem:[%s14202_s7 + $0x28] sm:$0xff]  }
 0x500   :  { %v4944_v36 = vpop.permute.xlu1 %4943  ;;  %v6902_v62 = vld [vmem:[#allocation2 + $0xf0] sm:$0xff] }
 0x501   :  { %4963 = vst.msk [vmem:[#allocation2 + $0x100] sm:$0xff] %vm4954_vm3, %v4944_v36  ;;  %v6922_v63 = vpack.c.bf16 %v6902_v62, %v6898_v41  ;;  %10058 = vmatpush3.bf16.msra.mxu0 %v10876_v2  ;;  %v10899_v2 = vld [vmem:[%s14202_s7 + $0xf8] sm:$0xff]  }
 0x502   :  { %v5685_v0 = vpop.permute.xlu0 %5684  ;;  %10059 = vmatprep.subr.bf16.mxu0 %v10879_v32 }
 0x503   :  { %5703 = vst.msk [vmem:[#allocation2 + $0x108] sm:$0xff] %vm5110_vm4, %v5685_v0  ;;  %7320 = vmatmul.mubr.bf16.gmra.mrb[192].mxu1 %v6922_v63 }
 0x504   :  { %v6543_v5 = vpop.permute.xlu1 %6542 }
 0x505   :  { %6561 = vst.msk [vmem:[#allocation2 + $0x118] sm:$0xff] %vm4798_vm2, %v6543_v5  ;;  %10060 = vmatpush3.bf16.msra.mxu0 %v10880_v34 }
 0x506   :  { %v5100_v31 = vpop.permute.xlu0 %5099 }
 0x507   :  { %5119 = vst.msk [vmem:[#allocation2 + $0x100] sm:$0xff] %vm5110_vm4, %v5100_v31 }
 0x508   :  { %v5959_v52 = vpop.permute.xlu1 %5958 }
 0x509   :  { %5977 = vst.msk [vmem:[#allocation2 + $0x110] sm:$0xff] %vm4798_vm2, %v5959_v52  ;;  %v10881_v52 = vld [vmem:[%s14202_s7 + $0xd0] sm:$0xff]  }
 0x50a   :  { %v6698_v4 = vpop.permute.xlu0 %6697  ;;  %v6905_v49 = vld [vmem:[#allocation2 + $0x108] sm:$0xff]  ;;  %10075 = vmatprep.subr.bf16.mxu1 %v10881_v52 }
 0x50b   :  { %6716 = vst.msk [vmem:[#allocation2 + $0x118] sm:$0xff] %vm4954_vm3, %v6698_v4  ;;  %v6925_v12 = vpack.c.bf16 %v6905_v49, %v6905_v49  ;;  %v10882_v4 = vld [vmem:[%s14202_s7 + $0x90] sm:$0xff]  }
 0x50c   :  { %v6114_v43 = vpop.permute.xlu1 %6113  ;;  %v10883_v49 = vld [vmem:[%s14202_s7 + $0x70] sm:$0xff]   ;;  %10076 = vmatpush3.bf16.msra.mxu1 %v10882_v4 }
 0x50d   :  { %6132 = vst.msk [vmem:[#allocation2 + $0x110] sm:$0xff] %vm4954_vm3, %v6114_v43  ;;  %7255 = vmatprep.mubr.bf16.mxu0 %v6925_v12  ;;  %10061 = vmatprep.subr.bf16.mxu0 %v10883_v49 }
 0x50e   :  { %v6853_v35 = vpop.permute.xlu0 %6852  ;;  %v6904_v47 = vld [vmem:[#allocation2 + $0x100] sm:$0xff] }
 0x50f   :  { %6871 = vst.msk [vmem:[#allocation2 + $0x118] sm:$0xff] %vm5110_vm4, %v6853_v35  ;;  %v6924_v45 = vpack.c.bf16 %v6904_v47, %v6904_v47  ;;  %v10884_v35 = vld [vmem:[%s14202_s7 + $0x30] sm:$0xff]   ;;  %v10885_v47 = vld [vmem:[%s14202_s7 + $0xd8] sm:$0xff]  }
 0x510   :  { %v6269_v7 = vpop.permute.xlu1 %6268  ;;  %10062 = vmatpush3.bf16.msra.mxu0 %v10884_v35  ;;  %10077 = vmatprep.subr.bf16.mxu1 %v10885_v47 }
 0x511   :  { %6287 = vst.msk [vmem:[#allocation2 + $0x110] sm:$0xff] %vm5110_vm4, %v6269_v7  ;;  %7256 = vmatmul.mubr.bf16.gmra.mrb[188].mxu0 %v6924_v45  ;;  %v10886_v45 = vld [vmem:[%s14202_s7 + $0x78] sm:$0xff]  }
 0x512   :  { %10063 = vmatprep.subr.bf16.mxu0 %v10886_v45 }
 0x516   :  { %v6907_v30 = vld [vmem:[#allocation2 + $0x118] sm:$0xff] }
 0x517   :  { %v6927_v44 = vpack.c.bf16 %v6907_v30, %v6907_v30 }
 0x518   :  { %v6906_v40 = vld [vmem:[#allocation2 + $0x110] sm:$0xff] }
 0x519   :  { %7327 = vmatprep.mubr.bf16.mxu1 %v6927_v44  ;;  %v6926_v10 = vpack.c.bf16 %v6906_v40, %v6906_v40  ;;  %v10887_v44 = vld [vmem:[%s14202_s7 + $0x98] sm:$0xff]  }
 0x51a   :  { %v10888_v40 = vld [vmem:[%s14202_s7 + $0x38] sm:$0xff]   ;;  %10078 = vmatpush3.bf16.msra.mxu1 %v10887_v44 }
 0x51b   :  { %v9973_v15 = vpop.f32.mrb[172].mxu0  ;;  %7328 = vmatmul.mubr.bf16.gmra.mrb[196].mxu1 %v6926_v10  ;;  %10064 = vmatpush3.bf16.msra.mxu0 %v10888_v40  ;;  %v10891_v40 = vld [vmem:[%s14202_s7 + $0x100] sm:$0xff]  }
 0x51c   :  { %v9974_v11 = vpop.f32.mrb[173].mxu0  ;;  %10718 = vmatprep.subr.bf16.mxu0 %v10937_v1 }
 0x51d   :  { %v9975_v53 = vadd.f32 %v9974_v11, %v9973_v15  ;;  %v9976_v13 = vpop.f32.mrb[174].mxu0 }
 0x51e   :  { %v9977_v56 = vpop.f32.mrb[175].mxu0 }
 0x51f   :  { %v9978_v14 = vadd.f32 %v9977_v56, %v9976_v13  ;;  %v7226_v36 = vadd.f32 %v9975_v53, %v13738_v42 }
 0x521   :  { %v7229_v0 = vadd.f32 %v9978_v14, %v13738_v42 }
 0x523   :  { %v9979_v17 = vpop.f32.mrb[176].mxu0 }
 0x524   :  { %v9980_v26 = vpop.f32.mrb[177].mxu0 }
 0x525   :  { %v13678_v6 = vadd.f32 %v9980_v26, %v9979_v17  ;;  %v9982_v19 = vpop.f32.mrb[178].mxu0 }
 0x526   :  { %v9983_v22 = vpop.f32.mrb[179].mxu0 }
 0x527   :  { %v13680_v9 = vadd.f32 %v9983_v22, %v9982_v19  ;;  %v7234_v15 = vadd.f32 %v13678_v6, %v13738_v42  ;;  %v10889_v6 = vld [vmem:[%s14202_s7 + $0xe0] sm:$0xff]  }
 0x528   :  { %10079 = vmatprep.subr.bf16.mxu1 %v10889_v6 }
 0x529   :  { %v7237_v56 = vadd.f32 %v13680_v9, %v13738_v42  ;;  %v10890_v9 = vld [vmem:[%s14202_s7 + $0xa0] sm:$0xff]  }
 0x52a   :  { %10080 = vmatpush3.bf16.msra.mxu1 %v10890_v9 }
 0x52b   :  { %v9985_v48 = vpop.f32.mrb[180].mxu0 }
 0x52c   :  { %v9986_v23 = vpop.f32.mrb[181].mxu0 }
 0x52d   :  { %v13682_v24 = vadd.f32 %v9986_v23, %v9985_v48  ;;  %v9988_v25 = vpop.f32.mrb[182].mxu0 }
 0x52e   :  { %v9989_v27 = vpop.f32.mrb[183].mxu0 }
 0x52f   :  { %v13684_v59 = vadd.f32 %v9989_v27, %v9988_v25  ;;  %v7242_v25 = vadd.f32 %v13682_v24, %v13738_v42  ;;  %v10894_v24 = vld [vmem:[%s14202_s7 + $0xa8] sm:$0xff]  }
 0x533   :  { %v9991_v37 = vpop.f32.mrb[184].mxu0 }
 0x534   :  { %v9992_v18 = vpop.f32.mrb[185].mxu0 }
 0x535   :  { %v13686_v29 = vadd.f32 %v9992_v18, %v9991_v37  ;;  %v9994_v21 = vpop.f32.mrb[186].mxu0  ;;  %v10892_v18 = vld [vmem:[%s14202_s7 + $0xe8] sm:$0xff]  }
 0x536   :  { %v9995_v20 = vpop.f32.mrb[187].mxu0  ;;  %10081 = vmatprep.subr.bf16.mxu1 %v10892_v18  ;;  %v7809_v18 = vld [vmem:[%s14204_s9 + $0x40] sm:$0xff] }
 0x537   :  { %v13688_v28 = vadd.f32 %v9995_v20, %v9994_v21  ;;  %v7245_v20 = vadd.f32 %v13684_v59, %v13738_v42  ;;  %10082 = vmatpush3.bf16.msra.mxu1 %v10894_v24  ;;  %v10897_v59 = vld [vmem:[%s14202_s7 + $0xb0] sm:$0xff]   ;;  %v7250_v16 = vadd.f32 %v13686_v29, %v13738_v42 }
 0x538   :  { %10083 = vmatprep.subr.bf16.mxu1 %v10896_v50  ;;  %v7821_v50 = vld [vmem:[%s14204_s9 + $0xa0] sm:$0xff] }
 0x539   :  { %v7253_v32 = vadd.f32 %v13688_v28, %v13738_v42 }
 0x53b   :  { %10084 = vmatpush3.bf16.msra.mxu1 %v10897_v59  ;;  %v7818_v59 = vld [vmem:[%s14204_s9 + $0x88] sm:$0xff] }
 0x53c   :  { %10085 = vmatprep.subr.bf16.mxu1 %v10899_v2  ;;  %v7825_v2 = vld [vmem:[%s14204_s9 + $0xc0] sm:$0xff] }
 0x53f   :  { %10086 = vmatpush3.bf16.msra.mxu1 %v10900_v55  ;;  %v7829_v55 = vld [vmem:[%s14204_s9 + $0xe0] sm:$0xff] }
 0x5bb   :  { %v10019_v57 = vpop.f32.mrb[180].mxu1 }
 0x5bc   :  { %v10020_v60 = vpop.f32.mrb[181].mxu1 }
 0x5bd   :  { %v10021_v41 = vadd.f32 %v10020_v60, %v10019_v57  ;;  %v10022_v62 = vpop.f32.mrb[182].mxu1 }
 0x5be   :  { %v10023_v63 = vpop.f32.mrb[183].mxu1 }
 0x5bf   :  { %v7298_v5 = vadd.f32 %v10021_v41, %v7226_v36  ;;  %v10024_v31 = vadd.f32 %v10023_v63, %v10022_v62 }
 0x5c1   :  { %v7335_v12 = vmax.f32 %v7298_v5, 0.0  ;;  %v7301_v43 = vadd.f32 %v10024_v31, %v7229_v0 }
 0x5c3   :  { %v7336_v7 = vmax.f32 %v7301_v43, 0.0  ;;  %v10025_v30 = vpop.f32.mrb[184].mxu1  ;;  %7345 = vst.msk [vmem:[#allocation3] sm:$0xff] %vm7344_vm5, %v7335_v12 }
 0x5c4   :  { %v10026_v10 = vpop.f32.mrb[185].mxu1 }
 0x5c5   :  { %v10027_v11 = vadd.f32 %v10026_v10, %v10025_v30  ;;  %v10028_v53 = vpop.f32.mrb[186].mxu1  ;;  %7347 = vrot.lane.b32.xlu1 %v7336_v7, %s10939_s24 }
 0x5c6   :  { %v10029_v13 = vpop.f32.mrb[187].mxu1 }
 0x5c7   :  { %v7306_v14 = vadd.f32 %v10027_v11, %v7234_v15  ;;  %v10030_v17 = vadd.f32 %v10029_v13, %v10028_v53  ;;  %v10893_v15 = vld [vmem:[%s14202_s7 + $0x108] sm:$0xff]   ;;  %v10895_v11 = vld [vmem:[%s14202_s7 + $0x110] sm:$0xff]   ;;  %v10898_v13 = vld [vmem:[%s14202_s7 + $0x118] sm:$0xff]  }
 0x5c9   :  { %v7337_v26 = vmax.f32 %v7306_v14, 0.0  ;;  %v7309_v19 = vadd.f32 %v10030_v17, %v7237_v56 }
 0x5cb   :  { %v7338_v22 = vmax.f32 %v7309_v19, 0.0  ;;  %v10031_v48 = vpop.f32.mrb[188].mxu1  ;;  %7352 = vst.msk [vmem:[#allocation3 + $0x8] sm:$0xff] %vm7344_vm5, %v7337_v26 }
 0x5cc   :  { %v10032_v23 = vpop.f32.mrb[189].mxu1 }
 0x5cd   :  { %v10033_v27 = vadd.f32 %v10032_v23, %v10031_v48  ;;  %v10034_v37 = vpop.f32.mrb[190].mxu1  ;;  %7354 = vrot.lane.b32.xlu0 %v7338_v22, %s10939_s24  ;;  %v7801_v22 = vld [vmem:[%s14204_s9] sm:$0xff] }
 0x5ce   :  { %v10035_v21 = vpop.f32.mrb[191].mxu1  ;;  %v7805_v48 = vld [vmem:[%s14204_s9 + $0x20] sm:$0xff] }
 0x5cf   :  { %v7314_v39 = vadd.f32 %v10033_v27, %v7242_v25  ;;  %v10036_v8 = vadd.f32 %v10035_v21, %v10034_v37  ;;  %v9614_v9 = vcombine.low %v7801_v22, %v7805_v48  ;;  %v9615_v23 = vcombine.high %v7801_v22, %v7805_v48  ;;  %v7806_v25 = vld [vmem:[%s14204_s9 + $0x28] sm:$0xff]  ;;  %v7813_v21 = vld [vmem:[%s14204_s9 + $0x60] sm:$0xff] }
 0x5d0   :  { %v9622_v24 = vcombine.low %v7809_v18, %v7813_v21 }
 0x5d1   :  { %v7339_v58 = vmax.f32 %v7314_v39, 0.0  ;;  %v7317_v46 = vadd.f32 %v10036_v8, %v7245_v20  ;;  %v7810_v20 = vld [vmem:[%s14204_s9 + $0x48] sm:$0xff]  ;;  %v9623_v39 = vcombine.high %v7809_v18, %v7813_v21 }
 0x5d2   :  { %v7814_v8 = vld [vmem:[%s14204_s9 + $0x68] sm:$0xff] }
 0x5d3   :  { %v7340_v61 = vmax.f32 %v7317_v46, 0.0  ;;  %7358 = vst.msk [vmem:[#allocation3 + $0x10] sm:$0xff] %vm7344_vm5, %v7339_v58  ;;  %v9624_v58 = vcombine.low %v7810_v20, %v7814_v8  ;;  %v9625_v46 = vcombine.high %v7810_v20, %v7814_v8  ;;  %v7831_v8 = vld [vmem:[%s14204_s9 + $0xf0] sm:$0xff] }
 0x5d5   :  { %7360 = vrot.lane.b32.xlu1 %v7340_v61, %s10939_s24  ;;  %v7817_v61 = vld [vmem:[%s14204_s9 + $0x80] sm:$0xff] }
 0x5d6   :  { %v10037_v51 = vpop.f32.mrb[192].mxu1 }
 0x5d7   :  { %v10038_v54 = vpop.f32.mrb[193].mxu1 }
 0x5d8   :  { %v10039_v33 = vadd.f32 %v10038_v54, %v10037_v51  ;;  %v10040_v38 = vpop.f32.mrb[194].mxu1  ;;  %v9631_v51 = vcombine.high %v7817_v61, %v7821_v50  ;;  %v7822_v54 = vld [vmem:[%s14204_s9 + $0xa8] sm:$0xff] }
 0x5d9   :  { %v10041_v3 = vpop.f32.mrb[195].mxu1 }
 0x5da   :  { %v7322_v57 = vadd.f32 %v10039_v33, %v7250_v16  ;;  %v10042_v34 = vadd.f32 %v10041_v3, %v10040_v38  ;;  %v9630_v16 = vcombine.low %v7817_v61, %v7821_v50  ;;  %v9632_v33 = vcombine.low %v7818_v59, %v7822_v54  ;;  %v7826_v3 = vld [vmem:[%s14204_s9 + $0xc8] sm:$0xff] }
 0x5db   :  { %v9633_v38 = vcombine.high %v7818_v59, %v7822_v54 }
 0x5dc   :  { %v7341_v60 = vmax.f32 %v7322_v57, 0.0  ;;  %v7325_v29 = vadd.f32 %v10042_v34, %v7253_v32  ;;  %v9639_v32 = vcombine.high %v7825_v2, %v7829_v55  ;;  %v7830_v57 = vld [vmem:[%s14204_s9 + $0xe8] sm:$0xff]  ;;  %v9638_v34 = vcombine.low %v7825_v2, %v7829_v55  ;;  %v7833_v55 = vld [vmem:[%s14205_s10] sm:$0xff] }
 0x5de   :  { %v7342_v36 = vmax.f32 %v7325_v29, 0.0  ;;  %7364 = vst.msk [vmem:[#allocation3 + $0x18] sm:$0xff] %vm7344_vm5, %v7341_v60  ;;  %v9640_v60 = vcombine.low %v7826_v3, %v7830_v57  ;;  %v9641_v29 = vcombine.high %v7826_v3, %v7830_v57 }
 0x5e0   :  { %7366 = vrot.lane.b32.xlu0 %v7342_v36, %s10939_s24  ;;  %v7803_v36 = vld [vmem:[%s14204_s9 + $0x10] sm:$0xff] }
 0x5e4   :  { %v9997_v41 = vpop.f32.mrb[188].mxu0 }
 0x5e5   :  { %v9998_v62 = vpop.f32.mrb[189].mxu0 }
 0x5e6   :  { %v9999_v63 = vadd.f32 %v9998_v62, %v9997_v41  ;;  %v10000_v0 = vpop.f32.mrb[190].mxu0  ;;  %v7807_v41 = vld [vmem:[%s14204_s9 + $0x30] sm:$0xff]  ;;  %v7804_v62 = vld [vmem:[%s14204_s9 + $0x18] sm:$0xff] }
 0x5e7   :  { %v10001_v5 = vpop.f32.mrb[191].mxu0  ;;  %v9619_v0 = vcombine.high %v7803_v36, %v7807_v41 }
 0x5e8   :  { %v7258_v28 = vadd.f32 %v9999_v63, %v13738_v42  ;;  %v9618_v63 = vcombine.low %v7803_v36, %v7807_v41  ;;  %v7808_v5 = vld [vmem:[%s14204_s9 + $0x38] sm:$0xff] }
 0x5ee   :  { %v10043_v31 = vpop.f32.mrb[196].mxu1 }
 0x5ef   :  { %v10044_v52 = vpop.f32.mrb[197].mxu1 }
 0x5f0   :  { %v10045_v4 = vadd.f32 %v10044_v52, %v10043_v31  ;;  %v10046_v49 = vpop.f32.mrb[198].mxu1  ;;  %v10942_v31 = vmov 0   ;;  %v9620_v52 = vcombine.low %v7804_v62, %v7808_v5 }
 0x5f1   :  { %v10047_v12 = vpop.f32.mrb[199].mxu1 }
 0x5f2   :  { %v7330_v43 = vadd.f32 %v10045_v4, %v7258_v28  ;;  %v9621_v28 = vcombine.high %v7804_v62, %v7808_v5 }
 0x5f4   :  { %v7343_v35 = vmax.f32 %v7330_v43, 0.0 }
 0x5f6   :  { %7370 = vst.msk [vmem:[#allocation3 + $0x20] sm:$0xff] %vm7344_vm5, %v7343_v35 }
 0x5fd   :  { %v7375_v56 = vld [vmem:[#allocation3 + $0x20] sm:$0xff] }
 0x5fe   :  { %v7380_v14 = vpack.c.bf16 %v7375_v56, %v7375_v56 }
 0x637   :  { %v7348_v47 = vpop.permute.xlu1 %7347 }
 0x638   :  { %7351 = vst.msk [vmem:[#allocation3] sm:$0xff] %vm7350_vm6, %v7348_v47 }
 0x63f   :  { %v7355_v45 = vpop.permute.xlu0 %7354  ;;  %v7371_v7 = vld [vmem:[#allocation3] sm:$0xff] }
 0x640   :  { %7357 = vst.msk [vmem:[#allocation3 + $0x8] sm:$0xff] %vm7350_vm6, %v7355_v45  ;;  %v7376_v10 = vpack.c.bf16 %v7371_v7, %v7371_v7  ;;  %v9576_v7 = vld [vmem:[%s14203_s8] ss:$0 sm:$0xff] }
 0x647   :  { %v7361_v30 = vpop.permute.xlu1 %7360  ;;  %v7372_v44 = vld [vmem:[#allocation3 + $0x8] sm:$0xff] }
 0x648   :  { %7363 = vst.msk [vmem:[#allocation3 + $0x10] sm:$0xff] %vm7350_vm6, %v7361_v30  ;;  %v7377_v42 = vpack.c.bf16 %v7372_v44, %v7372_v44 }
 0x64a   :  { %7711 = vmatprep.mubr.bf16.mxu0 %v7377_v42 }
 0x64b   :  { %7712 = vmatmul.mubr.bf16.vlgmr.msra.gmra.mrb[192].mxu0 %v7376_v10 }
 0x64c   :  { %10719 = vmatpush3.bf16.msra.mxu0 %v10891_v40  ;;  %10726 = vmatprep.mubr.msk.bf16.mxu0 %vm10938_vm0, %v10937_v1 }
 0x64d   :  { %10720 = vmatprep.subr.bf16.mxu0 %v10937_v1 }
 0x64f   :  { %v7373_v17 = vld [vmem:[#allocation3 + $0x10] sm:$0xff] }
 0x650   :  { %10721 = vmatpush3.bf16.msra.mxu0 %v10893_v15  ;;  %v7378_v6 = vpack.c.bf16 %v7373_v17, %v7373_v17  ;;  %v7815_v17 = vld [vmem:[%s14204_s9 + $0x70] sm:$0xff] }
 0x651   :  { %10722 = vmatprep.subr.bf16.mxu0 %v10937_v1 }
 0x652   :  { %v7367_v53 = vpop.permute.xlu0 %7366 }
 0x653   :  { %7369 = vst.msk [vmem:[#allocation3 + $0x18] sm:$0xff] %vm7350_vm6, %v7367_v53 }
 0x654   :  { %10723 = vmatpush3.bf16.msra.mxu0 %v10895_v11 }
 0x655   :  { %10724 = vmatprep.subr.bf16.mxu0 %v10937_v1  ;;  %v7802_v1 = vld [vmem:[%s14204_s9 + $0x8] sm:$0xff] }
 0x656   :  { %v9616_v27 = vcombine.low %v7802_v1, %v7806_v25  ;;  %v9617_v37 = vcombine.high %v7802_v1, %v7806_v25  ;;  %v7820_v25 = vld [vmem:[%s14204_s9 + $0x98] sm:$0xff] }
 0x658   :  { %10725 = vmatpush3.bf16.msra.mxu0 %v10898_v13  ;;  %8079 = vmatprep.subr.bf16.mxu1 %v9617_v37 }
 0x659   :  { %8038 = vmatprep.subr.bf16.mxu0 %v9615_v23  ;;  %v7823_v23 = vld [vmem:[%s14204_s9 + $0xb0] sm:$0xff] }
 0x65a   :  { %v7374_v26 = vld [vmem:[#allocation3 + $0x18] sm:$0xff] }
 0x65b   :  { %10727 = vmatmul.mubr.msk.bf16.vlgmr.msra.gmra.mrb[196].mxu0 %vm7344_vm5, %v7380_v14  ;;  %v7379_v19 = vpack.c.bf16 %v7374_v26, %v7374_v26  ;;  %v7811_v14 = vld [vmem:[%s14204_s9 + $0x50] sm:$0xff]  ;;  %v7812_v26 = vld [vmem:[%s14204_s9 + $0x58] sm:$0xff] }
 0x65c   :  { %8039 = vmatpush1.bf16.msra.mxu0 %v9614_v9  ;;  %8070 = vmatprep.mubr.bf16.mxu0 %v10942_v31  ;;  %v9627_v48 = vcombine.high %v7811_v14, %v7815_v17  ;;  %v7819_v9 = vld [vmem:[%s14204_s9 + $0x90] sm:$0xff]  ;;  %v9626_v37 = vcombine.low %v7811_v14, %v7815_v17 }
 0x65d   :  { %7751 = vmatprep.mubr.bf16.mxu1 %v7379_v19  ;;  %8040 = vmatprep.subr.bf16.mxu0 %v9623_v39  ;;  %v7816_v19 = vld [vmem:[%s14204_s9 + $0x78] sm:$0xff]  ;;  %v9635_v21 = vcombine.high %v7819_v9, %v7823_v23  ;;  %v7827_v39 = vld [vmem:[%s14204_s9 + $0xd0] sm:$0xff] }
 0x65e   :  { %7752 = vmatmul.mubr.bf16.vlgmr.msra.gmra.mrb[200].mxu1 %v7378_v6  ;;  %v9629_v1 = vcombine.high %v7812_v26, %v7816_v19  ;;  %v9628_v18 = vcombine.low %v7812_v26, %v7816_v19  ;;  %v9643_v50 = vcombine.high %v7827_v39, %v7831_v8 }
 0x65f   :  { %8080 = vmatpush1.bf16.msra.mxu1 %v9616_v27  ;;  %8111 = vmatprep.mubr.bf16.mxu1 %v10942_v31  ;;  %v7824_v27 = vld [vmem:[%s14204_s9 + $0xb8] sm:$0xff] }
 0x660   :  { %8081 = vmatprep.subr.bf16.mxu1 %v9625_v46  ;;  %8041 = vmatpush1.bf16.msra.mxu0 %v9622_v24  ;;  %v9637_v20 = vcombine.high %v7820_v25, %v7824_v27  ;;  %v7828_v24 = vld [vmem:[%s14204_s9 + $0xd8] sm:$0xff]  ;;  %v9634_v46 = vcombine.low %v7819_v9, %v7823_v23  ;;  %v9636_v61 = vcombine.low %v7820_v25, %v7824_v27 }
 0x661   :  { %8042 = vmatprep.subr.bf16.mxu0 %v9631_v51  ;;  %v9642_v51 = vcombine.low %v7827_v39, %v7831_v8 }
 0x663   :  { %8082 = vmatpush1.bf16.msra.mxu1 %v9624_v58  ;;  %v7832_v58 = vld [vmem:[%s14204_s9 + $0xf8] sm:$0xff] }
 0x664   :  { %8083 = vmatprep.subr.bf16.mxu1 %v9633_v38  ;;  %8043 = vmatpush1.bf16.msra.mxu0 %v9630_v16  ;;  %v9645_v59 = vcombine.high %v7828_v24, %v7832_v58  ;;  %v9644_v54 = vcombine.low %v7828_v24, %v7832_v58  ;;  %v7835_v16 = vlaneseq }
 0x665   :  { %8044 = vmatprep.subr.bf16.mxu0 %v9639_v32 }
 0x667   :  { %8084 = vmatpush1.bf16.msra.mxu1 %v9632_v33  ;;  %v7836_v33 = vshrl.u32 %v7835_v16, 7 }
 0x668   :  { %8085 = vmatprep.subr.bf16.mxu1 %v9641_v29  ;;  %8045 = vmatpush1.bf16.msra.mxu0 %v9638_v34 }
 0x669   :  { %8120 = vmatprep.subr.bf16.mxu0 %v9619_v0  ;;  %v13945_v38 = vsub.s32 0, %v7836_v33  ;;  %v13947_v2 = vsub.s32 2, %v7836_v33  ;;  %v13952_v3 = vsub.s32 1, %v7836_v33  ;;  %v13954_v32 = vsub.s32 3, %v7836_v33 }
 0x66b   :  { %8086 = vmatpush1.bf16.msra.mxu1 %v9640_v60  ;;  %v7838_v57 = vrot.slane %v7833_v55, %v13945_v38  ;;  %v7846_v34 = vrot.slane %v7833_v55, %v13947_v2  ;;  %v7842_v60 = vrot.slane %v7833_v55, %v13952_v3  ;;  %v7850_v29 = vrot.slane %v7833_v55, %v13954_v32 }
 0x66c   :  { %8161 = vmatprep.subr.bf16.mxu1 %v9621_v28 }
 0x71e   :  { %v10065_v4 = vpop.f32.mrb[192].mxu0 }
 0x71f   :  { %v10066_v49 = vpop.f32.mrb[193].mxu0 }
 0x720   :  { %v10067_v12 = vadd.f32 %v10066_v49, %v10065_v4  ;;  %v10068_v43 = vpop.f32.mrb[194].mxu0 }
 0x721   :  { %v10069_v35 = vpop.f32.mrb[195].mxu0 }
 0x722   :  { %v7714_v10 = vadd.f32 %v10067_v12, %v9576_v7 }
 0x72e   :  { %v7793_v47 = vpop.f32.mrb[196].mxu0 }
 0x72f   :  { %v10728_v45 = vpop.f32.mrb[197].mxu0 }
 0x730   :  { %v7796_v30 = vpop.f32.mrb[198].mxu0 }
 0x731   :  { %v10729_v44 = vpop.f32.mrb[199].mxu0  ;;  %v10087_v42 = vpop.f32.mrb[200].mxu1  ;;  %v7853_v30 = vsub.s32 4, %v7836_v33 }
 0x732   :  { %v10088_v40 = vpop.f32.mrb[201].mxu1  ;;  %v7861_v44 = vsub.s32 6, %v7836_v33 }
 0x733   :  { %v10089_v15 = vadd.f32 %v10088_v40, %v10087_v42  ;;  %v10090_v11 = vpop.f32.mrb[202].mxu1  ;;  %v7857_v42 = vsub.s32 5, %v7836_v33  ;;  %v7865_v40 = vsub.s32 7, %v7836_v33 }
 0x734   :  { %v10091_v53 = vpop.f32.mrb[203].mxu1 }
 0x735   :  { %v7754_v13 = vadd.f32 %v10089_v15, %v7714_v10  ;;  %v7854_v10 = vrot.slane %v7833_v55, %v7853_v30  ;;  %v7862_v15 = vrot.slane %v7833_v55, %v7861_v44  ;;  %v7858_v11 = vrot.slane %v7833_v55, %v7857_v42 }
 0x736   :  { %v7866_v53 = vrot.slane %v7833_v55, %v7865_v40 }
 0x737   :  { %v7794_v56 = vadd.f32 %v7793_v47, %v7754_v13 }
 0x739   :  { %v7799_v6 = vmax.f32 %v7794_v56, 0.0 }
 0x73b   :  { %v7800_v22 = vpack.c.bf16 %v7799_v6, %v7799_v6 }
 0x73d   :  { %9646 = vmatmul.mubr.msk.bf16.vlgmr.msra.gmra.mrb[200].mxu0 %vm7344_vm5, %v7800_v22  ;;  %9647 = vmatmul.mubr.msk.bf16.vlgmr.msra.gmra.mrb[204].mxu1 %vm7344_vm5, %v7800_v22 }
 0x73e   :  { %8121 = vmatpush1.bf16.msra.mxu0 %v9618_v63  ;;  %8162 = vmatpush1.bf16.msra.mxu1 %v9620_v52 }
 0x73f   :  { %8122 = vmatprep.subr.bf16.mxu0 %v9627_v48  ;;  %8163 = vmatprep.subr.bf16.mxu1 %v9629_v1 }
 0x740   :  { %8152 = vmatprep.mubr.bf16.mxu0 %v10942_v31  ;;  %8193 = vmatprep.mubr.bf16.mxu1 %v10942_v31 }
 0x742   :  { %8123 = vmatpush1.bf16.msra.mxu0 %v9626_v37  ;;  %8164 = vmatpush1.bf16.msra.mxu1 %v9628_v18 }
 0x743   :  { %8124 = vmatprep.subr.bf16.mxu0 %v9635_v21  ;;  %8165 = vmatprep.subr.bf16.mxu1 %v9637_v20 }
 0x746   :  { %8125 = vmatpush1.bf16.msra.mxu0 %v9634_v46  ;;  %8166 = vmatpush1.bf16.msra.mxu1 %v9636_v61 }
 0x747   :  { %8126 = vmatprep.subr.bf16.mxu0 %v9643_v50  ;;  %8167 = vmatprep.subr.bf16.mxu1 %v9645_v59 }
 0x74a   :  { %8127 = vmatpush1.bf16.msra.mxu0 %v9642_v51  ;;  %8168 = vmatpush1.bf16.msra.mxu1 %v9644_v54 }
 0x74d   :  { %9648 = vmatmul.mubr.msk.bf16.vlgmr.msra.gmra.mrb[204].mxu0 %vm7344_vm5, %v7800_v22  ;;  %9649 = vmatmul.mubr.msk.bf16.vlgmr.msra.gmra.mrb[208].mxu1 %vm7344_vm5, %v7800_v22 }
 0x810   :  { %v8072_v36 = vpop.f32.mrb[200].mxu0  ;;  %v8113_v41 = vpop.f32.mrb[204].mxu1 }
 0x811   :  { %v13960_v62 = vadd.f32 %v8072_v36, %v7838_v57  ;;  %v13962_v63 = vadd.f32 %v8113_v41, %v7846_v34  ;;  %v8074_v0 = vpop.f32.mrb[201].mxu0  ;;  %v8115_v5 = vpop.f32.mrb[205].mxu1 }
 0x812   :  { %v8075_v52 = vadd.f32 %v8074_v0, %v7842_v60  ;;  %v8116_v28 = vadd.f32 %v8115_v5, %v7850_v29  ;;  %v8076_v4 = vpop.f32.mrb[202].mxu0  ;;  %v8117_v49 = vpop.f32.mrb[206].mxu1 }
 0x813   :  { %v8202_v12 = vmax.f32 %v13960_v62, 0.0  ;;  %v8204_v43 = vmax.f32 %v13962_v63, 0.0  ;;  %v8077_v35 = vpop.f32.mrb[203].mxu0  ;;  %v8118_v47 = vpop.f32.mrb[207].mxu1 }
 0x814   :  { %v8203_v45 = vmax.f32 %v8075_v52, 0.0  ;;  %v8205_v7 = vmax.f32 %v8116_v28, 0.0 }
 0x820   :  { %v8154_v13 = vpop.f32.mrb[204].mxu0  ;;  %v8195_v56 = vpop.f32.mrb[208].mxu1 }
 0x821   :  { %v13966_v14 = vadd.f32 %v8154_v13, %v7854_v10  ;;  %v13968_v17 = vadd.f32 %v8195_v56, %v7862_v15  ;;  %v8156_v26 = vpop.f32.mrb[205].mxu0  ;;  %v8197_v19 = vpop.f32.mrb[209].mxu1 }
 0x822   :  { %v13970_v6 = vadd.f32 %v8156_v26, %v7858_v11  ;;  %v13972_v22 = vadd.f32 %v8197_v19, %v7866_v53  ;;  %v8158_v48 = vpop.f32.mrb[206].mxu0  ;;  %v8199_v1 = vpop.f32.mrb[210].mxu1 }
 0x823   :  { %v8206_v9 = vmax.f32 %v13966_v14, 0.0  ;;  %v8208_v23 = vmax.f32 %v13968_v17, 0.0  ;;  %v8159_v25 = vpop.f32.mrb[207].mxu0  ;;  %v8200_v27 = vpop.f32.mrb[211].mxu1 }
 0x824   :  { %v8207_v37 = vmax.f32 %v13970_v6, 0.0  ;;  %v8209_v18 = vmax.f32 %v13972_v22, 0.0 }
 0x825   :  { %10935 = dma.done.wait [#allocation5], 32768 }
 0x826   :  { %10936 = vsyncadd [#allocation5], 4294934528  ;;  %v13978_v21 = vpack.c.bf16 %v8203_v45, %v8203_v45  ;;  %v13980_v20 = vpack.c.bf16 %v8205_v7, %v8205_v7  ;;  %10901 = vset.pattern.permute.xlu0 %v10942_v31  ;;  %v8224_v39 = vld [vmem:[#allocation4 + $0x8] sm:$0xff]  ;;  %v8223_v24 = vld [vmem:[#allocation4] sm:$0xff]  ;;  %v14004_v62 = vpack.c.bf16 %v8207_v37, %v8207_v37  ;;  %v14009_v63 = vpack.c.bf16 %v8209_v18, %v8209_v18 }
 0x827   :  { %v8288_v8 = vld [vmem:[#allocation4 + $0x208] sm:$0xff]  ;;  %8510 = vmatprep.subr.bf16.mxu0 %v8224_v39  ;;  %v8287_v58 = vld [vmem:[#allocation4 + $0x200] sm:$0xff]  ;;  %v8229_v14 = vld [vmem:[#allocation4 + $0x30] sm:$0xff] }
 0x828   :  { %8542 = vmatprep.mubr.bf16.mxu0 %v13978_v21  ;;  %8583 = vmatprep.mubr.bf16.mxu1 %v13980_v20  ;;  %v8228_v46 = vld [vmem:[#allocation4 + $0x28] sm:$0xff]  ;;  %v8227_v50 = vld [vmem:[#allocation4 + $0x20] sm:$0xff]  ;;  %v8293_v17 = vld [vmem:[#allocation4 + $0x230] sm:$0xff] }
 0x829   :  { %8551 = vmatprep.subr.bf16.mxu1 %v8288_v8  ;;  %v8292_v61 = vld [vmem:[#allocation4 + $0x228] sm:$0xff]  ;;  %8511 = vmatpush1.bf16.msra.mxu0 %v8223_v24  ;;  %v8291_v59 = vld [vmem:[#allocation4 + $0x220] sm:$0xff] }
 0x82a   :  { %8552 = vmatpush1.bf16.msra.mxu1 %v8287_v58  ;;  %8512 = vmatprep.subr.bf16.mxu0 %v8228_v46  ;;  %v8232_v51 = vld [vmem:[#allocation4 + $0x48] sm:$0xff]  ;;  %v8231_v54 = vld [vmem:[#allocation4 + $0x40] sm:$0xff] }
 0x82b   :  { %8553 = vmatprep.subr.bf16.mxu1 %v8292_v61  ;;  %v8296_v31 = vld [vmem:[#allocation4 + $0x248] sm:$0xff]  ;;  %v8295_v16 = vld [vmem:[#allocation4 + $0x240] sm:$0xff] }
 0x82c   :  { %v8236_v33 = vld [vmem:[#allocation4 + $0x68] sm:$0xff]  ;;  %v8235_v57 = vld [vmem:[#allocation4 + $0x60] sm:$0xff] }
 0x82d   :  { %8513 = vmatpush1.bf16.msra.mxu0 %v8227_v50  ;;  %v8300_v55 = vld [vmem:[#allocation4 + $0x268] sm:$0xff]  ;;  %v8299_v34 = vld [vmem:[#allocation4 + $0x260] sm:$0xff] }
 0x82e   :  { %8554 = vmatpush1.bf16.msra.mxu1 %v8291_v59  ;;  %8514 = vmatprep.subr.bf16.mxu0 %v8232_v51  ;;  %v8240_v60 = vld [vmem:[#allocation4 + $0x88] sm:$0xff]  ;;  %v8239_v36 = vld [vmem:[#allocation4 + $0x80] sm:$0xff]  ;;  %v13988_v51 = vld [vmem:[%s14196_s1] sm:$0xff] }
 0x82f   :  { %8555 = vmatprep.subr.bf16.mxu1 %v8296_v31  ;;  %v8304_v29 = vld [vmem:[#allocation4 + $0x288] sm:$0xff]  ;;  %v8303_v41 = vld [vmem:[#allocation4 + $0x280] sm:$0xff]  ;;  %8482 = vperm.xlu0 %10901, %v13988_v51  }
 0x830   :  { %v8244_v0 = vld [vmem:[#allocation4 + $0xa8] sm:$0xff]  ;;  %v8243_v52 = vld [vmem:[#allocation4 + $0xa0] sm:$0xff] }
 0x831   :  { %8515 = vmatpush1.bf16.msra.mxu0 %v8231_v54  ;;  %v8308_v5 = vld [vmem:[#allocation4 + $0x2a8] sm:$0xff]  ;;  %v8307_v28 = vld [vmem:[#allocation4 + $0x2a0] sm:$0xff] }
 0x832   :  { %8556 = vmatpush1.bf16.msra.mxu1 %v8295_v16  ;;  %8516 = vmatprep.subr.bf16.mxu0 %v8236_v33  ;;  %v8248_v4 = vld [vmem:[#allocation4 + $0xc8] sm:$0xff]  ;;  %v8247_v35 = vld [vmem:[#allocation4 + $0xc0] sm:$0xff] }
 0x833   :  { %8557 = vmatprep.subr.bf16.mxu1 %v8300_v55  ;;  %v8312_v49 = vld [vmem:[#allocation4 + $0x2c8] sm:$0xff]  ;;  %v8311_v47 = vld [vmem:[#allocation4 + $0x2c0] sm:$0xff] }
 0x834   :  { %v8252_v45 = vld [vmem:[#allocation4 + $0xe8] sm:$0xff]  ;;  %v8251_v30 = vld [vmem:[#allocation4 + $0xe0] sm:$0xff] }
 0x835   :  { %8517 = vmatpush1.bf16.msra.mxu0 %v8235_v57  ;;  %v8316_v7 = vld [vmem:[#allocation4 + $0x2e8] sm:$0xff]  ;;  %v8315_v44 = vld [vmem:[#allocation4 + $0x2e0] sm:$0xff] }
 0x836   :  { %8558 = vmatpush1.bf16.msra.mxu1 %v8299_v34  ;;  %8518 = vmatprep.subr.bf16.mxu0 %v8240_v60  ;;  %v8256_v42 = vld [vmem:[#allocation4 + $0x108] sm:$0xff]  ;;  %v8255_v10 = vld [vmem:[#allocation4 + $0x100] sm:$0xff] }
 0x837   :  { %8559 = vmatprep.subr.bf16.mxu1 %v8304_v29  ;;  %v8320_v40 = vld [vmem:[#allocation4 + $0x308] sm:$0xff]  ;;  %v8319_v15 = vld [vmem:[#allocation4 + $0x300] sm:$0xff] }
 0x838   :  { %v8260_v11 = vld [vmem:[#allocation4 + $0x128] sm:$0xff]  ;;  %v8259_v13 = vld [vmem:[#allocation4 + $0x120] sm:$0xff] }
 0x839   :  { %8519 = vmatpush1.bf16.msra.mxu0 %v8239_v36  ;;  %v8324_v53 = vld [vmem:[#allocation4 + $0x328] sm:$0xff]  ;;  %v8323_v56 = vld [vmem:[#allocation4 + $0x320] sm:$0xff] }
 0x83a   :  { %8560 = vmatpush1.bf16.msra.mxu1 %v8303_v41  ;;  %8520 = vmatprep.subr.bf16.mxu0 %v8244_v0  ;;  %v8264_v26 = vld [vmem:[#allocation4 + $0x148] sm:$0xff]  ;;  %v8263_v48 = vld [vmem:[#allocation4 + $0x140] sm:$0xff] }
 0x83b   :  { %8561 = vmatprep.subr.bf16.mxu1 %v8308_v5  ;;  %v8328_v19 = vld [vmem:[#allocation4 + $0x348] sm:$0xff]  ;;  %v8327_v1 = vld [vmem:[#allocation4 + $0x340] sm:$0xff]  ;;  %v13994_v5 = vpack.c.bf16 %v8202_v12, %v8202_v12 }
 0x83c   :  { %v8268_v25 = vld [vmem:[#allocation4 + $0x168] sm:$0xff]  ;;  %v8267_v39 = vld [vmem:[#allocation4 + $0x160] sm:$0xff] }
 0x83d   :  { %8521 = vmatpush1.bf16.msra.mxu0 %v8243_v52  ;;  %v8332_v27 = vld [vmem:[#allocation4 + $0x368] sm:$0xff]  ;;  %v8331_v8 = vld [vmem:[#allocation4 + $0x360] sm:$0xff]  ;;  %v13999_v52 = vpack.c.bf16 %v8204_v43, %v8204_v43 }
 0x83e   :  { %8562 = vmatpush1.bf16.msra.mxu1 %v8307_v28  ;;  %8522 = vmatprep.subr.bf16.mxu0 %v8248_v4  ;;  %v8272_v24 = vld [vmem:[#allocation4 + $0x188] sm:$0xff]  ;;  %v8271_v46 = vld [vmem:[#allocation4 + $0x180] sm:$0xff] }
 0x83f   :  { %8563 = vmatprep.subr.bf16.mxu1 %v8312_v49  ;;  %v8336_v58 = vld [vmem:[#allocation4 + $0x388] sm:$0xff]  ;;  %v8335_v61 = vld [vmem:[#allocation4 + $0x380] sm:$0xff] }
 0x840   :  { %v8276_v50 = vld [vmem:[#allocation4 + $0x1a8] sm:$0xff]  ;;  %v8275_v31 = vld [vmem:[#allocation4 + $0x1a0] sm:$0xff] }
 0x841   :  { %8523 = vmatpush1.bf16.msra.mxu0 %v8247_v35  ;;  %v8340_v59 = vld [vmem:[#allocation4 + $0x3a8] sm:$0xff]  ;;  %v8339_v54 = vld [vmem:[#allocation4 + $0x3a0] sm:$0xff] }
 0x842   :  { %8564 = vmatpush1.bf16.msra.mxu1 %v8311_v47  ;;  %8524 = vmatprep.subr.bf16.mxu0 %v8252_v45  ;;  %v8280_v16 = vld [vmem:[#allocation4 + $0x1c8] sm:$0xff]  ;;  %v8279_v55 = vld [vmem:[#allocation4 + $0x1c0] sm:$0xff] }
 0x843   :  { %8565 = vmatprep.subr.bf16.mxu1 %v8316_v7  ;;  %v8344_v33 = vld [vmem:[#allocation4 + $0x3c8] sm:$0xff]  ;;  %v8343_v57 = vld [vmem:[#allocation4 + $0x3c0] sm:$0xff] }
 0x844   :  { %v8284_v34 = vld [vmem:[#allocation4 + $0x1e8] sm:$0xff]  ;;  %v8283_v29 = vld [vmem:[#allocation4 + $0x1e0] sm:$0xff] }
 0x845   :  { %8525 = vmatpush1.bf16.msra.mxu0 %v8251_v30  ;;  %v8348_v60 = vld [vmem:[#allocation4 + $0x3e8] sm:$0xff]  ;;  %v8347_v36 = vld [vmem:[#allocation4 + $0x3e0] sm:$0xff] }
 0x846   :  { %8566 = vmatpush1.bf16.msra.mxu1 %v8315_v44  ;;  %8526 = vmatprep.subr.bf16.mxu0 %v8256_v42  ;;  %v8352_v41 = vld [vmem:[#allocation4 + $0x408] sm:$0xff]  ;;  %v8351_v28 = vld [vmem:[#allocation4 + $0x400] sm:$0xff] }
 0x847   :  { %8567 = vmatprep.subr.bf16.mxu1 %v8320_v40  ;;  %v8416_v0 = vld [vmem:[#allocation4 + $0x608] sm:$0xff]  ;;  %v8415_v4 = vld [vmem:[#allocation4 + $0x600] sm:$0xff] }
 0x848   :  { %v8356_v49 = vld [vmem:[#allocation4 + $0x428] sm:$0xff]  ;;  %v8355_v12 = vld [vmem:[#allocation4 + $0x420] sm:$0xff] }
 0x849   :  { %8527 = vmatpush1.bf16.msra.mxu0 %v8255_v10  ;;  %v8420_v35 = vld [vmem:[#allocation4 + $0x628] sm:$0xff]  ;;  %v8419_v43 = vld [vmem:[#allocation4 + $0x620] sm:$0xff] }
 0x84a   :  { %8568 = vmatpush1.bf16.msra.mxu1 %v8319_v15  ;;  %8528 = vmatprep.subr.bf16.mxu0 %v8260_v11  ;;  %v8360_v47 = vld [vmem:[#allocation4 + $0x448] sm:$0xff]  ;;  %v8359_v22 = vld [vmem:[#allocation4 + $0x440] sm:$0xff] }
 0x84b   :  { %8569 = vmatprep.subr.bf16.mxu1 %v8324_v53  ;;  %v8424_v6 = vld [vmem:[#allocation4 + $0x648] sm:$0xff]  ;;  %v8423_v37 = vld [vmem:[#allocation4 + $0x640] sm:$0xff] }
 0x84c   :  { %v8364_v18 = vld [vmem:[#allocation4 + $0x468] sm:$0xff]  ;;  %v8363_v7 = vld [vmem:[#allocation4 + $0x460] sm:$0xff] }
 0x84d   :  { %8529 = vmatpush1.bf16.msra.mxu0 %v8259_v13  ;;  %v8428_v45 = vld [vmem:[#allocation4 + $0x668] sm:$0xff]  ;;  %v8427_v30 = vld [vmem:[#allocation4 + $0x660] sm:$0xff] }
 0x84e   :  { %8570 = vmatpush1.bf16.msra.mxu1 %v8323_v56  ;;  %8530 = vmatprep.subr.bf16.mxu0 %v8264_v26  ;;  %v8368_v44 = vld [vmem:[#allocation4 + $0x488] sm:$0xff]  ;;  %v8367_v40 = vld [vmem:[#allocation4 + $0x480] sm:$0xff] }
 0x84f   :  { %8571 = vmatprep.subr.bf16.mxu1 %v8328_v19  ;;  %v8432_v42 = vld [vmem:[#allocation4 + $0x688] sm:$0xff]  ;;  %v8431_v10 = vld [vmem:[#allocation4 + $0x680] sm:$0xff] }
 0x850   :  { %v8372_v15 = vld [vmem:[#allocation4 + $0x4a8] sm:$0xff]  ;;  %v8371_v53 = vld [vmem:[#allocation4 + $0x4a0] sm:$0xff] }
 0x851   :  { %8531 = vmatpush1.bf16.msra.mxu0 %v8263_v48  ;;  %v8436_v11 = vld [vmem:[#allocation4 + $0x6a8] sm:$0xff]  ;;  %v8435_v13 = vld [vmem:[#allocation4 + $0x6a0] sm:$0xff] }
 0x852   :  { %8572 = vmatpush1.bf16.msra.mxu1 %v8327_v1  ;;  %8532 = vmatprep.subr.bf16.mxu0 %v8268_v25  ;;  %v8376_v56 = vld [vmem:[#allocation4 + $0x4c8] sm:$0xff]  ;;  %v8375_v19 = vld [vmem:[#allocation4 + $0x4c0] sm:$0xff] }
 0x853   :  { %8573 = vmatprep.subr.bf16.mxu1 %v8332_v27  ;;  %v8440_v26 = vld [vmem:[#allocation4 + $0x6c8] sm:$0xff]  ;;  %v8439_v48 = vld [vmem:[#allocation4 + $0x6c0] sm:$0xff]  ;;  %v10943_v27 = vmov 1  }
 0x854   :  { %v8380_v1 = vld [vmem:[#allocation4 + $0x4e8] sm:$0xff]  ;;  %10902 = vset.pattern.permute.xlu0 %v10943_v27  ;;  %v8306_v27 = vld [vmem:[#allocation4 + $0x298] sm:$0xff] }
 0x855   :  { %8533 = vmatpush1.bf16.msra.mxu0 %v8267_v39  ;;  %v8444_v25 = vld [vmem:[#allocation4 + $0x6e8] sm:$0xff]  ;;  %v8379_v39 = vld [vmem:[#allocation4 + $0x4e0] sm:$0xff]  ;;  %8841 = vperm.xlu0 %10902, %v13988_v51  }
 0x856   :  { %8574 = vmatpush1.bf16.msra.mxu1 %v8331_v8  ;;  %8534 = vmatprep.subr.bf16.mxu0 %v8272_v24  ;;  %v8443_v8 = vld [vmem:[#allocation4 + $0x6e0] sm:$0xff]  ;;  %v8384_v24 = vld [vmem:[#allocation4 + $0x508] sm:$0xff] }
 0x857   :  { %8575 = vmatprep.subr.bf16.mxu1 %v8336_v58  ;;  %v8448_v58 = vld [vmem:[#allocation4 + $0x708] sm:$0xff]  ;;  %v8387_v51 = vld [vmem:[#allocation4 + $0x520] sm:$0xff] }
 0x859   :  { %8535 = vmatpush1.bf16.msra.mxu0 %v8271_v46  ;;  %v8383_v46 = vld [vmem:[#allocation4 + $0x500] sm:$0xff] }
 0x85a   :  { %8576 = vmatpush1.bf16.msra.mxu1 %v8335_v61  ;;  %8536 = vmatprep.subr.bf16.mxu0 %v8276_v50  ;;  %v8447_v61 = vld [vmem:[#allocation4 + $0x700] sm:$0xff]  ;;  %v8388_v50 = vld [vmem:[#allocation4 + $0x528] sm:$0xff] }
 0x85b   :  { %8577 = vmatprep.subr.bf16.mxu1 %v8340_v59  ;;  %v8452_v59 = vld [vmem:[#allocation4 + $0x728] sm:$0xff] }
 0x85d   :  { %8537 = vmatpush1.bf16.msra.mxu0 %v8275_v31  ;;  %v8451_v31 = vld [vmem:[#allocation4 + $0x720] sm:$0xff] }
 0x85e   :  { %8578 = vmatpush1.bf16.msra.mxu1 %v8339_v54  ;;  %8538 = vmatprep.subr.bf16.mxu0 %v8280_v16  ;;  %v8392_v54 = vld [vmem:[#allocation4 + $0x548] sm:$0xff] }
 0x85f   :  { %8579 = vmatprep.subr.bf16.mxu1 %v8344_v33  ;;  %v8456_v16 = vld [vmem:[#allocation4 + $0x748] sm:$0xff]  ;;  %v8391_v33 = vld [vmem:[#allocation4 + $0x540] sm:$0xff] }
 0x861   :  { %8539 = vmatpush1.bf16.msra.mxu0 %v8279_v55  ;;  %v8455_v55 = vld [vmem:[#allocation4 + $0x740] sm:$0xff] }
 0x862   :  { %8580 = vmatpush1.bf16.msra.mxu1 %v8343_v57  ;;  %8540 = vmatprep.subr.bf16.mxu0 %v8284_v34  ;;  %v8396_v57 = vld [vmem:[#allocation4 + $0x568] sm:$0xff] }
 0x863   :  { %8581 = vmatprep.subr.bf16.mxu1 %v8348_v60  ;;  %v8460_v34 = vld [vmem:[#allocation4 + $0x768] sm:$0xff]  ;;  %v8395_v60 = vld [vmem:[#allocation4 + $0x560] sm:$0xff] }
 0x865   :  { %8541 = vmatpush1.bf16.msra.mxu0 %v8283_v29  ;;  %v8459_v29 = vld [vmem:[#allocation4 + $0x760] sm:$0xff] }
 0x866   :  { %8582 = vmatpush1.bf16.msra.mxu1 %v8347_v36  ;;  %8592 = vmatprep.subr.bf16.mxu0 %v8352_v41  ;;  %v8400_v36 = vld [vmem:[#allocation4 + $0x588] sm:$0xff] }
 0x867   :  { %8633 = vmatprep.subr.bf16.mxu1 %v8416_v0  ;;  %v8464_v41 = vld [vmem:[#allocation4 + $0x788] sm:$0xff]  ;;  %v8399_v0 = vld [vmem:[#allocation4 + $0x580] sm:$0xff] }
 0x868   :  { %8543 = vmatmul.mubr.bf16.vlgmr.msra.gmra.mrb[208].mxu0 %v13994_v5 }
 0x869   :  { %8584 = vmatmul.mubr.bf16.vlgmr.msra.gmra.mrb[212].mxu1 %v13999_v52  ;;  %8593 = vmatpush1.bf16.msra.mxu0 %v8351_v28  ;;  %v8463_v28 = vld [vmem:[#allocation4 + $0x780] sm:$0xff] }
 0x86a   :  { %8634 = vmatpush1.bf16.msra.mxu1 %v8415_v4  ;;  %8594 = vmatprep.subr.bf16.mxu0 %v8356_v49  ;;  %v8404_v4 = vld [vmem:[#allocation4 + $0x5a8] sm:$0xff] }
 0x86b   :  { %8635 = vmatprep.subr.bf16.mxu1 %v8420_v35  ;;  %8624 = vmatprep.mubr.bf16.mxu0 %v14004_v62  ;;  %v8468_v49 = vld [vmem:[#allocation4 + $0x7a8] sm:$0xff]  ;;  %v8403_v35 = vld [vmem:[#allocation4 + $0x5a0] sm:$0xff] }
 0x86c   :  { %8665 = vmatprep.mubr.bf16.mxu1 %v14009_v63 }
 0x86d   :  { %8595 = vmatpush1.bf16.msra.mxu0 %v8355_v12  ;;  %v8467_v12 = vld [vmem:[#allocation4 + $0x7a0] sm:$0xff] }
 0x86e   :  { %8636 = vmatpush1.bf16.msra.mxu1 %v8419_v43  ;;  %8596 = vmatprep.subr.bf16.mxu0 %v8360_v47  ;;  %v8408_v43 = vld [vmem:[#allocation4 + $0x5c8] sm:$0xff] }
 0x86f   :  { %8637 = vmatprep.subr.bf16.mxu1 %v8424_v6  ;;  %v8472_v47 = vld [vmem:[#allocation4 + $0x7c8] sm:$0xff]  ;;  %v8407_v6 = vld [vmem:[#allocation4 + $0x5c0] sm:$0xff] }
 0x871   :  { %8597 = vmatpush1.bf16.msra.mxu0 %v8359_v22  ;;  %v8471_v22 = vld [vmem:[#allocation4 + $0x7c0] sm:$0xff] }
 0x872   :  { %8638 = vmatpush1.bf16.msra.mxu1 %v8423_v37  ;;  %8598 = vmatprep.subr.bf16.mxu0 %v8364_v18  ;;  %v8412_v37 = vld [vmem:[#allocation4 + $0x5e8] sm:$0xff] }
 0x873   :  { %8639 = vmatprep.subr.bf16.mxu1 %v8428_v45  ;;  %v8476_v18 = vld [vmem:[#allocation4 + $0x7e8] sm:$0xff]  ;;  %v8411_v45 = vld [vmem:[#allocation4 + $0x5e0] sm:$0xff] }
 0x875   :  { %8599 = vmatpush1.bf16.msra.mxu0 %v8363_v7  ;;  %v8475_v7 = vld [vmem:[#allocation4 + $0x7e0] sm:$0xff] }
 0x876   :  { %8640 = vmatpush1.bf16.msra.mxu1 %v8427_v30  ;;  %8600 = vmatprep.subr.bf16.mxu0 %v8368_v44  ;;  %v8226_v30 = vld [vmem:[#allocation4 + $0x18] sm:$0xff] }
 0x877   :  { %8641 = vmatprep.subr.bf16.mxu1 %v8432_v42  ;;  %v8290_v44 = vld [vmem:[#allocation4 + $0x218] sm:$0xff]  ;;  %v14019_v42 = vpack.c.bf16 %v8206_v9, %v8206_v9 }
 0x878   :  { %v8234_v9 = vld [vmem:[#allocation4 + $0x58] sm:$0xff] }
 0x879   :  { %8601 = vmatpush1.bf16.msra.mxu0 %v8367_v40  ;;  %v14024_v40 = vpack.c.bf16 %v8208_v23, %v8208_v23  ;;  %v8298_v23 = vld [vmem:[#allocation4 + $0x258] sm:$0xff] }
 0x87a   :  { %8642 = vmatpush1.bf16.msra.mxu1 %v8431_v10  ;;  %8602 = vmatprep.subr.bf16.mxu0 %v8372_v15  ;;  %v8225_v10 = vld [vmem:[#allocation4 + $0x10] sm:$0xff] }
 0x87b   :  { %8643 = vmatprep.subr.bf16.mxu1 %v8436_v11  ;;  %v8289_v15 = vld [vmem:[#allocation4 + $0x210] sm:$0xff]  ;;  %v8230_v11 = vld [vmem:[#allocation4 + $0x38] sm:$0xff] }
 0x87d   :  { %8603 = vmatpush1.bf16.msra.mxu0 %v8371_v53  ;;  %v8294_v53 = vld [vmem:[#allocation4 + $0x238] sm:$0xff] }
 0x87e   :  { %8644 = vmatpush1.bf16.msra.mxu1 %v8435_v13  ;;  %8604 = vmatprep.subr.bf16.mxu0 %v8376_v56  ;;  %v8233_v13 = vld [vmem:[#allocation4 + $0x50] sm:$0xff] }
 0x87f   :  { %8645 = vmatprep.subr.bf16.mxu1 %v8440_v26  ;;  %v8297_v56 = vld [vmem:[#allocation4 + $0x250] sm:$0xff]  ;;  %v8238_v26 = vld [vmem:[#allocation4 + $0x78] sm:$0xff] }
 0x881   :  { %8605 = vmatpush1.bf16.msra.mxu0 %v8375_v19  ;;  %v8302_v19 = vld [vmem:[#allocation4 + $0x278] sm:$0xff] }
 0x882   :  { %8646 = vmatpush1.bf16.msra.mxu1 %v8439_v48  ;;  %8606 = vmatprep.subr.bf16.mxu0 %v8380_v1  ;;  %v8237_v48 = vld [vmem:[#allocation4 + $0x70] sm:$0xff] }
 0x883   :  { %8647 = vmatprep.subr.bf16.mxu1 %v8444_v25  ;;  %v8301_v1 = vld [vmem:[#allocation4 + $0x270] sm:$0xff]  ;;  %v8242_v25 = vld [vmem:[#allocation4 + $0x98] sm:$0xff] }
 0x885   :  { %8607 = vmatpush1.bf16.msra.mxu0 %v8379_v39  ;;  %v8246_v39 = vld [vmem:[#allocation4 + $0xb8] sm:$0xff] }
 0x886   :  { %8648 = vmatpush1.bf16.msra.mxu1 %v8443_v8  ;;  %8608 = vmatprep.subr.bf16.mxu0 %v8384_v24  ;;  %v8310_v8 = vld [vmem:[#allocation4 + $0x2b8] sm:$0xff]  ;;  %v8245_v24 = vld [vmem:[#allocation4 + $0xb0] sm:$0xff] }
 0x887   :  { %8649 = vmatprep.subr.bf16.mxu1 %v8448_v58  ;;  %v8309_v58 = vld [vmem:[#allocation4 + $0x2b0] sm:$0xff] }
 0x889   :  { %8609 = vmatpush1.bf16.msra.mxu0 %v8383_v46  ;;  %v8250_v46 = vld [vmem:[#allocation4 + $0xd8] sm:$0xff] }
 0x88a   :  { %8650 = vmatpush1.bf16.msra.mxu1 %v8447_v61  ;;  %8610 = vmatprep.subr.bf16.mxu0 %v8388_v50  ;;  %v8314_v61 = vld [vmem:[#allocation4 + $0x2d8] sm:$0xff]  ;;  %v8249_v50 = vld [vmem:[#allocation4 + $0xd0] sm:$0xff] }
 0x88b   :  { %8651 = vmatprep.subr.bf16.mxu1 %v8452_v59  ;;  %v8313_v59 = vld [vmem:[#allocation4 + $0x2d0] sm:$0xff] }
 0x88d   :  { %8611 = vmatpush1.bf16.msra.mxu0 %v8387_v51  ;;  %v8254_v51 = vld [vmem:[#allocation4 + $0xf8] sm:$0xff] }
 0x88e   :  { %8652 = vmatpush1.bf16.msra.mxu1 %v8451_v31  ;;  %8612 = vmatprep.subr.bf16.mxu0 %v8392_v54  ;;  %v8318_v31 = vld [vmem:[#allocation4 + $0x2f8] sm:$0xff]  ;;  %v8253_v54 = vld [vmem:[#allocation4 + $0xf0] sm:$0xff] }
 0x88f   :  { %8653 = vmatprep.subr.bf16.mxu1 %v8456_v16  ;;  %v8317_v16 = vld [vmem:[#allocation4 + $0x2f0] sm:$0xff] }
 0x891   :  { %8613 = vmatpush1.bf16.msra.mxu0 %v8391_v33  ;;  %v8258_v33 = vld [vmem:[#allocation4 + $0x118] sm:$0xff] }
 0x892   :  { %8654 = vmatpush1.bf16.msra.mxu1 %v8455_v55  ;;  %8614 = vmatprep.subr.bf16.mxu0 %v8396_v57  ;;  %v8322_v55 = vld [vmem:[#allocation4 + $0x318] sm:$0xff]  ;;  %v8257_v57 = vld [vmem:[#allocation4 + $0x110] sm:$0xff] }
 0x893   :  { %8655 = vmatprep.subr.bf16.mxu1 %v8460_v34  ;;  %v8321_v34 = vld [vmem:[#allocation4 + $0x310] sm:$0xff] }
 0x895   :  { %8615 = vmatpush1.bf16.msra.mxu0 %v8395_v60  ;;  %v8262_v60 = vld [vmem:[#allocation4 + $0x138] sm:$0xff] }
 0x896   :  { %8656 = vmatpush1.bf16.msra.mxu1 %v8459_v29  ;;  %8616 = vmatprep.subr.bf16.mxu0 %v8400_v36  ;;  %v8326_v29 = vld [vmem:[#allocation4 + $0x338] sm:$0xff]  ;;  %v8261_v36 = vld [vmem:[#allocation4 + $0x130] sm:$0xff] }
 0x897   :  { %8657 = vmatprep.subr.bf16.mxu1 %v8464_v41  ;;  %v8325_v41 = vld [vmem:[#allocation4 + $0x330] sm:$0xff] }
 0x899   :  { %8617 = vmatpush1.bf16.msra.mxu0 %v8399_v0  ;;  %v8266_v0 = vld [vmem:[#allocation4 + $0x158] sm:$0xff] }
 0x89a   :  { %8658 = vmatpush1.bf16.msra.mxu1 %v8463_v28  ;;  %8618 = vmatprep.subr.bf16.mxu0 %v8404_v4  ;;  %v8330_v28 = vld [vmem:[#allocation4 + $0x358] sm:$0xff]  ;;  %v8265_v4 = vld [vmem:[#allocation4 + $0x150] sm:$0xff] }
 0x89b   :  { %8659 = vmatprep.subr.bf16.mxu1 %v8468_v49  ;;  %v8329_v49 = vld [vmem:[#allocation4 + $0x350] sm:$0xff] }
 0x89d   :  { %8619 = vmatpush1.bf16.msra.mxu0 %v8403_v35  ;;  %v8270_v35 = vld [vmem:[#allocation4 + $0x178] sm:$0xff] }
 0x89e   :  { %8660 = vmatpush1.bf16.msra.mxu1 %v8467_v12  ;;  %8620 = vmatprep.subr.bf16.mxu0 %v8408_v43  ;;  %v8334_v12 = vld [vmem:[#allocation4 + $0x378] sm:$0xff]  ;;  %v8269_v43 = vld [vmem:[#allocation4 + $0x170] sm:$0xff] }
 0x89f   :  { %8661 = vmatprep.subr.bf16.mxu1 %v8472_v47  ;;  %v8333_v47 = vld [vmem:[#allocation4 + $0x370] sm:$0xff] }
 0x8a1   :  { %8621 = vmatpush1.bf16.msra.mxu0 %v8407_v6  ;;  %v8274_v6 = vld [vmem:[#allocation4 + $0x198] sm:$0xff] }
 0x8a2   :  { %8662 = vmatpush1.bf16.msra.mxu1 %v8471_v22  ;;  %8622 = vmatprep.subr.bf16.mxu0 %v8412_v37  ;;  %v8338_v22 = vld [vmem:[#allocation4 + $0x398] sm:$0xff]  ;;  %v8273_v37 = vld [vmem:[#allocation4 + $0x190] sm:$0xff] }
 0x8a3   :  { %8663 = vmatprep.subr.bf16.mxu1 %v8476_v18  ;;  %v8337_v18 = vld [vmem:[#allocation4 + $0x390] sm:$0xff] }
 0x8a5   :  { %8623 = vmatpush1.bf16.msra.mxu0 %v8411_v45  ;;  %v8278_v45 = vld [vmem:[#allocation4 + $0x1b8] sm:$0xff] }
 0x8a6   :  { %8664 = vmatpush1.bf16.msra.mxu1 %v8475_v7  ;;  %8674 = vmatprep.subr.bf16.mxu0 %v8226_v30  ;;  %v8342_v7 = vld [vmem:[#allocation4 + $0x3b8] sm:$0xff]  ;;  %v8277_v30 = vld [vmem:[#allocation4 + $0x1b0] sm:$0xff] }
 0x8a7   :  { %8715 = vmatprep.subr.bf16.mxu1 %v8290_v44  ;;  %v8341_v44 = vld [vmem:[#allocation4 + $0x3b0] sm:$0xff] }
 0x8a8   :  { %8625 = vmatmul.mubr.bf16.vlgmr.msra.gmra.mrb[212].mxu0 %v14019_v42 }
 0x8a9   :  { %8666 = vmatmul.mubr.bf16.vlgmr.msra.gmra.mrb[216].mxu1 %v14024_v40  ;;  %8675 = vmatpush1.bf16.msra.mxu0 %v8225_v10  ;;  %v8282_v10 = vld [vmem:[#allocation4 + $0x1d8] sm:$0xff] }
 0x8aa   :  { %8716 = vmatpush1.bf16.msra.mxu1 %v8289_v15  ;;  %8676 = vmatprep.subr.bf16.mxu0 %v8230_v11  ;;  %v8346_v15 = vld [vmem:[#allocation4 + $0x3d8] sm:$0xff]  ;;  %v8281_v11 = vld [vmem:[#allocation4 + $0x1d0] sm:$0xff] }
 0x8ab   :  { %8717 = vmatprep.subr.bf16.mxu1 %v8294_v53  ;;  %8706 = vmatprep.mubr.bf16.mxu0 %v13978_v21  ;;  %v8241_v21 = vld [vmem:[#allocation4 + $0x90] sm:$0xff] }
 0x8ac   :  { %8747 = vmatprep.mubr.bf16.mxu1 %v13980_v20  ;;  %v8305_v20 = vld [vmem:[#allocation4 + $0x290] sm:$0xff] }
 0x8ad   :  { %8677 = vmatpush1.bf16.msra.mxu0 %v8229_v14  ;;  %v8345_v53 = vld [vmem:[#allocation4 + $0x3d0] sm:$0xff]  ;;  %v8286_v14 = vld [vmem:[#allocation4 + $0x1f8] sm:$0xff] }
 0x8ae   :  { %8718 = vmatpush1.bf16.msra.mxu1 %v8293_v17  ;;  %8678 = vmatprep.subr.bf16.mxu0 %v8234_v9  ;;  %v8350_v17 = vld [vmem:[#allocation4 + $0x3f8] sm:$0xff]  ;;  %v8285_v9 = vld [vmem:[#allocation4 + $0x1f0] sm:$0xff] }
 0x8af   :  { %8719 = vmatprep.subr.bf16.mxu1 %v8298_v23  ;;  %v8349_v23 = vld [vmem:[#allocation4 + $0x3f0] sm:$0xff] }
 0x8b1   :  { %8679 = vmatpush1.bf16.msra.mxu0 %v8233_v13  ;;  %v8354_v13 = vld [vmem:[#allocation4 + $0x418] sm:$0xff] }
 0x8b2   :  { %8720 = vmatpush1.bf16.msra.mxu1 %v8297_v56  ;;  %8680 = vmatprep.subr.bf16.mxu0 %v8238_v26  ;;  %v8418_v56 = vld [vmem:[#allocation4 + $0x618] sm:$0xff]  ;;  %v8353_v26 = vld [vmem:[#allocation4 + $0x410] sm:$0xff] }
 0x8b3   :  { %8721 = vmatprep.subr.bf16.mxu1 %v8302_v19  ;;  %v8417_v19 = vld [vmem:[#allocation4 + $0x610] sm:$0xff] }
 0x8b5   :  { %8681 = vmatpush1.bf16.msra.mxu0 %v8237_v48  ;;  %v8358_v48 = vld [vmem:[#allocation4 + $0x438] sm:$0xff] }
 0x8b6   :  { %8722 = vmatpush1.bf16.msra.mxu1 %v8301_v1  ;;  %8682 = vmatprep.subr.bf16.mxu0 %v8242_v25  ;;  %v8422_v1 = vld [vmem:[#allocation4 + $0x638] sm:$0xff]  ;;  %v8357_v25 = vld [vmem:[#allocation4 + $0x430] sm:$0xff] }
 0x8b7   :  { %8723 = vmatprep.subr.bf16.mxu1 %v8306_v27  ;;  %v8421_v27 = vld [vmem:[#allocation4 + $0x630] sm:$0xff] }
 0x8b9   :  { %8683 = vmatpush1.bf16.msra.mxu0 %v8241_v21  ;;  %v8362_v21 = vld [vmem:[#allocation4 + $0x458] sm:$0xff] }
 0x8ba   :  { %8724 = vmatpush1.bf16.msra.mxu1 %v8305_v20  ;;  %8684 = vmatprep.subr.bf16.mxu0 %v8246_v39  ;;  %v8426_v20 = vld [vmem:[#allocation4 + $0x658] sm:$0xff]  ;;  %v8361_v39 = vld [vmem:[#allocation4 + $0x450] sm:$0xff] }
 0x8bb   :  { %8725 = vmatprep.subr.bf16.mxu1 %v8310_v8  ;;  %v8366_v8 = vld [vmem:[#allocation4 + $0x478] sm:$0xff] }
 0x8bd   :  { %8685 = vmatpush1.bf16.msra.mxu0 %v8245_v24  ;;  %v8365_v24 = vld [vmem:[#allocation4 + $0x470] sm:$0xff] }
 0x8be   :  { %8726 = vmatpush1.bf16.msra.mxu1 %v8309_v58  ;;  %8686 = vmatprep.subr.bf16.mxu0 %v8250_v46  ;;  %v8429_v58 = vld [vmem:[#allocation4 + $0x670] sm:$0xff]  ;;  %v8370_v46 = vld [vmem:[#allocation4 + $0x498] sm:$0xff] }
 0x8bf   :  { %8727 = vmatprep.subr.bf16.mxu1 %v8314_v61  ;;  %v8434_v61 = vld [vmem:[#allocation4 + $0x698] sm:$0xff] }
 0x8c1   :  { %8687 = vmatpush1.bf16.msra.mxu0 %v8249_v50  ;;  %v8374_v50 = vld [vmem:[#allocation4 + $0x4b8] sm:$0xff] }
 0x8c2   :  { %8728 = vmatpush1.bf16.msra.mxu1 %v8313_v59  ;;  %8688 = vmatprep.subr.bf16.mxu0 %v8254_v51  ;;  %v8438_v59 = vld [vmem:[#allocation4 + $0x6b8] sm:$0xff]  ;;  %v8373_v51 = vld [vmem:[#allocation4 + $0x4b0] sm:$0xff] }
 0x8c3   :  { %8729 = vmatprep.subr.bf16.mxu1 %v8318_v31  ;;  %v8437_v31 = vld [vmem:[#allocation4 + $0x6b0] sm:$0xff] }
 0x8c5   :  { %8689 = vmatpush1.bf16.msra.mxu0 %v8253_v54  ;;  %v8378_v54 = vld [vmem:[#allocation4 + $0x4d8] sm:$0xff] }
 0x8c6   :  { %8730 = vmatpush1.bf16.msra.mxu1 %v8317_v16  ;;  %8690 = vmatprep.subr.bf16.mxu0 %v8258_v33  ;;  %v8442_v16 = vld [vmem:[#allocation4 + $0x6d8] sm:$0xff]  ;;  %v14034_v33 = vpop.permute.xlu0 %8482 }
 0x8c7   :  { %8731 = vmatprep.subr.bf16.mxu1 %v8322_v55  ;;  %v8377_v55 = vld [vmem:[#allocation4 + $0x4d0] sm:$0xff] }
 0x8c9   :  { %8691 = vmatpush1.bf16.msra.mxu0 %v8257_v57  ;;  %v8441_v57 = vld [vmem:[#allocation4 + $0x6d0] sm:$0xff] }
 0x8ca   :  { %8732 = vmatpush1.bf16.msra.mxu1 %v8321_v34  ;;  %8692 = vmatprep.subr.bf16.mxu0 %v8262_v60  ;;  %v14039_v34 = vld [vmem:[%s14207_s12 + $0x1] ss:$2 sm:$0xf] }
 0x8cb   :  { %8733 = vmatprep.subr.bf16.mxu1 %v8326_v29  ;;  %v8382_v60 = vld [vmem:[#allocation4 + $0x4f8] sm:$0xff] }
 0x8cc   :  { %v8446_v29 = vld [vmem:[#allocation4 + $0x6f8] sm:$0xff] }
 0x8cd   :  { %8693 = vmatpush1.bf16.msra.mxu0 %v8261_v36  ;;  %v8856_v36 = vrot.slane %v14039_v34, %v13947_v2 }
 0x8ce   :  { %8734 = vmatpush1.bf16.msra.mxu1 %v8325_v41  ;;  %8694 = vmatprep.subr.bf16.mxu0 %v8266_v0  ;;  %v8860_v41 = vrot.slane %v14039_v34, %v13954_v32 }
 0x8cf   :  { %8735 = vmatprep.subr.bf16.mxu1 %v8330_v28 }
 0x8d1   :  { %8695 = vmatpush1.bf16.msra.mxu0 %v8265_v4 }
 0x8d2   :  { %8736 = vmatpush1.bf16.msra.mxu1 %v8329_v49  ;;  %8696 = vmatprep.subr.bf16.mxu0 %v8270_v35  ;;  %v8381_v49 = vld [vmem:[#allocation4 + $0x4f0] sm:$0xff] }
 0x8d3   :  { %8737 = vmatprep.subr.bf16.mxu1 %v8334_v12  ;;  %v8445_v35 = vld [vmem:[#allocation4 + $0x6f0] sm:$0xff]  ;;  %v8386_v12 = vld [vmem:[#allocation4 + $0x518] sm:$0xff] }
 0x8d4   :  { %v14045_v0 = vpop.permute.xlu0 %8841 }
 0x8d5   :  { %8697 = vmatpush1.bf16.msra.mxu0 %v8269_v43  ;;  %v14048_v28 = vmul.f32 %v8856_v36, %v14045_v0  ;;  %v14051_v4 = vmul.f32 %v8860_v41, %v14045_v0  ;;  %v8450_v43 = vld [vmem:[#allocation4 + $0x718] sm:$0xff] }
 0x8d6   :  { %8738 = vmatpush1.bf16.msra.mxu1 %v8333_v47  ;;  %8698 = vmatprep.subr.bf16.mxu0 %v8274_v6  ;;  %v8385_v47 = vld [vmem:[#allocation4 + $0x510] sm:$0xff] }
 0x8d7   :  { %8739 = vmatprep.subr.bf16.mxu1 %v8338_v22  ;;  %v8449_v6 = vld [vmem:[#allocation4 + $0x710] sm:$0xff]  ;;  %v8390_v22 = vld [vmem:[#allocation4 + $0x538] sm:$0xff] }
 0x8d9   :  { %8699 = vmatpush1.bf16.msra.mxu0 %v8273_v37  ;;  %v8454_v37 = vld [vmem:[#allocation4 + $0x738] sm:$0xff] }
 0x8da   :  { %8740 = vmatpush1.bf16.msra.mxu1 %v8337_v18  ;;  %8700 = vmatprep.subr.bf16.mxu0 %v8278_v45  ;;  %v8389_v18 = vld [vmem:[#allocation4 + $0x530] sm:$0xff] }
 0x8db   :  { %8741 = vmatprep.subr.bf16.mxu1 %v8342_v7  ;;  %v8453_v45 = vld [vmem:[#allocation4 + $0x730] sm:$0xff]  ;;  %v8394_v7 = vld [vmem:[#allocation4 + $0x558] sm:$0xff] }
 0x8dd   :  { %8701 = vmatpush1.bf16.msra.mxu0 %v8277_v30  ;;  %v8458_v30 = vld [vmem:[#allocation4 + $0x758] sm:$0xff] }
 0x8de   :  { %8742 = vmatpush1.bf16.msra.mxu1 %v8341_v44  ;;  %8702 = vmatprep.subr.bf16.mxu0 %v8282_v10  ;;  %v8393_v44 = vld [vmem:[#allocation4 + $0x550] sm:$0xff] }
 0x8df   :  { %8743 = vmatprep.subr.bf16.mxu1 %v8346_v15  ;;  %v8457_v10 = vld [vmem:[#allocation4 + $0x750] sm:$0xff]  ;;  %v8398_v15 = vld [vmem:[#allocation4 + $0x578] sm:$0xff] }
 0x8e1   :  { %8703 = vmatpush1.bf16.msra.mxu0 %v8281_v11  ;;  %v8462_v11 = vld [vmem:[#allocation4 + $0x778] sm:$0xff] }
 0x8e2   :  { %8744 = vmatpush1.bf16.msra.mxu1 %v8345_v53  ;;  %8704 = vmatprep.subr.bf16.mxu0 %v8286_v14  ;;  %v8397_v53 = vld [vmem:[#allocation4 + $0x570] sm:$0xff] }
 0x8e3   :  { %8745 = vmatprep.subr.bf16.mxu1 %v8350_v17  ;;  %v8461_v14 = vld [vmem:[#allocation4 + $0x770] sm:$0xff]  ;;  %v8402_v17 = vld [vmem:[#allocation4 + $0x598] sm:$0xff] }
 0x8e5   :  { %8705 = vmatpush1.bf16.msra.mxu0 %v8285_v9  ;;  %v8466_v9 = vld [vmem:[#allocation4 + $0x798] sm:$0xff] }
 0x8e6   :  { %8746 = vmatpush1.bf16.msra.mxu1 %v8349_v23  ;;  %8756 = vmatprep.subr.bf16.mxu0 %v8354_v13  ;;  %v8401_v23 = vld [vmem:[#allocation4 + $0x590] sm:$0xff] }
 0x8e7   :  { %8797 = vmatprep.subr.bf16.mxu1 %v8418_v56  ;;  %v8465_v13 = vld [vmem:[#allocation4 + $0x790] sm:$0xff]  ;;  %v8406_v56 = vld [vmem:[#allocation4 + $0x5b8] sm:$0xff] }
 0x8e8   :  { %8707 = vmatmul.mubr.bf16.vlgmr.msra.gmra.mrb[216].mxu0 %v13994_v5  ;;  %v8425_v5 = vld [vmem:[#allocation4 + $0x650] sm:$0xff] }
 0x8e9   :  { %8748 = vmatmul.mubr.bf16.vlgmr.msra.gmra.mrb[220].mxu1 %v13999_v52  ;;  %8757 = vmatpush1.bf16.msra.mxu0 %v8353_v26  ;;  %v8430_v52 = vld [vmem:[#allocation4 + $0x678] sm:$0xff] }
 0x8ea   :  { %8798 = vmatpush1.bf16.msra.mxu1 %v8417_v19  ;;  %8758 = vmatprep.subr.bf16.mxu0 %v8358_v48  ;;  %v8470_v26 = vld [vmem:[#allocation4 + $0x7b8] sm:$0xff]  ;;  %v8405_v19 = vld [vmem:[#allocation4 + $0x5b0] sm:$0xff] }
 0x8eb   :  { %8799 = vmatprep.subr.bf16.mxu1 %v8422_v1  ;;  %8788 = vmatprep.mubr.bf16.mxu0 %v14004_v62  ;;  %v8369_v62 = vld [vmem:[#allocation4 + $0x490] sm:$0xff]  ;;  %v8410_v1 = vld [vmem:[#allocation4 + $0x5d8] sm:$0xff] }
 0x8ec   :  { %8829 = vmatprep.mubr.bf16.mxu1 %v14009_v63  ;;  %v8433_v63 = vld [vmem:[#allocation4 + $0x690] sm:$0xff] }
 0x8ed   :  { %8759 = vmatpush1.bf16.msra.mxu0 %v8357_v25  ;;  %v8469_v48 = vld [vmem:[#allocation4 + $0x7b0] sm:$0xff]  ;;  %v8474_v25 = vld [vmem:[#allocation4 + $0x7d8] sm:$0xff] }
 0x8ee   :  { %8800 = vmatpush1.bf16.msra.mxu1 %v8421_v27  ;;  %8760 = vmatprep.subr.bf16.mxu0 %v8362_v21  ;;  %v8409_v27 = vld [vmem:[#allocation4 + $0x5d0] sm:$0xff] }
 0x8ef   :  { %8801 = vmatprep.subr.bf16.mxu1 %v8426_v20  ;;  %v8473_v21 = vld [vmem:[#allocation4 + $0x7d0] sm:$0xff]  ;;  %v8414_v20 = vld [vmem:[#allocation4 + $0x5f8] sm:$0xff] }
 0x8f1   :  { %8761 = vmatpush1.bf16.msra.mxu0 %v8361_v39  ;;  %v8478_v39 = vld [vmem:[#allocation4 + $0x7f8] sm:$0xff] }
 0x8f2   :  { %8802 = vmatpush1.bf16.msra.mxu1 %v8425_v5  ;;  %8762 = vmatprep.subr.bf16.mxu0 %v8366_v8  ;;  %v8413_v5 = vld [vmem:[#allocation4 + $0x5f0] sm:$0xff] }
 0x8f3   :  { %8803 = vmatprep.subr.bf16.mxu1 %v8430_v52  ;;  %v8477_v8 = vld [vmem:[#allocation4 + $0x7f0] sm:$0xff]  ;;  %v10903_v52 = vld [vmem:[%s14209_s14 + $0x40] sm:$0xff]  }
 0x8f5   :  { %8763 = vmatpush1.bf16.msra.mxu0 %v8365_v24  ;;  %v10904_v24 = vld [vmem:[%s14209_s14] sm:$0xff]  }
 0x8f6   :  { %8804 = vmatpush1.bf16.msra.mxu1 %v8429_v58  ;;  %8764 = vmatprep.subr.bf16.mxu0 %v8370_v46  ;;  %v10905_v58 = vld [vmem:[%s14209_s14 + $0x48] sm:$0xff]  }
 0x8f7   :  { %8805 = vmatprep.subr.bf16.mxu1 %v8434_v61  ;;  %v10906_v46 = vld [vmem:[%s14209_s14 + $0x8] sm:$0xff]   ;;  %v10907_v61 = vld [vmem:[%s14209_s14 + $0x50] sm:$0xff]  }
 0x8f9   :  { %8765 = vmatpush1.bf16.msra.mxu0 %v8369_v62  ;;  %v10908_v62 = vld [vmem:[%s14209_s14 + $0x10] sm:$0xff]  }
 0x8fa   :  { %8806 = vmatpush1.bf16.msra.mxu1 %v8433_v63  ;;  %8766 = vmatprep.subr.bf16.mxu0 %v8374_v50  ;;  %v10910_v63 = vld [vmem:[%s14209_s14 + $0x18] sm:$0xff]   ;;  %v10911_v50 = vld [vmem:[%s14209_s14 + $0x60] sm:$0xff]  }
 0x8fb   :  { %8807 = vmatprep.subr.bf16.mxu1 %v8438_v59 }
 0x8fd   :  { %8767 = vmatpush1.bf16.msra.mxu0 %v8373_v51 }
 0x8fe   :  { %8808 = vmatpush1.bf16.msra.mxu1 %v8437_v31  ;;  %8768 = vmatprep.subr.bf16.mxu0 %v8378_v54  ;;  %v10912_v31 = vld [vmem:[%s14209_s14 + $0x20] sm:$0xff]   ;;  %v10913_v54 = vld [vmem:[%s14209_s14 + $0x68] sm:$0xff]  }
 0x8ff   :  { %8809 = vmatprep.subr.bf16.mxu1 %v8442_v16 }
 0x901   :  { %8769 = vmatpush1.bf16.msra.mxu0 %v8377_v55 }
 0x902   :  { %8810 = vmatpush1.bf16.msra.mxu1 %v8441_v57  ;;  %8770 = vmatprep.subr.bf16.mxu0 %v8382_v60  ;;  %v10914_v57 = vld [vmem:[%s14209_s14 + $0x28] sm:$0xff]   ;;  %v10915_v60 = vld [vmem:[%s14209_s14 + $0x70] sm:$0xff]  }
 0x903   :  { %8811 = vmatprep.subr.bf16.mxu1 %v8446_v29 }
 0x905   :  { %8771 = vmatpush1.bf16.msra.mxu0 %v8381_v49 }
 0x906   :  { %8812 = vmatpush1.bf16.msra.mxu1 %v8445_v35  ;;  %8772 = vmatprep.subr.bf16.mxu0 %v8386_v12 }
 0x907   :  { %8813 = vmatprep.subr.bf16.mxu1 %v8450_v43 }
 0x909   :  { %8773 = vmatpush1.bf16.msra.mxu0 %v8385_v47 }
 0x90a   :  { %8814 = vmatpush1.bf16.msra.mxu1 %v8449_v6  ;;  %8774 = vmatprep.subr.bf16.mxu0 %v8390_v22  ;;  %v10916_v6 = vld [vmem:[%s14209_s14 + $0x30] sm:$0xff]  }
 0x90b   :  { %8815 = vmatprep.subr.bf16.mxu1 %v8454_v37 }
 0x90d   :  { %8775 = vmatpush1.bf16.msra.mxu0 %v8389_v18 }
 0x90e   :  { %8816 = vmatpush1.bf16.msra.mxu1 %v8453_v45  ;;  %8776 = vmatprep.subr.bf16.mxu0 %v8394_v7  ;;  %v10917_v45 = vld [vmem:[%s14209_s14 + $0x78] sm:$0xff]  }
 0x90f   :  { %8817 = vmatprep.subr.bf16.mxu1 %v8458_v30  ;;  %v10919_v30 = vld [vmem:[%s14209_s14 + $0xc0] sm:$0xff]  }
 0x911   :  { %8777 = vmatpush1.bf16.msra.mxu0 %v8393_v44  ;;  %v10920_v44 = vld [vmem:[%s14209_s14 + $0x80] sm:$0xff]  }
 0x912   :  { %8818 = vmatpush1.bf16.msra.mxu1 %v8457_v10  ;;  %8778 = vmatprep.subr.bf16.mxu0 %v8398_v15  ;;  %v10921_v10 = vld [vmem:[%s14209_s14 + $0xc8] sm:$0xff]   ;;  %v10918_v15 = vld [vmem:[%s14209_s14 + $0x38] sm:$0xff]  }
 0x913   :  { %8819 = vmatprep.subr.bf16.mxu1 %v8462_v11  ;;  %v10922_v11 = vld [vmem:[%s14209_s14 + $0x88] sm:$0xff]  }
 0x915   :  { %8779 = vmatpush1.bf16.msra.mxu0 %v8397_v53  ;;  %v10923_v53 = vld [vmem:[%s14209_s14 + $0xd0] sm:$0xff]  }
 0x916   :  { %8820 = vmatpush1.bf16.msra.mxu1 %v8461_v14  ;;  %8780 = vmatprep.subr.bf16.mxu0 %v8402_v17  ;;  %v10924_v14 = vld [vmem:[%s14209_s14 + $0x90] sm:$0xff]   ;;  %v10925_v17 = vld [vmem:[%s14209_s14 + $0xd8] sm:$0xff]  }
 0x917   :  { %8821 = vmatprep.subr.bf16.mxu1 %v8466_v9  ;;  %v10926_v9 = vld [vmem:[%s14209_s14 + $0x98] sm:$0xff]  }
 0x919   :  { %8781 = vmatpush1.bf16.msra.mxu0 %v8401_v23  ;;  %v10927_v23 = vld [vmem:[%s14209_s14 + $0xe0] sm:$0xff]  }
 0x91a   :  { %8822 = vmatpush1.bf16.msra.mxu1 %v8465_v13  ;;  %8782 = vmatprep.subr.bf16.mxu0 %v8406_v56  ;;  %v8848_v13 = vrot.slane %v14039_v34, %v13945_v38  ;;  %v8852_v56 = vrot.slane %v14039_v34, %v13952_v3  ;;  %v10929_v34 = vld [vmem:[%s14209_s14 + $0xe8] sm:$0xff]  }
 0x91b   :  { %8823 = vmatprep.subr.bf16.mxu1 %v8470_v26  ;;  %v10928_v26 = vld [vmem:[%s14209_s14 + $0xa0] sm:$0xff]  }
 0x91d   :  { %8783 = vmatpush1.bf16.msra.mxu0 %v8405_v19 }
 0x91e   :  { %8824 = vmatpush1.bf16.msra.mxu1 %v8469_v48  ;;  %8784 = vmatprep.subr.bf16.mxu0 %v8410_v1  ;;  %v14151_v1 = vld [vmem:[%s14208_s13] sm:$0xf] }
 0x91f   :  { %8825 = vmatprep.subr.bf16.mxu1 %v8474_v25 }
 0x921   :  { %8785 = vmatpush1.bf16.msra.mxu0 %v8409_v27 }
 0x922   :  { %8826 = vmatpush1.bf16.msra.mxu1 %v8473_v21  ;;  %8786 = vmatprep.subr.bf16.mxu0 %v8414_v20  ;;  %v8865_v20 = vmul.f32 %v8848_v13, %v14045_v0 }
 0x923   :  { %8827 = vmatprep.subr.bf16.mxu1 %v8478_v39 }
 0x925   :  { %8787 = vmatpush1.bf16.msra.mxu0 %v8413_v5 }
 0x926   :  { %8828 = vmatpush1.bf16.msra.mxu1 %v8477_v8  ;;  %10098 = vmatprep.subr.bf16.mxu0 %v10903_v52  ;;  %v8866_v52 = vmul.f32 %v8852_v56, %v14045_v0  ;;  %v10931_v0 = vld [vmem:[%s14209_s14 + $0xf0] sm:$0xff]  }
 0x927   :  { %10120 = vmatprep.subr.bf16.mxu1 %v10919_v30 }
 0x928   :  { %8789 = vmatmul.mubr.bf16.vlgmr.msra.gmra.mrb[220].mxu0 %v14019_v42  ;;  %v10909_v42 = vld [vmem:[%s14209_s14 + $0x58] sm:$0xff]  }
 0x929   :  { %8830 = vmatmul.mubr.bf16.vlgmr.msra.gmra.mrb[224].mxu1 %v14024_v40  ;;  %10099 = vmatpush3.bf16.msra.mxu0 %v10904_v24  ;;  %v14079_v40 = vld [vmem:[%s14207_s12] ss:$2 sm:$0xf]  ;;  %v10930_v24 = vld [vmem:[%s14209_s14 + $0xa8] sm:$0xff]  }
 0x92a   :  { %10100 = vmatprep.subr.bf16.mxu0 %v10905_v58  ;;  %v8489_v59 = vrot.slane %v14079_v40, %v13945_v38  ;;  %v8493_v51 = vrot.slane %v14079_v40, %v13952_v3  ;;  %10121 = vmatpush3.bf16.msra.mxu1 %v10920_v44 }
 0x92b   :  { %10122 = vmatprep.subr.bf16.mxu1 %v10921_v10 }
 0x92c   :  { %v8506_v16 = vmul.f32 %v8489_v59, %v14034_v33  ;;  %v8507_v55 = vmul.f32 %v8493_v51, %v14034_v33  ;;  %v10932_v51 = vld [vmem:[%s14209_s14 + $0xb0] sm:$0xff]  }
 0x92d   :  { %10101 = vmatpush3.bf16.msra.mxu0 %v10906_v46  ;;  %v8878_v46 = vrot.slane %v14151_v1, %v13945_v38 }
 0x92e   :  { %10102 = vmatprep.subr.bf16.mxu0 %v10907_v61  ;;  %10123 = vmatpush3.bf16.msra.mxu1 %v10922_v11 }
 0x92f   :  { %10124 = vmatprep.subr.bf16.mxu1 %v10923_v53 }
 0x931   :  { %10103 = vmatpush3.bf16.msra.mxu0 %v10908_v62 }
 0x932   :  { %10104 = vmatprep.subr.bf16.mxu0 %v10909_v42  ;;  %10125 = vmatpush3.bf16.msra.mxu1 %v10924_v14 }
 0x933   :  { %10126 = vmatprep.subr.bf16.mxu1 %v10925_v17 }
 0x935   :  { %10105 = vmatpush3.bf16.msra.mxu0 %v10910_v63  ;;  %v8882_v63 = vrot.slane %v14151_v1, %v13952_v3  ;;  %v10933_v3 = vld [vmem:[%s14209_s14 + $0xf8] sm:$0xff]  }
 0x936   :  { %10106 = vmatprep.subr.bf16.mxu0 %v10911_v50  ;;  %10127 = vmatpush3.bf16.msra.mxu1 %v10926_v9 }
 0x937   :  { %10128 = vmatprep.subr.bf16.mxu1 %v10927_v23  ;;  %v8886_v23 = vrot.slane %v14151_v1, %v13947_v2 }
 0x939   :  { %10107 = vmatpush3.bf16.msra.mxu0 %v10912_v31 }
 0x93a   :  { %10108 = vmatprep.subr.bf16.mxu0 %v10913_v54  ;;  %10129 = vmatpush3.bf16.msra.mxu1 %v10928_v26 }
 0x93b   :  { %v8544_v29 = vpop.f32.mrb[208].mxu0  ;;  %10130 = vmatprep.subr.bf16.mxu1 %v10929_v34 }
 0x93c   :  { %v8585_v36 = vpop.f32.mrb[212].mxu1  ;;  %v8545_v41 = vadd.f32 %v8544_v29, %v8506_v16  ;;  %v8546_v49 = vpop.f32.mrb[209].mxu0  ;;  %v8497_v29 = vrot.slane %v14079_v40, %v13947_v2 }
 0x93d   :  { %v8587_v35 = vpop.f32.mrb[213].mxu1  ;;  %v8547_v12 = vadd.f32 %v8546_v49, %v8507_v55  ;;  %v8548_v43 = vpop.f32.mrb[210].mxu0  ;;  %10109 = vmatpush3.bf16.msra.mxu0 %v10914_v57  ;;  %v10934_v55 = vld [vmem:[%s14209_s14 + $0xb8] sm:$0xff]  }
 0x93e   :  { %v8589_v47 = vpop.f32.mrb[214].mxu1  ;;  %v8586_v22 = vadd.f32 %v8585_v36, %v8545_v41  ;;  %v8549_v37 = vpop.f32.mrb[211].mxu0  ;;  %10110 = vmatprep.subr.bf16.mxu0 %v10915_v60  ;;  %10131 = vmatpush3.bf16.msra.mxu1 %v10930_v24  ;;  %v8501_v36 = vrot.slane %v14079_v40, %v13954_v32  ;;  %v8508_v41 = vmul.f32 %v8497_v29, %v14034_v33 }
 0x93f   :  { %v8590_v18 = vpop.f32.mrb[215].mxu1  ;;  %v8588_v7 = vadd.f32 %v8587_v35, %v8547_v12  ;;  %10132 = vmatprep.subr.bf16.mxu1 %v10931_v0 }
 0x940   :  { %v8509_v49 = vmul.f32 %v8501_v36, %v14034_v33 }
 0x941   :  { %10111 = vmatpush3.bf16.msra.mxu0 %v10916_v6 }
 0x942   :  { %10112 = vmatprep.subr.bf16.mxu0 %v10917_v45  ;;  %10133 = vmatpush3.bf16.msra.mxu1 %v10932_v51 }
 0x943   :  { %10134 = vmatprep.subr.bf16.mxu1 %v10933_v3 }
 0x945   :  { %10113 = vmatpush3.bf16.msra.mxu0 %v10918_v15 }
 0x946   :  { %10135 = vmatpush3.bf16.msra.mxu1 %v10934_v55 }
 0x97b   :  { %v8626_v19 = vpop.f32.mrb[212].mxu0 }
 0x97c   :  { %v8667_v48 = vpop.f32.mrb[216].mxu1  ;;  %v8627_v25 = vadd.f32 %v8626_v19, %v8586_v22  ;;  %v8628_v27 = vpop.f32.mrb[213].mxu0  ;;  %v8890_v19 = vrot.slane %v14151_v1, %v13954_v32  ;;  %v9651_v32 = vld [vmem:[%s14210_s15] ss:$0 sm:$0xff] }
 0x97d   :  { %v8669_v21 = vpop.f32.mrb[217].mxu1  ;;  %v8629_v39 = vadd.f32 %v8628_v27, %v8588_v7  ;;  %v8630_v5 = vpop.f32.mrb[214].mxu0 }
 0x97e   :  { %v8671_v8 = vpop.f32.mrb[218].mxu1  ;;  %v8668_v58 = vadd.f32 %v8667_v48, %v8627_v25  ;;  %v8631_v61 = vpop.f32.mrb[215].mxu0 }
 0x97f   :  { %v8672_v62 = vpop.f32.mrb[219].mxu1  ;;  %v8670_v42 = vadd.f32 %v8669_v21, %v8629_v39 }
 0x980   :  { %v8869_v50 = vadd.f32 %v8865_v20, %v8668_v58 }
 0x981   :  { %v8870_v59 = vadd.f32 %v8866_v52, %v8670_v42 }
 0x982   :  { %v8895_v31 = vadd.f32 %v8878_v46, %v8869_v50 }
 0x983   :  { %v8896_v38 = vadd.f32 %v8882_v63, %v8870_v59 }
 0x984   :  { %v8899_v54 = vmax.f32 %v8895_v31, 0.0 }
 0x985   :  { %v8900_v16 = vmax.f32 %v8896_v38, 0.0 }
 0x986   :  { %v8903_v60 = vpack.c.bf16 %v8899_v54, %v8899_v54 }
 0x987   :  { %v8904_v57 = vpack.c.bf16 %v8900_v16, %v8900_v16 }
 0x989   :  { %9202 = vmatprep.mubr.bf16.mxu0 %v8904_v57 }
 0x98a   :  { %9203 = vmatmul.mubr.bf16.vlgmr.msra.gmra.mrb[224].mxu0 %v8903_v60 }
 0x9bb   :  { %v8708_v35 = vpop.f32.mrb[216].mxu0 }
 0x9bc   :  { %v8749_v12 = vpop.f32.mrb[220].mxu1  ;;  %v8709_v43 = vadd.f32 %v8708_v35, %v8508_v41  ;;  %v8710_v47 = vpop.f32.mrb[217].mxu0 }
 0x9bd   :  { %v8751_v6 = vpop.f32.mrb[221].mxu1  ;;  %v8711_v22 = vadd.f32 %v8710_v47, %v8509_v49  ;;  %v8712_v37 = vpop.f32.mrb[218].mxu0 }
 0x9be   :  { %v8753_v18 = vpop.f32.mrb[222].mxu1  ;;  %v8750_v45 = vadd.f32 %v8749_v12, %v8709_v43  ;;  %v8713_v7 = vpop.f32.mrb[219].mxu0 }
 0x9bf   :  { %v8754_v30 = vpop.f32.mrb[223].mxu1  ;;  %v8752_v44 = vadd.f32 %v8751_v6, %v8711_v22 }
 0x9fb   :  { %v8790_v10 = vpop.f32.mrb[220].mxu0 }
 0x9fc   :  { %v8831_v15 = vpop.f32.mrb[224].mxu1  ;;  %v8791_v11 = vadd.f32 %v8790_v10, %v8750_v45  ;;  %v8792_v40 = vpop.f32.mrb[221].mxu0 }
 0x9fd   :  { %v8833_v53 = vpop.f32.mrb[225].mxu1  ;;  %v8793_v14 = vadd.f32 %v8792_v40, %v8752_v44  ;;  %v8794_v17 = vpop.f32.mrb[222].mxu0 }
 0x9fe   :  { %v8835_v33 = vpop.f32.mrb[226].mxu1  ;;  %v8832_v9 = vadd.f32 %v8831_v15, %v8791_v11  ;;  %v8795_v13 = vpop.f32.mrb[223].mxu0 }
 0x9ff   :  { %v8836_v56 = vpop.f32.mrb[227].mxu1  ;;  %v8834_v26 = vadd.f32 %v8833_v53, %v8793_v14 }
 0xa00   :  { %v8871_v48 = vadd.f32 %v14048_v28, %v8832_v9 }
 0xa01   :  { %v8872_v25 = vadd.f32 %v14051_v4, %v8834_v26 }
 0xa02   :  { %v8897_v27 = vadd.f32 %v8886_v23, %v8871_v48 }
 0xa03   :  { %v8898_v21 = vadd.f32 %v8890_v19, %v8872_v25 }
 0xa04   :  { %v8901_v20 = vmax.f32 %v8897_v27, 0.0 }
 0xa05   :  { %v8902_v34 = vmax.f32 %v8898_v21, 0.0 }
 0xa06   :  { %v8905_v5 = vpack.c.bf16 %v8901_v20, %v8901_v20 }
 0xa07   :  { %v8906_v39 = vpack.c.bf16 %v8902_v34, %v8902_v34 }
 0xa09   :  { %9242 = vmatprep.mubr.bf16.mxu1 %v8906_v39 }
 0xa0a   :  { %9243 = vmatmul.mubr.bf16.vlgmr.msra.gmra.mrb[228].mxu1 %v8905_v5 }
 0xa5d   :  { %v10114_v8 = vpop.f32.mrb[224].mxu0 }
 0xa5e   :  { %v10115_v2 = vpop.f32.mrb[225].mxu0 }
 0xa5f   :  { %v10116_v52 = vadd.f32 %v10115_v2, %v10114_v8  ;;  %v10117_v24 = vpop.f32.mrb[226].mxu0 }
 0xa60   :  { %v10118_v58 = vpop.f32.mrb[227].mxu0 }
 0xa61   :  { %v9205_v4 = vadd.f32 %v10116_v52, %v9651_v32 }
 0xadd   :  { %v10136_v28 = vpop.f32.mrb[228].mxu1 }
 0xade   :  { %v10137_v1 = vpop.f32.mrb[229].mxu1 }
 0xadf   :  { %v10138_v46 = vadd.f32 %v10137_v1, %v10136_v28  ;;  %v10139_v61 = vpop.f32.mrb[230].mxu1 }
 0xae0   :  { %v10140_v62 = vpop.f32.mrb[231].mxu1 }
 0xae1   :  { %v9245_v42 = vadd.f32 %v10138_v46, %v9205_v4 }
 0xae3   :  { %9250 = vst [vmem:[%s14211_s16] sm:$0xff] %v9245_v42 }
 0xae4   :  { %9255 = vsyncmov [#allocation5] }
 0xae7   :  { %s9256_s17 = vpop.sfrf %9255 }
 0xae8   :  { %p9684_p0 = scmp.ne.s32.totalorder %s9256_s17, 0 }
 0xaea   :  { %9260 = shalt.err (%p9684_p0)  }

</bundles_post_ra>
